<compile_context>
chip_gen: v7x
topology: tpu7x:2x2x1
jax: 0.10.0
libtpu: 0.0.40
codegen_flags: <defaults>
</compile_context>

<pallas_src>
import functools

import jax
import jax.numpy as jnp
from jax.experimental import pallas as pl
from jax.experimental.pallas import tpu as pltpu

H1, H1_PAD = 2000, 2048   # i2h.0 / i2o.2 inner width, padded to lane multiple
O1, O1_PAD = 500, 512     # i2o.0 width, padded to lane multiple
LANE = 128


def _round_up(n, m):
    return ((n + m - 1) // m) * m


def _relu(x):
    return jnp.maximum(x, 0.0)


def _pad2d(a, rows, cols):
    return jnp.pad(a, ((0, rows - a.shape[0]), (0, cols - a.shape[1])))


def rnn_kernel(x_ref, h_ref,
               wh1_ref, bh1_ref, wh2_ref, bh2_ref,
               wo1_ref, bo1_ref, wo2_ref, bo2_ref, wo3_ref, bo3_ref,
               out_ref, comb_ref, *wo2_scratch, hid_pad, wo2_manual):
    """One batch tile: i2h MLP then i2o MLP (concat realized in VMEM scratch).

    Matmul operands are bf16, accumulation and elementwise ops are f32.
    """
    f32 = jnp.float32
    bf16 = jnp.bfloat16

    if wo2_manual:
        # grid==1 path: BlockSpec pipelining would block kernel entry until the
        # 2 MiB wo2 tile has landed.  Start its DMA here instead and hide it
        # behind the wh1 / wh2 / wo1 matmuls; wait right before it is needed.
        wo2_buf, wo2_sem = wo2_scratch
        wo2_copy = pltpu.make_async_copy(wo2_ref, wo2_buf, wo2_sem)
        wo2_copy.start()

    x = x_ref[...]   # bf16 (bt, IN_PAD)
    h = h_ref[...]   # bf16 (bt, HID_PAD)

    # i2h: Linear(input, 2000) -> ReLU -> Linear(2000, hidden) -> ReLU
    h1 = _relu(jnp.dot(x, wh1_ref[...],
                       preferred_element_type=f32) + bh1_ref[...])
    hidden_new = _relu(
        jnp.dot(h1.astype(bf16), wh2_ref[...],
                preferred_element_type=f32) + bh2_ref[...])

    # cat((hidden_new, hidden), 1): two lane-aligned stores into a VMEM scratch
    # (no tile-boundary crossing), then ONE K=2*hid matmul.  Uses the full
    # 256-deep MXU on v6e/v7x; on v5e the internal 2x128 passes cost the same
    # as the former split-matmul formulation.
    comb_ref[:, :hid_pad] = hidden_new.astype(bf16)
    comb_ref[:, hid_pad:] = h
    o1 = _relu(jnp.dot(comb_ref[...], wo1_ref[...],
                       preferred_element_type=f32) + bo1_ref[...])

    if wo2_manual:
        wo2_copy.wait()
        wo2 = wo2_buf[...]
    else:
        wo2 = wo2_ref[...]

    o2 = _relu(jnp.dot(o1.astype(bf16), wo2,
                       preferred_element_type=f32) + bo2_ref[...])
    out = (jnp.dot(o2.astype(bf16), wo3_ref[...],
                   preferred_element_type=f32) + bo3_ref[...])
    out_ref[...] = out.astype(out_ref.dtype)


def init_params(key, input_size, hidden_size, output_size):
    """Deterministic synthetic parameters (PyTorch-Linear init, (in, out) layout)."""
    out_dim = output_size[0] * output_size[1]
    dims = [
        (input_size, H1),          # i2h.0
        (H1, hidden_size),         # i2h.2
        (hidden_size * 2, O1),     # i2o.0
        (O1, H1),                  # i2o.2
        (H1, out_dim),             # i2o.4
    ]
    params = []
    for i, (fin, fout) in enumerate(dims):
        kw, kb = jax.random.split(jax.random.fold_in(key, i))
        scale = 1.0 / jnp.sqrt(jnp.float32(fin))
        w = jax.random.uniform(kw, (fin, fout), jnp.float32, -scale, scale)
        b = jax.random.uniform(kb, (1, fout), jnp.float32, -scale, scale)
        params.append((w, b))
    return params


def prepare_params(params, input_size, hidden_size):
    """Zero-pad every feature dim to lane multiples, merge the i2o.0 weight into
    a single (2*hid_pad, O1_PAD) block matching the in-kernel combined buffer,
    and cast weights to bf16 (biases stay f32)."""
    (wh1, bh1), (wh2, bh2), (wo1, bo1), (wo2, bo2), (wo3, bo3) = params
    out_dim = wo3.shape[1]
    in_pad = _round_up(input_size, LANE)
    hid_pad = _round_up(hidden_size, LANE)
    out_pad = _round_up(out_dim, LANE)

    wh1_p = _pad2d(wh1, in_pad, H1_PAD).astype(jnp.bfloat16)
    bh1_p = _pad2d(bh1, 1, H1_PAD)                               # f32
    wh2_p = _pad2d(wh2, H1_PAD, hid_pad).astype(jnp.bfloat16)
    bh2_p = _pad2d(bh2, 1, hid_pad)                              # f32

    # i2o.0: rows [0:hidden) multiply hidden_new, rows [hidden:2*hidden) the old
    # hidden.  Re-stack each half at a lane-aligned (hid_pad) row offset so it
    # lines up with the halves of the in-kernel combined buffer.
    wo1a = _pad2d(wo1[:hidden_size], hid_pad, O1_PAD)
    wo1b = _pad2d(wo1[hidden_size:], hid_pad, O1_PAD)
    wo1_p = jnp.concatenate([wo1a, wo1b], axis=0).astype(jnp.bfloat16)
    bo1_p = _pad2d(bo1, 1, O1_PAD)                               # f32
    wo2_p = _pad2d(wo2, O1_PAD, H1_PAD).astype(jnp.bfloat16)
    bo2_p = _pad2d(bo2, 1, H1_PAD)                               # f32
    wo3_p = _pad2d(wo3, H1_PAD, out_pad).astype(jnp.bfloat16)
    bo3_p = _pad2d(bo3, 1, out_pad)                              # f32

    return (wh1_p, bh1_p, wh2_p, bh2_p, wo1_p, bo1_p,
            wo2_p, bo2_p, wo3_p, bo3_p)


def _choose_batch_tile(b_pad):
    # Biggest tile <= 512 (cuts per-grid-step overhead ~0.35 us/step) while
    # keeping >= 2 grid steps when possible so the 'parallel' axis can shard
    # across v7x's two TensorCores.
    for bt in (512, 256, 128):
        if b_pad % bt == 0 and b_pad // bt >= 2:
            return bt
    return 128


@functools.partial(jax.jit, static_argnames=("output_size", "batch_tile"))
def rnn_forward(x, hidden, flat_params, output_size, batch_tile=None):
    B, input_size = x.shape
    hidden_size = hidden.shape[1]
    out_dim = output_size[0] * output_size[1]

    in_pad = _round_up(input_size, LANE)
    hid_pad = _round_up(hidden_size, LANE)
    out_pad = _round_up(out_dim, LANE)

    if batch_tile is None:
        batch_tile = _choose_batch_tile(_round_up(B, LANE))
    B_pad = _round_up(B, batch_tile)
    n_steps = B_pad // batch_tile
    wo2_manual = (n_steps == 1)

    # Pad batch + feature dims, cast activations to bf16 (MXU LHS operands).
    x_p = _pad2d(x, B_pad, in_pad).astype(jnp.bfloat16)
    h_p = _pad2d(hidden, B_pad, hid_pad).astype(jnp.bfloat16)

    (wh1, bh1, wh2, bh2, wo1, bo1, wo2, bo2, wo3, bo3) = flat_params

    def weight_spec(arr):
        # Constant index_map -> weights stay VMEM-resident across the batch
        # grid; single-buffered (double-buffering a constant block wastes VMEM).
        return pl.BlockSpec(arr.shape, lambda i: (0, 0),
                            pipeline_mode=pl.Buffered(1))

    scratch_shapes = [pltpu.VMEM((batch_tile, 2 * hid_pad), jnp.bfloat16)]
    if wo2_manual:
        # Raw HBM ref; the kernel overlaps its DMA behind the earlier matmuls.
        wo2_spec = pl.BlockSpec(memory_space=pl.ANY)
        scratch_shapes += [pltpu.VMEM((O1_PAD, H1_PAD), jnp.bfloat16),
                           pltpu.SemaphoreType.DMA]
    else:
        wo2_spec = weight_spec(wo2)

    kernel = functools.partial(rnn_kernel, hid_pad=hid_pad,
                               wo2_manual=wo2_manual)

    out_flat = pl.pallas_call(
        kernel,
        out_shape=jax.ShapeDtypeStruct((B_pad, out_pad), jnp.float32),
        grid_spec=pltpu.PrefetchScalarGridSpec(
            num_scalar_prefetch=0,
            grid=(n_steps,),
            in_specs=[
                pl.BlockSpec((batch_tile, in_pad), lambda i: (i, 0)),
                pl.BlockSpec((batch_tile, hid_pad), lambda i: (i, 0)),
                weight_spec(wh1), weight_spec(bh1),
                weight_spec(wh2), weight_spec(bh2),
                weight_spec(wo1), weight_spec(bo1),
                wo2_spec, weight_spec(bo2),
                weight_spec(wo3), weight_spec(bo3),
            ],
            out_specs=pl.BlockSpec((batch_tile, out_pad), lambda i: (i, 0)),
            scratch_shapes=scratch_shapes,
        ),
        compiler_params=pltpu.CompilerParams(
            dimension_semantics=("parallel",),
            vmem_limit_bytes=48 * 1024 * 1024,
        ),
    )(x_p, h_p, wh1, bh1, wh2, bh2, wo1, bo1, wo2, bo2, wo3, bo3)

    output = out_flat[:B, :out_dim].reshape(-1, 1, output_size[0],
                                            output_size[1])
    # The module returns (output, hidden) with the *input* hidden unchanged.
    return output, hidden


def rnn_forward_ref(x, hidden, flat_params, output_size):
    """Pure-JAX reference with the same padded bf16 weights / cast pattern."""
    (wh1, bh1, wh2, bh2, wo1, bo1, wo2, bo2, wo3, bo3) = flat_params
    f32 = jnp.float32
    bf16 = jnp.bfloat16
    in_pad = wh1.shape[0]
    hid_pad = wh2.shape[1]
    out_dim = output_size[0] * output_size[1]

    xb = _pad2d(x, x.shape[0], in_pad).astype(bf16)
    hb = _pad2d(hidden, hidden.shape[0], hid_pad).astype(bf16)
    h1 = jnp.maximum(jnp.dot(xb, wh1, preferred_element_type=f32) + bh1, 0.0)
    hn = jnp.maximum(jnp.dot(h1.astype(bf16), wh2,
                             preferred_element_type=f32) + bh2, 0.0)
    comb = jnp.concatenate([hn.astype(bf16), hb], axis=1)
    o1 = jnp.maximum(jnp.dot(comb, wo1, preferred_element_type=f32) + bo1, 0.0)
    o2 = jnp.maximum(jnp.dot(o1.astype(bf16), wo2,
                             preferred_element_type=f32) + bo2, 0.0)
    out = jnp.dot(o2.astype(bf16), wo3, preferred_element_type=f32) + bo3
    out = out[:, :out_dim].reshape(-1, 1, output_size[0], output_size[1])
    return out, hidden


if __name__ == "__main__":
    key = jax.random.PRNGKey(0)

    # Small, shape-consistent configuration (module fixes the 2000/500 widths).
    batch = 8
    input_size = 128
    hidden_size = 128
    output_size = (8, 16)   # out_dim = 128 (lane-dense output)

    kx, kh, kp = jax.random.split(key, 3)
    x = jax.random.normal(kx, (batch, input_size), jnp.float32)
    hidden = jax.random.normal(kh, (batch, hidden_size), jnp.float32)

    params = init_params(kp, input_size, hidden_size, output_size)
    flat_params = prepare_params(params, input_size, hidden_size)

    out, h_out = rnn_forward(x, hidden, flat_params, output_size)
    out = jax.block_until_ready(out)
    h_out = jax.block_until_ready(h_out)

    out_ref, _ = rnn_forward_ref(x, hidden, flat_params, output_size)
    assert out.shape == (batch, 1, output_size[0], output_size[1])
    assert h_out.shape == (batch, hidden_size)
    assert jnp.allclose(out, out_ref, atol=2e-3, rtol=2e-3), \
        float(jnp.max(jnp.abs(out - out_ref)))
    assert jnp.allclose(h_out, hidden)

    print("KERNEL_OK")
</pallas_src>

<mosaic_0001>
module attributes {stable_mosaic.version = 11 : i64} {
  func.func @rnn_kernel(%arg0: i32, %arg1: memref<128x128xbf16, #tpu.memory_space<vmem>>, %arg2: memref<128x128xbf16, #tpu.memory_space<vmem>>, %arg3: memref<128x2048xbf16, #tpu.memory_space<vmem>>, %arg4: memref<1x2048xf32, #tpu.memory_space<vmem>>, %arg5: memref<2048x128xbf16, #tpu.memory_space<vmem>>, %arg6: memref<1x128xf32, #tpu.memory_space<vmem>>, %arg7: memref<256x512xbf16, #tpu.memory_space<vmem>>, %arg8: memref<1x512xf32, #tpu.memory_space<vmem>>, %arg9: memref<512x2048xbf16, #tpu.memory_space<any>>, %arg10: memref<1x2048xf32, #tpu.memory_space<vmem>>, %arg11: memref<2048x128xbf16, #tpu.memory_space<vmem>>, %arg12: memref<1x128xf32, #tpu.memory_space<vmem>>, %arg13: memref<128x128xf32, #tpu.memory_space<vmem>>, %arg14: memref<128x256xbf16, #tpu.memory_space<vmem>>, %arg15: memref<512x2048xbf16, #tpu.memory_space<vmem>>, %arg16: memref<!tpu.dma_semaphore, #tpu.memory_space<semaphore_mem>>) attributes {dimension_semantics = [#tpu.dimension_semantics<parallel>], iteration_bounds = array<i64: 1>, scalar_prefetch = 0 : i64, scratch_operands = 3 : i64, tpu.core_type = #tpu.core_type<tc>, window_params = [{transform_indices = @transform_0, window_bounds = array<i64: 128, 128>}, {transform_indices = @transform_1, window_bounds = array<i64: 128, 128>}, {pipeline_mode = #tpu.pipeline_mode<synchronous>, transform_indices = @transform_2, window_bounds = array<i64: 128, 2048>}, {pipeline_mode = #tpu.pipeline_mode<synchronous>, transform_indices = @transform_3, window_bounds = array<i64: 1, 2048>}, {pipeline_mode = #tpu.pipeline_mode<synchronous>, transform_indices = @transform_4, window_bounds = array<i64: 2048, 128>}, {pipeline_mode = #tpu.pipeline_mode<synchronous>, transform_indices = @transform_5, window_bounds = array<i64: 1, 128>}, {pipeline_mode = #tpu.pipeline_mode<synchronous>, transform_indices = @transform_6, window_bounds = array<i64: 256, 512>}, {pipeline_mode = #tpu.pipeline_mode<synchronous>, transform_indices = @transform_7, window_bounds = array<i64: 1, 512>}, {}, {pipeline_mode = #tpu.pipeline_mode<synchronous>, transform_indices = @transform_9, window_bounds = array<i64: 1, 2048>}, {pipeline_mode = #tpu.pipeline_mode<synchronous>, transform_indices = @transform_10, window_bounds = array<i64: 2048, 128>}, {pipeline_mode = #tpu.pipeline_mode<synchronous>, transform_indices = @transform_11, window_bounds = array<i64: 1, 128>}, {transform_indices = @transform_12, window_bounds = array<i64: 128, 128>}]} {
    tpu.enqueue_dma source(%arg9 : memref<512x2048xbf16, #tpu.memory_space<any>>) target(%arg15 : memref<512x2048xbf16, #tpu.memory_space<vmem>>) target_semaphore(%arg16 : memref<!tpu.dma_semaphore, #tpu.memory_space<semaphore_mem>>)
    %c0 = arith.constant 0 : index
    %c0_0 = arith.constant 0 : index
    %0 = vector.load %arg1[%c0, %c0_0] : memref<128x128xbf16, #tpu.memory_space<vmem>>, vector<128x128xbf16>
    %c0_1 = arith.constant 0 : index
    %c0_2 = arith.constant 0 : index
    %1 = vector.load %arg2[%c0_1, %c0_2] : memref<128x128xbf16, #tpu.memory_space<vmem>>, vector<128x128xbf16>
    %c0_3 = arith.constant 0 : index
    %c0_4 = arith.constant 0 : index
    %2 = vector.load %arg3[%c0_3, %c0_4] : memref<128x2048xbf16, #tpu.memory_space<vmem>>, vector<128x2048xbf16>
    %cst = arith.constant dense<0.000000e+00> : vector<128x2048xf32>
    %3 = tpu.matmul %0, %2, %cst {dimension_numbers = #tpu.dot_dimension_numbers<[1], [0], [0], [1], [0, 0, 1, 1], [], []>} : vector<128x128xbf16>, vector<128x2048xbf16>, vector<128x2048xf32> -> vector<128x2048xf32>
    %c0_5 = arith.constant 0 : index
    %c0_6 = arith.constant 0 : index
    %4 = vector.load %arg4[%c0_5, %c0_6] : memref<1x2048xf32, #tpu.memory_space<vmem>>, vector<1x2048xf32>
    %5 = vector.broadcast %4 : vector<1x2048xf32> to vector<128x2048xf32>
    %6 = arith.addf %3, %5 : vector<128x2048xf32>
    %cst_7 = arith.constant 0.000000e+00 : f32
    %7 = vector.broadcast %cst_7 : f32 to vector<128x2048xf32>
    %8 = arith.maximumf %6, %7 : vector<128x2048xf32>
    %9 = arith.truncf %8 : vector<128x2048xf32> to vector<128x2048xbf16>
    %c0_8 = arith.constant 0 : index
    %c0_9 = arith.constant 0 : index
    %10 = vector.load %arg5[%c0_8, %c0_9] : memref<2048x128xbf16, #tpu.memory_space<vmem>>, vector<2048x128xbf16>
    %cst_10 = arith.constant dense<0.000000e+00> : vector<128x128xf32>
    %11 = tpu.matmul %9, %10, %cst_10 {dimension_numbers = #tpu.dot_dimension_numbers<[1], [0], [0], [1], [0, 0, 1, 1], [], []>} : vector<128x2048xbf16>, vector<2048x128xbf16>, vector<128x128xf32> -> vector<128x128xf32>
    %c0_11 = arith.constant 0 : index
    %c0_12 = arith.constant 0 : index
    %12 = vector.load %arg6[%c0_11, %c0_12] : memref<1x128xf32, #tpu.memory_space<vmem>>, vector<1x128xf32>
    %13 = vector.broadcast %12 : vector<1x128xf32> to vector<128x128xf32>
    %14 = arith.addf %11, %13 : vector<128x128xf32>
    %cst_13 = arith.constant 0.000000e+00 : f32
    %15 = vector.broadcast %cst_13 : f32 to vector<128x128xf32>
    %16 = arith.maximumf %14, %15 : vector<128x128xf32>
    %17 = arith.truncf %16 : vector<128x128xf32> to vector<128x128xbf16>
    %c0_14 = arith.constant 0 : index
    %c0_15 = arith.constant 0 : index
    %18 = vector.load %arg14[%c0_14, %c0_15] : memref<128x256xbf16, #tpu.memory_space<vmem>>, vector<128x128xbf16>
    tpu.vector_store %arg14[%c0_14, %c0_15], %17 {strides = array<i32>} : memref<128x256xbf16, #tpu.memory_space<vmem>>, vector<128x128xbf16>,
    %c0_16 = arith.constant 0 : index
    %c128 = arith.constant 128 : index
    %19 = vector.load %arg14[%c0_16, %c128] : memref<128x256xbf16, #tpu.memory_space<vmem>>, vector<128x128xbf16>
    tpu.vector_store %arg14[%c0_16, %c128], %1 {strides = array<i32>} : memref<128x256xbf16, #tpu.memory_space<vmem>>, vector<128x128xbf16>,
    %c0_17 = arith.constant 0 : index
    %c0_18 = arith.constant 0 : index
    %20 = vector.load %arg14[%c0_17, %c0_18] : memref<128x256xbf16, #tpu.memory_space<vmem>>, vector<128x256xbf16>
    %c0_19 = arith.constant 0 : index
    %c0_20 = arith.constant 0 : index
    %21 = vector.load %arg7[%c0_19, %c0_20] : memref<256x512xbf16, #tpu.memory_space<vmem>>, vector<256x512xbf16>
    %cst_21 = arith.constant dense<0.000000e+00> : vector<128x512xf32>
    %22 = tpu.matmul %20, %21, %cst_21 {dimension_numbers = #tpu.dot_dimension_numbers<[1], [0], [0], [1], [0, 0, 1, 1], [], []>} : vector<128x256xbf16>, vector<256x512xbf16>, vector<128x512xf32> -> vector<128x512xf32>
    %c0_22 = arith.constant 0 : index
    %c0_23 = arith.constant 0 : index
    %23 = vector.load %arg8[%c0_22, %c0_23] : memref<1x512xf32, #tpu.memory_space<vmem>>, vector<1x512xf32>
    %24 = vector.broadcast %23 : vector<1x512xf32> to vector<128x512xf32>
    %25 = arith.addf %22, %24 : vector<128x512xf32>
    %cst_24 = arith.constant 0.000000e+00 : f32
    %26 = vector.broadcast %cst_24 : f32 to vector<128x512xf32>
    %27 = arith.maximumf %25, %26 : vector<128x512xf32>
    tpu.wait_dma2 semaphore(%arg16 : memref<!tpu.dma_semaphore, #tpu.memory_space<semaphore_mem>>) src(%arg9 : memref<512x2048xbf16, #tpu.memory_space<any>>) dst(%arg15 : memref<512x2048xbf16, #tpu.memory_space<vmem>>)
    %c0_25 = arith.constant 0 : index
    %c0_26 = arith.constant 0 : index
    %28 = vector.load %arg15[%c0_25, %c0_26] : memref<512x2048xbf16, #tpu.memory_space<vmem>>, vector<512x2048xbf16>
    %29 = arith.truncf %27 : vector<128x512xf32> to vector<128x512xbf16>
    %cst_27 = arith.constant dense<0.000000e+00> : vector<128x2048xf32>
    %30 = tpu.matmul %29, %28, %cst_27 {dimension_numbers = #tpu.dot_dimension_numbers<[1], [0], [0], [1], [0, 0, 1, 1], [], []>} : vector<128x512xbf16>, vector<512x2048xbf16>, vector<128x2048xf32> -> vector<128x2048xf32>
    %c0_28 = arith.constant 0 : index
    %c0_29 = arith.constant 0 : index
    %31 = vector.load %arg10[%c0_28, %c0_29] : memref<1x2048xf32, #tpu.memory_space<vmem>>, vector<1x2048xf32>
    %32 = vector.broadcast %31 : vector<1x2048xf32> to vector<128x2048xf32>
    %33 = arith.addf %30, %32 : vector<128x2048xf32>
    %cst_30 = arith.constant 0.000000e+00 : f32
    %34 = vector.broadcast %cst_30 : f32 to vector<128x2048xf32>
    %35 = arith.maximumf %33, %34 : vector<128x2048xf32>
    %36 = arith.truncf %35 : vector<128x2048xf32> to vector<128x2048xbf16>
    %c0_31 = arith.constant 0 : index
    %c0_32 = arith.constant 0 : index
    %37 = vector.load %arg11[%c0_31, %c0_32] : memref<2048x128xbf16, #tpu.memory_space<vmem>>, vector<2048x128xbf16>
    %cst_33 = arith.constant dense<0.000000e+00> : vector<128x128xf32>
    %38 = tpu.matmul %36, %37, %cst_33 {dimension_numbers = #tpu.dot_dimension_numbers<[1], [0], [0], [1], [0, 0, 1, 1], [], []>} : vector<128x2048xbf16>, vector<2048x128xbf16>, vector<128x128xf32> -> vector<128x128xf32>
    %c0_34 = arith.constant 0 : index
    %c0_35 = arith.constant 0 : index
    %39 = vector.load %arg12[%c0_34, %c0_35] : memref<1x128xf32, #tpu.memory_space<vmem>>, vector<1x128xf32>
    %40 = vector.broadcast %39 : vector<1x128xf32> to vector<128x128xf32>
    %41 = arith.addf %38, %40 : vector<128x128xf32>
    %c0_36 = arith.constant 0 : index
    %c0_37 = arith.constant 0 : index
    %42 = vector.load %arg13[%c0_36, %c0_37] : memref<128x128xf32, #tpu.memory_space<vmem>>, vector<128x128xf32>
    tpu.vector_store %arg13[%c0_36, %c0_37], %41 {strides = array<i32>} : memref<128x128xf32, #tpu.memory_space<vmem>>, vector<128x128xf32>,
    return
  }
  func.func @transform_0(%arg0: i32) -> (i32, i32) {
    %c0_i32 = arith.constant 0 : i32
    %c0_i32_0 = arith.constant 0 : i32
    return %arg0, %c0_i32 : i32, i32
  }
  func.func @transform_1(%arg0: i32) -> (i32, i32) {
    %c0_i32 = arith.constant 0 : i32
    %c0_i32_0 = arith.constant 0 : i32
    return %arg0, %c0_i32 : i32, i32
  }
  func.func @transform_2(%arg0: i32) -> (i32, i32) {
    %c0_i32 = arith.constant 0 : i32
    %c0_i32_0 = arith.constant 0 : i32
    %c0_i32_1 = arith.constant 0 : i32
    return %c0_i32, %c0_i32_0 : i32, i32
  }
  func.func @transform_3(%arg0: i32) -> (i32, i32) {
    %c0_i32 = arith.constant 0 : i32
    %c0_i32_0 = arith.constant 0 : i32
    %c0_i32_1 = arith.constant 0 : i32
    return %c0_i32, %c0_i32_0 : i32, i32
  }
  func.func @transform_4(%arg0: i32) -> (i32, i32) {
    %c0_i32 = arith.constant 0 : i32
    %c0_i32_0 = arith.constant 0 : i32
    %c0_i32_1 = arith.constant 0 : i32
    return %c0_i32, %c0_i32_0 : i32, i32
  }
  func.func @transform_5(%arg0: i32) -> (i32, i32) {
    %c0_i32 = arith.constant 0 : i32
    %c0_i32_0 = arith.constant 0 : i32
    %c0_i32_1 = arith.constant 0 : i32
    return %c0_i32, %c0_i32_0 : i32, i32
  }
  func.func @transform_6(%arg0: i32) -> (i32, i32) {
    %c0_i32 = arith.constant 0 : i32
    %c0_i32_0 = arith.constant 0 : i32
    %c0_i32_1 = arith.constant 0 : i32
    return %c0_i32, %c0_i32_0 : i32, i32
  }
  func.func @transform_7(%arg0: i32) -> (i32, i32) {
    %c0_i32 = arith.constant 0 : i32
    %c0_i32_0 = arith.constant 0 : i32
    %c0_i32_1 = arith.constant 0 : i32
    return %c0_i32, %c0_i32_0 : i32, i32
  }
  func.func @transform_9(%arg0: i32) -> (i32, i32) {
    %c0_i32 = arith.constant 0 : i32
    %c0_i32_0 = arith.constant 0 : i32
    %c0_i32_1 = arith.constant 0 : i32
    return %c0_i32, %c0_i32_0 : i32, i32
  }
  func.func @transform_10(%arg0: i32) -> (i32, i32) {
    %c0_i32 = arith.constant 0 : i32
    %c0_i32_0 = arith.constant 0 : i32
    %c0_i32_1 = arith.constant 0 : i32
    return %c0_i32, %c0_i32_0 : i32, i32
  }
  func.func @transform_11(%arg0: i32) -> (i32, i32) {
    %c0_i32 = arith.constant 0 : i32
    %c0_i32_0 = arith.constant 0 : i32
    %c0_i32_1 = arith.constant 0 : i32
    return %c0_i32, %c0_i32_0 : i32, i32
  }
  func.func @transform_12(%arg0: i32) -> (i32, i32) {
    %c0_i32 = arith.constant 0 : i32
    %c0_i32_0 = arith.constant 0 : i32
    return %arg0, %c0_i32 : i32, i32
  }
}

</mosaic_0001>

<bundles_post_ra>
// kernel: rnn_forward.1
= control target key start
LH: loop header
LB: loop body
LE: loop exit
PB: predicated region body
PF: predicated region fallthrough
CT: control target
= control target key end

     0   :  { %17 = vsyncpa [#allocation6], 0  ;;  %s15252_s0 = inlined_call_operand.vmem [shape: bf16[128,128], index: 0, kind: input, shape index: {}]   ;;  %s15253_s1 = inlined_call_operand.vmem [shape: bf16[128,128], index: 1, kind: input, shape index: {}]   ;;  %s15254_s2 = inlined_call_operand.hbm [shape: bf16[128,2048], index: 2, kind: input, shape index: {}]   ;;  %s15255_s3 = inlined_call_operand.hbm [shape: f32[1,2048], index: 3, kind: input, shape index: {}]   ;;  %s15256_s4 = inlined_call_operand.hbm [shape: bf16[2048,128], index: 4, kind: input, shape index: {}]   ;;  %s15257_s5 = inlined_call_operand.hbm [shape: f32[1,128], index: 5, kind: input, shape index: {}]   ;;  %s15258_s6 = inlined_call_operand.hbm [shape: bf16[256,512], index: 6, kind: input, shape index: {}]   ;;  %s15259_s7 = inlined_call_operand.hbm [shape: f32[1,512], index: 7, kind: input, shape index: {}]   ;;  %s15260_s8 = inlined_call_operand.hbm [shape: bf16[512,2048], index: 8, kind: input, shape index: {}]   ;;  %s15261_s9 = inlined_call_operand.hbm [shape: f32[1,2048], index: 9, kind: input, shape index: {}]   ;;  %s15262_s10 = inlined_call_operand.hbm [shape: bf16[2048,128], index: 10, kind: input, shape index: {}]   ;;  %s15263_s11 = inlined_call_operand.hbm [shape: f32[1,128], index: 11, kind: input, shape index: {}]   ;;  %s15264_s12 = inlined_call_operand.vmem [shape: f32[128,128], index: 12, kind: output, shape index: {}]  }
   0x1   :  { %18 = vsyncpa [#allocation8], 0 }
   0x2   :  { %19 = vsyncpa [#allocation11], 0 }
   0x3   :  { %20 = vsyncpa [#allocation14], 0 }
   0x4   :  { %21 = vsyncpa [#allocation17], 0  ;;  %s12289_s21 = smov [#allocation7]   ;;  %s12290_s23 = smov [#allocation10]  }
   0x5   :  { %s44_s22 = sshll.u32 %s12289_s21, 4  ;;  %s66_s24 = sshll.u32 %s12290_s23, 4  ;;  %s45_s22 = int_to_ptr.vmem [resolvable:$true] %s44_s22  ;;  %s67_s24 = int_to_ptr.vmem [resolvable:$true] %s66_s24 }
   0x6   :  { %s12079_s27 = scalar_lea.hbm %s15255_s3, 256 }
   0x7   :  { %p12080_p0 = scmp.ne.s32.totalorder %s15255_s3, %s12079_s27  ;;  %p12083_p1 = scmp.lt.u32.totalorder %s12079_s27, %s15255_s3 }
   0x9   :  { %p12085_p2 = pnand %p12083_p1, %p12080_p0 }
   0xb   :  { %12088 = shalt.err (!%p12085_p2)
}
   0xc   :  { %s12089_s14 = scalar_lea.vmem %s45_s22, 256  ;;  %p12094_p4 = scmp.lt.s32.totalorder %s45_s22, %s45_s22 }
   0xd   :  { %p12090_p3 = scmp.ne.s32.totalorder %s45_s22, %s12089_s14  ;;  %p12095_p5 = scmp.lt.s32.totalorder %s12089_s14, %s12089_s14 }
   0xf   :  { %p12096_p6 = por %p12095_p5, %p12094_p4 }
  0x11   :  { %p12097_p7 = pnand %p12096_p6, %p12090_p3 }
  0x13   :  { %12100 = shalt.err (!%p12097_p7)
}
  0x14   :  { %47 = dma.hbm_to_vmem [thread:$0]  %s15255_s3, 256, %s45_s22, [#allocation8]  }
  0x15   :  { %s12101_s19 = scalar_lea.hbm %s15257_s5, 16 }
  0x16   :  { %p12102_p8 = scmp.ne.s32.totalorder %s15257_s5, %s12101_s19  ;;  %p12105_p9 = scmp.lt.u32.totalorder %s12101_s19, %s15257_s5 }
  0x18   :  { %p12107_p10 = pnand %p12105_p9, %p12102_p8 }
  0x1a   :  { %12110 = shalt.err (!%p12107_p10)
}
  0x1b   :  { %s12111_s26 = scalar_lea.vmem %s67_s24, 16  ;;  %s12115_s27 = scalar_lea.vmem %s67_s24, 32 }
  0x1c   :  { %p12112_p11 = scmp.ne.s32.totalorder %s67_s24, %s12111_s26  ;;  %p12116_p12 = scmp.lt.s32.totalorder %s67_s24, %s67_s24 }
  0x1d   :  { %p12117_p13 = scmp.lt.s32.totalorder %s12115_s27, %s12111_s26 }
  0x1f   :  { %p12118_p0 = por %p12117_p13, %p12116_p12 }
  0x21   :  { %p12119_p1 = pnand %p12118_p0, %p12112_p11 }
  0x23   :  { %12122 = shalt.err (!%p12119_p1)
}
  0x24   :  { %69 = dma.hbm_to_vmem [thread:$0]  %s15257_s5, 16, %s67_s24, [#allocation11]  }
  0x25   :  { %s12291_s28 = smov [#allocation13]   ;;  %s12123_s14 = scalar_lea.hbm %s15259_s7, 64 }
  0x26   :  { %s88_s29 = sshll.u32 %s12291_s28, 4  ;;  %p12124_p2 = scmp.ne.s32.totalorder %s15259_s7, %s12123_s14  ;;  %s89_s29 = int_to_ptr.vmem [resolvable:$true] %s88_s29 }
  0x27   :  { %p12127_p3 = scmp.lt.u32.totalorder %s12123_s14, %s15259_s7 }
  0x29   :  { %p12129_p4 = pnand %p12127_p3, %p12124_p2 }
  0x2b   :  { %12132 = shalt.err (!%p12129_p4)
}
  0x2c   :  { %s12133_s19 = scalar_lea.vmem %s89_s29, 64  ;;  %p12138_p6 = scmp.lt.s32.totalorder %s89_s29, %s89_s29 }
  0x2d   :  { %p12134_p5 = scmp.ne.s32.totalorder %s89_s29, %s12133_s19  ;;  %p12139_p7 = scmp.lt.s32.totalorder %s12133_s19, %s12133_s19 }
  0x2f   :  { %p12140_p8 = por %p12139_p7, %p12138_p6 }
  0x31   :  { %p12141_p9 = pnand %p12140_p8, %p12134_p5 }
  0x33   :  { %12144 = shalt.err (!%p12141_p9)
}
  0x34   :  { %91 = dma.hbm_to_vmem [thread:$0]  %s15259_s7, 64, %s89_s29, [#allocation14]  }
  0x35   :  { %s12292_s20 = smov [#allocation16]   ;;  %s12293_s23 = smov [#allocation5]  }
  0x36   :  { %s107_s21 = sshll.u32 %s12292_s20, 4  ;;  %s31_s25 = sshll.u32 %s12293_s23, 4  ;;  %s108_s21 = int_to_ptr.vmem [resolvable:$true] %s107_s21  ;;  %s32_s25 = int_to_ptr.vmem [resolvable:$true] %s31_s25 }
  0x37   :  { %s12145_s3 = scalar_lea.hbm %s15262_s10, 16384 }
  0x38   :  { %p12146_p10 = scmp.ne.s32.totalorder %s15262_s10, %s12145_s3  ;;  %p12149_p11 = scmp.lt.u32.totalorder %s12145_s3, %s15262_s10 }
  0x3a   :  { %p12151_p12 = pnand %p12149_p11, %p12146_p10 }
  0x3c   :  { %12154 = shalt.err (!%p12151_p12)
}
  0x3d   :  { %s12155_s7 = scalar_lea.vmem %s108_s21, 16384  ;;  %p12160_p0 = scmp.lt.s32.totalorder %s108_s21, %s108_s21 }
  0x3e   :  { %p12156_p13 = scmp.ne.s32.totalorder %s108_s21, %s12155_s7  ;;  %p12161_p1 = scmp.lt.s32.totalorder %s12155_s7, %s12155_s7 }
  0x40   :  { %p12162_p2 = por %p12161_p1, %p12160_p0 }
  0x42   :  { %p12163_p3 = pnand %p12162_p2, %p12156_p13 }
  0x44   :  { %12166 = shalt.err (!%p12163_p3)
}
  0x45   :  { %s12294_s29 = smov 64   ;;  %s12295_s14 = smov 4  }
  0x46   :  { %113 = dma.hbm_to_vmem [thread:$0]  %s15262_s10, 16384, %s108_s21, [#allocation17], %s12294_s29, %s12294_s29, %s12295_s14  }
  0x47   :  { %s12167_s19 = scalar_lea.hbm %s15254_s2, 16384 }
  0x48   :  { %p12168_p4 = scmp.ne.s32.totalorder %s15254_s2, %s12167_s19  ;;  %p12171_p5 = scmp.lt.u32.totalorder %s12167_s19, %s15254_s2 }
  0x4a   :  { %p12173_p6 = pnand %p12171_p5, %p12168_p4 }
  0x4c   :  { %12176 = shalt.err (!%p12173_p6)
}
  0x4d   :  { %s12177_s26 = scalar_lea.vmem %s32_s25, 16384  ;;  %p12182_p8 = scmp.lt.s32.totalorder %s32_s25, %s32_s25 }
  0x4e   :  { %p12178_p7 = scmp.ne.s32.totalorder %s32_s25, %s12177_s26  ;;  %p12183_p9 = scmp.lt.s32.totalorder %s12177_s26, %s12177_s26 }
  0x50   :  { %p12184_p10 = por %p12183_p9, %p12182_p8 }
  0x52   :  { %p12185_p11 = pnand %p12184_p10, %p12178_p7 }
  0x54   :  { %12188 = shalt.err (!%p12185_p11)
}
  0x55   :  { %s12296_s10 = smov 1024   ;;  %s12297_s3 = smov [#allocation9]  }
  0x56   :  { %37 = dma.hbm_to_vmem [thread:$0]  %s15254_s2, 16384, %s32_s25, [#allocation6], %s12296_s10, %s12296_s10, %s12294_s29  }
  0x57   :  { %s53_s22 = sshll.u32 %s12297_s3, 4  ;;  %s12298_s28 = smov [#allocation12]   ;;  %s54_s22 = int_to_ptr.vmem [resolvable:$true] %s53_s22 }
  0x58   :  { %s75_s30 = sshll.u32 %s12298_s28, 4  ;;  %s12189_s15 = scalar_lea.hbm %s15256_s4, 16384  ;;  %s12441_s30 = int_to_ptr.vmem [resolvable:$true] %s75_s30 }
  0x59   :  { %p12190_p12 = scmp.ne.s32.totalorder %s15256_s4, %s12189_s15  ;;  %p12193_p13 = scmp.lt.u32.totalorder %s12189_s15, %s15256_s4 }
  0x5b   :  { %p12195_p0 = pnand %p12193_p13, %p12190_p12 }
  0x5d   :  { %12198 = shalt.err (!%p12195_p0)
}
  0x5e   :  { %s12199_s2 = scalar_lea.vmem %s54_s22, 16384  ;;  %p12204_p2 = scmp.lt.s32.totalorder %s54_s22, %s54_s22 }
  0x5f   :  { %p12200_p1 = scmp.ne.s32.totalorder %s54_s22, %s12199_s2  ;;  %p12205_p3 = scmp.lt.s32.totalorder %s12199_s2, %s12199_s2 }
  0x61   :  { %p12206_p4 = por %p12205_p3, %p12204_p2 }
  0x63   :  { %p12207_p5 = pnand %p12206_p4, %p12200_p1 }
  0x65   :  { %12210 = shalt.err (!%p12207_p5)
}
  0x66   :  { %59 = dma.hbm_to_vmem [thread:$0]  %s15256_s4, 16384, %s54_s22, [#allocation8], %s12294_s29, %s12294_s29, %s12295_s14  }
  0x67   :  { %s12211_s23 = scalar_lea.hbm %s15258_s6, 8192 }
  0x68   :  { %p12212_p6 = scmp.ne.s32.totalorder %s15258_s6, %s12211_s23  ;;  %p12215_p7 = scmp.lt.u32.totalorder %s12211_s23, %s15258_s6 }
  0x6a   :  { %p12217_p8 = pnand %p12215_p7, %p12212_p6 }
  0x6c   :  { %12220 = shalt.err (!%p12217_p8)
}
  0x6d   :  { %s12221_s28 = scalar_lea.vmem %s12441_s30, 8192  ;;  %p12226_p10 = scmp.lt.s32.totalorder %s12441_s30, %s12441_s30 }
  0x6e   :  { %p12222_p9 = scmp.ne.s32.totalorder %s12441_s30, %s12221_s28  ;;  %p12227_p11 = scmp.lt.s32.totalorder %s12221_s28, %s12221_s28 }
  0x70   :  { %p12228_p12 = por %p12227_p11, %p12226_p10 }
  0x72   :  { %p12229_p13 = pnand %p12228_p12, %p12222_p9 }
  0x74   :  { %12232 = shalt.err (!%p12229_p13)
}
  0x75   :  { %s12299_s4 = smov 256   ;;  %s12300_s22 = smov 16  }
  0x76   :  { %81 = dma.hbm_to_vmem [thread:$0]  %s15258_s6, 8192, %s12441_s30, [#allocation11], %s12299_s4, %s12299_s4, %s12300_s22  }
  0x77   :  { %s12301_s15 = smov [#allocation15]   ;;  %s12302_s17 = smov [#allocation18]  }
  0x78   :  { %s98_s16 = sshll.u32 %s12301_s15, 4  ;;  %s120_s18 = sshll.u32 %s12302_s17, 4  ;;  %s99_s16 = int_to_ptr.vmem [resolvable:$true] %s98_s16  ;;  %s121_s18 = int_to_ptr.vmem [resolvable:$true] %s120_s18 }
  0x79   :  { %s12233_s25 = scalar_lea.hbm %s15261_s9, 256 }
  0x7a   :  { %p12234_p0 = scmp.ne.s32.totalorder %s15261_s9, %s12233_s25  ;;  %p12237_p1 = scmp.lt.u32.totalorder %s12233_s25, %s15261_s9 }
  0x7c   :  { %p12239_p2 = pnand %p12237_p1, %p12234_p0 }
  0x7e   :  { %12242 = shalt.err (!%p12239_p2)
}
  0x7f   :  { %s12243_s6 = scalar_lea.vmem %s99_s16, 256  ;;  %p12248_p4 = scmp.lt.s32.totalorder %s99_s16, %s99_s16 }
  0x80   :  { %p12244_p3 = scmp.ne.s32.totalorder %s99_s16, %s12243_s6  ;;  %p12249_p5 = scmp.lt.s32.totalorder %s12243_s6, %s12243_s6 }
  0x82   :  { %p12250_p6 = por %p12249_p5, %p12248_p4 }
  0x84   :  { %p12251_p7 = pnand %p12250_p6, %p12244_p3 }
  0x86   :  { %12254 = shalt.err (!%p12251_p7)
}
  0x87   :  { %101 = dma.hbm_to_vmem [thread:$0]  %s15261_s9, 256, %s99_s16, [#allocation14]  }
  0x88   :  { %s12255_s3 = scalar_lea.hbm %s15263_s11, 16 }
  0x89   :  { %p12256_p8 = scmp.ne.s32.totalorder %s15263_s11, %s12255_s3  ;;  %p12259_p9 = scmp.lt.u32.totalorder %s12255_s3, %s15263_s11 }
  0x8b   :  { %p12261_p10 = pnand %p12259_p9, %p12256_p8 }
  0x8d   :  { %12264 = shalt.err (!%p12261_p10)
}
  0x8e   :  { %s12265_s15 = scalar_lea.vmem %s121_s18, 16  ;;  %s12269_s17 = scalar_lea.vmem %s121_s18, 32 }
  0x8f   :  { %p12266_p11 = scmp.ne.s32.totalorder %s121_s18, %s12265_s15  ;;  %p12270_p12 = scmp.lt.s32.totalorder %s121_s18, %s121_s18 }
  0x90   :  { %p12271_p13 = scmp.lt.s32.totalorder %s12269_s17, %s12265_s15 }
  0x92   :  { %p12272_p0 = por %p12271_p13, %p12270_p12 }
  0x94   :  { %p12273_p1 = pnand %p12272_p0, %p12266_p11 }
  0x96   :  { %12276 = shalt.err (!%p12273_p1)
}
  0x97   :  { %123 = dma.hbm_to_vmem [thread:$0]  %s15263_s11, 16, %s121_s18, [#allocation17]  }
  0x98   :  { %12277 = dma.done.wait [#allocation6], 16384  }
  0x99   :  { %12278 = vsyncadd [#allocation6], 4294950912 }
  0x9a   :  { %12279 = dma.done.wait [#allocation8], 16640  }
  0x9b   :  { %12280 = vsyncadd [#allocation8], 4294950656 }
  0x9c   :  { %12281 = dma.done.wait [#allocation11], 8208  }
  0x9d   :  { %12282 = vsyncadd [#allocation11], 4294959088 }
  0x9e   :  { %12283 = dma.done.wait [#allocation14], 320  }
  0x9f   :  { %12284 = vsyncadd [#allocation14], 4294966976 }
  0xa0   :  { %12285 = dma.done.wait [#allocation17], 16400  }
  0xa1   :  { %12286 = vsyncadd [#allocation17], 4294950896  ;;  %s156_s19 = sld [smem:[#allocation0]]   ;;  %s12303_s2 = smov 2048   ;;  %v12304_v0 = vmov 0  }
  0xa2   :  { %168 = sst [smem:[#allocation20]] %s12303_s2  ;;  %1151 = vmatprep.mubr.bf16.mxu0 %v12304_v0  ;;  %1264 = vmatprep.mubr.bf16.mxu1 %v12304_v0  ;;  %s12305_s11 = smov [#allocation3]  }
  0xa3   :  { %170 = sst [smem:[#allocation20 + $0x1]] %s12303_s2  ;;  %s164_s18 = sshll.u32 %s12305_s11, 4  ;;  %s165_s18 = int_to_ptr.vmem [resolvable:$true] %s164_s18 }
  0xa4   :  { %172 = sst [smem:[#allocation20 + $0x2]] %s12300_s22  ;;  %s12306_s25 = smov 128  }
  0xa5   :  { %174 = sst [smem:[#allocation20 + $0x3]] %s12294_s29  ;;  %s12307_s5 = smov 2  }
  0xa6   :  { %176 = sst [smem:[#allocation20 + $0x4]] %s12306_s25  ;;  %s12308_s23 = smov [#allocation4]  }
  0xa7   :  { %178 = sst [smem:[#allocation20 + $0x5]] %s12307_s5  ;;  %s9676_s24 = sshll.u32 %s156_s19, 26 }
  0xa8   :  { %180 = sst [smem:[#allocation20 + $0x6]] %s12296_s10  ;;  %s9677_s20 = sadd.s32 134217728, %s9676_s24 }
  0xa9   :  { %182 = sst [smem:[#allocation20 + $0x7]] %s12294_s29  ;;  %s12309_s6 = smov [#allocation19]  }
  0xaa   :  { %184 = sst [smem:[#allocation20 + $0x8]] %s12295_s14 }
  0xab   :  { %186 = dma.general %s15260_s8, 65536, %s165_s18, %s12308_s23, %s12309_s6, [#allocation20], %s9677_s20, 0  }
  0xac   :  { %v219_v1 = vld [vmem:[#allocation5] sm:$0xff]  ;;  %v220_v3 = vld [vmem:[#allocation5 + $0x8] sm:$0xff]  ;;  %v221_v63 = vld [vmem:[#allocation5 + $0x10] sm:$0xff] }
  0xad   :  { %v227_v2 = vld [vmem:[#allocation5 + $0x40] sm:$0xff]  ;;  %v228_v5 = vld [vmem:[#allocation5 + $0x48] sm:$0xff] }
  0xae   :  { %v9687_v4 = vcombine.high %v219_v1, %v227_v2  ;;  %v9686_v6 = vcombine.low %v219_v1, %v227_v2  ;;  %v235_v7 = vld [vmem:[#allocation5 + $0x80] sm:$0xff]  ;;  %v9689_v9 = vcombine.high %v220_v3, %v228_v5  ;;  %v9688_v10 = vcombine.low %v220_v3, %v228_v5  ;;  %v236_v12 = vld [vmem:[#allocation5 + $0x88] sm:$0xff]  ;;  %v229_v1 = vld [vmem:[#allocation5 + $0x50] sm:$0xff] }
  0xaf   :  { %v243_v8 = vld [vmem:[#allocation5 + $0xc0] sm:$0xff]  ;;  %v244_v13 = vld [vmem:[#allocation5 + $0xc8] sm:$0xff]  ;;  %v222_v2 = vld [vmem:[#allocation5 + $0x18] sm:$0xff] }
  0xb0   :  { %v9703_v11 = vcombine.high %v235_v7, %v243_v8  ;;  %v251_v14 = vld [vmem:[#allocation5 + $0x100] sm:$0xff]  ;;  %1119 = vmatprep.subr.bf16.mxu0 %v9687_v4  ;;  %v9705_v15 = vcombine.high %v236_v12, %v244_v13  ;;  %v252_v17 = vld [vmem:[#allocation5 + $0x108] sm:$0xff]  ;;  %1232 = vmatprep.subr.bf16.mxu1 %v9689_v9  ;;  %v9702_v19 = vcombine.low %v235_v7, %v243_v8  ;;  %v230_v3 = vld [vmem:[#allocation5 + $0x58] sm:$0xff] }
  0xb1   :  { %v259_v16 = vld [vmem:[#allocation5 + $0x140] sm:$0xff]  ;;  %v260_v18 = vld [vmem:[#allocation5 + $0x148] sm:$0xff]  ;;  %1120 = vmatpush1.bf16.msra.mxu0 %v9686_v6  ;;  %1233 = vmatpush1.bf16.msra.mxu1 %v9688_v10  ;;  %v9704_v20 = vcombine.low %v236_v12, %v244_v13  ;;  %v9691_v6 = vcombine.high %v221_v63, %v229_v1  ;;  %v9693_v7 = vcombine.high %v222_v2, %v230_v3  ;;  %v237_v9 = vld [vmem:[#allocation5 + $0x90] sm:$0xff] }
  0xb2   :  { %1121 = vmatprep.subr.bf16.mxu0 %v9703_v11  ;;  %v9719_v21 = vcombine.high %v251_v14, %v259_v16  ;;  %1234 = vmatprep.subr.bf16.mxu1 %v9705_v15  ;;  %v9721_v22 = vcombine.high %v252_v17, %v260_v18  ;;  %v267_v23 = vld [vmem:[#allocation5 + $0x180] sm:$0xff]  ;;  %v268_v25 = vld [vmem:[#allocation5 + $0x188] sm:$0xff]  ;;  %v9718_v27 = vcombine.low %v251_v14, %v259_v16  ;;  %v245_v10 = vld [vmem:[#allocation5 + $0xd0] sm:$0xff] }
  0xb3   :  { %v275_v24 = vld [vmem:[#allocation5 + $0x1c0] sm:$0xff]  ;;  %v276_v26 = vld [vmem:[#allocation5 + $0x1c8] sm:$0xff]  ;;  %v9720_v28 = vcombine.low %v252_v17, %v260_v18  ;;  %v9690_v11 = vcombine.low %v221_v63, %v229_v1  ;;  %v238_v12 = vld [vmem:[#allocation5 + $0x98] sm:$0xff]  ;;  %v9692_v14 = vcombine.low %v222_v2, %v230_v3  ;;  %v9707_v15 = vcombine.high %v237_v9, %v245_v10 }
  0xb4   :  { %v9735_v29 = vcombine.high %v267_v23, %v275_v24  ;;  %v9737_v30 = vcombine.high %v268_v25, %v276_v26  ;;  %v283_v31 = vld [vmem:[#allocation5 + $0x200] sm:$0xff]  ;;  %v284_v33 = vld [vmem:[#allocation5 + $0x208] sm:$0xff]  ;;  %v9734_v35 = vcombine.low %v267_v23, %v275_v24  ;;  %v9736_v36 = vcombine.low %v268_v25, %v276_v26  ;;  %v246_v13 = vld [vmem:[#allocation5 + $0xd8] sm:$0xff] }
  0xb5   :  { %1122 = vmatpush1.bf16.msra.mxu0 %v9702_v19  ;;  %1235 = vmatpush1.bf16.msra.mxu1 %v9704_v20  ;;  %v291_v32 = vld [vmem:[#allocation5 + $0x240] sm:$0xff]  ;;  %v292_v34 = vld [vmem:[#allocation5 + $0x248] sm:$0xff]  ;;  %v253_v16 = vld [vmem:[#allocation5 + $0x110] sm:$0xff]  ;;  %v9709_v18 = vcombine.high %v238_v12, %v246_v13 }
  0xb6   :  { %1123 = vmatprep.subr.bf16.mxu0 %v9719_v21  ;;  %1236 = vmatprep.subr.bf16.mxu1 %v9721_v22  ;;  %v9751_v37 = vcombine.high %v283_v31, %v291_v32  ;;  %v9753_v38 = vcombine.high %v284_v33, %v292_v34  ;;  %v299_v39 = vld [vmem:[#allocation5 + $0x280] sm:$0xff]  ;;  %v300_v41 = vld [vmem:[#allocation5 + $0x288] sm:$0xff]  ;;  %v9750_v43 = vcombine.low %v283_v31, %v291_v32  ;;  %v261_v17 = vld [vmem:[#allocation5 + $0x150] sm:$0xff] }
  0xb7   :  { %v307_v40 = vld [vmem:[#allocation5 + $0x2c0] sm:$0xff]  ;;  %v308_v42 = vld [vmem:[#allocation5 + $0x2c8] sm:$0xff]  ;;  %v9752_v44 = vcombine.low %v284_v33, %v292_v34  ;;  %v254_v19 = vld [vmem:[#allocation5 + $0x118] sm:$0xff]  ;;  %v9706_v21 = vcombine.low %v237_v9, %v245_v10  ;;  %v9708_v22 = vcombine.low %v238_v12, %v246_v13  ;;  %v9723_v23 = vcombine.high %v253_v16, %v261_v17 }
  0xb8   :  { %v9767_v45 = vcombine.high %v299_v39, %v307_v40  ;;  %v9769_v46 = vcombine.high %v300_v41, %v308_v42  ;;  %v315_v47 = vld [vmem:[#allocation5 + $0x300] sm:$0xff]  ;;  %v316_v49 = vld [vmem:[#allocation5 + $0x308] sm:$0xff]  ;;  %v9766_v51 = vcombine.low %v299_v39, %v307_v40  ;;  %v9768_v52 = vcombine.low %v300_v41, %v308_v42  ;;  %v262_v20 = vld [vmem:[#allocation5 + $0x158] sm:$0xff] }
  0xb9   :  { %1124 = vmatpush1.bf16.msra.mxu0 %v9718_v27  ;;  %1237 = vmatpush1.bf16.msra.mxu1 %v9720_v28  ;;  %v323_v48 = vld [vmem:[#allocation5 + $0x340] sm:$0xff]  ;;  %v324_v50 = vld [vmem:[#allocation5 + $0x348] sm:$0xff]  ;;  %v9725_v24 = vcombine.high %v254_v19, %v262_v20  ;;  %v269_v26 = vld [vmem:[#allocation5 + $0x190] sm:$0xff]  ;;  %v9724_v33 = vcombine.low %v254_v19, %v262_v20 }
  0xba   :  { %1125 = vmatprep.subr.bf16.mxu0 %v9735_v29  ;;  %1238 = vmatprep.subr.bf16.mxu1 %v9737_v30  ;;  %v9783_v53 = vcombine.high %v315_v47, %v323_v48  ;;  %v331_v54 = vld [vmem:[#allocation5 + $0x380] sm:$0xff]  ;;  %v9785_v55 = vcombine.high %v316_v49, %v324_v50  ;;  %v332_v57 = vld [vmem:[#allocation5 + $0x388] sm:$0xff]  ;;  %v9782_v59 = vcombine.low %v315_v47, %v323_v48  ;;  %v277_v27 = vld [vmem:[#allocation5 + $0x1d0] sm:$0xff] }
  0xbb   :  { %v339_v56 = vld [vmem:[#allocation5 + $0x3c0] sm:$0xff]  ;;  %v340_v58 = vld [vmem:[#allocation5 + $0x3c8] sm:$0xff]  ;;  %v9784_v60 = vcombine.low %v316_v49, %v324_v50  ;;  %v270_v28 = vld [vmem:[#allocation5 + $0x198] sm:$0xff]  ;;  %v9722_v30 = vcombine.low %v253_v16, %v261_v17  ;;  %v9739_v34 = vcombine.high %v269_v26, %v277_v27  ;;  %v9738_v39 = vcombine.low %v269_v26, %v277_v27 }
  0xbc   :  { %v9799_v61 = vcombine.high %v331_v54, %v339_v56  ;;  %v9801_v62 = vcombine.high %v332_v57, %v340_v58  ;;  %v9798_v4 = vcombine.low %v331_v54, %v339_v56  ;;  %v9800_v5 = vcombine.low %v332_v57, %v340_v58  ;;  %v12513_v8 = vld [vmem:[%s15252_s0] sm:$0xff]   ;;  %v12522_v25 = vld [vmem:[%s15252_s0 + $0x8] sm:$0xff]   ;;  %v278_v29 = vld [vmem:[#allocation5 + $0x1d8] sm:$0xff] }
  0xbd   :  { %1126 = vmatpush1.bf16.msra.mxu0 %v9734_v35  ;;  %1239 = vmatpush1.bf16.msra.mxu1 %v9736_v36  ;;  %v285_v31 = vld [vmem:[#allocation5 + $0x210] sm:$0xff]  ;;  %v9741_v35 = vcombine.high %v270_v28, %v278_v29  ;;  %v286_v36 = vld [vmem:[#allocation5 + $0x218] sm:$0xff]  ;;  %v9740_v42 = vcombine.low %v270_v28, %v278_v29  ;;  %v223_v2 = vld [vmem:[#allocation5 + $0x20] sm:$0xff] }
  0xbe   :  { %1127 = vmatprep.subr.bf16.mxu0 %v9751_v37  ;;  %1240 = vmatprep.subr.bf16.mxu1 %v9753_v38  ;;  %v293_v32 = vld [vmem:[#allocation5 + $0x250] sm:$0xff]  ;;  %v294_v37 = vld [vmem:[#allocation5 + $0x258] sm:$0xff]  ;;  %v231_v3 = vld [vmem:[#allocation5 + $0x60] sm:$0xff] }
  0xbf   :  { %v12531_v38 = vld [vmem:[%s15252_s0 + $0x10] sm:$0xff]   ;;  %v9754_v47 = vcombine.low %v285_v31, %v293_v32  ;;  %v9756_v50 = vcombine.low %v286_v36, %v294_v37  ;;  %v326_v54 = vld [vmem:[#allocation5 + $0x358] sm:$0xff]  ;;  %v232_v9 = vld [vmem:[#allocation5 + $0x68] sm:$0xff]  ;;  %v9695_v13 = vcombine.high %v223_v2, %v231_v3 }
  0xc0   :  { %v301_v40 = vld [vmem:[#allocation5 + $0x290] sm:$0xff]  ;;  %v12549_v10 = vld [vmem:[%s15252_s0 + $0x20] sm:$0xff]   ;;  %v12576_v17 = vld [vmem:[%s15252_s0 + $0x38] sm:$0xff]  }
  0xc1   :  { %1128 = vmatpush1.bf16.msra.mxu0 %v9750_v43  ;;  %1241 = vmatpush1.bf16.msra.mxu1 %v9752_v44  ;;  %v309_v41 = vld [vmem:[#allocation5 + $0x2d0] sm:$0xff]  ;;  %v9755_v43 = vcombine.high %v285_v31, %v293_v32  ;;  %v302_v44 = vld [vmem:[#allocation5 + $0x298] sm:$0xff]  ;;  %v247_v19 = vld [vmem:[#allocation5 + $0xe0] sm:$0xff] }
  0xc2   :  { %1129 = vmatprep.subr.bf16.mxu0 %v9767_v45  ;;  %1242 = vmatprep.subr.bf16.mxu1 %v9769_v46  ;;  %v310_v45 = vld [vmem:[#allocation5 + $0x2d8] sm:$0xff]  ;;  %v9757_v46 = vcombine.high %v286_v36, %v294_v37  ;;  %v317_v48 = vld [vmem:[#allocation5 + $0x310] sm:$0xff]  ;;  %v9770_v56 = vcombine.low %v301_v40, %v309_v41  ;;  %v240_v20 = vld [vmem:[#allocation5 + $0xa8] sm:$0xff] }
  0xc3   :  { %v325_v49 = vld [vmem:[#allocation5 + $0x350] sm:$0xff]  ;;  %v256_v27 = vld [vmem:[#allocation5 + $0x128] sm:$0xff] }
  0xc4   :  { %v333_v57 = vld [vmem:[#allocation5 + $0x390] sm:$0xff]  ;;  %v9786_v1 = vcombine.low %v317_v48, %v325_v49  ;;  %v264_v28 = vld [vmem:[#allocation5 + $0x168] sm:$0xff] }
  0xc5   :  { %1130 = vmatpush1.bf16.msra.mxu0 %v9766_v51  ;;  %1243 = vmatpush1.bf16.msra.mxu1 %v9768_v52  ;;  %v9771_v51 = vcombine.high %v301_v40, %v309_v41  ;;  %v9773_v52 = vcombine.high %v302_v44, %v310_v45  ;;  %v341_v58 = vld [vmem:[#allocation5 + $0x3d0] sm:$0xff]  ;;  %v9729_v36 = vcombine.high %v256_v27, %v264_v28  ;;  %v272_v37 = vld [vmem:[#allocation5 + $0x1a8] sm:$0xff]  ;;  %v295_v41 = vld [vmem:[#allocation5 + $0x260] sm:$0xff] }
  0xc6   :  { %1131 = vmatprep.subr.bf16.mxu0 %v9783_v53  ;;  %1244 = vmatprep.subr.bf16.mxu1 %v9785_v55  ;;  %v318_v53 = vld [vmem:[#allocation5 + $0x318] sm:$0xff]  ;;  %v12567_v16 = vld [vmem:[%s15252_s0 + $0x30] sm:$0xff]  }
  0xc7   :  { %v12540_v55 = vld [vmem:[%s15252_s0 + $0x18] sm:$0xff]   ;;  %v9789_v63 = vcombine.high %v318_v53, %v326_v54 }
  0xc9   :  { %1132 = vmatpush1.bf16.msra.mxu0 %v9782_v59  ;;  %1245 = vmatpush1.bf16.msra.mxu1 %v9784_v60  ;;  %v9772_v59 = vcombine.low %v302_v44, %v310_v45  ;;  %v9787_v60 = vcombine.high %v317_v48, %v325_v49  ;;  %v288_v45 = vld [vmem:[#allocation5 + $0x228] sm:$0xff]  ;;  %v303_v48 = vld [vmem:[#allocation5 + $0x2a0] sm:$0xff] }
  0xca   :  { %1133 = vmatprep.subr.bf16.mxu0 %v9799_v61  ;;  %1246 = vmatprep.subr.bf16.mxu1 %v9801_v62  ;;  %v334_v61 = vld [vmem:[#allocation5 + $0x398] sm:$0xff]  ;;  %v311_v49 = vld [vmem:[#allocation5 + $0x2e0] sm:$0xff] }
  0xcb   :  { %v342_v62 = vld [vmem:[#allocation5 + $0x3d8] sm:$0xff] }
  0xcc   :  { %v9804_v12 = vcombine.low %v334_v61, %v342_v62 }
  0xcd   :  { %1134 = vmatpush1.bf16.msra.mxu0 %v9798_v4  ;;  %1247 = vmatpush1.bf16.msra.mxu1 %v9800_v5  ;;  %v9788_v4 = vcombine.low %v318_v53, %v326_v54  ;;  %v9803_v5 = vcombine.high %v333_v57, %v341_v58  ;;  %v312_v53 = vld [vmem:[#allocation5 + $0x2e8] sm:$0xff] }
  0xce   :  { %1345 = vmatprep.subr.bf16.mxu0 %v9691_v6  ;;  %1458 = vmatprep.subr.bf16.mxu1 %v9693_v7  ;;  %v9805_v6 = vcombine.high %v334_v61, %v342_v62  ;;  %v224_v7 = vld [vmem:[#allocation5 + $0x28] sm:$0xff] }
  0xcf   :  { %v9696_v26 = vcombine.low %v224_v7, %v232_v9  ;;  %v320_v61 = vld [vmem:[#allocation5 + $0x328] sm:$0xff] }
  0xd0   :  { %1152 = vmatmul.mubr.bf16.vlgmr.msra.gmra.mrb[0].mxu0 %v12513_v8  ;;  %1265 = vmatmul.mubr.bf16.vlgmr.msra.gmra.mrb[0].mxu1 %v12513_v8  ;;  %v328_v62 = vld [vmem:[#allocation5 + $0x368] sm:$0xff] }
  0xd1   :  { %1346 = vmatpush1.bf16.msra.mxu0 %v9690_v11  ;;  %1459 = vmatpush1.bf16.msra.mxu1 %v9692_v14  ;;  %v9802_v11 = vcombine.low %v333_v57, %v341_v58  ;;  %v9697_v14 = vcombine.high %v224_v7, %v232_v9  ;;  %v327_v57 = vld [vmem:[#allocation5 + $0x360] sm:$0xff]  ;;  %v9793_v7 = vcombine.high %v320_v61, %v328_v62  ;;  %v225_v9 = vld [vmem:[#allocation5 + $0x30] sm:$0xff] }
  0xd2   :  { %1161 = vmatprep.mubr.bf16.mxu0 %v12304_v0  ;;  %1274 = vmatprep.mubr.bf16.mxu1 %v12304_v0 }
  0xd3   :  { %1347 = vmatprep.subr.bf16.mxu0 %v9707_v15  ;;  %1460 = vmatprep.subr.bf16.mxu1 %v9709_v18  ;;  %v12558_v15 = vld [vmem:[%s15252_s0 + $0x28] sm:$0xff]   ;;  %v239_v18 = vld [vmem:[#allocation5 + $0xa0] sm:$0xff] }
  0xd4   :  { %v9711_v29 = vcombine.high %v239_v18, %v247_v19  ;;  %v9710_v31 = vcombine.low %v239_v18, %v247_v19  ;;  %v234_v18 = vld [vmem:[#allocation5 + $0x78] sm:$0xff] }
  0xd5   :  { %1348 = vmatpush1.bf16.msra.mxu0 %v9706_v21  ;;  %1461 = vmatpush1.bf16.msra.mxu1 %v9708_v22  ;;  %v248_v21 = vld [vmem:[#allocation5 + $0xe8] sm:$0xff]  ;;  %v9694_v22 = vcombine.low %v223_v2, %v231_v3  ;;  %v343_v2 = vld [vmem:[#allocation5 + $0x3e0] sm:$0xff] }
  0xd6   :  { %1349 = vmatprep.subr.bf16.mxu0 %v9723_v23  ;;  %1462 = vmatprep.subr.bf16.mxu1 %v9725_v24  ;;  %v255_v23 = vld [vmem:[#allocation5 + $0x120] sm:$0xff]  ;;  %v9712_v32 = vcombine.low %v240_v20, %v248_v21 }
  0xd7   :  { %v263_v24 = vld [vmem:[#allocation5 + $0x160] sm:$0xff] }
  0xd8   :  { %1162 = vmatmul.mubr.bf16.gmra.mrb[4].mxu0 %v12522_v25  ;;  %1275 = vmatmul.mubr.bf16.gmra.mrb[4].mxu1 %v12522_v25  ;;  %v9726_v40 = vcombine.low %v255_v23, %v263_v24 }
  0xd9   :  { %1171 = vmatprep.mubr.bf16.mxu0 %v12304_v0  ;;  %1284 = vmatprep.mubr.bf16.mxu1 %v12304_v0 }
  0xda   :  { %1350 = vmatpush1.bf16.msra.mxu0 %v9722_v30  ;;  %1463 = vmatpush1.bf16.msra.mxu1 %v9724_v33  ;;  %v9713_v30 = vcombine.high %v240_v20, %v248_v21  ;;  %v9727_v33 = vcombine.high %v255_v23, %v263_v24  ;;  %v250_v24 = vld [vmem:[#allocation5 + $0xf8] sm:$0xff] }
  0xdb   :  { %1351 = vmatprep.subr.bf16.mxu0 %v9739_v34  ;;  %1464 = vmatprep.subr.bf16.mxu1 %v9741_v35  ;;  %v271_v34 = vld [vmem:[#allocation5 + $0x1a0] sm:$0xff] }
  0xdc   :  { %v279_v35 = vld [vmem:[#allocation5 + $0x1e0] sm:$0xff] }
  0xde   :  { %1352 = vmatpush1.bf16.msra.mxu0 %v9738_v39  ;;  %1465 = vmatpush1.bf16.msra.mxu1 %v9740_v42  ;;  %v280_v39 = vld [vmem:[#allocation5 + $0x1e8] sm:$0xff]  ;;  %v9728_v42 = vcombine.low %v256_v27, %v264_v28  ;;  %v257_v27 = vld [vmem:[#allocation5 + $0x130] sm:$0xff] }
  0xdf   :  { %1353 = vmatprep.subr.bf16.mxu0 %v9755_v43  ;;  %1466 = vmatprep.subr.bf16.mxu1 %v9757_v46  ;;  %v9743_v43 = vcombine.high %v271_v34, %v279_v35  ;;  %v9745_v44 = vcombine.high %v272_v37, %v280_v39  ;;  %v296_v46 = vld [vmem:[#allocation5 + $0x268] sm:$0xff]  ;;  %v265_v28 = vld [vmem:[#allocation5 + $0x170] sm:$0xff] }
  0xe0   :  { %1172 = vmatmul.mubr.bf16.gmra.mrb[8].mxu0 %v12531_v38  ;;  %1285 = vmatmul.mubr.bf16.gmra.mrb[8].mxu1 %v12531_v38  ;;  %v9761_v54 = vcombine.high %v288_v45, %v296_v46  ;;  %v9760_v58 = vcombine.low %v288_v45, %v296_v46  ;;  %v297_v45 = vld [vmem:[#allocation5 + $0x270] sm:$0xff] }
  0xe1   :  { %1181 = vmatprep.mubr.bf16.mxu0 %v12304_v0  ;;  %1294 = vmatprep.mubr.bf16.mxu1 %v12304_v0 }
  0xe2   :  { %1354 = vmatpush1.bf16.msra.mxu0 %v9754_v47  ;;  %1467 = vmatpush1.bf16.msra.mxu1 %v9756_v50  ;;  %v9742_v47 = vcombine.low %v271_v34, %v279_v35  ;;  %v9744_v50 = vcombine.low %v272_v37, %v280_v39  ;;  %v9731_v37 = vcombine.high %v257_v27, %v265_v28  ;;  %v273_v39 = vld [vmem:[#allocation5 + $0x1b0] sm:$0xff] }
  0xe3   :  { %1355 = vmatprep.subr.bf16.mxu0 %v9771_v51  ;;  %1468 = vmatprep.subr.bf16.mxu1 %v9773_v52  ;;  %v304_v52 = vld [vmem:[#allocation5 + $0x2a8] sm:$0xff] }
  0xe4   :  { %v9776_v3 = vcombine.low %v304_v52, %v312_v53 }
  0xe6   :  { %1356 = vmatpush1.bf16.msra.mxu0 %v9770_v56  ;;  %1469 = vmatpush1.bf16.msra.mxu1 %v9772_v59  ;;  %v319_v56 = vld [vmem:[#allocation5 + $0x320] sm:$0xff]  ;;  %v9775_v59 = vcombine.high %v303_v48, %v311_v49 }
  0xe7   :  { %1357 = vmatprep.subr.bf16.mxu0 %v9787_v60  ;;  %1470 = vmatprep.subr.bf16.mxu1 %v9789_v63  ;;  %v9777_v60 = vcombine.high %v304_v52, %v312_v53  ;;  %v9774_v63 = vcombine.low %v303_v48, %v311_v49  ;;  %v290_v48 = vld [vmem:[#allocation5 + $0x238] sm:$0xff]  ;;  %v305_v53 = vld [vmem:[#allocation5 + $0x2b0] sm:$0xff] }
  0xe8   :  { %1182 = vmatmul.mubr.bf16.gmra.mrb[12].mxu0 %v12540_v55  ;;  %1295 = vmatmul.mubr.bf16.gmra.mrb[12].mxu1 %v12540_v55  ;;  %v298_v49 = vld [vmem:[#allocation5 + $0x278] sm:$0xff] }
  0xe9   :  { %1191 = vmatprep.mubr.bf16.mxu0 %v12304_v0  ;;  %1304 = vmatprep.mubr.bf16.mxu1 %v12304_v0 }
  0xea   :  { %1358 = vmatpush1.bf16.msra.mxu0 %v9786_v1  ;;  %1471 = vmatpush1.bf16.msra.mxu1 %v9788_v4  ;;  %v335_v1 = vld [vmem:[#allocation5 + $0x3a0] sm:$0xff]  ;;  %v9791_v4 = vcombine.high %v319_v56, %v327_v57 }
  0xeb   :  { %1359 = vmatprep.subr.bf16.mxu0 %v9803_v5  ;;  %1472 = vmatprep.subr.bf16.mxu1 %v9805_v6  ;;  %v336_v5 = vld [vmem:[#allocation5 + $0x3a8] sm:$0xff]  ;;  %v9806_v20 = vcombine.low %v335_v1, %v343_v2 }
  0xec   :  { %v344_v6 = vld [vmem:[#allocation5 + $0x3e8] sm:$0xff] }
  0xed   :  { %v9809_v19 = vcombine.high %v336_v5, %v344_v6  ;;  %v9808_v21 = vcombine.low %v336_v5, %v344_v6  ;;  %v330_v5 = vld [vmem:[#allocation5 + $0x378] sm:$0xff] }
  0xee   :  { %1360 = vmatpush1.bf16.msra.mxu0 %v9802_v11  ;;  %1473 = vmatpush1.bf16.msra.mxu1 %v9804_v12  ;;  %v233_v11 = vld [vmem:[#allocation5 + $0x70] sm:$0xff]  ;;  %v9792_v12 = vcombine.low %v320_v61, %v328_v62  ;;  %v9764_v61 = vcombine.low %v290_v48, %v298_v49 }
  0xef   :  { %1571 = vmatprep.subr.bf16.mxu0 %v9695_v13  ;;  %1684 = vmatprep.subr.bf16.mxu1 %v9697_v14  ;;  %v9807_v13 = vcombine.high %v335_v1, %v343_v2  ;;  %v226_v14 = vld [vmem:[#allocation5 + $0x38] sm:$0xff]  ;;  %v321_v2 = vld [vmem:[#allocation5 + $0x330] sm:$0xff] }
  0xf0   :  { %1192 = vmatmul.mubr.bf16.gmra.mrb[16].mxu0 %v12549_v10  ;;  %1305 = vmatmul.mubr.bf16.gmra.mrb[16].mxu1 %v12549_v10  ;;  %v9701_v23 = vcombine.high %v226_v14, %v234_v18 }
  0xf1   :  { %1201 = vmatprep.mubr.bf16.mxu0 %v12304_v0  ;;  %1314 = vmatprep.mubr.bf16.mxu1 %v12304_v0 }
  0xf8   :  { %1202 = vmatmul.mubr.bf16.gmra.mrb[20].mxu0 %v12558_v15  ;;  %1315 = vmatmul.mubr.bf16.gmra.mrb[20].mxu1 %v12558_v15 }
  0xf9   :  { %1211 = vmatprep.mubr.bf16.mxu0 %v12304_v0  ;;  %1324 = vmatprep.mubr.bf16.mxu1 %v12304_v0 }
 0x100   :  { %1212 = vmatmul.mubr.bf16.gmra.mrb[24].mxu0 %v12567_v16  ;;  %1325 = vmatmul.mubr.bf16.gmra.mrb[24].mxu1 %v12567_v16 }
 0x101   :  { %1221 = vmatprep.mubr.bf16.mxu0 %v12304_v0  ;;  %1334 = vmatprep.mubr.bf16.mxu1 %v12304_v0 }
 0x108   :  { %1222 = vmatmul.mubr.bf16.gmra.mrb[28].mxu0 %v12576_v17  ;;  %1335 = vmatmul.mubr.bf16.gmra.mrb[28].mxu1 %v12576_v17 }
 0x109   :  { %1377 = vmatprep.mubr.bf16.mxu0 %v12304_v0  ;;  %1490 = vmatprep.mubr.bf16.mxu1 %v12304_v0 }
 0x110   :  { %1378 = vmatmul.mubr.bf16.vlgmr.msra.gmra.mrb[32].mxu0 %v12513_v8  ;;  %1491 = vmatmul.mubr.bf16.vlgmr.msra.gmra.mrb[32].mxu1 %v12513_v8  ;;  %v287_v8 = vld [vmem:[#allocation5 + $0x220] sm:$0xff] }
 0x111   :  { %1572 = vmatpush1.bf16.msra.mxu0 %v9694_v22  ;;  %1685 = vmatpush1.bf16.msra.mxu1 %v9696_v26  ;;  %v9759_v51 = vcombine.high %v287_v8, %v295_v41  ;;  %v9699_v22 = vcombine.high %v225_v9, %v233_v11  ;;  %v9698_v26 = vcombine.low %v225_v9, %v233_v11  ;;  %v337_v11 = vld [vmem:[#allocation5 + $0x3b0] sm:$0xff] }
 0x112   :  { %1387 = vmatprep.mubr.bf16.mxu0 %v12304_v0  ;;  %1500 = vmatprep.mubr.bf16.mxu1 %v12304_v0 }
 0x113   :  { %1573 = vmatprep.subr.bf16.mxu0 %v9711_v29  ;;  %1686 = vmatprep.subr.bf16.mxu1 %v9713_v30  ;;  %v9700_v29 = vcombine.low %v226_v14, %v234_v18  ;;  %v258_v30 = vld [vmem:[#allocation5 + $0x138] sm:$0xff] }
 0x114   :  { %v346_v14 = vld [vmem:[#allocation5 + $0x3f8] sm:$0xff] }
 0x115   :  { %1574 = vmatpush1.bf16.msra.mxu0 %v9710_v31  ;;  %1687 = vmatpush1.bf16.msra.mxu1 %v9712_v32  ;;  %v266_v31 = vld [vmem:[#allocation5 + $0x178] sm:$0xff] }
 0x116   :  { %1575 = vmatprep.subr.bf16.mxu0 %v9727_v33  ;;  %1688 = vmatprep.subr.bf16.mxu1 %v9729_v36  ;;  %v12617_v33 = vld [vmem:[%s15252_s0] sm:$0xff]   ;;  %v9732_v46 = vcombine.low %v258_v30, %v266_v31 }
 0x118   :  { %1388 = vmatmul.mubr.bf16.gmra.mrb[36].mxu0 %v12522_v25  ;;  %1501 = vmatmul.mubr.bf16.gmra.mrb[36].mxu1 %v12522_v25  ;;  %v9758_v25 = vcombine.low %v287_v8, %v295_v41  ;;  %v9733_v8 = vcombine.high %v258_v30, %v266_v31  ;;  %v274_v41 = vld [vmem:[#allocation5 + $0x1b8] sm:$0xff] }
 0x119   :  { %1397 = vmatprep.mubr.bf16.mxu0 %v12304_v0  ;;  %1510 = vmatprep.mubr.bf16.mxu1 %v12304_v0  ;;  %v11716_v30 = vld [vmem:[#allocation9 + $0xc8] sm:$0xff]  }
 0x11a   :  { %1576 = vmatpush1.bf16.msra.mxu0 %v9726_v40  ;;  %1689 = vmatpush1.bf16.msra.mxu1 %v9728_v42  ;;  %v281_v40 = vld [vmem:[#allocation5 + $0x1f0] sm:$0xff]  ;;  %v282_v42 = vld [vmem:[#allocation5 + $0x1f8] sm:$0xff] }
 0x11b   :  { %1577 = vmatprep.subr.bf16.mxu0 %v9743_v43  ;;  %1690 = vmatprep.subr.bf16.mxu1 %v9745_v44  ;;  %v9730_v43 = vcombine.low %v257_v27, %v265_v28  ;;  %v289_v44 = vld [vmem:[#allocation5 + $0x230] sm:$0xff]  ;;  %v9746_v52 = vcombine.low %v273_v39, %v281_v40  ;;  %v11717_v31 = vld [vmem:[#allocation9 + $0x88] sm:$0xff]  }
 0x11c   :  { %v11711_v27 = vld [vmem:[#allocation9] sm:$0xff]  }
 0x11d   :  { %v11713_v28 = vld [vmem:[#allocation9 + $0x80] sm:$0xff]  }
 0x11e   :  { %1578 = vmatpush1.bf16.msra.mxu0 %v9742_v47  ;;  %1691 = vmatpush1.bf16.msra.mxu1 %v9744_v50  ;;  %v9747_v47 = vcombine.high %v273_v39, %v281_v40  ;;  %v12626_v50 = vld [vmem:[%s15252_s0 + $0x8] sm:$0xff]  }
 0x11f   :  { %1579 = vmatprep.subr.bf16.mxu0 %v9759_v51  ;;  %1692 = vmatprep.subr.bf16.mxu1 %v9761_v54  ;;  %v9749_v51 = vcombine.high %v274_v41, %v282_v42  ;;  %v313_v54 = vld [vmem:[#allocation5 + $0x2f0] sm:$0xff]  ;;  %v11724_v39 = vld [vmem:[#allocation9 + $0xd8] sm:$0xff]  }
 0x120   :  { %1398 = vmatmul.mubr.bf16.gmra.mrb[40].mxu0 %v12531_v38  ;;  %1511 = vmatmul.mubr.bf16.gmra.mrb[40].mxu1 %v12531_v38  ;;  %v9790_v38 = vcombine.low %v319_v56, %v327_v57  ;;  %v9763_v56 = vcombine.high %v289_v44, %v297_v45  ;;  %v9765_v57 = vcombine.high %v290_v48, %v298_v49  ;;  %v11723_v40 = vld [vmem:[#allocation9 + $0x18] sm:$0xff]   ;;  %v11727_v48 = vld [vmem:[#allocation9 + $0x20] sm:$0xff]  }
 0x121   :  { %1407 = vmatprep.mubr.bf16.mxu0 %v12304_v0  ;;  %1520 = vmatprep.mubr.bf16.mxu1 %v12304_v0  ;;  %v9779_v62 = vcombine.high %v305_v53, %v313_v54  ;;  %v9778_v6 = vcombine.low %v305_v53, %v313_v54  ;;  %v11729_v49 = vld [vmem:[#allocation9 + $0xa0] sm:$0xff]  }
 0x122   :  { %1580 = vmatpush1.bf16.msra.mxu0 %v9758_v25  ;;  %1693 = vmatpush1.bf16.msra.mxu1 %v9760_v58  ;;  %v9748_v25 = vcombine.low %v274_v41, %v282_v42  ;;  %v306_v58 = vld [vmem:[#allocation5 + $0x2b8] sm:$0xff]  ;;  %v11726_v41 = vld [vmem:[#allocation9 + $0x60] sm:$0xff]  }
 0x123   :  { %1581 = vmatprep.subr.bf16.mxu0 %v9775_v59  ;;  %1694 = vmatprep.subr.bf16.mxu1 %v9777_v60  ;;  %v314_v59 = vld [vmem:[#allocation5 + $0x2f8] sm:$0xff]  ;;  %v9762_v60 = vcombine.low %v289_v44, %v297_v45  ;;  %v12689_v44 = vld [vmem:[#allocation7] sm:$0xff] }
 0x124   :  { %v9781_v1 = vcombine.high %v306_v58, %v314_v59 }
 0x126   :  { %1582 = vmatpush1.bf16.msra.mxu0 %v9774_v63  ;;  %1695 = vmatpush1.bf16.msra.mxu1 %v9776_v3  ;;  %v12635_v63 = vld [vmem:[%s15252_s0 + $0x10] sm:$0xff]  }
 0x127   :  { %1583 = vmatprep.subr.bf16.mxu0 %v9791_v4  ;;  %1696 = vmatprep.subr.bf16.mxu1 %v9793_v7  ;;  %v329_v3 = vld [vmem:[#allocation5 + $0x370] sm:$0xff]  ;;  %v322_v4 = vld [vmem:[#allocation5 + $0x338] sm:$0xff]  ;;  %v9780_v7 = vcombine.low %v306_v58, %v314_v59  ;;  %v11734_v59 = vld [vmem:[#allocation9 + $0x70] sm:$0xff]  }
 0x128   :  { %1408 = vmatmul.mubr.bf16.gmra.mrb[44].mxu0 %v12540_v55  ;;  %1521 = vmatmul.mubr.bf16.gmra.mrb[44].mxu1 %v12540_v55  ;;  %v241_v55 = vld [vmem:[#allocation5 + $0xb0] sm:$0xff]  ;;  %v9797_v9 = vcombine.high %v322_v4, %v330_v5  ;;  %v9794_v18 = vcombine.low %v321_v2, %v329_v3  ;;  %v11733_v58 = vld [vmem:[#allocation9 + $0xa8] sm:$0xff]  }
 0x129   :  { %1417 = vmatprep.mubr.bf16.mxu0 %v12304_v0  ;;  %1530 = vmatprep.mubr.bf16.mxu1 %v12304_v0 }
 0x12a   :  { %1584 = vmatpush1.bf16.msra.mxu0 %v9790_v38  ;;  %1697 = vmatpush1.bf16.msra.mxu1 %v9792_v12  ;;  %v9795_v38 = vcombine.high %v321_v2, %v329_v3  ;;  %v345_v12 = vld [vmem:[#allocation5 + $0x3f0] sm:$0xff] }
 0x12b   :  { %1585 = vmatprep.subr.bf16.mxu0 %v9807_v13  ;;  %1698 = vmatprep.subr.bf16.mxu1 %v9809_v19  ;;  %v338_v13 = vld [vmem:[#allocation5 + $0x3b8] sm:$0xff]  ;;  %v9796_v19 = vcombine.low %v322_v4, %v330_v5 }
 0x12e   :  { %1586 = vmatpush1.bf16.msra.mxu0 %v9806_v20  ;;  %1699 = vmatpush1.bf16.msra.mxu1 %v9808_v21  ;;  %v9811_v20 = vcombine.high %v337_v11, %v345_v12  ;;  %v12644_v21 = vld [vmem:[%s15252_s0 + $0x18] sm:$0xff]  }
 0x12f   :  { %1797 = vmatprep.subr.bf16.mxu0 %v9699_v22  ;;  %1910 = vmatprep.subr.bf16.mxu1 %v9701_v23  ;;  %v9813_v22 = vcombine.high %v338_v13, %v346_v14  ;;  %v9810_v23 = vcombine.low %v337_v11, %v345_v12 }
 0x130   :  { %1418 = vmatmul.mubr.bf16.gmra.mrb[48].mxu0 %v12549_v10  ;;  %1531 = vmatmul.mubr.bf16.gmra.mrb[48].mxu1 %v12549_v10  ;;  %v249_v10 = vld [vmem:[#allocation5 + $0xf0] sm:$0xff] }
 0x131   :  { %1427 = vmatprep.mubr.bf16.mxu0 %v12304_v0  ;;  %1540 = vmatprep.mubr.bf16.mxu1 %v12304_v0  ;;  %v9715_v32 = vcombine.high %v241_v55, %v249_v10  ;;  %v9714_v35 = vcombine.low %v241_v55, %v249_v10  ;;  %v9812_v55 = vcombine.low %v338_v13, %v346_v14  ;;  %v11710_v10 = vld [vmem:[#allocation9 + $0x40] sm:$0xff]  }
 0x138   :  { %1428 = vmatmul.mubr.bf16.gmra.mrb[52].mxu0 %v12558_v15  ;;  %1541 = vmatmul.mubr.bf16.gmra.mrb[52].mxu1 %v12558_v15  ;;  %v242_v15 = vld [vmem:[#allocation5 + $0xb8] sm:$0xff] }
 0x139   :  { %1437 = vmatprep.mubr.bf16.mxu0 %v12304_v0  ;;  %1550 = vmatprep.mubr.bf16.mxu1 %v12304_v0  ;;  %v9717_v34 = vcombine.high %v242_v15, %v250_v24  ;;  %v9716_v36 = vcombine.low %v242_v15, %v250_v24  ;;  %v11712_v15 = vld [vmem:[#allocation9 + $0xc0] sm:$0xff]   ;;  %v12653_v24 = vld [vmem:[%s15252_s0 + $0x20] sm:$0xff]  }
 0x140   :  { %1438 = vmatmul.mubr.bf16.gmra.mrb[56].mxu0 %v12567_v16  ;;  %1551 = vmatmul.mubr.bf16.gmra.mrb[56].mxu1 %v12567_v16 }
 0x141   :  { %1447 = vmatprep.mubr.bf16.mxu0 %v12304_v0  ;;  %1560 = vmatprep.mubr.bf16.mxu1 %v12304_v0 }
 0x148   :  { %1448 = vmatmul.mubr.bf16.gmra.mrb[60].mxu0 %v12576_v17  ;;  %1561 = vmatmul.mubr.bf16.gmra.mrb[60].mxu1 %v12576_v17 }
 0x149   :  { %1603 = vmatprep.mubr.bf16.mxu0 %v12304_v0  ;;  %1716 = vmatprep.mubr.bf16.mxu1 %v12304_v0 }
 0x150   :  { %1604 = vmatmul.mubr.bf16.vlgmr.msra.gmra.mrb[64].mxu0 %v12617_v33  ;;  %1717 = vmatmul.mubr.bf16.vlgmr.msra.gmra.mrb[64].mxu1 %v12617_v33 }
 0x151   :  { %1798 = vmatpush1.bf16.msra.mxu0 %v9698_v26  ;;  %1911 = vmatpush1.bf16.msra.mxu1 %v9700_v29  ;;  %v12662_v26 = vld [vmem:[%s15252_s0 + $0x28] sm:$0xff]   ;;  %v11714_v29 = vld [vmem:[#allocation9 + $0x48] sm:$0xff]  }
 0x152   :  { %1613 = vmatprep.mubr.bf16.mxu0 %v12304_v0  ;;  %1726 = vmatprep.mubr.bf16.mxu1 %v12304_v0 }
 0x153   :  { %1799 = vmatprep.subr.bf16.mxu0 %v9715_v32  ;;  %1912 = vmatprep.subr.bf16.mxu1 %v9717_v34  ;;  %v11718_v32 = vld [vmem:[#allocation9 + $0x50] sm:$0xff]   ;;  %v351_v34 = vlaneseq }
 0x155   :  { %1800 = vmatpush1.bf16.msra.mxu0 %v9714_v35  ;;  %1913 = vmatpush1.bf16.msra.mxu1 %v9716_v36  ;;  %v11719_v35 = vld [vmem:[#allocation9 + $0x10] sm:$0xff]  }
 0x156   :  { %1801 = vmatprep.subr.bf16.mxu0 %v9731_v37  ;;  %1914 = vmatprep.subr.bf16.mxu1 %v9733_v8  ;;  %v11721_v36 = vld [vmem:[#allocation9 + $0x90] sm:$0xff]   ;;  %v12681_v37 = vshrl.u32 %v351_v34, 7  ;;  %v11725_v8 = vld [vmem:[#allocation9 + $0x98] sm:$0xff]  }
 0x157   :  { %v11741_v34 = vld [vmem:[#allocation9 + $0xb8] sm:$0xff]  }
 0x158   :  { %1614 = vmatmul.mubr.bf16.gmra.mrb[68].mxu0 %v12626_v50  ;;  %1727 = vmatmul.mubr.bf16.gmra.mrb[68].mxu1 %v12626_v50  ;;  %v12687_v42 = vsub.s32 0, %v12681_v37  ;;  %v12692_v45 = vsub.s32 2, %v12681_v37 }
 0x159   :  { %1623 = vmatprep.mubr.bf16.mxu0 %v12304_v0  ;;  %1736 = vmatprep.mubr.bf16.mxu1 %v12304_v0 }
 0x15a   :  { %1802 = vmatpush1.bf16.msra.mxu0 %v9730_v43  ;;  %1915 = vmatpush1.bf16.msra.mxu1 %v9732_v46  ;;  %15295 = vst [vmem:[#allocation27_spill] sm:$0xff] %v12687_v42  ;;  %v11728_v43 = vld [vmem:[#allocation9 + $0xe0] sm:$0xff]   ;;  %15296 = vst [vmem:[#allocation28_spill] sm:$0xff] %v12692_v45  ;;  %v12695_v46 = vsub.s32 1, %v12681_v37  ;;  %v12708_v53 = vrot.slane %v12689_v44, %v12692_v45 }
 0x15b   :  { %1803 = vmatprep.subr.bf16.mxu0 %v9747_v47  ;;  %1916 = vmatprep.subr.bf16.mxu1 %v9749_v51  ;;  %v12698_v47 = vsub.s32 3, %v12681_v37  ;;  %v12703_v51 = vrot.slane %v12689_v44, %v12687_v42 }
 0x15c   :  { %15297 = vst [vmem:[#allocation29_spill] sm:$0xff] %v12695_v46  ;;  %v12712_v54 = vrot.slane %v12689_v44, %v12695_v46 }
 0x15d   :  { %15298 = vst [vmem:[#allocation30_spill] sm:$0xff] %v12698_v47 }
 0x15e   :  { %1804 = vmatpush1.bf16.msra.mxu0 %v9746_v52  ;;  %1917 = vmatpush1.bf16.msra.mxu1 %v9748_v25  ;;  %v11732_v52 = vld [vmem:[#allocation9 + $0xe8] sm:$0xff]   ;;  %v12717_v25 = vrot.slane %v12689_v44, %v12698_v47 }
 0x15f   :  { %1805 = vmatprep.subr.bf16.mxu0 %v9763_v56  ;;  %1918 = vmatprep.subr.bf16.mxu1 %v9765_v57  ;;  %v11731_v56 = vld [vmem:[#allocation9 + $0x28] sm:$0xff]  }
 0x160   :  { %1624 = vmatmul.mubr.bf16.gmra.mrb[72].mxu0 %v12635_v63  ;;  %1737 = vmatmul.mubr.bf16.gmra.mrb[72].mxu1 %v12635_v63 }
 0x161   :  { %1633 = vmatprep.mubr.bf16.mxu0 %v12304_v0  ;;  %1746 = vmatprep.mubr.bf16.mxu1 %v12304_v0 }
 0x162   :  { %1806 = vmatpush1.bf16.msra.mxu0 %v9762_v60  ;;  %1919 = vmatpush1.bf16.msra.mxu1 %v9764_v61 }
 0x163   :  { %1807 = vmatprep.subr.bf16.mxu0 %v9779_v62  ;;  %1920 = vmatprep.subr.bf16.mxu1 %v9781_v1 }
 0x166   :  { %1808 = vmatpush1.bf16.msra.mxu0 %v9778_v6  ;;  %1921 = vmatpush1.bf16.msra.mxu1 %v9780_v7 }
 0x167   :  { %1809 = vmatprep.subr.bf16.mxu0 %v9795_v38  ;;  %1922 = vmatprep.subr.bf16.mxu1 %v9797_v9  ;;  %v11735_v9 = vld [vmem:[#allocation9 + $0x30] sm:$0xff]  }
 0x168   :  { %1634 = vmatmul.mubr.bf16.gmra.mrb[76].mxu0 %v12644_v21  ;;  %1747 = vmatmul.mubr.bf16.gmra.mrb[76].mxu1 %v12644_v21 }
 0x169   :  { %1643 = vmatprep.mubr.bf16.mxu0 %v12304_v0  ;;  %1756 = vmatprep.mubr.bf16.mxu1 %v12304_v0 }
 0x16a   :  { %1810 = vmatpush1.bf16.msra.mxu0 %v9794_v18  ;;  %1923 = vmatpush1.bf16.msra.mxu1 %v9796_v19  ;;  %v11737_v18 = vld [vmem:[#allocation9 + $0xb0] sm:$0xff]   ;;  %v11738_v19 = vld [vmem:[#allocation9 + $0x78] sm:$0xff]  }
 0x16b   :  { %1811 = vmatprep.subr.bf16.mxu0 %v9811_v20  ;;  %1924 = vmatprep.subr.bf16.mxu1 %v9813_v22 }
 0x16e   :  { %1812 = vmatpush1.bf16.msra.mxu0 %v9810_v23  ;;  %1925 = vmatpush1.bf16.msra.mxu1 %v9812_v55 }
 0x16f   :  { %10145 = vmatprep.subr.bf16.mxu0 %v11710_v10  ;;  %10209 = vmatprep.subr.bf16.mxu1 %v11712_v15  ;;  %v11740_v10 = vld [vmem:[#allocation9 + $0xf8] sm:$0xff]  }
 0x170   :  { %1644 = vmatmul.mubr.bf16.gmra.mrb[80].mxu0 %v12653_v24  ;;  %1757 = vmatmul.mubr.bf16.gmra.mrb[80].mxu1 %v12653_v24 }
 0x171   :  { %1653 = vmatprep.mubr.bf16.mxu0 %v12304_v0  ;;  %1766 = vmatprep.mubr.bf16.mxu1 %v12304_v0 }
 0x178   :  { %1654 = vmatmul.mubr.bf16.gmra.mrb[84].mxu0 %v12662_v26  ;;  %1767 = vmatmul.mubr.bf16.gmra.mrb[84].mxu1 %v12662_v26 }
 0x179   :  { %1663 = vmatprep.mubr.bf16.mxu0 %v12304_v0  ;;  %1776 = vmatprep.mubr.bf16.mxu1 %v12304_v0 }
 0x180   :  { %1664 = vmatmul.mubr.bf16.gmra.mrb[88].mxu0 %v12567_v16  ;;  %1777 = vmatmul.mubr.bf16.gmra.mrb[88].mxu1 %v12567_v16  ;;  %v11715_v16 = vld [vmem:[#allocation9 + $0x8] sm:$0xff]  }
 0x181   :  { %1673 = vmatprep.mubr.bf16.mxu0 %v12304_v0  ;;  %1786 = vmatprep.mubr.bf16.mxu1 %v12304_v0 }
 0x188   :  { %1674 = vmatmul.mubr.bf16.gmra.mrb[92].mxu0 %v12576_v17  ;;  %1787 = vmatmul.mubr.bf16.gmra.mrb[92].mxu1 %v12576_v17  ;;  %v11720_v17 = vld [vmem:[#allocation9 + $0xd0] sm:$0xff]  }
 0x189   :  { %1829 = vmatprep.mubr.bf16.mxu0 %v12304_v0  ;;  %1942 = vmatprep.mubr.bf16.mxu1 %v12304_v0 }
 0x190   :  { %1830 = vmatmul.mubr.bf16.vlgmr.msra.gmra.mrb[96].mxu0 %v12617_v33  ;;  %1943 = vmatmul.mubr.bf16.vlgmr.msra.gmra.mrb[96].mxu1 %v12617_v33  ;;  %v11722_v33 = vld [vmem:[#allocation9 + $0x58] sm:$0xff]  }
 0x191   :  { %10146 = vmatpush3.bf16.msra.mxu0 %v11711_v27  ;;  %10210 = vmatpush3.bf16.msra.mxu1 %v11713_v28 }
 0x192   :  { %1839 = vmatprep.mubr.bf16.mxu0 %v12304_v0  ;;  %1952 = vmatprep.mubr.bf16.mxu1 %v12304_v0 }
 0x193   :  { %10147 = vmatprep.subr.bf16.mxu0 %v11714_v29  ;;  %10211 = vmatprep.subr.bf16.mxu1 %v11716_v30 }
 0x195   :  { %10148 = vmatpush3.bf16.msra.mxu0 %v11715_v16  ;;  %10212 = vmatpush3.bf16.msra.mxu1 %v11717_v31  ;;  %v11739_v16 = vld [vmem:[#allocation9 + $0x38] sm:$0xff]  }
 0x196   :  { %10149 = vmatprep.subr.bf16.mxu0 %v11718_v32  ;;  %10213 = vmatprep.subr.bf16.mxu1 %v11720_v17 }
 0x198   :  { %1840 = vmatmul.mubr.bf16.gmra.mrb[100].mxu0 %v12626_v50  ;;  %1953 = vmatmul.mubr.bf16.gmra.mrb[100].mxu1 %v12626_v50  ;;  %v11730_v50 = vld [vmem:[#allocation9 + $0x68] sm:$0xff]  }
 0x199   :  { %1849 = vmatprep.mubr.bf16.mxu0 %v12304_v0  ;;  %1962 = vmatprep.mubr.bf16.mxu1 %v12304_v0 }
 0x19a   :  { %10150 = vmatpush3.bf16.msra.mxu0 %v11719_v35  ;;  %10214 = vmatpush3.bf16.msra.mxu1 %v11721_v36  ;;  %v11742_v35 = vld [vmem:[#allocation9 + $0x140] sm:$0xff]  }
 0x19b   :  { %10151 = vmatprep.subr.bf16.mxu0 %v11722_v33  ;;  %10215 = vmatprep.subr.bf16.mxu1 %v11724_v39 }
 0x19e   :  { %10152 = vmatpush3.bf16.msra.mxu0 %v11723_v40  ;;  %10216 = vmatpush3.bf16.msra.mxu1 %v11725_v8  ;;  %v11744_v40 = vld [vmem:[#allocation9 + $0x1c0] sm:$0xff]  }
 0x19f   :  { %10153 = vmatprep.subr.bf16.mxu0 %v11726_v41  ;;  %10217 = vmatprep.subr.bf16.mxu1 %v11728_v43 }
 0x1a0   :  { %1850 = vmatmul.mubr.bf16.gmra.mrb[104].mxu0 %v12635_v63  ;;  %1963 = vmatmul.mubr.bf16.gmra.mrb[104].mxu1 %v12635_v63  ;;  %v11736_v63 = vld [vmem:[#allocation9 + $0xf0] sm:$0xff]  }
 0x1a1   :  { %1859 = vmatprep.mubr.bf16.mxu0 %v12304_v0  ;;  %1972 = vmatprep.mubr.bf16.mxu1 %v12304_v0 }
 0x1a2   :  { %10154 = vmatpush3.bf16.msra.mxu0 %v11727_v48  ;;  %10218 = vmatpush3.bf16.msra.mxu1 %v11729_v49 }
 0x1a3   :  { %v1153_v57 = vpop.f32.mrb[0].mxu0  ;;  %10155 = vmatprep.subr.bf16.mxu0 %v11730_v50  ;;  %v1266_v61 = vpop.f32.mrb[0].mxu1  ;;  %10219 = vmatprep.subr.bf16.mxu1 %v11732_v52 }
 0x1a4   :  { %v1154_v60 = vadd.f32 %v1153_v57, %v12703_v51  ;;  %v1155_v62 = vpop.f32.mrb[1].mxu0  ;;  %v1267_v1 = vadd.f32 %v1266_v61, %v12708_v53  ;;  %v1268_v3 = vpop.f32.mrb[1].mxu1 }
 0x1a5   :  { %v1156_v2 = vadd.f32 %v1155_v62, %v12712_v54  ;;  %v1157_v4 = vpop.f32.mrb[2].mxu0  ;;  %v1269_v5 = vadd.f32 %v1268_v3, %v12717_v25  ;;  %v1270_v7 = vpop.f32.mrb[2].mxu1 }
 0x1a6   :  { %v1158_v6 = vadd.f32 %v1157_v4, %v12703_v51  ;;  %v1159_v38 = vpop.f32.mrb[3].mxu0  ;;  %10156 = vmatpush3.bf16.msra.mxu0 %v11731_v56  ;;  %v2025_v11 = vmax.f32 %v1267_v1, 0.0  ;;  %v1271_v12 = vadd.f32 %v1270_v7, %v12708_v53  ;;  %v1272_v14 = vpop.f32.mrb[3].mxu1  ;;  %10220 = vmatpush3.bf16.msra.mxu1 %v11733_v58  ;;  %v2023_v20 = vmax.f32 %v1154_v60, 0.0 }
 0x1a7   :  { %v1160_v13 = vadd.f32 %v1159_v38, %v12712_v54  ;;  %10157 = vmatprep.subr.bf16.mxu0 %v11734_v59  ;;  %v2026_v22 = vmax.f32 %v1269_v5, 0.0  ;;  %v1273_v55 = vadd.f32 %v1272_v14, %v12717_v25  ;;  %10221 = vmatprep.subr.bf16.mxu1 %v11736_v63  ;;  %v2024_v15 = vmax.f32 %v1156_v2, 0.0 }
 0x1a8   :  { %v2039_v23 = vmax.f32 %v1158_v6, 0.0  ;;  %1860 = vmatmul.mubr.bf16.gmra.mrb[108].mxu0 %v12644_v21  ;;  %v2041_v27 = vmax.f32 %v1271_v12, 0.0  ;;  %1973 = vmatmul.mubr.bf16.gmra.mrb[108].mxu1 %v12644_v21 }
 0x1a9   :  { %v2040_v28 = vmax.f32 %v1160_v13, 0.0  ;;  %1869 = vmatprep.mubr.bf16.mxu0 %v12304_v0  ;;  %v2042_v30 = vmax.f32 %v1273_v55, 0.0  ;;  %1982 = vmatprep.mubr.bf16.mxu1 %v12304_v0 }
 0x1aa   :  { %v12731_v29 = vpack.c.bf16 %v2039_v23, %v2023_v20  ;;  %10158 = vmatpush3.bf16.msra.mxu0 %v11735_v9  ;;  %v12734_v31 = vpack.c.bf16 %v2041_v27, %v2025_v11  ;;  %10222 = vmatpush3.bf16.msra.mxu1 %v11737_v18 }
 0x1ab   :  { %v1163_v32 = vpop.f32.mrb[4].mxu0  ;;  %10159 = vmatprep.subr.bf16.mxu0 %v11738_v19  ;;  %v12736_v17 = vpack.c.bf16 %v2040_v28, %v2024_v15  ;;  %v1276_v36 = vpop.f32.mrb[4].mxu1  ;;  %v12739_v39 = vpack.c.bf16 %v2042_v30, %v2026_v22  ;;  %10223 = vmatprep.subr.bf16.mxu1 %v11740_v10 }
 0x1ac   :  { %v1164_v21 = vadd.f32 %v1163_v32, %v12703_v51  ;;  %v1165_v33 = vpop.f32.mrb[5].mxu0  ;;  %v1277_v8 = vadd.f32 %v1276_v36, %v12708_v53  ;;  %v1278_v43 = vpop.f32.mrb[5].mxu1 }
 0x1ad   :  { %v1166_v41 = vadd.f32 %v1165_v33, %v12712_v54  ;;  %v1167_v48 = vpop.f32.mrb[6].mxu0  ;;  %v1279_v49 = vadd.f32 %v1278_v43, %v12717_v25  ;;  %v1280_v52 = vpop.f32.mrb[6].mxu1 }
 0x1ae   :  { %v1168_v50 = vadd.f32 %v1167_v48, %v12703_v51  ;;  %v1169_v56 = vpop.f32.mrb[7].mxu0  ;;  %10160 = vmatpush3.bf16.msra.mxu0 %v11739_v16  ;;  %v2057_v57 = vmax.f32 %v1277_v8, 0.0  ;;  %v1281_v58 = vadd.f32 %v1280_v52, %v12708_v53  ;;  %v1282_v60 = vpop.f32.mrb[7].mxu1  ;;  %10224 = vmatpush3.bf16.msra.mxu1 %v11741_v34  ;;  %v2055_v61 = vmax.f32 %v1164_v21, 0.0 }
 0x1af   :  { %v1170_v59 = vadd.f32 %v1169_v56, %v12712_v54  ;;  %10273 = vmatprep.subr.bf16.mxu0 %v11742_v35  ;;  %v2058_v62 = vmax.f32 %v1279_v49, 0.0  ;;  %v1283_v1 = vadd.f32 %v1282_v60, %v12717_v25  ;;  %10337 = vmatprep.subr.bf16.mxu1 %v11744_v40  ;;  %v2056_v2 = vmax.f32 %v1166_v41, 0.0 }
 0x1b0   :  { %v2071_v63 = vmax.f32 %v1168_v50, 0.0  ;;  %1870 = vmatmul.mubr.bf16.gmra.mrb[112].mxu0 %v12653_v24  ;;  %v2073_v3 = vmax.f32 %v1281_v58, 0.0  ;;  %1983 = vmatmul.mubr.bf16.gmra.mrb[112].mxu1 %v12653_v24 }
 0x1b1   :  { %v2072_v4 = vmax.f32 %v1170_v59, 0.0  ;;  %1879 = vmatprep.mubr.bf16.mxu0 %v12304_v0  ;;  %v2074_v5 = vmax.f32 %v1283_v1, 0.0  ;;  %1992 = vmatprep.mubr.bf16.mxu1 %v12304_v0 }
 0x1b2   :  { %v12752_v6 = vpack.c.bf16 %v2071_v63, %v2055_v61  ;;  %v12756_v9 = vpack.c.bf16 %v2073_v3, %v2057_v57 }
 0x1b3   :  { %v1173_v7 = vpop.f32.mrb[8].mxu0  ;;  %v12754_v38 = vpack.c.bf16 %v2072_v4, %v2056_v2  ;;  %v1286_v12 = vpop.f32.mrb[8].mxu1  ;;  %v12759_v14 = vpack.c.bf16 %v2074_v5, %v2058_v62 }
 0x1b4   :  { %v1174_v11 = vadd.f32 %v1173_v7, %v12703_v51  ;;  %v1175_v13 = vpop.f32.mrb[9].mxu0  ;;  %v1287_v24 = vadd.f32 %v1286_v12, %v12708_v53  ;;  %v1288_v19 = vpop.f32.mrb[9].mxu1 }
 0x1b5   :  { %v1176_v18 = vadd.f32 %v1175_v13, %v12712_v54  ;;  %v1177_v20 = vpop.f32.mrb[10].mxu0  ;;  %v1289_v22 = vadd.f32 %v1288_v19, %v12717_v25  ;;  %v1290_v55 = vpop.f32.mrb[10].mxu1  ;;  %v11948_v13 = vld [vmem:[%s15252_s0 + $0x30] sm:$0xff]  }
 0x1b6   :  { %v1178_v23 = vadd.f32 %v1177_v20, %v12703_v51  ;;  %v1179_v10 = vpop.f32.mrb[11].mxu0  ;;  %v2089_v15 = vmax.f32 %v1287_v24, 0.0  ;;  %v1291_v27 = vadd.f32 %v1290_v55, %v12708_v53  ;;  %v1292_v30 = vpop.f32.mrb[11].mxu1  ;;  %v2087_v16 = vmax.f32 %v1174_v11, 0.0 }
 0x1b7   :  { %v1180_v28 = vadd.f32 %v1179_v10, %v12712_v54  ;;  %v2090_v32 = vmax.f32 %v1289_v22, 0.0  ;;  %v1293_v35 = vadd.f32 %v1292_v30, %v12717_v25  ;;  %v2088_v21 = vmax.f32 %v1176_v18, 0.0 }
 0x1b8   :  { %v2103_v34 = vmax.f32 %v1178_v23, 0.0  ;;  %1880 = vmatmul.mubr.bf16.gmra.mrb[116].mxu0 %v12662_v26  ;;  %v2105_v36 = vmax.f32 %v1291_v27, 0.0  ;;  %1993 = vmatmul.mubr.bf16.gmra.mrb[116].mxu1 %v12662_v26 }
 0x1b9   :  { %v2104_v33 = vmax.f32 %v1180_v28, 0.0  ;;  %1889 = vmatprep.mubr.bf16.mxu0 %v12304_v0  ;;  %v2106_v40 = vmax.f32 %v1293_v35, 0.0  ;;  %2002 = vmatprep.mubr.bf16.mxu1 %v12304_v0 }
 0x1ba   :  { %v12772_v8 = vpack.c.bf16 %v2103_v34, %v2087_v16  ;;  %v12776_v48 = vpack.c.bf16 %v2105_v36, %v2089_v15 }
 0x1bb   :  { %v1183_v41 = vpop.f32.mrb[12].mxu0  ;;  %v12774_v43 = vpack.c.bf16 %v2104_v33, %v2088_v21  ;;  %v1296_v50 = vpop.f32.mrb[12].mxu1  ;;  %v12779_v56 = vpack.c.bf16 %v2106_v40, %v2090_v32 }
 0x1bc   :  { %v1184_v49 = vadd.f32 %v1183_v41, %v12703_v51  ;;  %v1185_v52 = vpop.f32.mrb[13].mxu0  ;;  %v1297_v26 = vadd.f32 %v1296_v50, %v12708_v53  ;;  %v1298_v58 = vpop.f32.mrb[13].mxu1 }
 0x1bd   :  { %v1186_v57 = vadd.f32 %v1185_v52, %v12712_v54  ;;  %v1187_v59 = vpop.f32.mrb[14].mxu0  ;;  %v1299_v60 = vadd.f32 %v1298_v58, %v12717_v25  ;;  %v1300_v62 = vpop.f32.mrb[14].mxu1 }
 0x1be   :  { %v1188_v61 = vadd.f32 %v1187_v59, %v12703_v51  ;;  %v1189_v63 = vpop.f32.mrb[15].mxu0  ;;  %v2121_v1 = vmax.f32 %v1297_v26, 0.0  ;;  %v1301_v2 = vadd.f32 %v1300_v62, %v12708_v53  ;;  %v1302_v4 = vpop.f32.mrb[15].mxu1  ;;  %v2119_v5 = vmax.f32 %v1184_v49, 0.0  ;;  %v11949_v59 = vld [vmem:[%s15252_s0 + $0x38] sm:$0xff]  }
 0x1bf   :  { %v1190_v3 = vadd.f32 %v1189_v63, %v12712_v54  ;;  %v2122_v7 = vmax.f32 %v1299_v60, 0.0  ;;  %v1303_v12 = vadd.f32 %v1302_v4, %v12717_v25  ;;  %v2120_v24 = vmax.f32 %v1186_v57, 0.0 }
 0x1c0   :  { %v2135_v11 = vmax.f32 %v1188_v61, 0.0  ;;  %1890 = vmatmul.mubr.bf16.gmra.mrb[120].mxu0 %v11948_v13  ;;  %v2137_v18 = vmax.f32 %v1301_v2, 0.0  ;;  %2003 = vmatmul.mubr.bf16.gmra.mrb[120].mxu1 %v11948_v13 }
 0x1c1   :  { %v2136_v19 = vmax.f32 %v1190_v3, 0.0  ;;  %1899 = vmatprep.mubr.bf16.mxu0 %v12304_v0  ;;  %v2138_v20 = vmax.f32 %v1303_v12, 0.0  ;;  %2012 = vmatprep.mubr.bf16.mxu1 %v12304_v0 }
 0x1c2   :  { %v12793_v22 = vpack.c.bf16 %v2135_v11, %v2119_v5  ;;  %v12797_v10 = vpack.c.bf16 %v2137_v18, %v2121_v1 }
 0x1c3   :  { %v1193_v23 = vpop.f32.mrb[16].mxu0  ;;  %v12795_v55 = vpack.c.bf16 %v2136_v19, %v2120_v24  ;;  %v1306_v27 = vpop.f32.mrb[16].mxu1  ;;  %v12800_v30 = vpack.c.bf16 %v2138_v20, %v2122_v7 }
 0x1c4   :  { %v1194_v15 = vadd.f32 %v1193_v23, %v12703_v51  ;;  %v1195_v28 = vpop.f32.mrb[17].mxu0  ;;  %v1307_v16 = vadd.f32 %v1306_v27, %v12708_v53  ;;  %v1308_v34 = vpop.f32.mrb[17].mxu1 }
 0x1c5   :  { %v1196_v32 = vadd.f32 %v1195_v28, %v12712_v54  ;;  %v1197_v35 = vpop.f32.mrb[18].mxu0  ;;  %v1309_v0 = vadd.f32 %v1308_v34, %v12717_v25  ;;  %v1310_v36 = vpop.f32.mrb[18].mxu1  ;;  %v11745_v34 = vld [vmem:[#allocation9 + $0x180] sm:$0xff]  }
 0x1c6   :  { %v1198_v21 = vadd.f32 %v1197_v35, %v12703_v51  ;;  %v1199_v33 = vpop.f32.mrb[19].mxu0  ;;  %v2153_v40 = vmax.f32 %v1307_v16, 0.0  ;;  %v1311_v41 = vadd.f32 %v1310_v36, %v12708_v53  ;;  %v1312_v50 = vpop.f32.mrb[19].mxu1  ;;  %v2151_v52 = vmax.f32 %v1194_v15, 0.0  ;;  %v11743_v15 = vld [vmem:[#allocation9 + $0x100] sm:$0xff]   ;;  %v11746_v35 = vld [vmem:[#allocation9 + $0x148] sm:$0xff]  }
 0x1c7   :  { %v1200_v49 = vadd.f32 %v1199_v33, %v12712_v54  ;;  %v2154_v26 = vmax.f32 %v1309_v0, 0.0  ;;  %v1313_v58 = vadd.f32 %v1312_v50, %v12717_v25  ;;  %v2152_v60 = vmax.f32 %v1196_v32, 0.0 }
 0x1c8   :  { %v2167_v57 = vmax.f32 %v1198_v21, 0.0  ;;  %1900 = vmatmul.mubr.bf16.gmra.mrb[124].mxu0 %v11949_v59  ;;  %v2169_v61 = vmax.f32 %v1311_v41, 0.0  ;;  %2013 = vmatmul.mubr.bf16.gmra.mrb[124].mxu1 %v11949_v59  ;;  %v11749_v59 = vld [vmem:[#allocation9 + $0x188] sm:$0xff]  }
 0x1c9   :  { %v2168_v62 = vmax.f32 %v1200_v49, 0.0  ;;  %3470 = vmatprep.mubr.bf16.mxu0 %v12736_v17  ;;  %v2170_v63 = vmax.f32 %v1313_v58, 0.0  ;;  %3567 = vmatprep.mubr.bf16.mxu1 %v12739_v39 }
 0x1ca   :  { %v12814_v1 = vpack.c.bf16 %v2167_v57, %v2151_v52  ;;  %v12818_v4 = vpack.c.bf16 %v2169_v61, %v2153_v40  ;;  %v11748_v40 = vld [vmem:[#allocation9 + $0x1c8] sm:$0xff]  }
 0x1cb   :  { %v1203_v2 = vpop.f32.mrb[20].mxu0  ;;  %v12816_v3 = vpack.c.bf16 %v2168_v62, %v2152_v60  ;;  %v1316_v7 = vpop.f32.mrb[20].mxu1  ;;  %v12821_v12 = vpack.c.bf16 %v2170_v63, %v2154_v26  ;;  %v11747_v26 = vld [vmem:[#allocation9 + $0x108] sm:$0xff]   ;;  %v11752_v63 = vld [vmem:[#allocation9 + $0x1d0] sm:$0xff]  }
 0x1cc   :  { %v1204_v5 = vadd.f32 %v1203_v2, %v12703_v51  ;;  %v1205_v11 = vpop.f32.mrb[21].mxu0  ;;  %v1317_v13 = vadd.f32 %v1316_v7, %v12708_v53  ;;  %v1318_v24 = vpop.f32.mrb[21].mxu1 }
 0x1cd   :  { %v1206_v17 = vadd.f32 %v1205_v11, %v12712_v54  ;;  %v1207_v18 = vpop.f32.mrb[22].mxu0  ;;  %v1319_v39 = vadd.f32 %v1318_v24, %v12717_v25  ;;  %v1320_v20 = vpop.f32.mrb[22].mxu1 }
 0x1ce   :  { %v1208_v19 = vadd.f32 %v1207_v18, %v12703_v51  ;;  %v1209_v23 = vpop.f32.mrb[23].mxu0  ;;  %v2185_v27 = vmax.f32 %v1317_v13, 0.0  ;;  %v1321_v28 = vadd.f32 %v1320_v20, %v12708_v53  ;;  %v1322_v32 = vpop.f32.mrb[23].mxu1  ;;  %v2183_v0 = vmax.f32 %v1204_v5, 0.0 }
 0x1cf   :  { %v1210_v16 = vadd.f32 %v1209_v23, %v12712_v54  ;;  %v2186_v21 = vmax.f32 %v1319_v39, 0.0  ;;  %v1323_v33 = vadd.f32 %v1322_v32, %v12717_v25  ;;  %v2184_v41 = vmax.f32 %v1206_v17, 0.0  ;;  %v11751_v39 = vld [vmem:[#allocation9 + $0x110] sm:$0xff]  }
 0x1d0   :  { %v2199_v36 = vmax.f32 %v1208_v19, 0.0  ;;  %3471 = vmatmul.mubr.bf16.vlgmr.msra.gmra.mrb[128].mxu0 %v12731_v29  ;;  %v2201_v49 = vmax.f32 %v1321_v28, 0.0  ;;  %3568 = vmatmul.mubr.bf16.vlgmr.msra.gmra.mrb[128].mxu1 %v12734_v31  ;;  %v11750_v29 = vld [vmem:[#allocation9 + $0x150] sm:$0xff]   ;;  %v11754_v28 = vld [vmem:[#allocation9 + $0x158] sm:$0xff]  }
 0x1d1   :  { %v2200_v50 = vmax.f32 %v1210_v16, 0.0  ;;  %3478 = vmatprep.mubr.bf16.mxu0 %v12754_v38  ;;  %v2202_v52 = vmax.f32 %v1323_v33, 0.0  ;;  %3575 = vmatprep.mubr.bf16.mxu1 %v12759_v14 }
 0x1d2   :  { %10274 = vmatpush3.bf16.msra.mxu0 %v11743_v15  ;;  %v12834_v57 = vpack.c.bf16 %v2199_v36, %v2183_v0  ;;  %10338 = vmatpush3.bf16.msra.mxu1 %v11745_v34  ;;  %v12838_v61 = vpack.c.bf16 %v2201_v49, %v2185_v27  ;;  %v11753_v27 = vld [vmem:[#allocation9 + $0x190] sm:$0xff]   ;;  %v11756_v0 = vld [vmem:[#allocation9 + $0x1d8] sm:$0xff]  }
 0x1d3   :  { %v1213_v58 = vpop.f32.mrb[24].mxu0  ;;  %10275 = vmatprep.subr.bf16.mxu0 %v11746_v35  ;;  %v12836_v60 = vpack.c.bf16 %v2200_v50, %v2184_v41  ;;  %v1326_v62 = vpop.f32.mrb[24].mxu1  ;;  %10339 = vmatprep.subr.bf16.mxu1 %v11748_v40  ;;  %v12841_v14 = vpack.c.bf16 %v2202_v52, %v2186_v21  ;;  %v12855_v41 = vsub.s32 4, %v12681_v37  ;;  %v11755_v49 = vld [vmem:[#allocation9 + $0x118] sm:$0xff]   ;;  %v12860_v52 = vsub.s32 5, %v12681_v37 }
 0x1d4   :  { %v1214_v31 = vadd.f32 %v1213_v58, %v12703_v51  ;;  %v1215_v38 = vpop.f32.mrb[25].mxu0  ;;  %v1327_v2 = vadd.f32 %v1326_v62, %v12708_v53  ;;  %v1328_v7 = vpop.f32.mrb[25].mxu1 }
 0x1d5   :  { %v1216_v5 = vadd.f32 %v1215_v38, %v12712_v54  ;;  %v1217_v11 = vpop.f32.mrb[26].mxu0  ;;  %v1329_v13 = vadd.f32 %v1328_v7, %v12717_v25  ;;  %v1330_v24 = vpop.f32.mrb[26].mxu1  ;;  %15299 = vst [vmem:[#allocation31_spill] sm:$0xff] %v12855_v41  ;;  %15300 = vst [vmem:[#allocation32_spill] sm:$0xff] %v12860_v52  ;;  %v12872_v7 = vsub.s32 6, %v12681_v37 }
 0x1d6   :  { %v1218_v17 = vadd.f32 %v1217_v11, %v12703_v51  ;;  %v1219_v18 = vpop.f32.mrb[27].mxu0  ;;  %10276 = vmatpush3.bf16.msra.mxu0 %v11747_v26  ;;  %v2217_v19 = vmax.f32 %v1327_v2, 0.0  ;;  %v1331_v20 = vadd.f32 %v1330_v24, %v12708_v53  ;;  %v1332_v15 = vpop.f32.mrb[27].mxu1  ;;  %10340 = vmatpush3.bf16.msra.mxu1 %v11749_v59  ;;  %v2215_v16 = vmax.f32 %v1214_v31, 0.0  ;;  %v11757_v26 = vld [vmem:[#allocation9 + $0x198] sm:$0xff]   ;;  %v11760_v31 = vld [vmem:[#allocation9 + $0x1e0] sm:$0xff]  }
 0x1d7   :  { %v1220_v23 = vadd.f32 %v1219_v18, %v12712_v54  ;;  %10277 = vmatprep.subr.bf16.mxu0 %v11750_v29  ;;  %v2218_v32 = vmax.f32 %v1329_v13, 0.0  ;;  %v1333_v35 = vadd.f32 %v1332_v15, %v12717_v25  ;;  %10341 = vmatprep.subr.bf16.mxu1 %v11752_v63  ;;  %v2216_v21 = vmax.f32 %v1216_v5, 0.0  ;;  %15301 = vst [vmem:[#allocation33_spill] sm:$0xff] %v12872_v7 }
 0x1d8   :  { %v2231_v34 = vmax.f32 %v1218_v17, 0.0  ;;  %3479 = vmatmul.mubr.bf16.gmra.mrb[132].mxu0 %v12752_v6  ;;  %v2233_v36 = vmax.f32 %v1331_v20, 0.0  ;;  %3576 = vmatmul.mubr.bf16.gmra.mrb[132].mxu1 %v12756_v9  ;;  %v11758_v9 = vld [vmem:[#allocation9 + $0x160] sm:$0xff]   ;;  %v12878_v18 = vrot.slane %v12689_v44, %v12855_v41 }
 0x1d9   :  { %v2232_v33 = vmax.f32 %v1220_v23, 0.0  ;;  %3486 = vmatprep.mubr.bf16.mxu0 %v12774_v43  ;;  %v2234_v40 = vmax.f32 %v1333_v35, 0.0  ;;  %3583 = vmatprep.mubr.bf16.mxu1 %v12779_v56 }
 0x1da   :  { %10278 = vmatpush3.bf16.msra.mxu0 %v11751_v39  ;;  %v12857_v50 = vpack.c.bf16 %v2231_v34, %v2215_v16  ;;  %10342 = vmatpush3.bf16.msra.mxu1 %v11753_v27  ;;  %v12864_v43 = vpack.c.bf16 %v2233_v36, %v2217_v19  ;;  %v12881_v39 = vsub.s32 7, %v12681_v37  ;;  %v11759_v19 = vld [vmem:[#allocation9 + $0x120] sm:$0xff]   ;;  %v11762_v16 = vld [vmem:[#allocation9 + $0x168] sm:$0xff]   ;;  %v12895_v36 = vrot.slane %v12689_v44, %v12872_v7 }
 0x1db   :  { %v1223_v6 = vpop.f32.mrb[28].mxu0  ;;  %10279 = vmatprep.subr.bf16.mxu0 %v11754_v28  ;;  %v12862_v58 = vpack.c.bf16 %v2232_v33, %v2216_v21  ;;  %v1336_v59 = vpop.f32.mrb[28].mxu1  ;;  %10343 = vmatprep.subr.bf16.mxu1 %v11756_v0  ;;  %v12867_v62 = vpack.c.bf16 %v2234_v40, %v2218_v32  ;;  %v11761_v28 = vld [vmem:[#allocation9 + $0x1a0] sm:$0xff]  }
 0x1dc   :  { %v1224_v56 = vadd.f32 %v1223_v6, %v12703_v51  ;;  %v1225_v29 = vpop.f32.mrb[29].mxu0  ;;  %v1337_v38 = vadd.f32 %v1336_v59, %v12708_v53  ;;  %v1338_v2 = vpop.f32.mrb[29].mxu1  ;;  %15302 = vst [vmem:[#allocation34_spill] sm:$0xff] %v12881_v39  ;;  %v11768_v59 = vld [vmem:[#allocation9 + $0x1f0] sm:$0xff]  }
 0x1dd   :  { %v1226_v63 = vadd.f32 %v1225_v29, %v12712_v54  ;;  %v1227_v5 = vpop.f32.mrb[30].mxu0  ;;  %v1339_v11 = vadd.f32 %v1338_v2, %v12717_v25  ;;  %v1340_v17 = vpop.f32.mrb[30].mxu1 }
 0x1de   :  { %v1228_v13 = vadd.f32 %v1227_v5, %v12703_v51  ;;  %v1229_v24 = vpop.f32.mrb[31].mxu0  ;;  %10280 = vmatpush3.bf16.msra.mxu0 %v11755_v49  ;;  %v2249_v20 = vmax.f32 %v1337_v38, 0.0  ;;  %v1341_v23 = vadd.f32 %v1340_v17, %v12708_v53  ;;  %v1342_v27 = vpop.f32.mrb[31].mxu1  ;;  %v12887_v51 = vrot.slane %v12689_v44, %v12860_v52  ;;  %10344 = vmatpush3.bf16.msra.mxu1 %v11757_v26  ;;  %v11764_v53 = vld [vmem:[#allocation9 + $0x1e8] sm:$0xff]   ;;  %v11767_v17 = vld [vmem:[#allocation9 + $0x130] sm:$0xff]  }
 0x1df   :  { %v1230_v15 = vadd.f32 %v1229_v24, %v12712_v54  ;;  %10281 = vmatprep.subr.bf16.mxu0 %v11758_v9  ;;  %v2247_v32 = vmax.f32 %v1224_v56, 0.0  ;;  %v2250_v34 = vmax.f32 %v1339_v11, 0.0  ;;  %v1343_v35 = vadd.f32 %v1342_v27, %v12717_v25  ;;  %10345 = vmatprep.subr.bf16.mxu1 %v11760_v31  ;;  %v11770_v27 = vld [vmem:[#allocation9 + $0x178] sm:$0xff]  }
 0x1e0   :  { %v2263_v37 = vmax.f32 %v1228_v13, 0.0  ;;  %3487 = vmatmul.mubr.bf16.gmra.mrb[136].mxu0 %v12772_v8  ;;  %v2248_v0 = vmax.f32 %v1226_v63, 0.0  ;;  %v2265_v54 = vmax.f32 %v1341_v23, 0.0  ;;  %3584 = vmatmul.mubr.bf16.gmra.mrb[136].mxu1 %v12776_v48  ;;  %v12900_v25 = vrot.slane %v12689_v44, %v12881_v39  ;;  %v11763_v8 = vld [vmem:[#allocation9 + $0x128] sm:$0xff]  }
 0x1e1   :  { %v2264_v21 = vmax.f32 %v1230_v15, 0.0  ;;  %3494 = vmatprep.mubr.bf16.mxu0 %v12795_v55  ;;  %v2266_v33 = vmax.f32 %v1343_v35, 0.0  ;;  %3591 = vmatprep.mubr.bf16.mxu1 %v12800_v30  ;;  %v11765_v48 = vld [vmem:[#allocation9 + $0x1a8] sm:$0xff]   ;;  %v11766_v55 = vld [vmem:[#allocation9 + $0x170] sm:$0xff]  }
 0x1e2   :  { %10282 = vmatpush3.bf16.msra.mxu0 %v11759_v19  ;;  %v12902_v40 = vpack.c.bf16 %v2263_v37, %v2247_v32  ;;  %10346 = vmatpush3.bf16.msra.mxu1 %v11761_v28  ;;  %v12906_v26 = vpack.c.bf16 %v2265_v54, %v2249_v20  ;;  %v11769_v15 = vld [vmem:[#allocation9 + $0x1b0] sm:$0xff]   ;;  %v11772_v37 = vld [vmem:[#allocation9 + $0x1f8] sm:$0xff]  }
 0x1e3   :  { %v1379_v49 = vpop.f32.mrb[32].mxu0  ;;  %10283 = vmatprep.subr.bf16.mxu0 %v11762_v16  ;;  %v12904_v6 = vpack.c.bf16 %v2264_v21, %v2248_v0  ;;  %v1492_v30 = vpop.f32.mrb[32].mxu1  ;;  %10347 = vmatprep.subr.bf16.mxu1 %v11764_v53  ;;  %v12909_v44 = vpack.c.bf16 %v2266_v33, %v2250_v34  ;;  %v11771_v33 = vld [vmem:[#allocation9 + $0x138] sm:$0xff]  }
 0x1e4   :  { %v1380_v9 = vadd.f32 %v1379_v49, %v12878_v18  ;;  %v1381_v56 = vpop.f32.mrb[33].mxu0  ;;  %v1493_v29 = vadd.f32 %v1492_v30, %v12895_v36  ;;  %v1494_v38 = vpop.f32.mrb[33].mxu1 }
 0x1e5   :  { %v1382_v31 = vadd.f32 %v1381_v56, %v12887_v51  ;;  %v1383_v63 = vpop.f32.mrb[34].mxu0  ;;  %v1495_v2 = vadd.f32 %v1494_v38, %v12900_v25  ;;  %v1496_v11 = vpop.f32.mrb[34].mxu1  ;;  %v11776_v56 = vld [vmem:[#allocation9 + $0x2c0] sm:$0xff]  }
 0x1e6   :  { %v1384_v5 = vadd.f32 %v1383_v63, %v12878_v18  ;;  %v1385_v13 = vpop.f32.mrb[35].mxu0  ;;  %10284 = vmatpush3.bf16.msra.mxu0 %v11763_v8  ;;  %v2029_v24 = vmax.f32 %v1493_v29, 0.0  ;;  %v1497_v19 = vadd.f32 %v1496_v11, %v12895_v36  ;;  %v1498_v23 = vpop.f32.mrb[35].mxu1  ;;  %10348 = vmatpush3.bf16.msra.mxu1 %v11765_v48  ;;  %v2027_v28 = vmax.f32 %v1380_v9, 0.0  ;;  %v11773_v48 = vld [vmem:[#allocation9 + $0x1b8] sm:$0xff]  }
 0x1e7   :  { %v1386_v20 = vadd.f32 %v1385_v13, %v12887_v51  ;;  %10285 = vmatprep.subr.bf16.mxu0 %v11766_v55  ;;  %v2030_v16 = vmax.f32 %v1495_v2, 0.0  ;;  %v1499_v34 = vadd.f32 %v1498_v23, %v12900_v25  ;;  %10349 = vmatprep.subr.bf16.mxu1 %v11768_v59  ;;  %v2028_v35 = vmax.f32 %v1382_v31, 0.0  ;;  %v11774_v55 = vld [vmem:[#allocation9 + $0x240] sm:$0xff]  }
 0x1e8   :  { %v2043_v32 = vmax.f32 %v1384_v5, 0.0  ;;  %3495 = vmatmul.mubr.bf16.gmra.mrb[140].mxu0 %v12793_v22  ;;  %v2045_v53 = vmax.f32 %v1497_v19, 0.0  ;;  %3592 = vmatmul.mubr.bf16.gmra.mrb[140].mxu1 %v12797_v10 }
 0x1e9   :  { %v2044_v0 = vmax.f32 %v1386_v20, 0.0  ;;  %3502 = vmatprep.mubr.bf16.mxu0 %v12816_v3  ;;  %v2046_v21 = vmax.f32 %v1499_v34, 0.0  ;;  %3599 = vmatprep.mubr.bf16.mxu1 %v12821_v12 }
 0x1ea   :  { %v12921_v54 = vpack.c.bf16 %v2043_v32, %v2027_v28  ;;  %10286 = vmatpush3.bf16.msra.mxu0 %v11767_v17  ;;  %v12924_v8 = vpack.c.bf16 %v2045_v53, %v2029_v24  ;;  %10350 = vmatpush3.bf16.msra.mxu1 %v11769_v15 }
 0x1eb   :  { %v12926_v49 = vpack.c.bf16 %v2044_v0, %v2028_v35  ;;  %v1389_v22 = vpop.f32.mrb[36].mxu0  ;;  %10287 = vmatprep.subr.bf16.mxu0 %v11770_v27  ;;  %v12928_v9 = vpack.c.bf16 %v2046_v21, %v2030_v16  ;;  %v1502_v3 = vpop.f32.mrb[36].mxu1  ;;  %10351 = vmatprep.subr.bf16.mxu1 %v11772_v37 }
 0x1ec   :  { %v1390_v10 = vadd.f32 %v1389_v22, %v12878_v18  ;;  %v1391_v30 = vpop.f32.mrb[37].mxu0  ;;  %v1503_v12 = vadd.f32 %v1502_v3, %v12895_v36  ;;  %v1504_v29 = vpop.f32.mrb[37].mxu1 }
 0x1ed   :  { %v1392_v59 = vadd.f32 %v1391_v30, %v12887_v51  ;;  %v1393_v31 = vpop.f32.mrb[38].mxu0  ;;  %v1505_v38 = vadd.f32 %v1504_v29, %v12900_v25  ;;  %v1506_v2 = vpop.f32.mrb[38].mxu1 }
 0x1ee   :  { %v1394_v63 = vadd.f32 %v1393_v31, %v12878_v18  ;;  %v1395_v5 = vpop.f32.mrb[39].mxu0  ;;  %10288 = vmatpush3.bf16.msra.mxu0 %v11771_v33  ;;  %v2061_v11 = vmax.f32 %v1503_v12, 0.0  ;;  %v1507_v13 = vadd.f32 %v1506_v2, %v12895_v36  ;;  %v1508_v24 = vpop.f32.mrb[39].mxu1  ;;  %10352 = vmatpush3.bf16.msra.mxu1 %v11773_v48  ;;  %v2059_v19 = vmax.f32 %v1390_v10, 0.0 }
 0x1ef   :  { %v1396_v17 = vadd.f32 %v1395_v5, %v12887_v51  ;;  %10401 = vmatprep.subr.bf16.mxu0 %v11774_v55  ;;  %v2062_v20 = vmax.f32 %v1505_v38, 0.0  ;;  %v1509_v15 = vadd.f32 %v1508_v24, %v12900_v25  ;;  %10465 = vmatprep.subr.bf16.mxu1 %v11776_v56  ;;  %v2060_v27 = vmax.f32 %v1392_v59, 0.0 }
 0x1f0   :  { %v2075_v23 = vmax.f32 %v1394_v63, 0.0  ;;  %3503 = vmatmul.mubr.bf16.gmra.mrb[144].mxu0 %v12814_v1  ;;  %v2077_v28 = vmax.f32 %v1507_v13, 0.0  ;;  %3600 = vmatmul.mubr.bf16.gmra.mrb[144].mxu1 %v12818_v4 }
 0x1f1   :  { %v2076_v16 = vmax.f32 %v1396_v17, 0.0  ;;  %3510 = vmatprep.mubr.bf16.mxu0 %v12836_v60  ;;  %v2078_v34 = vmax.f32 %v1509_v15, 0.0  ;;  %3607 = vmatprep.mubr.bf16.mxu1 %v12841_v14 }
 0x1f2   :  { %v12941_v32 = vpack.c.bf16 %v2075_v23, %v2059_v19  ;;  %v12944_v37 = vpack.c.bf16 %v2077_v28, %v2061_v11 }
 0x1f3   :  { %v12946_v35 = vpack.c.bf16 %v2076_v16, %v2060_v27  ;;  %v1399_v53 = vpop.f32.mrb[40].mxu0  ;;  %v12948_v0 = vpack.c.bf16 %v2078_v34, %v2062_v20  ;;  %v1512_v21 = vpop.f32.mrb[40].mxu1 }
 0x1f4   :  { %v1400_v1 = vadd.f32 %v1399_v53, %v12878_v18  ;;  %v1401_v33 = vpop.f32.mrb[41].mxu0  ;;  %v1513_v4 = vadd.f32 %v1512_v21, %v12895_v36  ;;  %v1514_v22 = vpop.f32.mrb[41].mxu1 }
 0x1f5   :  { %v1402_v60 = vadd.f32 %v1401_v33, %v12887_v51  ;;  %v1403_v48 = vpop.f32.mrb[42].mxu0  ;;  %v1515_v55 = vadd.f32 %v1514_v22, %v12900_v25  ;;  %v1516_v10 = vpop.f32.mrb[42].mxu1 }
 0x1f6   :  { %v1404_v14 = vadd.f32 %v1403_v48, %v12878_v18  ;;  %v1405_v3 = vpop.f32.mrb[43].mxu0  ;;  %v2093_v30 = vmax.f32 %v1513_v4, 0.0  ;;  %v1517_v56 = vadd.f32 %v1516_v10, %v12895_v36  ;;  %v1518_v59 = vpop.f32.mrb[43].mxu1  ;;  %v2091_v29 = vmax.f32 %v1400_v1, 0.0 }
 0x1f7   :  { %v1406_v12 = vadd.f32 %v1405_v3, %v12887_v51  ;;  %v2094_v31 = vmax.f32 %v1515_v55, 0.0  ;;  %v1519_v63 = vadd.f32 %v1518_v59, %v12900_v25  ;;  %v2092_v2 = vmax.f32 %v1402_v60, 0.0 }
 0x1f8   :  { %v2107_v38 = vmax.f32 %v1404_v14, 0.0  ;;  %3511 = vmatmul.mubr.bf16.gmra.mrb[148].mxu0 %v12834_v57  ;;  %v2109_v5 = vmax.f32 %v1517_v56, 0.0  ;;  %3608 = vmatmul.mubr.bf16.gmra.mrb[148].mxu1 %v12838_v61 }
 0x1f9   :  { %v2108_v11 = vmax.f32 %v1406_v12, 0.0  ;;  %3518 = vmatprep.mubr.bf16.mxu0 %v12862_v58  ;;  %v2110_v17 = vmax.f32 %v1519_v63, 0.0  ;;  %3615 = vmatprep.mubr.bf16.mxu1 %v12867_v62 }
 0x1fa   :  { %v12961_v13 = vpack.c.bf16 %v2107_v38, %v2091_v29  ;;  %v12964_v24 = vpack.c.bf16 %v2109_v5, %v2093_v30 }
 0x1fb   :  { %v12966_v19 = vpack.c.bf16 %v2108_v11, %v2092_v2  ;;  %v1409_v20 = vpop.f32.mrb[44].mxu0  ;;  %v12968_v23 = vpack.c.bf16 %v2110_v17, %v2094_v31  ;;  %v1522_v15 = vpop.f32.mrb[44].mxu1 }
 0x1fc   :  { %v1410_v57 = vadd.f32 %v1409_v20, %v12878_v18  ;;  %v1411_v27 = vpop.f32.mrb[45].mxu0  ;;  %v1523_v61 = vadd.f32 %v1522_v15, %v12895_v36  ;;  %v1524_v28 = vpop.f32.mrb[45].mxu1 }
 0x1fd   :  { %v1412_v58 = vadd.f32 %v1411_v27, %v12887_v51  ;;  %v1413_v16 = vpop.f32.mrb[46].mxu0  ;;  %v1525_v34 = vadd.f32 %v1524_v28, %v12900_v25  ;;  %v1526_v53 = vpop.f32.mrb[46].mxu1 }
 0x1fe   :  { %v1414_v62 = vadd.f32 %v1413_v16, %v12878_v18  ;;  %v1415_v1 = vpop.f32.mrb[47].mxu0  ;;  %v2125_v21 = vmax.f32 %v1523_v61, 0.0  ;;  %v1527_v33 = vadd.f32 %v1526_v53, %v12895_v36  ;;  %v1528_v60 = vpop.f32.mrb[47].mxu1  ;;  %v2123_v22 = vmax.f32 %v1410_v57, 0.0 }
 0x1ff   :  { %v1416_v4 = vadd.f32 %v1415_v1, %v12887_v51  ;;  %v2126_v48 = vmax.f32 %v1525_v34, 0.0  ;;  %v1529_v14 = vadd.f32 %v1528_v60, %v12900_v25  ;;  %v2124_v10 = vmax.f32 %v1412_v58, 0.0 }
 0x200   :  { %v2139_v55 = vmax.f32 %v1414_v62, 0.0  ;;  %3519 = vmatmul.mubr.bf16.gmra.mrb[152].mxu0 %v12857_v50  ;;  %v2141_v3 = vmax.f32 %v1527_v33, 0.0  ;;  %3616 = vmatmul.mubr.bf16.gmra.mrb[152].mxu1 %v12864_v43 }
 0x201   :  { %v2140_v30 = vmax.f32 %v1416_v4, 0.0  ;;  %3526 = vmatprep.mubr.bf16.mxu0 %v12904_v6  ;;  %v2142_v12 = vmax.f32 %v1529_v14, 0.0  ;;  %3623 = vmatprep.mubr.bf16.mxu1 %v12909_v44 }
 0x202   :  { %v12981_v56 = vpack.c.bf16 %v2139_v55, %v2123_v22  ;;  %v12984_v59 = vpack.c.bf16 %v2141_v3, %v2125_v21 }
 0x203   :  { %v12986_v29 = vpack.c.bf16 %v2140_v30, %v2124_v10  ;;  %v1419_v31 = vpop.f32.mrb[48].mxu0  ;;  %v12988_v38 = vpack.c.bf16 %v2142_v12, %v2126_v48  ;;  %v1532_v63 = vpop.f32.mrb[48].mxu1 }
 0x204   :  { %v1420_v50 = vadd.f32 %v1419_v31, %v12878_v18  ;;  %v1421_v2 = vpop.f32.mrb[49].mxu0  ;;  %v1533_v43 = vadd.f32 %v1532_v63, %v12895_v36  ;;  %v1534_v5 = vpop.f32.mrb[49].mxu1  ;;  %v11775_v63 = vld [vmem:[#allocation9 + $0x200] sm:$0xff]  }
 0x205   :  { %v1422_v6 = vadd.f32 %v1421_v2, %v12887_v51  ;;  %v1423_v11 = vpop.f32.mrb[50].mxu0  ;;  %v1535_v17 = vadd.f32 %v1534_v5, %v12900_v25  ;;  %v1536_v20 = vpop.f32.mrb[50].mxu1 }
 0x206   :  { %v1424_v44 = vadd.f32 %v1423_v11, %v12878_v18  ;;  %v1425_v57 = vpop.f32.mrb[51].mxu0  ;;  %v2157_v15 = vmax.f32 %v1533_v43, 0.0  ;;  %v1537_v27 = vadd.f32 %v1536_v20, %v12895_v36  ;;  %v1538_v58 = vpop.f32.mrb[51].mxu1  ;;  %v2155_v28 = vmax.f32 %v1420_v50, 0.0  ;;  %v11777_v11 = vld [vmem:[#allocation9 + $0x280] sm:$0xff]  }
 0x207   :  { %v1426_v61 = vadd.f32 %v1425_v57, %v12887_v51  ;;  %v2158_v16 = vmax.f32 %v1535_v17, 0.0  ;;  %v1539_v62 = vadd.f32 %v1538_v58, %v12900_v25  ;;  %v2156_v53 = vmax.f32 %v1422_v6, 0.0  ;;  %v11778_v17 = vld [vmem:[#allocation9 + $0x248] sm:$0xff]  }
 0x208   :  { %v2171_v34 = vmax.f32 %v1424_v44, 0.0  ;;  %3527 = vmatmul.mubr.bf16.gmra.mrb[156].mxu0 %v12902_v40  ;;  %v2173_v1 = vmax.f32 %v1537_v27, 0.0  ;;  %3624 = vmatmul.mubr.bf16.gmra.mrb[156].mxu1 %v12906_v26  ;;  %v11780_v27 = vld [vmem:[#allocation9 + $0x2c8] sm:$0xff]  }
 0x209   :  { %v2172_v21 = vmax.f32 %v1426_v61, 0.0  ;;  %3664 = vmatprep.mubr.bf16.mxu0 %v12926_v49  ;;  %v2174_v4 = vmax.f32 %v1539_v62, 0.0  ;;  %3761 = vmatprep.mubr.bf16.mxu1 %v12928_v9  ;;  %v11779_v62 = vld [vmem:[#allocation9 + $0x208] sm:$0xff]  }
 0x20a   :  { %v13001_v33 = vpack.c.bf16 %v2171_v34, %v2155_v28  ;;  %v13004_v60 = vpack.c.bf16 %v2173_v1, %v2157_v15 }
 0x20b   :  { %v13006_v22 = vpack.c.bf16 %v2172_v21, %v2156_v53  ;;  %v1429_v48 = vpop.f32.mrb[52].mxu0  ;;  %v13008_v55 = vpack.c.bf16 %v2174_v4, %v2158_v16  ;;  %v1542_v14 = vpop.f32.mrb[52].mxu1  ;;  %v11781_v21 = vld [vmem:[#allocation9 + $0x288] sm:$0xff]   ;;  %v11782_v4 = vld [vmem:[#allocation9 + $0x250] sm:$0xff]  }
 0x20c   :  { %v1430_v40 = vadd.f32 %v1429_v48, %v12878_v18  ;;  %v1431_v10 = vpop.f32.mrb[53].mxu0  ;;  %v1543_v26 = vadd.f32 %v1542_v14, %v12895_v36  ;;  %v1544_v3 = vpop.f32.mrb[53].mxu1  ;;  %v11784_v14 = vld [vmem:[#allocation9 + $0x2d0] sm:$0xff]  }
 0x20d   :  { %v1432_v49 = vadd.f32 %v1431_v10, %v12887_v51  ;;  %v1433_v30 = vpop.f32.mrb[54].mxu0  ;;  %v1545_v12 = vadd.f32 %v1544_v3, %v12900_v25  ;;  %v1546_v31 = vpop.f32.mrb[54].mxu1 }
 0x20e   :  { %v1434_v9 = vadd.f32 %v1433_v30, %v12878_v18  ;;  %v1435_v50 = vpop.f32.mrb[55].mxu0  ;;  %v2189_v2 = vmax.f32 %v1543_v26, 0.0  ;;  %v1547_v43 = vadd.f32 %v1546_v31, %v12895_v36  ;;  %v1548_v5 = vpop.f32.mrb[55].mxu1  ;;  %v2187_v44 = vmax.f32 %v1430_v40, 0.0  ;;  %v11783_v31 = vld [vmem:[#allocation9 + $0x210] sm:$0xff]  }
 0x20f   :  { %v1436_v6 = vadd.f32 %v1435_v50, %v12887_v51  ;;  %v2190_v20 = vmax.f32 %v1545_v12, 0.0  ;;  %v1549_v15 = vadd.f32 %v1548_v5, %v12900_v25  ;;  %v2188_v61 = vmax.f32 %v1432_v49, 0.0  ;;  %v11786_v5 = vld [vmem:[#allocation9 + $0x258] sm:$0xff]  }
 0x210   :  { %v2203_v57 = vmax.f32 %v1434_v9, 0.0  ;;  %3665 = vmatmul.mubr.bf16.vlgmr.msra.gmra.mrb[160].mxu0 %v12921_v54  ;;  %v2205_v58 = vmax.f32 %v1547_v43, 0.0  ;;  %3762 = vmatmul.mubr.bf16.vlgmr.msra.gmra.mrb[160].mxu1 %v12924_v8 }
 0x211   :  { %v2204_v28 = vmax.f32 %v1436_v6, 0.0  ;;  %3672 = vmatprep.mubr.bf16.mxu0 %v12946_v35  ;;  %v2206_v34 = vmax.f32 %v1549_v15, 0.0  ;;  %3769 = vmatprep.mubr.bf16.mxu1 %v12948_v0  ;;  %v11785_v6 = vld [vmem:[#allocation9 + $0x290] sm:$0xff]  }
 0x212   :  { %v13021_v16 = vpack.c.bf16 %v2203_v57, %v2187_v44  ;;  %10402 = vmatpush3.bf16.msra.mxu0 %v11775_v63  ;;  %v13024_v53 = vpack.c.bf16 %v2205_v58, %v2189_v2  ;;  %10466 = vmatpush3.bf16.msra.mxu1 %v11777_v11  ;;  %v11788_v57 = vld [vmem:[#allocation9 + $0x2d8] sm:$0xff]  }
 0x213   :  { %v13026_v1 = vpack.c.bf16 %v2204_v28, %v2188_v61  ;;  %v1439_v54 = vpop.f32.mrb[56].mxu0  ;;  %10403 = vmatprep.subr.bf16.mxu0 %v11778_v17  ;;  %v13028_v48 = vpack.c.bf16 %v2206_v34, %v2190_v20  ;;  %v1552_v35 = vpop.f32.mrb[56].mxu1  ;;  %10467 = vmatprep.subr.bf16.mxu1 %v11780_v27  ;;  %v11787_v34 = vld [vmem:[#allocation9 + $0x218] sm:$0xff]  }
 0x214   :  { %v1440_v8 = vadd.f32 %v1439_v54, %v12878_v18  ;;  %v1441_v40 = vpop.f32.mrb[57].mxu0  ;;  %v1553_v0 = vadd.f32 %v1552_v35, %v12895_v36  ;;  %v1554_v26 = vpop.f32.mrb[57].mxu1 }
 0x215   :  { %v1442_v10 = vadd.f32 %v1441_v40, %v12887_v51  ;;  %v1443_v49 = vpop.f32.mrb[58].mxu0  ;;  %v1555_v3 = vadd.f32 %v1554_v26, %v12900_v25  ;;  %v1556_v12 = vpop.f32.mrb[58].mxu1 }
 0x216   :  { %v1444_v30 = vadd.f32 %v1443_v49, %v12878_v18  ;;  %v1445_v9 = vpop.f32.mrb[59].mxu0  ;;  %10404 = vmatpush3.bf16.msra.mxu0 %v11779_v62  ;;  %v2221_v50 = vmax.f32 %v1553_v0, 0.0  ;;  %v1557_v63 = vadd.f32 %v1556_v12, %v12895_v36  ;;  %v1558_v43 = vpop.f32.mrb[59].mxu1  ;;  %10468 = vmatpush3.bf16.msra.mxu1 %v11781_v21  ;;  %v2219_v11 = vmax.f32 %v1440_v8, 0.0  ;;  %v13048_v21 = vld [vmem:[#allocation7 + $0x8] sm:$0xff] }
 0x217   :  { %v1446_v2 = vadd.f32 %v1445_v9, %v12887_v51  ;;  %10405 = vmatprep.subr.bf16.mxu0 %v11782_v4  ;;  %v2222_v17 = vmax.f32 %v1555_v3, 0.0  ;;  %v1559_v20 = vadd.f32 %v1558_v43, %v12900_v25  ;;  %10469 = vmatprep.subr.bf16.mxu1 %v11784_v14  ;;  %v2220_v15 = vmax.f32 %v1442_v10, 0.0  ;;  %v11789_v4 = vld [vmem:[#allocation9 + $0x298] sm:$0xff]  }
 0x218   :  { %v2235_v44 = vmax.f32 %v1444_v30, 0.0  ;;  %3673 = vmatmul.mubr.bf16.gmra.mrb[164].mxu0 %v12941_v32  ;;  %v2237_v27 = vmax.f32 %v1557_v63, 0.0  ;;  %3770 = vmatmul.mubr.bf16.gmra.mrb[164].mxu1 %v12944_v37  ;;  %v11790_v37 = vld [vmem:[#allocation9 + $0x260] sm:$0xff]   ;;  %v13059_v9 = vrot.slane %v13048_v21, %v12687_v42 }
 0x219   :  { %v2236_v61 = vmax.f32 %v1446_v2, 0.0  ;;  %3680 = vmatprep.mubr.bf16.mxu0 %v12966_v19  ;;  %v2238_v28 = vmax.f32 %v1559_v20, 0.0  ;;  %3777 = vmatprep.mubr.bf16.mxu1 %v12968_v23  ;;  %v11792_v23 = vld [vmem:[#allocation9 + $0x2e0] sm:$0xff]  }
 0x21a   :  { %v13041_v58 = vpack.c.bf16 %v2235_v44, %v2219_v11  ;;  %10406 = vmatpush3.bf16.msra.mxu0 %v11783_v31  ;;  %v13044_v62 = vpack.c.bf16 %v2237_v27, %v2221_v50  ;;  %10470 = vmatpush3.bf16.msra.mxu1 %v11785_v6  ;;  %v11791_v31 = vld [vmem:[#allocation9 + $0x220] sm:$0xff]   ;;  %v13065_v6 = vrot.slane %v13048_v21, %v12695_v46 }
 0x21b   :  { %v13046_v54 = vpack.c.bf16 %v2236_v61, %v2220_v15  ;;  %v1449_v32 = vpop.f32.mrb[60].mxu0  ;;  %10407 = vmatprep.subr.bf16.mxu0 %v11786_v5  ;;  %v13050_v8 = vpack.c.bf16 %v2238_v28, %v2222_v17  ;;  %v1562_v35 = vpop.f32.mrb[60].mxu1  ;;  %10471 = vmatprep.subr.bf16.mxu1 %v11788_v57  ;;  %v11794_v5 = vld [vmem:[#allocation9 + $0x268] sm:$0xff]   ;;  %v13073_v27 = vrot.slane %v13048_v21, %v12692_v45 }
 0x21c   :  { %v1450_v19 = vadd.f32 %v1449_v32, %v12878_v18  ;;  %v1451_v40 = vpop.f32.mrb[61].mxu0  ;;  %v1563_v14 = vadd.f32 %v1562_v35, %v12895_v36  ;;  %v1564_v10 = vpop.f32.mrb[61].mxu1  ;;  %v11797_v32 = vld [vmem:[#allocation9 + $0x2a8] sm:$0xff]  }
 0x21d   :  { %v1452_v0 = vadd.f32 %v1451_v40, %v12887_v51  ;;  %v1453_v26 = vpop.f32.mrb[62].mxu0  ;;  %v1565_v49 = vadd.f32 %v1564_v10, %v12900_v25  ;;  %v1566_v30 = vpop.f32.mrb[62].mxu1  ;;  %v11800_v40 = vld [vmem:[#allocation9 + $0x2f0] sm:$0xff]  }
 0x21e   :  { %v1454_v3 = vadd.f32 %v1453_v26, %v12878_v18  ;;  %v1455_v12 = vpop.f32.mrb[63].mxu0  ;;  %10408 = vmatpush3.bf16.msra.mxu0 %v11787_v34  ;;  %v2253_v50 = vmax.f32 %v1563_v14, 0.0  ;;  %v1567_v63 = vadd.f32 %v1566_v30, %v12895_v36  ;;  %v1568_v43 = vpop.f32.mrb[63].mxu1  ;;  %10472 = vmatpush3.bf16.msra.mxu1 %v11789_v4  ;;  %v11793_v18 = vld [vmem:[#allocation9 + $0x2a0] sm:$0xff]   ;;  %v2251_v11 = vmax.f32 %v1450_v19, 0.0  ;;  %v11796_v36 = vld [vmem:[#allocation9 + $0x2e8] sm:$0xff]  }
 0x21f   :  { %v1456_v2 = vadd.f32 %v1455_v12, %v12887_v51  ;;  %10409 = vmatprep.subr.bf16.mxu0 %v11790_v37  ;;  %v2254_v17 = vmax.f32 %v1565_v49, 0.0  ;;  %v1569_v20 = vadd.f32 %v1568_v43, %v12900_v25  ;;  %10473 = vmatprep.subr.bf16.mxu1 %v11792_v23  ;;  %v2252_v57 = vmax.f32 %v1452_v0, 0.0  ;;  %v11798_v4 = vld [vmem:[#allocation9 + $0x270] sm:$0xff]  }
 0x220   :  { %v2267_v44 = vmax.f32 %v1454_v3, 0.0  ;;  %3681 = vmatmul.mubr.bf16.gmra.mrb[168].mxu0 %v12961_v13  ;;  %v2269_v51 = vmax.f32 %v1567_v63, 0.0  ;;  %3778 = vmatmul.mubr.bf16.gmra.mrb[168].mxu1 %v12964_v24  ;;  %v13080_v25 = vrot.slane %v13048_v21, %v12698_v47  ;;  %v11795_v13 = vld [vmem:[#allocation9 + $0x228] sm:$0xff]   ;;  %v11799_v12 = vld [vmem:[#allocation9 + $0x230] sm:$0xff]  }
 0x221   :  { %v2268_v15 = vmax.f32 %v1456_v2, 0.0  ;;  %3688 = vmatprep.mubr.bf16.mxu0 %v12986_v29  ;;  %v2270_v28 = vmax.f32 %v1569_v20, 0.0  ;;  %3785 = vmatprep.mubr.bf16.mxu1 %v12988_v38  ;;  %v11801_v43 = vld [vmem:[#allocation9 + $0x2b0] sm:$0xff]   ;;  %v11804_v20 = vld [vmem:[#allocation9 + $0x2f8] sm:$0xff]  }
 0x222   :  { %v13075_v61 = vpack.c.bf16 %v2267_v44, %v2251_v11  ;;  %10410 = vmatpush3.bf16.msra.mxu0 %v11791_v31  ;;  %v13082_v34 = vpack.c.bf16 %v2269_v51, %v2253_v50  ;;  %10474 = vmatpush3.bf16.msra.mxu1 %v11793_v18  ;;  %v11802_v18 = vld [vmem:[#allocation9 + $0x278] sm:$0xff]  }
 0x223   :  { %v13084_v24 = vpack.c.bf16 %v2268_v15, %v2252_v57  ;;  %v1605_v29 = vpop.f32.mrb[64].mxu0  ;;  %10411 = vmatprep.subr.bf16.mxu0 %v11794_v5  ;;  %v13086_v37 = vpack.c.bf16 %v2270_v28, %v2254_v17  ;;  %v1718_v38 = vpop.f32.mrb[64].mxu1  ;;  %10475 = vmatprep.subr.bf16.mxu1 %v11796_v36 }
 0x224   :  { %v1606_v19 = vadd.f32 %v1605_v29, %v13059_v9  ;;  %v1607_v35 = vpop.f32.mrb[65].mxu0  ;;  %v1719_v23 = vadd.f32 %v1718_v38, %v13073_v27  ;;  %v1720_v0 = vpop.f32.mrb[65].mxu1 }
 0x225   :  { %v1608_v14 = vadd.f32 %v1607_v35, %v13065_v6  ;;  %v1609_v10 = vpop.f32.mrb[66].mxu0  ;;  %v1721_v26 = vadd.f32 %v1720_v0, %v13080_v25  ;;  %v1722_v3 = vpop.f32.mrb[66].mxu1 }
 0x226   :  { %v1610_v49 = vadd.f32 %v1609_v10, %v13059_v9  ;;  %v1611_v30 = vpop.f32.mrb[67].mxu0  ;;  %10412 = vmatpush3.bf16.msra.mxu0 %v11795_v13  ;;  %v2033_v31 = vmax.f32 %v1719_v23, 0.0  ;;  %v1723_v50 = vadd.f32 %v1722_v3, %v13073_v27  ;;  %v1724_v2 = vpop.f32.mrb[67].mxu1  ;;  %10476 = vmatpush3.bf16.msra.mxu1 %v11797_v32  ;;  %v2031_v5 = vmax.f32 %v1606_v19, 0.0  ;;  %v11803_v13 = vld [vmem:[#allocation9 + $0x238] sm:$0xff]   ;;  %v11806_v19 = vld [vmem:[#allocation9 + $0x340] sm:$0xff]  }
 0x227   :  { %v1612_v63 = vadd.f32 %v1611_v30, %v13065_v6  ;;  %10413 = vmatprep.subr.bf16.mxu0 %v11798_v4  ;;  %v2034_v11 = vmax.f32 %v1721_v26, 0.0  ;;  %v1725_v44 = vadd.f32 %v1724_v2, %v13080_v25  ;;  %10477 = vmatprep.subr.bf16.mxu1 %v11800_v40  ;;  %v2032_v36 = vmax.f32 %v1608_v14, 0.0  ;;  %v11805_v4 = vld [vmem:[#allocation9 + $0x2b8] sm:$0xff]   ;;  %v11808_v40 = vld [vmem:[#allocation9 + $0x3c0] sm:$0xff]  }
 0x228   :  { %v2047_v17 = vmax.f32 %v1610_v49, 0.0  ;;  %3689 = vmatmul.mubr.bf16.gmra.mrb[172].mxu0 %v12981_v56  ;;  %v2049_v57 = vmax.f32 %v1723_v50, 0.0  ;;  %3786 = vmatmul.mubr.bf16.gmra.mrb[172].mxu1 %v12984_v59 }
 0x229   :  { %v2048_v51 = vmax.f32 %v1612_v63, 0.0  ;;  %3696 = vmatprep.mubr.bf16.mxu0 %v13006_v22  ;;  %v2050_v28 = vmax.f32 %v1725_v44, 0.0  ;;  %3793 = vmatprep.mubr.bf16.mxu1 %v13008_v55 }
 0x22a   :  { %v13099_v15 = vpack.c.bf16 %v2047_v17, %v2031_v5  ;;  %10414 = vmatpush3.bf16.msra.mxu0 %v11799_v12  ;;  %v13102_v29 = vpack.c.bf16 %v2049_v57, %v2033_v31  ;;  %10478 = vmatpush3.bf16.msra.mxu1 %v11801_v43 }
 0x22b   :  { %v13104_v32 = vpack.c.bf16 %v2048_v51, %v2032_v36  ;;  %v1615_v56 = vpop.f32.mrb[68].mxu0  ;;  %10415 = vmatprep.subr.bf16.mxu0 %v11802_v18  ;;  %v13106_v38 = vpack.c.bf16 %v2050_v28, %v2034_v11  ;;  %v1728_v22 = vpop.f32.mrb[68].mxu1  ;;  %10479 = vmatprep.subr.bf16.mxu1 %v11804_v20 }
 0x22c   :  { %v1616_v59 = vadd.f32 %v1615_v56, %v13059_v9  ;;  %v1617_v35 = vpop.f32.mrb[69].mxu0  ;;  %v1729_v55 = vadd.f32 %v1728_v22, %v13073_v27  ;;  %v1730_v14 = vpop.f32.mrb[69].mxu1 }
 0x22d   :  { %v1618_v23 = vadd.f32 %v1617_v35, %v13065_v6  ;;  %v1619_v0 = vpop.f32.mrb[70].mxu0  ;;  %v1731_v10 = vadd.f32 %v1730_v14, %v13080_v25  ;;  %v1732_v49 = vpop.f32.mrb[70].mxu1 }
 0x22e   :  { %v1620_v26 = vadd.f32 %v1619_v0, %v13059_v9  ;;  %v1621_v3 = vpop.f32.mrb[71].mxu0  ;;  %10416 = vmatpush3.bf16.msra.mxu0 %v11803_v13  ;;  %v2065_v30 = vmax.f32 %v1729_v55, 0.0  ;;  %v1733_v12 = vadd.f32 %v1732_v49, %v13073_v27  ;;  %v1734_v50 = vpop.f32.mrb[71].mxu1  ;;  %10480 = vmatpush3.bf16.msra.mxu1 %v11805_v4  ;;  %v2063_v63 = vmax.f32 %v1616_v59, 0.0 }
 0x22f   :  { %v1622_v31 = vadd.f32 %v1621_v3, %v13065_v6  ;;  %10529 = vmatprep.subr.bf16.mxu0 %v11806_v19  ;;  %v2066_v2 = vmax.f32 %v1731_v10, 0.0  ;;  %v1735_v18 = vadd.f32 %v1734_v50, %v13080_v25  ;;  %10593 = vmatprep.subr.bf16.mxu1 %v11808_v40  ;;  %v2064_v5 = vmax.f32 %v1618_v23, 0.0 }
 0x230   :  { %v2079_v43 = vmax.f32 %v1620_v26, 0.0  ;;  %3697 = vmatmul.mubr.bf16.gmra.mrb[176].mxu0 %v13001_v33  ;;  %v2081_v11 = vmax.f32 %v1733_v12, 0.0  ;;  %3794 = vmatmul.mubr.bf16.gmra.mrb[176].mxu1 %v13004_v60 }
 0x231   :  { %v2080_v17 = vmax.f32 %v1622_v31, 0.0  ;;  %3704 = vmatprep.mubr.bf16.mxu0 %v13026_v1  ;;  %v2082_v20 = vmax.f32 %v1735_v18, 0.0  ;;  %3801 = vmatprep.mubr.bf16.mxu1 %v13028_v48 }
 0x232   :  { %v13119_v44 = vpack.c.bf16 %v2079_v43, %v2063_v63  ;;  %v13122_v36 = vpack.c.bf16 %v2081_v11, %v2065_v30 }
 0x233   :  { %v13124_v57 = vpack.c.bf16 %v2080_v17, %v2064_v5  ;;  %v1625_v51 = vpop.f32.mrb[72].mxu0  ;;  %v13126_v28 = vpack.c.bf16 %v2082_v20, %v2066_v2  ;;  %v1738_v13 = vpop.f32.mrb[72].mxu1 }
 0x234   :  { %v1626_v33 = vadd.f32 %v1625_v51, %v13059_v9  ;;  %v1627_v56 = vpop.f32.mrb[73].mxu0  ;;  %v1739_v60 = vadd.f32 %v1738_v13, %v13073_v27  ;;  %v1740_v4 = vpop.f32.mrb[73].mxu1 }
 0x235   :  { %v1628_v1 = vadd.f32 %v1627_v56, %v13065_v6  ;;  %v1629_v19 = vpop.f32.mrb[74].mxu0  ;;  %v1741_v59 = vadd.f32 %v1740_v4, %v13080_v25  ;;  %v1742_v22 = vpop.f32.mrb[74].mxu1 }
 0x236   :  { %v1630_v48 = vadd.f32 %v1629_v19, %v13059_v9  ;;  %v1631_v35 = vpop.f32.mrb[75].mxu0  ;;  %v2097_v40 = vmax.f32 %v1739_v60, 0.0  ;;  %v1743_v55 = vadd.f32 %v1742_v22, %v13073_v27  ;;  %v1744_v14 = vpop.f32.mrb[75].mxu1  ;;  %v2095_v0 = vmax.f32 %v1626_v33, 0.0 }
 0x237   :  { %v1632_v23 = vadd.f32 %v1631_v35, %v13065_v6  ;;  %v2098_v10 = vmax.f32 %v1741_v59, 0.0  ;;  %v1745_v49 = vadd.f32 %v1744_v14, %v13080_v25  ;;  %v2096_v3 = vmax.f32 %v1628_v1, 0.0 }
 0x238   :  { %v2111_v26 = vmax.f32 %v1630_v48, 0.0  ;;  %3705 = vmatmul.mubr.bf16.gmra.mrb[180].mxu0 %v13021_v16  ;;  %v2113_v30 = vmax.f32 %v1743_v55, 0.0  ;;  %3802 = vmatmul.mubr.bf16.gmra.mrb[180].mxu1 %v13024_v53 }
 0x239   :  { %v2112_v12 = vmax.f32 %v1632_v23, 0.0  ;;  %3712 = vmatprep.mubr.bf16.mxu0 %v13046_v54  ;;  %v2114_v50 = vmax.f32 %v1745_v49, 0.0  ;;  %3809 = vmatprep.mubr.bf16.mxu1 %v13050_v8 }
 0x23a   :  { %v13139_v31 = vpack.c.bf16 %v2111_v26, %v2095_v0  ;;  %v13142_v63 = vpack.c.bf16 %v2113_v30, %v2097_v40 }
 0x23b   :  { %v13144_v2 = vpack.c.bf16 %v2112_v12, %v2096_v3  ;;  %v1635_v43 = vpop.f32.mrb[76].mxu0  ;;  %v13146_v18 = vpack.c.bf16 %v2114_v50, %v2098_v10  ;;  %v1748_v5 = vpop.f32.mrb[76].mxu1 }
 0x23c   :  { %v1636_v16 = vadd.f32 %v1635_v43, %v13059_v9  ;;  %v1637_v11 = vpop.f32.mrb[77].mxu0  ;;  %v1749_v53 = vadd.f32 %v1748_v5, %v13073_v27  ;;  %v1750_v17 = vpop.f32.mrb[77].mxu1 }
 0x23d   :  { %v1638_v54 = vadd.f32 %v1637_v11, %v13065_v6  ;;  %v1639_v20 = vpop.f32.mrb[78].mxu0  ;;  %v1751_v51 = vadd.f32 %v1750_v17, %v13080_v25  ;;  %v1752_v33 = vpop.f32.mrb[78].mxu1 }
 0x23e   :  { %v1640_v8 = vadd.f32 %v1639_v20, %v13059_v9  ;;  %v1641_v13 = vpop.f32.mrb[79].mxu0  ;;  %v2129_v56 = vmax.f32 %v1749_v53, 0.0  ;;  %v1753_v60 = vadd.f32 %v1752_v33, %v13073_v27  ;;  %v1754_v4 = vpop.f32.mrb[79].mxu1  ;;  %v2127_v19 = vmax.f32 %v1636_v16, 0.0 }
 0x23f   :  { %v1642_v1 = vadd.f32 %v1641_v13, %v13065_v6  ;;  %v2130_v59 = vmax.f32 %v1751_v51, 0.0  ;;  %v1755_v22 = vadd.f32 %v1754_v4, %v13080_v25  ;;  %v2128_v35 = vmax.f32 %v1638_v54, 0.0 }
 0x240   :  { %v2143_v48 = vmax.f32 %v1640_v8, 0.0  ;;  %3713 = vmatmul.mubr.bf16.gmra.mrb[184].mxu0 %v13041_v58  ;;  %v2145_v40 = vmax.f32 %v1753_v60, 0.0  ;;  %3810 = vmatmul.mubr.bf16.gmra.mrb[184].mxu1 %v13044_v62 }
 0x241   :  { %v2144_v55 = vmax.f32 %v1642_v1, 0.0  ;;  %3720 = vmatprep.mubr.bf16.mxu0 %v13084_v24  ;;  %v2146_v14 = vmax.f32 %v1755_v22, 0.0  ;;  %3817 = vmatprep.mubr.bf16.mxu1 %v13086_v37 }
 0x242   :  { %v13159_v23 = vpack.c.bf16 %v2143_v48, %v2127_v19  ;;  %v13162_v0 = vpack.c.bf16 %v2145_v40, %v2129_v56 }
 0x243   :  { %v13164_v10 = vpack.c.bf16 %v2144_v55, %v2128_v35  ;;  %v1645_v26 = vpop.f32.mrb[80].mxu0  ;;  %v13166_v49 = vpack.c.bf16 %v2146_v14, %v2130_v59  ;;  %v1758_v3 = vpop.f32.mrb[80].mxu1 }
 0x244   :  { %v1646_v58 = vadd.f32 %v1645_v26, %v13059_v9  ;;  %v1647_v30 = vpop.f32.mrb[81].mxu0  ;;  %v1759_v62 = vadd.f32 %v1758_v3, %v13073_v27  ;;  %v1760_v12 = vpop.f32.mrb[81].mxu1 }
 0x245   :  { %v1648_v24 = vadd.f32 %v1647_v30, %v13065_v6  ;;  %v1649_v50 = vpop.f32.mrb[82].mxu0  ;;  %v1761_v43 = vadd.f32 %v1760_v12, %v13080_v25  ;;  %v1762_v16 = vpop.f32.mrb[82].mxu1  ;;  %v11807_v30 = vld [vmem:[#allocation9 + $0x300] sm:$0xff]  }
 0x246   :  { %v1650_v37 = vadd.f32 %v1649_v50, %v13059_v9  ;;  %v1651_v5 = vpop.f32.mrb[83].mxu0  ;;  %v2161_v11 = vmax.f32 %v1759_v62, 0.0  ;;  %v1763_v53 = vadd.f32 %v1762_v16, %v13073_v27  ;;  %v1764_v17 = vpop.f32.mrb[83].mxu1  ;;  %v2159_v20 = vmax.f32 %v1646_v58, 0.0 }
 0x247   :  { %v1652_v54 = vadd.f32 %v1651_v5, %v13065_v6  ;;  %v2162_v51 = vmax.f32 %v1761_v43, 0.0  ;;  %v1765_v33 = vadd.f32 %v1764_v17, %v13080_v25  ;;  %v2160_v13 = vmax.f32 %v1648_v24, 0.0  ;;  %v11809_v43 = vld [vmem:[#allocation9 + $0x380] sm:$0xff]  }
 0x248   :  { %v2175_v8 = vmax.f32 %v1650_v37, 0.0  ;;  %3721 = vmatmul.mubr.bf16.gmra.mrb[188].mxu0 %v13075_v61  ;;  %v2177_v56 = vmax.f32 %v1763_v53, 0.0  ;;  %3818 = vmatmul.mubr.bf16.gmra.mrb[188].mxu1 %v13082_v34  ;;  %v11810_v37 = vld [vmem:[#allocation9 + $0x348] sm:$0xff]  }
 0x249   :  { %v2176_v60 = vmax.f32 %v1652_v54, 0.0  ;;  %3858 = vmatprep.mubr.bf16.mxu0 %v13104_v32  ;;  %v2178_v4 = vmax.f32 %v1765_v33, 0.0  ;;  %3955 = vmatprep.mubr.bf16.mxu1 %v13106_v38  ;;  %v11812_v54 = vld [vmem:[#allocation9 + $0x3c8] sm:$0xff]  }
 0x24a   :  { %v13179_v1 = vpack.c.bf16 %v2175_v8, %v2159_v20  ;;  %v13182_v19 = vpack.c.bf16 %v2177_v56, %v2161_v11 }
 0x24b   :  { %v13184_v59 = vpack.c.bf16 %v2176_v60, %v2160_v13  ;;  %v1655_v48 = vpop.f32.mrb[84].mxu0  ;;  %v13186_v22 = vpack.c.bf16 %v2178_v4, %v2162_v51  ;;  %v1768_v35 = vpop.f32.mrb[84].mxu1  ;;  %v11811_v13 = vld [vmem:[#allocation9 + $0x308] sm:$0xff]  }
 0x24c   :  { %v1656_v61 = vadd.f32 %v1655_v48, %v13059_v9  ;;  %v1657_v40 = vpop.f32.mrb[85].mxu0  ;;  %v1769_v34 = vadd.f32 %v1768_v35, %v13073_v27  ;;  %v1770_v55 = vpop.f32.mrb[85].mxu1  ;;  %v11813_v4 = vld [vmem:[#allocation9 + $0x388] sm:$0xff]   ;;  %v11814_v48 = vld [vmem:[#allocation9 + $0x350] sm:$0xff]  }
 0x24d   :  { %v1658_v32 = vadd.f32 %v1657_v40, %v13065_v6  ;;  %v1659_v14 = vpop.f32.mrb[86].mxu0  ;;  %v1771_v26 = vadd.f32 %v1770_v55, %v13080_v25  ;;  %v1772_v58 = vpop.f32.mrb[86].mxu1  ;;  %v11816_v40 = vld [vmem:[#allocation9 + $0x3d0] sm:$0xff]  }
 0x24e   :  { %v1660_v38 = vadd.f32 %v1659_v14, %v13059_v9  ;;  %v1661_v3 = vpop.f32.mrb[87].mxu0  ;;  %v2193_v62 = vmax.f32 %v1769_v34, 0.0  ;;  %v1773_v24 = vadd.f32 %v1772_v58, %v13073_v27  ;;  %v1774_v50 = vpop.f32.mrb[87].mxu1  ;;  %v2191_v16 = vmax.f32 %v1656_v61, 0.0 }
 0x24f   :  { %v1662_v12 = vadd.f32 %v1661_v3, %v13065_v6  ;;  %v2194_v5 = vmax.f32 %v1771_v26, 0.0  ;;  %v1775_v53 = vadd.f32 %v1774_v50, %v13080_v25  ;;  %v2192_v17 = vmax.f32 %v1658_v32, 0.0  ;;  %v11815_v3 = vld [vmem:[#allocation9 + $0x310] sm:$0xff]  }
 0x250   :  { %v2207_v11 = vmax.f32 %v1660_v38, 0.0  ;;  %3859 = vmatmul.mubr.bf16.vlgmr.msra.gmra.mrb[192].mxu0 %v13099_v15  ;;  %v2209_v20 = vmax.f32 %v1773_v24, 0.0  ;;  %3956 = vmatmul.mubr.bf16.vlgmr.msra.gmra.mrb[192].mxu1 %v13102_v29  ;;  %v11817_v50 = vld [vmem:[#allocation9 + $0x390] sm:$0xff]  }
 0x251   :  { %v2208_v51 = vmax.f32 %v1662_v12, 0.0  ;;  %3866 = vmatprep.mubr.bf16.mxu0 %v13124_v57  ;;  %v2210_v33 = vmax.f32 %v1775_v53, 0.0  ;;  %3963 = vmatprep.mubr.bf16.mxu1 %v13126_v28  ;;  %v11820_v53 = vld [vmem:[#allocation9 + $0x3d8] sm:$0xff]  }
 0x252   :  { %v13199_v8 = vpack.c.bf16 %v2207_v11, %v2191_v16  ;;  %10530 = vmatpush3.bf16.msra.mxu0 %v11807_v30  ;;  %v13202_v56 = vpack.c.bf16 %v2209_v20, %v2193_v62  ;;  %10594 = vmatpush3.bf16.msra.mxu1 %v11809_v43  ;;  %v11818_v43 = vld [vmem:[#allocation9 + $0x358] sm:$0xff]  }
 0x253   :  { %v13204_v60 = vpack.c.bf16 %v2208_v51, %v2192_v17  ;;  %v1665_v15 = vpop.f32.mrb[88].mxu0  ;;  %10531 = vmatprep.subr.bf16.mxu0 %v11810_v37  ;;  %v13206_v61 = vpack.c.bf16 %v2210_v33, %v2194_v5  ;;  %v1778_v57 = vpop.f32.mrb[88].mxu1  ;;  %10595 = vmatprep.subr.bf16.mxu1 %v11812_v54 }
 0x254   :  { %v1666_v29 = vadd.f32 %v1665_v15, %v13059_v9  ;;  %v1667_v35 = vpop.f32.mrb[89].mxu0  ;;  %v1779_v28 = vadd.f32 %v1778_v57, %v13073_v27  ;;  %v1780_v32 = vpop.f32.mrb[89].mxu1 }
 0x255   :  { %v1668_v34 = vadd.f32 %v1667_v35, %v13065_v6  ;;  %v1669_v55 = vpop.f32.mrb[90].mxu0  ;;  %v1781_v14 = vadd.f32 %v1780_v32, %v13080_v25  ;;  %v1782_v38 = vpop.f32.mrb[90].mxu1 }
 0x256   :  { %v1670_v26 = vadd.f32 %v1669_v55, %v13059_v9  ;;  %v1671_v58 = vpop.f32.mrb[91].mxu0  ;;  %10532 = vmatpush3.bf16.msra.mxu0 %v11811_v13  ;;  %v2225_v30 = vmax.f32 %v1779_v28, 0.0  ;;  %v1783_v62 = vadd.f32 %v1782_v38, %v13073_v27  ;;  %v1784_v12 = vpop.f32.mrb[91].mxu1  ;;  %10596 = vmatpush3.bf16.msra.mxu1 %v11813_v4  ;;  %v2223_v37 = vmax.f32 %v1666_v29, 0.0  ;;  %v11819_v13 = vld [vmem:[#allocation9 + $0x318] sm:$0xff]   ;;  %v11822_v29 = vld [vmem:[#allocation9 + $0x360] sm:$0xff]  }
 0x257   :  { %v1672_v24 = vadd.f32 %v1671_v58, %v13065_v6  ;;  %10533 = vmatprep.subr.bf16.mxu0 %v11814_v48  ;;  %v2226_v16 = vmax.f32 %v1781_v14, 0.0  ;;  %v1785_v11 = vadd.f32 %v1784_v12, %v13080_v25  ;;  %10597 = vmatprep.subr.bf16.mxu1 %v11816_v40  ;;  %v2224_v54 = vmax.f32 %v1668_v34, 0.0  ;;  %v11821_v48 = vld [vmem:[#allocation9 + $0x398] sm:$0xff]   ;;  %v11824_v40 = vld [vmem:[#allocation9 + $0x3e0] sm:$0xff]  }
 0x258   :  { %v2239_v5 = vmax.f32 %v1670_v26, 0.0  ;;  %3867 = vmatmul.mubr.bf16.gmra.mrb[196].mxu0 %v13119_v44  ;;  %v2241_v17 = vmax.f32 %v1783_v62, 0.0  ;;  %3964 = vmatmul.mubr.bf16.gmra.mrb[196].mxu1 %v13122_v36  ;;  %v13235_v58 = vrot.slane %v13048_v21, %v12855_v41 }
 0x259   :  { %v2240_v20 = vmax.f32 %v1672_v24, 0.0  ;;  %3874 = vmatprep.mubr.bf16.mxu0 %v13144_v2  ;;  %v2242_v33 = vmax.f32 %v1785_v11, 0.0  ;;  %3971 = vmatprep.mubr.bf16.mxu1 %v13146_v18 }
 0x25a   :  { %v13219_v51 = vpack.c.bf16 %v2239_v5, %v2223_v37  ;;  %10534 = vmatpush3.bf16.msra.mxu0 %v11815_v3  ;;  %v13222_v15 = vpack.c.bf16 %v2241_v17, %v2225_v30  ;;  %10598 = vmatpush3.bf16.msra.mxu1 %v11817_v50  ;;  %v11823_v3 = vld [vmem:[#allocation9 + $0x320] sm:$0xff]   ;;  %v13241_v50 = vrot.slane %v13048_v21, %v12860_v52 }
 0x25b   :  { %v13224_v4 = vpack.c.bf16 %v2240_v20, %v2224_v54  ;;  %v1675_v44 = vpop.f32.mrb[92].mxu0  ;;  %10535 = vmatprep.subr.bf16.mxu0 %v11818_v43  ;;  %v13226_v57 = vpack.c.bf16 %v2242_v33, %v2226_v16  ;;  %v1788_v2 = vpop.f32.mrb[92].mxu1  ;;  %10599 = vmatprep.subr.bf16.mxu1 %v11820_v53  ;;  %v11826_v43 = vld [vmem:[#allocation9 + $0x368] sm:$0xff]   ;;  %v13249_v17 = vrot.slane %v13048_v21, %v12872_v7 }
 0x25c   :  { %v1676_v36 = vadd.f32 %v1675_v44, %v13059_v9  ;;  %v1677_v35 = vpop.f32.mrb[93].mxu0  ;;  %v1789_v18 = vadd.f32 %v1788_v2, %v13073_v27  ;;  %v1790_v34 = vpop.f32.mrb[93].mxu1  ;;  %v11829_v44 = vld [vmem:[#allocation9 + $0x3a8] sm:$0xff]  }
 0x25d   :  { %v1678_v28 = vadd.f32 %v1677_v35, %v13065_v6  ;;  %v1679_v32 = vpop.f32.mrb[94].mxu0  ;;  %v1791_v55 = vadd.f32 %v1790_v34, %v13080_v25  ;;  %v1792_v26 = vpop.f32.mrb[94].mxu1 }
 0x25e   :  { %v1680_v14 = vadd.f32 %v1679_v32, %v13059_v9  ;;  %v1681_v38 = vpop.f32.mrb[95].mxu0  ;;  %10536 = vmatpush3.bf16.msra.mxu0 %v11819_v13  ;;  %v2257_v30 = vmax.f32 %v1789_v18, 0.0  ;;  %v1793_v62 = vadd.f32 %v1792_v26, %v13073_v27  ;;  %v1794_v12 = vpop.f32.mrb[95].mxu1  ;;  %10600 = vmatpush3.bf16.msra.mxu1 %v11821_v48  ;;  %v11825_v9 = vld [vmem:[#allocation9 + $0x3a0] sm:$0xff]   ;;  %v2255_v37 = vmax.f32 %v1676_v36, 0.0  ;;  %v11828_v27 = vld [vmem:[#allocation9 + $0x3e8] sm:$0xff]  }
 0x25f   :  { %v1682_v24 = vadd.f32 %v1681_v38, %v13065_v6  ;;  %10537 = vmatprep.subr.bf16.mxu0 %v11822_v29  ;;  %v2258_v16 = vmax.f32 %v1791_v55, 0.0  ;;  %v1795_v11 = vadd.f32 %v1794_v12, %v13080_v25  ;;  %10601 = vmatprep.subr.bf16.mxu1 %v11824_v40  ;;  %v2256_v53 = vmax.f32 %v1678_v28, 0.0  ;;  %v11830_v48 = vld [vmem:[#allocation9 + $0x370] sm:$0xff]   ;;  %v11834_v12 = vld [vmem:[#allocation9 + $0x378] sm:$0xff]  }
 0x260   :  { %v2271_v5 = vmax.f32 %v1680_v14, 0.0  ;;  %3875 = vmatmul.mubr.bf16.gmra.mrb[200].mxu0 %v13139_v31  ;;  %v2273_v6 = vmax.f32 %v1793_v62, 0.0  ;;  %3972 = vmatmul.mubr.bf16.gmra.mrb[200].mxu1 %v13142_v63  ;;  %v13256_v25 = vrot.slane %v13048_v21, %v12881_v39  ;;  %v11827_v31 = vld [vmem:[#allocation9 + $0x328] sm:$0xff]   ;;  %v11832_v21 = vld [vmem:[#allocation9 + $0x3f0] sm:$0xff]  }
 0x261   :  { %v2272_v54 = vmax.f32 %v1682_v24, 0.0  ;;  %3882 = vmatprep.mubr.bf16.mxu0 %v13164_v10  ;;  %v2274_v33 = vmax.f32 %v1795_v11, 0.0  ;;  %3979 = vmatprep.mubr.bf16.mxu1 %v13166_v49  ;;  %v11831_v26 = vld [vmem:[#allocation9 + $0x330] sm:$0xff]  }
 0x262   :  { %v13251_v20 = vpack.c.bf16 %v2271_v5, %v2255_v37  ;;  %10538 = vmatpush3.bf16.msra.mxu0 %v11823_v3  ;;  %v13258_v13 = vpack.c.bf16 %v2273_v6, %v2257_v30  ;;  %10602 = vmatpush3.bf16.msra.mxu1 %v11825_v9  ;;  %v11833_v24 = vld [vmem:[#allocation9 + $0x3b0] sm:$0xff]   ;;  %v11836_v5 = vld [vmem:[#allocation9 + $0x3f8] sm:$0xff]  }
 0x263   :  { %v13260_v63 = vpack.c.bf16 %v2272_v54, %v2256_v53  ;;  %v1831_v10 = vpop.f32.mrb[96].mxu0  ;;  %10539 = vmatprep.subr.bf16.mxu0 %v11826_v43  ;;  %v13262_v29 = vpack.c.bf16 %v2274_v33, %v2258_v16  ;;  %v1944_v49 = vpop.f32.mrb[96].mxu1  ;;  %10603 = vmatprep.subr.bf16.mxu1 %v11828_v27  ;;  %v11835_v33 = vld [vmem:[#allocation9 + $0x338] sm:$0xff]  }
 0x264   :  { %v1832_v36 = vadd.f32 %v1831_v10, %v13235_v58  ;;  %v1833_v2 = vpop.f32.mrb[97].mxu0  ;;  %v1945_v35 = vadd.f32 %v1944_v49, %v13249_v17  ;;  %v1946_v18 = vpop.f32.mrb[97].mxu1 }
 0x265   :  { %v1834_v40 = vadd.f32 %v1833_v2, %v13241_v50  ;;  %v1835_v28 = vpop.f32.mrb[98].mxu0  ;;  %v1947_v34 = vadd.f32 %v1946_v18, %v13256_v25  ;;  %v1948_v55 = vpop.f32.mrb[98].mxu1 }
 0x266   :  { %v1836_v32 = vadd.f32 %v1835_v28, %v13235_v58  ;;  %v1837_v14 = vpop.f32.mrb[99].mxu0  ;;  %10540 = vmatpush3.bf16.msra.mxu0 %v11827_v31  ;;  %v2037_v38 = vmax.f32 %v1945_v35, 0.0  ;;  %v1949_v3 = vadd.f32 %v1948_v55, %v13249_v17  ;;  %v1950_v62 = vpop.f32.mrb[99].mxu1  ;;  %10604 = vmatpush3.bf16.msra.mxu1 %v11829_v44  ;;  %v2035_v9 = vmax.f32 %v1832_v36, 0.0  ;;  %v11837_v44 = vld [vmem:[#allocation9 + $0x3b8] sm:$0xff]  }
 0x267   :  { %v1838_v30 = vadd.f32 %v1837_v14, %v13241_v50  ;;  %10541 = vmatprep.subr.bf16.mxu0 %v11830_v48  ;;  %v2038_v43 = vmax.f32 %v1947_v34, 0.0  ;;  %v1951_v16 = vadd.f32 %v1950_v62, %v13256_v25  ;;  %10605 = vmatprep.subr.bf16.mxu1 %v11832_v21  ;;  %v2036_v11 = vmax.f32 %v1834_v40, 0.0 }
 0x268   :  { %v2051_v37 = vmax.f32 %v1836_v32, 0.0  ;;  %3883 = vmatmul.mubr.bf16.gmra.mrb[204].mxu0 %v13159_v23  ;;  %v2053_v27 = vmax.f32 %v1949_v3, 0.0  ;;  %3980 = vmatmul.mubr.bf16.gmra.mrb[204].mxu1 %v13162_v0 }
 0x269   :  { %v2052_v53 = vmax.f32 %v1838_v30, 0.0  ;;  %3890 = vmatprep.mubr.bf16.mxu0 %v13184_v59  ;;  %v2054_v54 = vmax.f32 %v1951_v16, 0.0  ;;  %3987 = vmatprep.mubr.bf16.mxu1 %v13186_v22 }
 0x26a   :  { %v13275_v6 = vpack.c.bf16 %v2051_v37, %v2035_v9  ;;  %10542 = vmatpush3.bf16.msra.mxu0 %v11831_v26  ;;  %v13278_v31 = vpack.c.bf16 %v2053_v27, %v2037_v38  ;;  %10606 = vmatpush3.bf16.msra.mxu1 %v11833_v24 }
 0x26b   :  { %v13280_v10 = vpack.c.bf16 %v2052_v53, %v2036_v11  ;;  %v1841_v23 = vpop.f32.mrb[100].mxu0  ;;  %10543 = vmatprep.subr.bf16.mxu0 %v11834_v12  ;;  %v13282_v48 = vpack.c.bf16 %v2054_v54, %v2038_v43  ;;  %v1954_v59 = vpop.f32.mrb[100].mxu1  ;;  %10607 = vmatprep.subr.bf16.mxu1 %v11836_v5 }
 0x26c   :  { %v1842_v0 = vadd.f32 %v1841_v23, %v13235_v58  ;;  %v1843_v36 = vpop.f32.mrb[101].mxu0  ;;  %v1955_v49 = vadd.f32 %v1954_v59, %v13249_v17  ;;  %v1956_v2 = vpop.f32.mrb[101].mxu1 }
 0x26d   :  { %v1844_v22 = vadd.f32 %v1843_v36, %v13241_v50  ;;  %v1845_v21 = vpop.f32.mrb[102].mxu0  ;;  %v1957_v35 = vadd.f32 %v1956_v2, %v13256_v25  ;;  %v1958_v18 = vpop.f32.mrb[102].mxu1 }
 0x26e   :  { %v1846_v40 = vadd.f32 %v1845_v21, %v13235_v58  ;;  %v1847_v28 = vpop.f32.mrb[103].mxu0  ;;  %10544 = vmatpush3.bf16.msra.mxu0 %v11835_v33  ;;  %v2069_v34 = vmax.f32 %v1955_v49, 0.0  ;;  %v1959_v32 = vadd.f32 %v1958_v18, %v13249_v17  ;;  %v1960_v14 = vpop.f32.mrb[103].mxu1  ;;  %10608 = vmatpush3.bf16.msra.mxu1 %v11837_v44  ;;  %v2067_v26 = vmax.f32 %v1842_v0, 0.0 }
 0x26f   :  { %v1848_v55 = vadd.f32 %v1847_v28, %v13241_v50  ;;  %v2070_v38 = vmax.f32 %v1957_v35, 0.0  ;;  %v1961_v30 = vadd.f32 %v1960_v14, %v13256_v25  ;;  %v2068_v62 = vmax.f32 %v1844_v22, 0.0 }
 0x270   :  { %v2083_v3 = vmax.f32 %v1846_v40, 0.0  ;;  %3891 = vmatmul.mubr.bf16.gmra.mrb[208].mxu0 %v13179_v1  ;;  %v2085_v24 = vmax.f32 %v1959_v32, 0.0  ;;  %3988 = vmatmul.mubr.bf16.gmra.mrb[208].mxu1 %v13182_v19 }
 0x271   :  { %v2084_v12 = vmax.f32 %v1848_v55, 0.0  ;;  %3898 = vmatprep.mubr.bf16.mxu0 %v13204_v60  ;;  %v2086_v43 = vmax.f32 %v1961_v30, 0.0  ;;  %3995 = vmatprep.mubr.bf16.mxu1 %v13206_v61 }
 0x272   :  { %v13295_v9 = vpack.c.bf16 %v2083_v3, %v2067_v26  ;;  %v13298_v37 = vpack.c.bf16 %v2085_v24, %v2069_v34 }
 0x273   :  { %v13300_v16 = vpack.c.bf16 %v2084_v12, %v2068_v62  ;;  %v1851_v5 = vpop.f32.mrb[104].mxu0  ;;  %v13302_v11 = vpack.c.bf16 %v2086_v43, %v2070_v38  ;;  %v1964_v27 = vpop.f32.mrb[104].mxu1 }
 0x274   :  { %v1852_v1 = vadd.f32 %v1851_v5, %v13235_v58  ;;  %v1853_v53 = vpop.f32.mrb[105].mxu0  ;;  %v1965_v19 = vadd.f32 %v1964_v27, %v13249_v17  ;;  %v1966_v54 = vpop.f32.mrb[105].mxu1 }
 0x275   :  { %v1854_v60 = vadd.f32 %v1853_v53, %v13241_v50  ;;  %v1855_v33 = vpop.f32.mrb[106].mxu0  ;;  %v1967_v23 = vadd.f32 %v1966_v54, %v13256_v25  ;;  %v1968_v44 = vpop.f32.mrb[106].mxu1 }
 0x276   :  { %v1856_v61 = vadd.f32 %v1855_v33, %v13235_v58  ;;  %v1857_v0 = vpop.f32.mrb[107].mxu0  ;;  %v2101_v59 = vmax.f32 %v1965_v19, 0.0  ;;  %v1969_v36 = vadd.f32 %v1968_v44, %v13249_v17  ;;  %v1970_v22 = vpop.f32.mrb[107].mxu1  ;;  %v2099_v2 = vmax.f32 %v1852_v1, 0.0 }
 0x277   :  { %v1858_v49 = vadd.f32 %v1857_v0, %v13241_v50  ;;  %v2102_v21 = vmax.f32 %v1967_v23, 0.0  ;;  %v1971_v40 = vadd.f32 %v1970_v22, %v13256_v25  ;;  %v2100_v18 = vmax.f32 %v1854_v60, 0.0 }
 0x278   :  { %v2115_v35 = vmax.f32 %v1856_v61, 0.0  ;;  %3899 = vmatmul.mubr.bf16.gmra.mrb[212].mxu0 %v13199_v8  ;;  %v2117_v28 = vmax.f32 %v1969_v36, 0.0  ;;  %3996 = vmatmul.mubr.bf16.gmra.mrb[212].mxu1 %v13202_v56 }
 0x279   :  { %v2116_v34 = vmax.f32 %v1858_v49, 0.0  ;;  %3906 = vmatprep.mubr.bf16.mxu0 %v13224_v4  ;;  %v2118_v55 = vmax.f32 %v1971_v40, 0.0  ;;  %4003 = vmatprep.mubr.bf16.mxu1 %v13226_v57 }
 0x27a   :  { %v13315_v32 = vpack.c.bf16 %v2115_v35, %v2099_v2  ;;  %v13318_v14 = vpack.c.bf16 %v2117_v28, %v2101_v59 }
 0x27b   :  { %v13320_v26 = vpack.c.bf16 %v2116_v34, %v2100_v18  ;;  %v1861_v38 = vpop.f32.mrb[108].mxu0  ;;  %v13322_v3 = vpack.c.bf16 %v2118_v55, %v2102_v21  ;;  %v1974_v30 = vpop.f32.mrb[108].mxu1 }
 0x27c   :  { %v1862_v8 = vadd.f32 %v1861_v38, %v13235_v58  ;;  %v1863_v62 = vpop.f32.mrb[109].mxu0  ;;  %v1975_v56 = vadd.f32 %v1974_v30, %v13249_v17  ;;  %v1976_v24 = vpop.f32.mrb[109].mxu1 }
 0x27d   :  { %v1864_v4 = vadd.f32 %v1863_v62, %v13241_v50  ;;  %v1865_v12 = vpop.f32.mrb[110].mxu0  ;;  %v1977_v43 = vadd.f32 %v1976_v24, %v13256_v25  ;;  %v1978_v5 = vpop.f32.mrb[110].mxu1 }
 0x27e   :  { %v1866_v57 = vadd.f32 %v1865_v12, %v13235_v58  ;;  %v1867_v1 = vpop.f32.mrb[111].mxu0  ;;  %v2133_v27 = vmax.f32 %v1975_v56, 0.0  ;;  %v1979_v53 = vadd.f32 %v1978_v5, %v13249_v17  ;;  %v1980_v60 = vpop.f32.mrb[111].mxu1  ;;  %v2131_v54 = vmax.f32 %v1862_v8, 0.0 }
 0x27f   :  { %v1868_v19 = vadd.f32 %v1867_v1, %v13241_v50  ;;  %v2134_v33 = vmax.f32 %v1977_v43, 0.0  ;;  %v1981_v61 = vadd.f32 %v1980_v60, %v13256_v25  ;;  %v2132_v44 = vmax.f32 %v1864_v4, 0.0 }
 0x280   :  { %v2147_v23 = vmax.f32 %v1866_v57, 0.0  ;;  %3907 = vmatmul.mubr.bf16.gmra.mrb[216].mxu0 %v13219_v51  ;;  %v2149_v0 = vmax.f32 %v1979_v53, 0.0  ;;  %4004 = vmatmul.mubr.bf16.gmra.mrb[216].mxu1 %v13222_v15 }
 0x281   :  { %v2148_v59 = vmax.f32 %v1868_v19, 0.0  ;;  %3914 = vmatprep.mubr.bf16.mxu0 %v13260_v63  ;;  %v2150_v49 = vmax.f32 %v1981_v61, 0.0  ;;  %4011 = vmatprep.mubr.bf16.mxu1 %v13262_v29 }
 0x282   :  { %v13335_v36 = vpack.c.bf16 %v2147_v23, %v2131_v54  ;;  %v13338_v22 = vpack.c.bf16 %v2149_v0, %v2133_v27 }
 0x283   :  { %v13340_v2 = vpack.c.bf16 %v2148_v59, %v2132_v44  ;;  %v1871_v21 = vpop.f32.mrb[112].mxu0  ;;  %v13342_v35 = vpack.c.bf16 %v2150_v49, %v2134_v33  ;;  %v1984_v40 = vpop.f32.mrb[112].mxu1 }
 0x284   :  { %v1872_v51 = vadd.f32 %v1871_v21, %v13235_v58  ;;  %v1873_v18 = vpop.f32.mrb[113].mxu0  ;;  %v1985_v15 = vadd.f32 %v1984_v40, %v13249_v17  ;;  %v1986_v28 = vpop.f32.mrb[113].mxu1 }
 0x285   :  { %v1874_v63 = vadd.f32 %v1873_v18, %v13241_v50  ;;  %v1875_v34 = vpop.f32.mrb[114].mxu0  ;;  %v1987_v55 = vadd.f32 %v1986_v28, %v13256_v25  ;;  %v1988_v38 = vpop.f32.mrb[114].mxu1 }
 0x286   :  { %v1876_v29 = vadd.f32 %v1875_v34, %v13235_v58  ;;  %v1877_v8 = vpop.f32.mrb[115].mxu0  ;;  %v2165_v30 = vmax.f32 %v1985_v15, 0.0  ;;  %v1989_v62 = vadd.f32 %v1988_v38, %v13249_v17  ;;  %v1990_v4 = vpop.f32.mrb[115].mxu1  ;;  %v2163_v24 = vmax.f32 %v1872_v51, 0.0 }
 0x287   :  { %v1878_v56 = vadd.f32 %v1877_v8, %v13241_v50  ;;  %v2166_v12 = vmax.f32 %v1987_v55, 0.0  ;;  %v1991_v57 = vadd.f32 %v1990_v4, %v13256_v25  ;;  %v2164_v5 = vmax.f32 %v1874_v63, 0.0 }
 0x288   :  { %v2179_v43 = vmax.f32 %v1876_v29, 0.0  ;;  %3915 = vmatmul.mubr.bf16.gmra.mrb[220].mxu0 %v13251_v20  ;;  %v2181_v1 = vmax.f32 %v1989_v62, 0.0  ;;  %4012 = vmatmul.mubr.bf16.gmra.mrb[220].mxu1 %v13258_v13 }
 0x289   :  { %v2180_v27 = vmax.f32 %v1878_v56, 0.0  ;;  %4052 = vmatprep.mubr.bf16.mxu0 %v13280_v10  ;;  %v2182_v19 = vmax.f32 %v1991_v57, 0.0  ;;  %4149 = vmatprep.mubr.bf16.mxu1 %v13282_v48 }
 0x28a   :  { %v13355_v53 = vpack.c.bf16 %v2179_v43, %v2163_v24  ;;  %v13358_v60 = vpack.c.bf16 %v2181_v1, %v2165_v30 }
 0x28b   :  { %v13360_v54 = vpack.c.bf16 %v2180_v27, %v2164_v5  ;;  %v1881_v33 = vpop.f32.mrb[116].mxu0  ;;  %v13362_v23 = vpack.c.bf16 %v2182_v19, %v2166_v12  ;;  %v1994_v61 = vpop.f32.mrb[116].mxu1 }
 0x28c   :  { %v1882_v20 = vadd.f32 %v1881_v33, %v13235_v58  ;;  %v1883_v44 = vpop.f32.mrb[117].mxu0  ;;  %v1995_v13 = vadd.f32 %v1994_v61, %v13249_v17  ;;  %v1996_v0 = vpop.f32.mrb[117].mxu1 }
 0x28d   :  { %v1884_v10 = vadd.f32 %v1883_v44, %v13241_v50  ;;  %v1885_v59 = vpop.f32.mrb[118].mxu0  ;;  %v1997_v49 = vadd.f32 %v1996_v0, %v13256_v25  ;;  %v1998_v21 = vpop.f32.mrb[118].mxu1 }
 0x28e   :  { %v1886_v48 = vadd.f32 %v1885_v59, %v13235_v58  ;;  %v1887_v51 = vpop.f32.mrb[119].mxu0  ;;  %v2197_v40 = vmax.f32 %v1995_v13, 0.0  ;;  %v1999_v18 = vadd.f32 %v1998_v21, %v13249_v17  ;;  %v2000_v63 = vpop.f32.mrb[119].mxu1  ;;  %v2195_v28 = vmax.f32 %v1882_v20, 0.0 }
 0x28f   :  { %v1888_v15 = vadd.f32 %v1887_v51, %v13241_v50  ;;  %v2198_v34 = vmax.f32 %v1997_v49, 0.0  ;;  %v2001_v29 = vadd.f32 %v2000_v63, %v13256_v25  ;;  %v2196_v38 = vmax.f32 %v1884_v10, 0.0 }
 0x290   :  { %v2211_v55 = vmax.f32 %v1886_v48, 0.0  ;;  %4053 = vmatmul.mubr.bf16.vlgmr.msra.gmra.mrb[224].mxu0 %v13275_v6  ;;  %v2213_v8 = vmax.f32 %v1999_v18, 0.0  ;;  %4150 = vmatmul.mubr.bf16.vlgmr.msra.gmra.mrb[224].mxu1 %v13278_v31 }
 0x291   :  { %v2212_v30 = vmax.f32 %v1888_v15, 0.0  ;;  %4060 = vmatprep.mubr.bf16.mxu0 %v13300_v16  ;;  %v2214_v56 = vmax.f32 %v2001_v29, 0.0  ;;  %4157 = vmatprep.mubr.bf16.mxu1 %v13302_v11 }
 0x292   :  { %v13375_v62 = vpack.c.bf16 %v2211_v55, %v2195_v28  ;;  %v13378_v4 = vpack.c.bf16 %v2213_v8, %v2197_v40 }
 0x293   :  { %v13380_v24 = vpack.c.bf16 %v2212_v30, %v2196_v38  ;;  %v1891_v12 = vpop.f32.mrb[120].mxu0  ;;  %v13382_v43 = vpack.c.bf16 %v2214_v56, %v2198_v34  ;;  %v2004_v57 = vpop.f32.mrb[120].mxu1 }
 0x294   :  { %v1892_v6 = vadd.f32 %v1891_v12, %v13235_v58  ;;  %v1893_v5 = vpop.f32.mrb[121].mxu0  ;;  %v2005_v31 = vadd.f32 %v2004_v57, %v13249_v17  ;;  %v2006_v1 = vpop.f32.mrb[121].mxu1 }
 0x295   :  { %v1894_v16 = vadd.f32 %v1893_v5, %v13241_v50  ;;  %v1895_v27 = vpop.f32.mrb[122].mxu0  ;;  %v2007_v19 = vadd.f32 %v2006_v1, %v13256_v25  ;;  %v2008_v33 = vpop.f32.mrb[122].mxu1 }
 0x296   :  { %v1896_v11 = vadd.f32 %v1895_v27, %v13235_v58  ;;  %v1897_v20 = vpop.f32.mrb[123].mxu0  ;;  %v2229_v61 = vmax.f32 %v2005_v31, 0.0  ;;  %v2009_v44 = vadd.f32 %v2008_v33, %v13249_v17  ;;  %v2010_v10 = vpop.f32.mrb[123].mxu1  ;;  %v2227_v0 = vmax.f32 %v1892_v6, 0.0 }
 0x297   :  { %v1898_v13 = vadd.f32 %v1897_v20, %v13241_v50  ;;  %v2230_v59 = vmax.f32 %v2007_v19, 0.0  ;;  %v2011_v48 = vadd.f32 %v2010_v10, %v13256_v25  ;;  %v2228_v21 = vmax.f32 %v1894_v16, 0.0  ;;  %v13424_v10 = vld [vmem:[#allocation10] ss:$0 sm:$0xff] }
 0x298   :  { %v2243_v49 = vmax.f32 %v1896_v11, 0.0  ;;  %4061 = vmatmul.mubr.bf16.gmra.mrb[228].mxu0 %v13295_v9  ;;  %v2245_v51 = vmax.f32 %v2009_v44, 0.0  ;;  %4158 = vmatmul.mubr.bf16.gmra.mrb[228].mxu1 %v13298_v37 }
 0x299   :  { %v2244_v40 = vmax.f32 %v1898_v13, 0.0  ;;  %4068 = vmatprep.mubr.bf16.mxu0 %v13320_v26  ;;  %v2246_v15 = vmax.f32 %v2011_v48, 0.0  ;;  %4165 = vmatprep.mubr.bf16.mxu1 %v13322_v3 }
 0x29a   :  { %v13395_v18 = vpack.c.bf16 %v2243_v49, %v2227_v0  ;;  %v13398_v63 = vpack.c.bf16 %v2245_v51, %v2229_v61 }
 0x29b   :  { %v13400_v28 = vpack.c.bf16 %v2244_v40, %v2228_v21  ;;  %v1901_v34 = vpop.f32.mrb[124].mxu0  ;;  %v13402_v55 = vpack.c.bf16 %v2246_v15, %v2230_v59  ;;  %v2014_v29 = vpop.f32.mrb[124].mxu1 }
 0x29c   :  { %v1902_v9 = vadd.f32 %v1901_v34, %v13235_v58  ;;  %v1903_v38 = vpop.f32.mrb[125].mxu0  ;;  %v2015_v37 = vadd.f32 %v2014_v29, %v13249_v17  ;;  %v2016_v8 = vpop.f32.mrb[125].mxu1 }
 0x29d   :  { %v1904_v26 = vadd.f32 %v1903_v38, %v13241_v50  ;;  %v1905_v30 = vpop.f32.mrb[126].mxu0  ;;  %v2017_v56 = vadd.f32 %v2016_v8, %v13256_v25  ;;  %v2018_v12 = vpop.f32.mrb[126].mxu1 }
 0x29e   :  { %v1906_v3 = vadd.f32 %v1905_v30, %v13235_v58  ;;  %v1907_v6 = vpop.f32.mrb[127].mxu0  ;;  %v2261_v57 = vmax.f32 %v2015_v37, 0.0  ;;  %v2019_v5 = vadd.f32 %v2018_v12, %v13249_v17  ;;  %v2020_v16 = vpop.f32.mrb[127].mxu1  ;;  %v2259_v1 = vmax.f32 %v1902_v9, 0.0 }
 0x29f   :  { %v1908_v31 = vadd.f32 %v1907_v6, %v13241_v50  ;;  %v2262_v27 = vmax.f32 %v2017_v56, 0.0  ;;  %v2021_v11 = vadd.f32 %v2020_v16, %v13256_v25  ;;  %v2260_v33 = vmax.f32 %v1904_v26, 0.0 }
 0x2a0   :  { %v2275_v19 = vmax.f32 %v1906_v3, 0.0  ;;  %4069 = vmatmul.mubr.bf16.gmra.mrb[232].mxu0 %v13315_v32  ;;  %v2277_v20 = vmax.f32 %v2019_v5, 0.0  ;;  %4166 = vmatmul.mubr.bf16.gmra.mrb[232].mxu1 %v13318_v14 }
 0x2a1   :  { %v2276_v61 = vmax.f32 %v1908_v31, 0.0  ;;  %4076 = vmatprep.mubr.bf16.mxu0 %v13340_v2  ;;  %v2278_v17 = vmax.f32 %v2021_v11, 0.0  ;;  %4173 = vmatprep.mubr.bf16.mxu1 %v13342_v35 }
 0x2a2   :  { %v13415_v58 = vpack.c.bf16 %v2275_v19, %v2259_v1  ;;  %v13418_v50 = vpack.c.bf16 %v2277_v20, %v2261_v57  ;;  %v11838_v1 = vld [vmem:[#allocation12] ss:$16 sps:$4 sm:$0xff]   ;;  %v11846_v20 = vld [vmem:[#allocation12 + $0x24] ss:$16 sps:$4 sm:$0xff]  }
 0x2a3   :  { %v13420_v44 = vpack.c.bf16 %v2276_v61, %v2260_v33  ;;  %v10161_v13 = vpop.f32.mrb[128].mxu0  ;;  %v13422_v25 = vpack.c.bf16 %v2278_v17, %v2262_v27  ;;  %v10225_v32 = vpop.f32.mrb[128].mxu1  ;;  %v11841_v27 = vld [vmem:[#allocation12 + $0x8] ss:$16 sps:$4 sm:$0xff]   ;;  %v11849_v61 = vld [vmem:[#allocation12 + $0x2c] ss:$16 sps:$4 sm:$0xff]  }
 0x2a4   :  { %v10162_v0 = vpop.f32.mrb[129].mxu0  ;;  %v10226_v14 = vpop.f32.mrb[129].mxu1 }
 0x2a5   :  { %v10163_v59 = vadd.f32 %v10162_v0, %v10161_v13  ;;  %v10164_v49 = vpop.f32.mrb[130].mxu0  ;;  %v10227_v2 = vadd.f32 %v10226_v14, %v10225_v32  ;;  %v10228_v48 = vpop.f32.mrb[130].mxu1  ;;  %v11844_v32 = vld [vmem:[#allocation12 + $0x20] ss:$16 sps:$4 sm:$0xff]  }
 0x2a6   :  { %v10165_v21 = vpop.f32.mrb[131].mxu0  ;;  %v10229_v40 = vpop.f32.mrb[131].mxu1 }
 0x2a7   :  { %v3473_v51 = vadd.f32 %v10163_v59, %v13424_v10  ;;  %v10166_v35 = vadd.f32 %v10165_v21, %v10164_v49  ;;  %v10230_v15 = vadd.f32 %v10229_v40, %v10228_v48  ;;  %v11852_v21 = vld [vmem:[#allocation12 + $0x44] ss:$16 sps:$4 sm:$0xff]  }
 0x2a8   :  { %4077 = vmatmul.mubr.bf16.gmra.mrb[236].mxu0 %v13335_v36  ;;  %4174 = vmatmul.mubr.bf16.gmra.mrb[236].mxu1 %v13338_v22 }
 0x2a9   :  { %v13428_v34 = vadd.f32 %v10227_v2, %v3473_v51  ;;  %v3476_v9 = vadd.f32 %v10166_v35, %v13424_v10  ;;  %4084 = vmatprep.mubr.bf16.mxu0 %v13360_v54  ;;  %4181 = vmatprep.mubr.bf16.mxu1 %v13362_v23  ;;  %v11840_v54 = vld [vmem:[#allocation12 + $0x4] ss:$16 sps:$4 sm:$0xff]   ;;  %v11843_v23 = vld [vmem:[#allocation12 + $0xc] ss:$16 sps:$4 sm:$0xff]  }
 0x2aa   :  { %4724 = vmatprep.subr.bf16.mxu0 %v11840_v54  ;;  %4837 = vmatprep.subr.bf16.mxu1 %v11843_v23  ;;  %v11855_v51 = vld [vmem:[#allocation12 + $0x4c] ss:$16 sps:$4 sm:$0xff]   ;;  %v11864_v23 = vld [vmem:[#allocation12 + $0x84] ss:$16 sps:$4 sm:$0xff]  }
 0x2ab   :  { %v13434_v29 = vadd.f32 %v10230_v15, %v3476_v9  ;;  %v10167_v38 = vpop.f32.mrb[132].mxu0  ;;  %v10231_v37 = vpop.f32.mrb[132].mxu1  ;;  %4725 = vmatpush1.bf16.msra.mxu0 %v11838_v1  ;;  %4838 = vmatpush1.bf16.msra.mxu1 %v11841_v27  ;;  %v11850_v15 = vld [vmem:[#allocation12 + $0x40] ss:$16 sps:$4 sm:$0xff]   ;;  %v11853_v9 = vld [vmem:[#allocation12 + $0x48] ss:$16 sps:$4 sm:$0xff]  }
 0x2ac   :  { %v10168_v26 = vpop.f32.mrb[133].mxu0  ;;  %v10232_v30 = vpop.f32.mrb[133].mxu1  ;;  %4726 = vmatprep.subr.bf16.mxu0 %v11846_v20  ;;  %4839 = vmatprep.subr.bf16.mxu1 %v11849_v61 }
 0x2ad   :  { %v10169_v8 = vadd.f32 %v10168_v26, %v10167_v38  ;;  %v10170_v56 = vpop.f32.mrb[134].mxu0  ;;  %v10233_v3 = vadd.f32 %v10232_v30, %v10231_v37  ;;  %v10234_v36 = vpop.f32.mrb[134].mxu1  ;;  %v11861_v30 = vld [vmem:[#allocation12 + $0x6c] ss:$16 sps:$4 sm:$0xff]  }
 0x2ae   :  { %v10171_v12 = vpop.f32.mrb[135].mxu0  ;;  %v10235_v5 = vpop.f32.mrb[135].mxu1 }
 0x2af   :  { %v3481_v6 = vadd.f32 %v10169_v8, %v13424_v10  ;;  %v10172_v57 = vadd.f32 %v10171_v12, %v10170_v56  ;;  %v10236_v22 = vadd.f32 %v10235_v5, %v10234_v36  ;;  %4727 = vmatpush1.bf16.msra.mxu0 %v11844_v32  ;;  %v11858_v8 = vld [vmem:[#allocation12 + $0x64] ss:$16 sps:$4 sm:$0xff]   ;;  %v11856_v36 = vld [vmem:[#allocation12 + $0x60] ss:$16 sps:$4 sm:$0xff]  }
 0x2b0   :  { %4085 = vmatmul.mubr.bf16.gmra.mrb[240].mxu0 %v13355_v53  ;;  %4182 = vmatmul.mubr.bf16.gmra.mrb[240].mxu1 %v13358_v60 }
 0x2b1   :  { %v13438_v31 = vadd.f32 %v10233_v3, %v3481_v6  ;;  %v3484_v16 = vadd.f32 %v10172_v57, %v13424_v10  ;;  %4092 = vmatprep.mubr.bf16.mxu0 %v13380_v24  ;;  %4189 = vmatprep.mubr.bf16.mxu1 %v13382_v43  ;;  %v11847_v24 = vld [vmem:[#allocation12 + $0x28] ss:$16 sps:$4 sm:$0xff]  }
 0x2b2   :  { %4840 = vmatpush1.bf16.msra.mxu1 %v11847_v24  ;;  %4728 = vmatprep.subr.bf16.mxu0 %v11852_v21  ;;  %v11868_v24 = vld [vmem:[#allocation12 + $0xa0] ss:$16 sps:$4 sm:$0xff]   ;;  %v11879_v21 = vld [vmem:[#allocation12 + $0xcc] ss:$16 sps:$4 sm:$0xff]  }
 0x2b3   :  { %v13444_v19 = vadd.f32 %v10236_v22, %v3484_v16  ;;  %v10173_v11 = vpop.f32.mrb[136].mxu0  ;;  %v10237_v53 = vpop.f32.mrb[136].mxu1  ;;  %4841 = vmatprep.subr.bf16.mxu1 %v11855_v51  ;;  %4729 = vmatpush1.bf16.msra.mxu0 %v11850_v15  ;;  %v11867_v16 = vld [vmem:[#allocation12 + $0x8c] ss:$16 sps:$4 sm:$0xff]   ;;  %v11874_v15 = vld [vmem:[#allocation12 + $0xc0] ss:$16 sps:$4 sm:$0xff]  }
 0x2b4   :  { %v10174_v33 = vpop.f32.mrb[137].mxu0  ;;  %v10238_v13 = vpop.f32.mrb[137].mxu1  ;;  %4730 = vmatprep.subr.bf16.mxu0 %v11858_v8 }
 0x2b5   :  { %v10175_v17 = vadd.f32 %v10174_v33, %v10173_v11  ;;  %v10176_v60 = vpop.f32.mrb[138].mxu0  ;;  %v10239_v0 = vadd.f32 %v10238_v13, %v10237_v53  ;;  %v10240_v59 = vpop.f32.mrb[138].mxu1  ;;  %v11862_v11 = vld [vmem:[#allocation12 + $0x80] ss:$16 sps:$4 sm:$0xff]   ;;  %v11865_v53 = vld [vmem:[#allocation12 + $0x88] ss:$16 sps:$4 sm:$0xff]  }
 0x2b6   :  { %v10177_v14 = vpop.f32.mrb[139].mxu0  ;;  %v10241_v2 = vpop.f32.mrb[139].mxu1  ;;  %4842 = vmatpush1.bf16.msra.mxu1 %v11853_v9  ;;  %v11873_v13 = vld [vmem:[#allocation12 + $0xac] ss:$16 sps:$4 sm:$0xff]   ;;  %v11877_v9 = vld [vmem:[#allocation12 + $0xc8] ss:$16 sps:$4 sm:$0xff]  }
 0x2b7   :  { %v3489_v43 = vadd.f32 %v10175_v17, %v13424_v10  ;;  %v10178_v49 = vadd.f32 %v10177_v14, %v10176_v60  ;;  %v10242_v48 = vadd.f32 %v10241_v2, %v10240_v59  ;;  %4843 = vmatprep.subr.bf16.mxu1 %v11861_v30  ;;  %4731 = vmatpush1.bf16.msra.mxu0 %v11856_v36  ;;  %v11870_v17 = vld [vmem:[#allocation12 + $0xa4] ss:$16 sps:$4 sm:$0xff]   ;;  %v11885_v30 = vld [vmem:[#allocation12 + $0xec] ss:$16 sps:$4 sm:$0xff]   ;;  %v11880_v36 = vld [vmem:[#allocation12 + $0xe0] ss:$16 sps:$4 sm:$0xff]  }
 0x2b8   :  { %4093 = vmatmul.mubr.bf16.gmra.mrb[244].mxu0 %v13375_v62  ;;  %4190 = vmatmul.mubr.bf16.gmra.mrb[244].mxu1 %v13378_v4 }
 0x2b9   :  { %v13448_v35 = vadd.f32 %v10239_v0, %v3489_v43  ;;  %v3492_v40 = vadd.f32 %v10178_v49, %v13424_v10  ;;  %4100 = vmatprep.mubr.bf16.mxu0 %v13400_v28  ;;  %4197 = vmatprep.mubr.bf16.mxu1 %v13402_v55  ;;  %v11859_v28 = vld [vmem:[#allocation12 + $0x68] ss:$16 sps:$4 sm:$0xff]  }
 0x2ba   :  { %4844 = vmatpush1.bf16.msra.mxu1 %v11859_v28  ;;  %4732 = vmatprep.subr.bf16.mxu0 %v11864_v23  ;;  %v11883_v28 = vld [vmem:[#allocation12 + $0xe8] ss:$16 sps:$4 sm:$0xff]   ;;  %v11891_v23 = vld [vmem:[#allocation12 + $0x10c] ss:$16 sps:$4 sm:$0xff]  }
 0x2bb   :  { %v13454_v38 = vadd.f32 %v10242_v48, %v3492_v40  ;;  %v10179_v37 = vpop.f32.mrb[140].mxu0  ;;  %v10243_v62 = vpop.f32.mrb[140].mxu1  ;;  %4845 = vmatprep.subr.bf16.mxu1 %v11867_v16  ;;  %4733 = vmatpush1.bf16.msra.mxu0 %v11862_v11  ;;  %v11876_v48 = vld [vmem:[#allocation12 + $0xc4] ss:$16 sps:$4 sm:$0xff]   ;;  %v11886_v11 = vld [vmem:[#allocation12 + $0x100] ss:$16 sps:$4 sm:$0xff]  }
 0x2bc   :  { %v10180_v26 = vpop.f32.mrb[141].mxu0  ;;  %v10244_v3 = vpop.f32.mrb[141].mxu1  ;;  %4734 = vmatprep.subr.bf16.mxu0 %v11870_v17 }
 0x2bd   :  { %v10181_v56 = vadd.f32 %v10180_v26, %v10179_v37  ;;  %v10182_v4 = vpop.f32.mrb[142].mxu0  ;;  %v10245_v12 = vadd.f32 %v10244_v3, %v10243_v62  ;;  %v10246_v6 = vpop.f32.mrb[142].mxu1 }
 0x2be   :  { %v10183_v57 = vpop.f32.mrb[143].mxu0  ;;  %v10247_v22 = vpop.f32.mrb[143].mxu1  ;;  %4846 = vmatpush1.bf16.msra.mxu1 %v11865_v53  ;;  %v11889_v53 = vld [vmem:[#allocation12 + $0x108] ss:$16 sps:$4 sm:$0xff]  }
 0x2bf   :  { %v3497_v55 = vadd.f32 %v10181_v56, %v13424_v10  ;;  %v10184_v5 = vadd.f32 %v10183_v57, %v10182_v4  ;;  %v10248_v54 = vadd.f32 %v10247_v22, %v10246_v6  ;;  %4847 = vmatprep.subr.bf16.mxu1 %v11873_v13  ;;  %4735 = vmatpush1.bf16.msra.mxu0 %v11868_v24  ;;  %v11894_v13 = vld [vmem:[#allocation12 + $0x124] ss:$16 sps:$4 sm:$0xff]  }
 0x2c0   :  { %4101 = vmatmul.mubr.bf16.gmra.mrb[248].mxu0 %v13395_v18  ;;  %4198 = vmatmul.mubr.bf16.gmra.mrb[248].mxu1 %v13398_v63 }
 0x2c1   :  { %v13458_v1 = vadd.f32 %v10245_v12, %v3497_v55  ;;  %v3500_v27 = vadd.f32 %v10184_v5, %v13424_v10  ;;  %4108 = vmatprep.mubr.bf16.mxu0 %v13420_v44  ;;  %4205 = vmatprep.mubr.bf16.mxu1 %v13422_v25  ;;  %v11871_v44 = vld [vmem:[#allocation12 + $0xa8] ss:$16 sps:$4 sm:$0xff]  }
 0x2c2   :  { %4848 = vmatpush1.bf16.msra.mxu1 %v11871_v44  ;;  %4736 = vmatprep.subr.bf16.mxu0 %v11876_v48  ;;  %v11892_v44 = vld [vmem:[#allocation12 + $0x120] ss:$16 sps:$4 sm:$0xff]  }
 0x2c3   :  { %v13464_v33 = vadd.f32 %v10248_v54, %v3500_v27  ;;  %v10185_v20 = vpop.f32.mrb[144].mxu0  ;;  %v10249_v18 = vpop.f32.mrb[144].mxu1  ;;  %4849 = vmatprep.subr.bf16.mxu1 %v11879_v21  ;;  %4737 = vmatpush1.bf16.msra.mxu0 %v11874_v15  ;;  %v11888_v54 = vld [vmem:[#allocation12 + $0x104] ss:$16 sps:$4 sm:$0xff]  }
 0x2c4   :  { %v10186_v61 = vpop.f32.mrb[145].mxu0  ;;  %v10250_v32 = vpop.f32.mrb[145].mxu1  ;;  %v11900_v21 = vld [vmem:[#allocation12 + $0x144] ss:$16 sps:$4 sm:$0xff]  }
 0x2c5   :  { %v10187_v60 = vadd.f32 %v10186_v61, %v10185_v20  ;;  %v10188_v63 = vpop.f32.mrb[146].mxu0  ;;  %v10251_v0 = vadd.f32 %v10250_v32, %v10249_v18  ;;  %v10252_v59 = vpop.f32.mrb[146].mxu1 }
 0x2c6   :  { %v10189_v14 = vpop.f32.mrb[147].mxu0  ;;  %v10253_v49 = vpop.f32.mrb[147].mxu1  ;;  %4850 = vmatpush1.bf16.msra.mxu1 %v11877_v9 }
 0x2c7   :  { %v3505_v25 = vadd.f32 %v10187_v60, %v13424_v10  ;;  %v10190_v43 = vadd.f32 %v10189_v14, %v10188_v63  ;;  %v10254_v2 = vadd.f32 %v10253_v49, %v10252_v59  ;;  %4851 = vmatprep.subr.bf16.mxu1 %v11885_v30  ;;  %v11897_v60 = vld [vmem:[#allocation12 + $0x12c] ss:$16 sps:$4 sm:$0xff]  }
 0x2c8   :  { %4109 = vmatmul.mubr.bf16.gmra.mrb[252].mxu0 %v13415_v58  ;;  %4206 = vmatmul.mubr.bf16.gmra.mrb[252].mxu1 %v13418_v50  ;;  %v11882_v58 = vld [vmem:[#allocation12 + $0xe4] ss:$16 sps:$4 sm:$0xff]  }
 0x2c9   :  { %v13468_v51 = vadd.f32 %v10251_v0, %v3505_v25  ;;  %v3508_v40 = vadd.f32 %v10190_v43, %v13424_v10  ;;  %4738 = vmatprep.subr.bf16.mxu0 %v11882_v58  ;;  %v11895_v0 = vld [vmem:[#allocation12 + $0x128] ss:$16 sps:$4 sm:$0xff]  }
 0x2ca   :  { %4739 = vmatpush1.bf16.msra.mxu0 %v11880_v36  ;;  %4852 = vmatpush1.bf16.msra.mxu1 %v11883_v28 }
 0x2cb   :  { %v13472_v37 = vadd.f32 %v10254_v2, %v3508_v40  ;;  %v10191_v62 = vpop.f32.mrb[148].mxu0  ;;  %v10255_v26 = vpop.f32.mrb[148].mxu1  ;;  %4740 = vmatprep.subr.bf16.mxu0 %v11888_v54  ;;  %4853 = vmatprep.subr.bf16.mxu1 %v11891_v23  ;;  %v11903_v40 = vld [vmem:[#allocation12 + $0x14c] ss:$16 sps:$4 sm:$0xff]  }
 0x2cc   :  { %v10192_v8 = vpop.f32.mrb[149].mxu0  ;;  %v10256_v3 = vpop.f32.mrb[149].mxu1 }
 0x2cd   :  { %v10193_v56 = vadd.f32 %v10192_v8, %v10191_v62  ;;  %v10194_v4 = vpop.f32.mrb[150].mxu0  ;;  %v10257_v12 = vadd.f32 %v10256_v3, %v10255_v26  ;;  %v10258_v50 = vpop.f32.mrb[150].mxu1  ;;  %v11898_v62 = vld [vmem:[#allocation12 + $0x140] ss:$16 sps:$4 sm:$0xff]   ;;  %v11901_v26 = vld [vmem:[#allocation12 + $0x148] ss:$16 sps:$4 sm:$0xff]  }
 0x2ce   :  { %v10195_v6 = vpop.f32.mrb[151].mxu0  ;;  %v10259_v5 = vpop.f32.mrb[151].mxu1  ;;  %4741 = vmatpush1.bf16.msra.mxu0 %v11886_v11  ;;  %4854 = vmatpush1.bf16.msra.mxu1 %v11889_v53  ;;  %v11906_v3 = vld [vmem:[#allocation12 + $0x164] ss:$16 sps:$4 sm:$0xff]   ;;  %v11915_v53 = vld [vmem:[#allocation12 + $0x18c] ss:$16 sps:$4 sm:$0xff]  }
 0x2cf   :  { %v3513_v57 = vadd.f32 %v10193_v56, %v13424_v10  ;;  %v10196_v55 = vadd.f32 %v10195_v6, %v10194_v4  ;;  %v10260_v22 = vadd.f32 %v10259_v5, %v10258_v50  ;;  %4742 = vmatprep.subr.bf16.mxu0 %v11894_v13  ;;  %4855 = vmatprep.subr.bf16.mxu1 %v11897_v60  ;;  %v11909_v4 = vld [vmem:[#allocation12 + $0x16c] ss:$16 sps:$4 sm:$0xff]   ;;  %v11904_v50 = vld [vmem:[#allocation12 + $0x160] ss:$16 sps:$4 sm:$0xff]   ;;  %v11907_v6 = vld [vmem:[#allocation12 + $0x168] ss:$16 sps:$4 sm:$0xff]  }
 0x2d0   :  { %v11912_v11 = vld [vmem:[#allocation12 + $0x184] ss:$16 sps:$4 sm:$0xff]   ;;  %v11913_v13 = vld [vmem:[#allocation12 + $0x188] ss:$16 sps:$4 sm:$0xff]  }
 0x2d1   :  { %v13475_v16 = vadd.f32 %v10257_v12, %v3513_v57  ;;  %v3516_v27 = vadd.f32 %v10196_v55, %v13424_v10 }
 0x2d2   :  { %4743 = vmatpush1.bf16.msra.mxu0 %v11892_v44  ;;  %4856 = vmatpush1.bf16.msra.mxu1 %v11895_v0  ;;  %v11918_v44 = vld [vmem:[#allocation12 + $0x1a4] ss:$16 sps:$4 sm:$0xff]   ;;  %v11921_v0 = vld [vmem:[#allocation12 + $0x1ac] ss:$16 sps:$4 sm:$0xff]  }
 0x2d3   :  { %v13478_v20 = vadd.f32 %v10260_v22, %v3516_v27  ;;  %v10197_v18 = vpop.f32.mrb[152].mxu0  ;;  %v10261_v61 = vpop.f32.mrb[152].mxu1  ;;  %4744 = vmatprep.subr.bf16.mxu0 %v11900_v21  ;;  %4857 = vmatprep.subr.bf16.mxu1 %v11903_v40 }
 0x2d4   :  { %v10198_v17 = vpop.f32.mrb[153].mxu0  ;;  %v10262_v63 = vpop.f32.mrb[153].mxu1 }
 0x2d5   :  { %v10199_v32 = vadd.f32 %v10198_v17, %v10197_v18  ;;  %v10200_v24 = vpop.f32.mrb[154].mxu0  ;;  %v10263_v59 = vadd.f32 %v10262_v63, %v10261_v61  ;;  %v10264_v14 = vpop.f32.mrb[154].mxu1  ;;  %v11910_v17 = vld [vmem:[#allocation12 + $0x180] ss:$16 sps:$4 sm:$0xff]  }
 0x2d6   :  { %v10201_v25 = vpop.f32.mrb[155].mxu0  ;;  %v10265_v2 = vpop.f32.mrb[155].mxu1  ;;  %4745 = vmatpush1.bf16.msra.mxu0 %v11898_v62  ;;  %4858 = vmatpush1.bf16.msra.mxu1 %v11901_v26  ;;  %v11924_v26 = vld [vmem:[#allocation12 + $0x1c4] ss:$16 sps:$4 sm:$0xff]  }
 0x2d7   :  { %v3521_v43 = vadd.f32 %v10199_v32, %v13424_v10  ;;  %v10202_v49 = vadd.f32 %v10201_v25, %v10200_v24  ;;  %v10266_v48 = vadd.f32 %v10265_v2, %v10264_v14  ;;  %4746 = vmatprep.subr.bf16.mxu0 %v11906_v3  ;;  %4859 = vmatprep.subr.bf16.mxu1 %v11909_v4  ;;  %v11922_v3 = vld [vmem:[#allocation12 + $0x1c0] ss:$16 sps:$4 sm:$0xff]   ;;  %v11925_v4 = vld [vmem:[#allocation12 + $0x1c8] ss:$16 sps:$4 sm:$0xff]  }
 0x2d9   :  { %v13481_v15 = vadd.f32 %v10263_v59, %v3521_v43  ;;  %v3524_v9 = vadd.f32 %v10202_v49, %v13424_v10  ;;  %v11916_v43 = vld [vmem:[#allocation12 + $0x1a0] ss:$16 sps:$4 sm:$0xff]   ;;  %v11919_v49 = vld [vmem:[#allocation12 + $0x1a8] ss:$16 sps:$4 sm:$0xff]  }
 0x2da   :  { %4747 = vmatpush1.bf16.msra.mxu0 %v11904_v50  ;;  %4860 = vmatpush1.bf16.msra.mxu1 %v11907_v6  ;;  %v11930_v50 = vld [vmem:[#allocation12 + $0x1e4] ss:$16 sps:$4 sm:$0xff]   ;;  %v11933_v6 = vld [vmem:[#allocation12 + $0x1ec] ss:$16 sps:$4 sm:$0xff]  }
 0x2db   :  { %v13484_v8 = vadd.f32 %v10266_v48, %v3524_v9  ;;  %v10203_v58 = vpop.f32.mrb[156].mxu0  ;;  %v10267_v30 = vpop.f32.mrb[156].mxu1  ;;  %4748 = vmatprep.subr.bf16.mxu0 %v11912_v11  ;;  %4861 = vmatprep.subr.bf16.mxu1 %v11915_v53 }
 0x2dc   :  { %v10204_v56 = vpop.f32.mrb[157].mxu0  ;;  %v10268_v28 = vpop.f32.mrb[157].mxu1 }
 0x2dd   :  { %v10205_v36 = vadd.f32 %v10204_v56, %v10203_v58  ;;  %v10206_v12 = vpop.f32.mrb[158].mxu0  ;;  %v10269_v57 = vadd.f32 %v10268_v28, %v10267_v30  ;;  %v10270_v55 = vpop.f32.mrb[158].mxu1  ;;  %v11927_v58 = vld [vmem:[#allocation12 + $0x1cc] ss:$16 sps:$4 sm:$0xff]  }
 0x2de   :  { %v10207_v5 = vpop.f32.mrb[159].mxu0  ;;  %v10271_v23 = vpop.f32.mrb[159].mxu1  ;;  %4749 = vmatpush1.bf16.msra.mxu0 %v11910_v17  ;;  %4862 = vmatpush1.bf16.msra.mxu1 %v11913_v13  ;;  %v11934_v17 = vld [vmem:[%s15253_s1] sm:$0xff]  }
 0x2df   :  { %v3529_v22 = vadd.f32 %v10205_v36, %v13424_v10  ;;  %v10208_v54 = vadd.f32 %v10207_v5, %v10206_v12  ;;  %v10272_v27 = vadd.f32 %v10271_v23, %v10270_v55  ;;  %4750 = vmatprep.subr.bf16.mxu0 %v11918_v44  ;;  %4863 = vmatprep.subr.bf16.mxu1 %v11921_v0 }
 0x2e0   :  { %4756 = vmatprep.mubr.bf16.mxu0 %v11934_v17  ;;  %4869 = vmatprep.mubr.bf16.mxu1 %v11934_v17 }
 0x2e1   :  { %v13487_v18 = vadd.f32 %v10269_v57, %v3529_v22  ;;  %v3532_v61 = vadd.f32 %v10208_v54, %v13424_v10  ;;  %v11928_v22 = vld [vmem:[#allocation12 + $0x1e0] ss:$16 sps:$4 sm:$0xff]   ;;  %v11931_v54 = vld [vmem:[#allocation12 + $0x1e8] ss:$16 sps:$4 sm:$0xff]  }
 0x2e2   :  { %4751 = vmatpush1.bf16.msra.mxu0 %v11916_v43  ;;  %4864 = vmatpush1.bf16.msra.mxu1 %v11919_v49 }
 0x2e3   :  { %v13490_v60 = vadd.f32 %v10272_v27, %v3532_v61  ;;  %v10289_v32 = vpop.f32.mrb[160].mxu0  ;;  %v10353_v63 = vpop.f32.mrb[160].mxu1  ;;  %4752 = vmatprep.subr.bf16.mxu0 %v11924_v26  ;;  %4865 = vmatprep.subr.bf16.mxu1 %v11927_v58 }
 0x2e4   :  { %v10290_v24 = vpop.f32.mrb[161].mxu0  ;;  %v10354_v14 = vpop.f32.mrb[161].mxu1 }
 0x2e5   :  { %v10291_v59 = vadd.f32 %v10290_v24, %v10289_v32  ;;  %v10292_v25 = vpop.f32.mrb[162].mxu0  ;;  %v10355_v2 = vadd.f32 %v10354_v14, %v10353_v63  ;;  %v10356_v10 = vpop.f32.mrb[162].mxu1 }
 0x2e6   :  { %v10293_v48 = vpop.f32.mrb[163].mxu0  ;;  %v10357_v9 = vpop.f32.mrb[163].mxu1  ;;  %4753 = vmatpush1.bf16.msra.mxu0 %v11922_v3  ;;  %4866 = vmatpush1.bf16.msra.mxu1 %v11925_v4 }
 0x2e7   :  { %v3667_v21 = vadd.f32 %v10291_v59, %v13428_v34  ;;  %v10294_v40 = vadd.f32 %v10293_v48, %v10292_v25  ;;  %v10358_v62 = vadd.f32 %v10357_v9, %v10356_v10  ;;  %4754 = vmatprep.subr.bf16.mxu0 %v11930_v50  ;;  %4867 = vmatprep.subr.bf16.mxu1 %v11933_v6 }
 0x2e9   :  { %v13493_v30 = vadd.f32 %v10355_v2, %v3667_v21  ;;  %v3670_v56 = vadd.f32 %v10294_v40, %v13434_v29 }
 0x2ea   :  { %4755 = vmatpush1.bf16.msra.mxu0 %v11928_v22  ;;  %4868 = vmatpush1.bf16.msra.mxu1 %v11931_v54 }
 0x2eb   :  { %v13496_v36 = vadd.f32 %v10358_v62, %v3670_v56  ;;  %v10295_v28 = vpop.f32.mrb[164].mxu0  ;;  %v10359_v34 = vpop.f32.mrb[164].mxu1 }
 0x2ec   :  { %v10296_v12 = vpop.f32.mrb[165].mxu0  ;;  %v10360_v55 = vpop.f32.mrb[165].mxu1 }
 0x2ed   :  { %v10297_v57 = vadd.f32 %v10296_v12, %v10295_v28  ;;  %v10298_v5 = vpop.f32.mrb[166].mxu0  ;;  %v10361_v23 = vadd.f32 %v10360_v55, %v10359_v34  ;;  %v10362_v29 = vpop.f32.mrb[166].mxu1 }
 0x2ee   :  { %v10299_v27 = vpop.f32.mrb[167].mxu0  ;;  %v10363_v61 = vpop.f32.mrb[167].mxu1 }
 0x2ef   :  { %v3675_v11 = vadd.f32 %v10297_v57, %v13438_v31  ;;  %v10300_v53 = vadd.f32 %v10299_v27, %v10298_v5  ;;  %v10364_v13 = vadd.f32 %v10363_v61, %v10362_v29 }
 0x2f1   :  { %v13502_v32 = vadd.f32 %v10361_v23, %v3675_v11  ;;  %v3678_v63 = vadd.f32 %v10300_v53, %v13444_v19 }
 0x2f3   :  { %v13505_v24 = vadd.f32 %v10364_v13, %v3678_v63  ;;  %v10301_v44 = vpop.f32.mrb[168].mxu0  ;;  %v10365_v0 = vpop.f32.mrb[168].mxu1 }
 0x2f4   :  { %v10302_v31 = vpop.f32.mrb[169].mxu0  ;;  %v10366_v14 = vpop.f32.mrb[169].mxu1 }
 0x2f5   :  { %v10303_v59 = vadd.f32 %v10302_v31, %v10301_v44  ;;  %v10304_v25 = vpop.f32.mrb[170].mxu0  ;;  %v10367_v43 = vadd.f32 %v10366_v14, %v10365_v0  ;;  %v10368_v49 = vpop.f32.mrb[170].mxu1 }
 0x2f6   :  { %v10305_v2 = vpop.f32.mrb[171].mxu0  ;;  %v10369_v21 = vpop.f32.mrb[171].mxu1 }
 0x2f7   :  { %v3683_v10 = vadd.f32 %v10303_v59, %v13448_v35  ;;  %v10306_v48 = vadd.f32 %v10305_v2, %v10304_v25  ;;  %v10370_v40 = vadd.f32 %v10369_v21, %v10368_v49 }
 0x2f9   :  { %v13508_v9 = vadd.f32 %v10367_v43, %v3683_v10  ;;  %v3686_v19 = vadd.f32 %v10306_v48, %v13454_v38 }
 0x2fb   :  { %v13511_v62 = vadd.f32 %v10370_v40, %v3686_v19  ;;  %v10307_v26 = vpop.f32.mrb[172].mxu0  ;;  %v10371_v58 = vpop.f32.mrb[172].mxu1 }
 0x2fc   :  { %v10308_v56 = vpop.f32.mrb[173].mxu0  ;;  %v10372_v4 = vpop.f32.mrb[173].mxu1 }
 0x2fd   :  { %v10309_v3 = vadd.f32 %v10308_v56, %v10307_v26  ;;  %v10310_v28 = vpop.f32.mrb[174].mxu0  ;;  %v10373_v34 = vadd.f32 %v10372_v4, %v10371_v58  ;;  %v10374_v12 = vpop.f32.mrb[174].mxu1 }
 0x2fe   :  { %v10311_v50 = vpop.f32.mrb[175].mxu0  ;;  %v10375_v57 = vpop.f32.mrb[175].mxu1 }
 0x2ff   :  { %v3691_v35 = vadd.f32 %v10309_v3, %v13458_v1  ;;  %v10312_v6 = vadd.f32 %v10311_v50, %v10310_v28  ;;  %v10376_v55 = vadd.f32 %v10375_v57, %v10374_v12 }
 0x301   :  { %v13514_v5 = vadd.f32 %v10373_v34, %v3691_v35  ;;  %v3694_v38 = vadd.f32 %v10312_v6, %v13464_v33 }
 0x303   :  { %v13517_v22 = vadd.f32 %v10376_v55, %v3694_v38  ;;  %v10313_v54 = vpop.f32.mrb[176].mxu0  ;;  %v10377_v23 = vpop.f32.mrb[176].mxu1 }
 0x304   :  { %v10314_v29 = vpop.f32.mrb[177].mxu0  ;;  %v10378_v11 = vpop.f32.mrb[177].mxu1 }
 0x305   :  { %v10315_v27 = vadd.f32 %v10314_v29, %v10313_v54  ;;  %v10316_v53 = vpop.f32.mrb[178].mxu0  ;;  %v10379_v61 = vadd.f32 %v10378_v11, %v10377_v23  ;;  %v10380_v17 = vpop.f32.mrb[178].mxu1 }
 0x306   :  { %v10317_v13 = vpop.f32.mrb[179].mxu0  ;;  %v10381_v44 = vpop.f32.mrb[179].mxu1 }
 0x307   :  { %v3699_v1 = vadd.f32 %v10315_v27, %v13468_v51  ;;  %v10318_v63 = vadd.f32 %v10317_v13, %v10316_v53  ;;  %v10382_v0 = vadd.f32 %v10381_v44, %v10380_v17 }
 0x309   :  { %v13520_v31 = vadd.f32 %v10379_v61, %v3699_v1  ;;  %v3702_v33 = vadd.f32 %v10318_v63, %v13472_v37 }
 0x30b   :  { %v13523_v59 = vadd.f32 %v10382_v0, %v3702_v33  ;;  %v10319_v14 = vpop.f32.mrb[180].mxu0  ;;  %v10383_v25 = vpop.f32.mrb[180].mxu1 }
 0x30c   :  { %v10320_v43 = vpop.f32.mrb[181].mxu0  ;;  %v10384_v2 = vpop.f32.mrb[181].mxu1 }
 0x30d   :  { %v10321_v49 = vadd.f32 %v10320_v43, %v10319_v14  ;;  %v10322_v10 = vpop.f32.mrb[182].mxu0  ;;  %v10385_v48 = vadd.f32 %v10384_v2, %v10383_v25  ;;  %v10386_v21 = vpop.f32.mrb[182].mxu1 }
 0x30e   :  { %v10323_v40 = vpop.f32.mrb[183].mxu0  ;;  %v10387_v26 = vpop.f32.mrb[183].mxu1 }
 0x30f   :  { %v3707_v51 = vadd.f32 %v10321_v49, %v13475_v16  ;;  %v10324_v19 = vadd.f32 %v10323_v40, %v10322_v10  ;;  %v10388_v58 = vadd.f32 %v10387_v26, %v10386_v21 }
 0x311   :  { %v13526_v56 = vadd.f32 %v10385_v48, %v3707_v51  ;;  %v3710_v37 = vadd.f32 %v10324_v19, %v13478_v20 }
 0x313   :  { %v13529_v3 = vadd.f32 %v10388_v58, %v3710_v37  ;;  %v10325_v4 = vpop.f32.mrb[184].mxu0  ;;  %v10389_v28 = vpop.f32.mrb[184].mxu1 }
 0x314   :  { %v10326_v34 = vpop.f32.mrb[185].mxu0  ;;  %v10390_v50 = vpop.f32.mrb[185].mxu1 }
 0x315   :  { %v10327_v12 = vadd.f32 %v10326_v34, %v10325_v4  ;;  %v10328_v35 = vpop.f32.mrb[186].mxu0  ;;  %v10391_v6 = vadd.f32 %v10390_v50, %v10389_v28  ;;  %v10392_v57 = vpop.f32.mrb[186].mxu1 }
 0x316   :  { %v10329_v55 = vpop.f32.mrb[187].mxu0  ;;  %v10393_v54 = vpop.f32.mrb[187].mxu1 }
 0x317   :  { %v3715_v16 = vadd.f32 %v10327_v12, %v13481_v15  ;;  %v10330_v38 = vadd.f32 %v10329_v55, %v10328_v35  ;;  %v10394_v23 = vadd.f32 %v10393_v54, %v10392_v57 }
 0x319   :  { %v13532_v29 = vadd.f32 %v10391_v6, %v3715_v16  ;;  %v3718_v20 = vadd.f32 %v10330_v38, %v13484_v8 }
 0x31b   :  { %v13535_v27 = vadd.f32 %v10394_v23, %v3718_v20  ;;  %v10331_v11 = vpop.f32.mrb[188].mxu0  ;;  %v10395_v53 = vpop.f32.mrb[188].mxu1 }
 0x31c   :  { %v10332_v61 = vpop.f32.mrb[189].mxu0  ;;  %v10396_v13 = vpop.f32.mrb[189].mxu1 }
 0x31d   :  { %v10333_v17 = vadd.f32 %v10332_v61, %v10331_v11  ;;  %v10334_v1 = vpop.f32.mrb[190].mxu0  ;;  %v10397_v63 = vadd.f32 %v10396_v13, %v10395_v53  ;;  %v10398_v44 = vpop.f32.mrb[190].mxu1 }
 0x31e   :  { %v10335_v0 = vpop.f32.mrb[191].mxu0  ;;  %v10399_v14 = vpop.f32.mrb[191].mxu1 }
 0x31f   :  { %v3723_v15 = vadd.f32 %v10333_v17, %v13487_v18  ;;  %v10336_v33 = vadd.f32 %v10335_v0, %v10334_v1  ;;  %v10400_v25 = vadd.f32 %v10399_v14, %v10398_v44 }
 0x321   :  { %v13538_v43 = vadd.f32 %v10397_v63, %v3723_v15  ;;  %v3726_v8 = vadd.f32 %v10336_v33, %v13490_v60 }
 0x323   :  { %v13541_v49 = vadd.f32 %v10400_v25, %v3726_v8  ;;  %v10417_v2 = vpop.f32.mrb[192].mxu0  ;;  %v10481_v10 = vpop.f32.mrb[192].mxu1 }
 0x324   :  { %v10418_v48 = vpop.f32.mrb[193].mxu0  ;;  %v10482_v40 = vpop.f32.mrb[193].mxu1 }
 0x325   :  { %v10419_v21 = vadd.f32 %v10418_v48, %v10417_v2  ;;  %v10420_v51 = vpop.f32.mrb[194].mxu0  ;;  %v10483_v19 = vadd.f32 %v10482_v40, %v10481_v10  ;;  %v10484_v26 = vpop.f32.mrb[194].mxu1 }
 0x326   :  { %v10421_v58 = vpop.f32.mrb[195].mxu0  ;;  %v10485_v4 = vpop.f32.mrb[195].mxu1 }
 0x327   :  { %v3861_v18 = vadd.f32 %v10419_v21, %v13493_v30  ;;  %v10422_v37 = vadd.f32 %v10421_v58, %v10420_v51  ;;  %v10486_v28 = vadd.f32 %v10485_v4, %v10484_v26 }
 0x329   :  { %v13544_v34 = vadd.f32 %v10483_v19, %v3861_v18  ;;  %v3864_v60 = vadd.f32 %v10422_v37, %v13496_v36 }
 0x32b   :  { %v13547_v12 = vadd.f32 %v10486_v28, %v3864_v60  ;;  %v10423_v50 = vpop.f32.mrb[196].mxu0  ;;  %v10487_v35 = vpop.f32.mrb[196].mxu1 }
 0x32c   :  { %v10424_v6 = vpop.f32.mrb[197].mxu0  ;;  %v10488_v55 = vpop.f32.mrb[197].mxu1 }
 0x32d   :  { %v10425_v57 = vadd.f32 %v10424_v6, %v10423_v50  ;;  %v10426_v16 = vpop.f32.mrb[198].mxu0  ;;  %v10489_v38 = vadd.f32 %v10488_v55, %v10487_v35  ;;  %v10490_v54 = vpop.f32.mrb[198].mxu1 }
 0x32e   :  { %v10427_v23 = vpop.f32.mrb[199].mxu0  ;;  %v10491_v11 = vpop.f32.mrb[199].mxu1 }
 0x32f   :  { %v3869_v30 = vadd.f32 %v10425_v57, %v13502_v32  ;;  %v10428_v20 = vadd.f32 %v10427_v23, %v10426_v16  ;;  %v10492_v53 = vadd.f32 %v10491_v11, %v10490_v54 }
 0x331   :  { %v13550_v61 = vadd.f32 %v10489_v38, %v3869_v30  ;;  %v3872_v36 = vadd.f32 %v10428_v20, %v13505_v24 }
 0x333   :  { %v13553_v17 = vadd.f32 %v10492_v53, %v3872_v36  ;;  %v10429_v13 = vpop.f32.mrb[200].mxu0  ;;  %v10493_v1 = vpop.f32.mrb[200].mxu1 }
 0x334   :  { %v10430_v63 = vpop.f32.mrb[201].mxu0  ;;  %v10494_v0 = vpop.f32.mrb[201].mxu1 }
 0x335   :  { %v10431_v44 = vadd.f32 %v10430_v63, %v10429_v13  ;;  %v10432_v15 = vpop.f32.mrb[202].mxu0  ;;  %v10495_v33 = vadd.f32 %v10494_v0, %v10493_v1  ;;  %v10496_v14 = vpop.f32.mrb[202].mxu1 }
 0x336   :  { %v10433_v25 = vpop.f32.mrb[203].mxu0  ;;  %v10497_v2 = vpop.f32.mrb[203].mxu1 }
 0x337   :  { %v3877_v32 = vadd.f32 %v10431_v44, %v13508_v9  ;;  %v10434_v8 = vadd.f32 %v10433_v25, %v10432_v15  ;;  %v10498_v10 = vadd.f32 %v10497_v2, %v10496_v14 }
 0x339   :  { %v13556_v48 = vadd.f32 %v10495_v33, %v3877_v32  ;;  %v3880_v24 = vadd.f32 %v10434_v8, %v13511_v62 }
 0x33b   :  { %v13559_v21 = vadd.f32 %v10498_v10, %v3880_v24  ;;  %v10435_v40 = vpop.f32.mrb[204].mxu0  ;;  %v10499_v51 = vpop.f32.mrb[204].mxu1 }
 0x33c   :  { %v10436_v19 = vpop.f32.mrb[205].mxu0  ;;  %v10500_v58 = vpop.f32.mrb[205].mxu1 }
 0x33d   :  { %v10437_v26 = vadd.f32 %v10436_v19, %v10435_v40  ;;  %v10438_v18 = vpop.f32.mrb[206].mxu0  ;;  %v10501_v37 = vadd.f32 %v10500_v58, %v10499_v51  ;;  %v10502_v4 = vpop.f32.mrb[206].mxu1 }
 0x33e   :  { %v10439_v28 = vpop.f32.mrb[207].mxu0  ;;  %v10503_v50 = vpop.f32.mrb[207].mxu1 }
 0x33f   :  { %v3885_v9 = vadd.f32 %v10437_v26, %v13514_v5  ;;  %v10440_v60 = vadd.f32 %v10439_v28, %v10438_v18  ;;  %v10504_v35 = vadd.f32 %v10503_v50, %v10502_v4 }
 0x341   :  { %v13562_v6 = vadd.f32 %v10501_v37, %v3885_v9  ;;  %v3888_v62 = vadd.f32 %v10440_v60, %v13517_v22 }
 0x343   :  { %v13565_v57 = vadd.f32 %v10504_v35, %v3888_v62  ;;  %v10441_v55 = vpop.f32.mrb[208].mxu0  ;;  %v10505_v16 = vpop.f32.mrb[208].mxu1 }
 0x344   :  { %v10442_v38 = vpop.f32.mrb[209].mxu0  ;;  %v10506_v23 = vpop.f32.mrb[209].mxu1 }
 0x345   :  { %v10443_v54 = vadd.f32 %v10442_v38, %v10441_v55  ;;  %v10444_v30 = vpop.f32.mrb[210].mxu0  ;;  %v10507_v20 = vadd.f32 %v10506_v23, %v10505_v16  ;;  %v10508_v11 = vpop.f32.mrb[210].mxu1 }
 0x346   :  { %v10445_v53 = vpop.f32.mrb[211].mxu0  ;;  %v10509_v13 = vpop.f32.mrb[211].mxu1 }
 0x347   :  { %v3893_v5 = vadd.f32 %v10443_v54, %v13520_v31  ;;  %v10446_v36 = vadd.f32 %v10445_v53, %v10444_v30  ;;  %v10510_v1 = vadd.f32 %v10509_v13, %v10508_v11 }
 0x349   :  { %v13568_v63 = vadd.f32 %v10507_v20, %v3893_v5  ;;  %v3896_v22 = vadd.f32 %v10446_v36, %v13523_v59 }
 0x34b   :  { %v13571_v44 = vadd.f32 %v10510_v1, %v3896_v22  ;;  %v10447_v0 = vpop.f32.mrb[212].mxu0  ;;  %v10511_v15 = vpop.f32.mrb[212].mxu1 }
 0x34c   :  { %v10448_v33 = vpop.f32.mrb[213].mxu0  ;;  %v10512_v25 = vpop.f32.mrb[213].mxu1 }
 0x34d   :  { %v10449_v14 = vadd.f32 %v10448_v33, %v10447_v0  ;;  %v10450_v32 = vpop.f32.mrb[214].mxu0  ;;  %v10513_v8 = vadd.f32 %v10512_v25, %v10511_v15  ;;  %v10514_v2 = vpop.f32.mrb[214].mxu1 }
 0x34e   :  { %v10451_v10 = vpop.f32.mrb[215].mxu0  ;;  %v10515_v40 = vpop.f32.mrb[215].mxu1 }
 0x34f   :  { %v3901_v31 = vadd.f32 %v10449_v14, %v13526_v56  ;;  %v10452_v24 = vadd.f32 %v10451_v10, %v10450_v32  ;;  %v10516_v51 = vadd.f32 %v10515_v40, %v10514_v2 }
 0x351   :  { %v13574_v19 = vadd.f32 %v10513_v8, %v3901_v31  ;;  %v3904_v59 = vadd.f32 %v10452_v24, %v13529_v3 }
 0x353   :  { %v13577_v26 = vadd.f32 %v10516_v51, %v3904_v59  ;;  %v10453_v58 = vpop.f32.mrb[216].mxu0  ;;  %v10517_v18 = vpop.f32.mrb[216].mxu1 }
 0x354   :  { %v10454_v37 = vpop.f32.mrb[217].mxu0  ;;  %v10518_v28 = vpop.f32.mrb[217].mxu1 }
 0x355   :  { %v10455_v4 = vadd.f32 %v10454_v37, %v10453_v58  ;;  %v10456_v9 = vpop.f32.mrb[218].mxu0  ;;  %v10519_v60 = vadd.f32 %v10518_v28, %v10517_v18  ;;  %v10520_v50 = vpop.f32.mrb[218].mxu1 }
 0x356   :  { %v10457_v35 = vpop.f32.mrb[219].mxu0  ;;  %v10521_v55 = vpop.f32.mrb[219].mxu1 }
 0x357   :  { %v3909_v56 = vadd.f32 %v10455_v4, %v13532_v29  ;;  %v10458_v62 = vadd.f32 %v10457_v35, %v10456_v9  ;;  %v10522_v16 = vadd.f32 %v10521_v55, %v10520_v50 }
 0x359   :  { %v13580_v38 = vadd.f32 %v10519_v60, %v3909_v56  ;;  %v3912_v3 = vadd.f32 %v10458_v62, %v13535_v27 }
 0x35b   :  { %v13583_v54 = vadd.f32 %v10522_v16, %v3912_v3  ;;  %v10459_v23 = vpop.f32.mrb[220].mxu0  ;;  %v10523_v30 = vpop.f32.mrb[220].mxu1 }
 0x35c   :  { %v10460_v20 = vpop.f32.mrb[221].mxu0  ;;  %v10524_v53 = vpop.f32.mrb[221].mxu1 }
 0x35d   :  { %v10461_v11 = vadd.f32 %v10460_v20, %v10459_v23  ;;  %v10462_v5 = vpop.f32.mrb[222].mxu0  ;;  %v10525_v36 = vadd.f32 %v10524_v53, %v10523_v30  ;;  %v10526_v13 = vpop.f32.mrb[222].mxu1 }
 0x35e   :  { %v10463_v1 = vpop.f32.mrb[223].mxu0  ;;  %v10527_v0 = vpop.f32.mrb[223].mxu1 }
 0x35f   :  { %v3917_v29 = vadd.f32 %v10461_v11, %v13538_v43  ;;  %v10464_v22 = vadd.f32 %v10463_v1, %v10462_v5  ;;  %v10528_v15 = vadd.f32 %v10527_v0, %v10526_v13 }
 0x361   :  { %v13586_v33 = vadd.f32 %v10525_v36, %v3917_v29  ;;  %v3920_v27 = vadd.f32 %v10464_v22, %v13541_v49 }
 0x363   :  { %v13589_v14 = vadd.f32 %v10528_v15, %v3920_v27  ;;  %v10545_v25 = vpop.f32.mrb[224].mxu0  ;;  %v10609_v32 = vpop.f32.mrb[224].mxu1 }
 0x364   :  { %v10546_v8 = vpop.f32.mrb[225].mxu0  ;;  %v10610_v10 = vpop.f32.mrb[225].mxu1 }
 0x365   :  { %v10547_v2 = vadd.f32 %v10546_v8, %v10545_v25  ;;  %v10548_v31 = vpop.f32.mrb[226].mxu0  ;;  %v10611_v24 = vadd.f32 %v10610_v10, %v10609_v32  ;;  %v10612_v40 = vpop.f32.mrb[226].mxu1 }
 0x366   :  { %v10549_v51 = vpop.f32.mrb[227].mxu0  ;;  %v10613_v58 = vpop.f32.mrb[227].mxu1 }
 0x367   :  { %v4055_v43 = vadd.f32 %v10547_v2, %v13544_v34  ;;  %v10550_v59 = vadd.f32 %v10549_v51, %v10548_v31  ;;  %v10614_v18 = vadd.f32 %v10613_v58, %v10612_v40  ;;  %v11935_v34 = vld [vmem:[%s15253_s1 + $0x8] sm:$0xff]  }
 0x369   :  { %v4152_v37 = vadd.f32 %v10611_v24, %v4055_v43  ;;  %v4058_v4 = vadd.f32 %v10550_v59, %v13547_v12 }
 0x36b   :  { %v4155_v49 = vadd.f32 %v10614_v18, %v4058_v4  ;;  %v10551_v28 = vpop.f32.mrb[228].mxu0  ;;  %v10615_v9 = vpop.f32.mrb[228].mxu1  ;;  %v4214_v50 = vmax.f32 %v4152_v37, 0.0 }
 0x36c   :  { %v10552_v60 = vpop.f32.mrb[229].mxu0  ;;  %v10616_v62 = vpop.f32.mrb[229].mxu1 }
 0x36d   :  { %v4215_v35 = vmax.f32 %v4155_v49, 0.0  ;;  %v10553_v56 = vadd.f32 %v10552_v60, %v10551_v28  ;;  %v10554_v55 = vpop.f32.mrb[230].mxu0  ;;  %v10617_v16 = vadd.f32 %v10616_v62, %v10615_v9  ;;  %v10618_v3 = vpop.f32.mrb[230].mxu1 }
 0x36e   :  { %v10555_v23 = vpop.f32.mrb[231].mxu0  ;;  %v10619_v11 = vpop.f32.mrb[231].mxu1 }
 0x36f   :  { %v4230_v30 = vpack.c.bf16 %v4215_v35, %v4214_v50  ;;  %v4063_v20 = vadd.f32 %v10553_v56, %v13550_v61  ;;  %v10556_v12 = vadd.f32 %v10555_v23, %v10554_v55  ;;  %v10620_v53 = vadd.f32 %v10619_v11, %v10618_v3 }
 0x371   :  { %v4160_v5 = vadd.f32 %v10617_v16, %v4063_v20  ;;  %v4066_v36 = vadd.f32 %v10556_v12, %v13553_v17  ;;  %4757 = vmatmul.mubr.bf16.vlgmr.msra.gmra.mrb[0].mxu0 %v4230_v30  ;;  %4870 = vmatmul.mubr.bf16.vlgmr.msra.gmra.mrb[0].mxu1 %v4230_v30  ;;  %v11936_v17 = vld [vmem:[%s15253_s1 + $0x10] sm:$0xff]  }
 0x372   :  { %4766 = vmatprep.mubr.bf16.mxu0 %v11935_v34  ;;  %4879 = vmatprep.mubr.bf16.mxu1 %v11935_v34 }
 0x373   :  { %v4163_v13 = vadd.f32 %v10620_v53, %v4066_v36  ;;  %v10557_v1 = vpop.f32.mrb[232].mxu0  ;;  %v10621_v29 = vpop.f32.mrb[232].mxu1  ;;  %v4216_v0 = vmax.f32 %v4160_v5, 0.0 }
 0x374   :  { %v10558_v22 = vpop.f32.mrb[233].mxu0  ;;  %v10622_v25 = vpop.f32.mrb[233].mxu1 }
 0x375   :  { %v4217_v15 = vmax.f32 %v4163_v13, 0.0  ;;  %v10559_v27 = vadd.f32 %v10558_v22, %v10557_v1  ;;  %v10560_v32 = vpop.f32.mrb[234].mxu0  ;;  %v10623_v61 = vadd.f32 %v10622_v25, %v10621_v29  ;;  %v10624_v8 = vpop.f32.mrb[234].mxu1 }
 0x376   :  { %v10561_v2 = vpop.f32.mrb[235].mxu0  ;;  %v10625_v40 = vpop.f32.mrb[235].mxu1 }
 0x377   :  { %v4231_v10 = vpack.c.bf16 %v4217_v15, %v4216_v0  ;;  %v4071_v31 = vadd.f32 %v10559_v27, %v13556_v48  ;;  %v10562_v24 = vadd.f32 %v10561_v2, %v10560_v32  ;;  %v10626_v51 = vadd.f32 %v10625_v40, %v10624_v8 }
 0x379   :  { %v4168_v43 = vadd.f32 %v10623_v61, %v4071_v31  ;;  %v4074_v59 = vadd.f32 %v10562_v24, %v13559_v21  ;;  %4767 = vmatmul.mubr.bf16.gmra.mrb[4].mxu0 %v4231_v10  ;;  %4880 = vmatmul.mubr.bf16.gmra.mrb[4].mxu1 %v4231_v10  ;;  %v11937_v21 = vld [vmem:[%s15253_s1 + $0x18] sm:$0xff]  }
 0x37a   :  { %4776 = vmatprep.mubr.bf16.mxu0 %v11936_v17  ;;  %4889 = vmatprep.mubr.bf16.mxu1 %v11936_v17 }
 0x37b   :  { %v4171_v58 = vadd.f32 %v10626_v51, %v4074_v59  ;;  %v10563_v18 = vpop.f32.mrb[236].mxu0  ;;  %v10627_v37 = vpop.f32.mrb[236].mxu1  ;;  %v4218_v49 = vmax.f32 %v4168_v43, 0.0 }
 0x37c   :  { %v10564_v4 = vpop.f32.mrb[237].mxu0  ;;  %v10628_v60 = vpop.f32.mrb[237].mxu1 }
 0x37d   :  { %v4219_v28 = vmax.f32 %v4171_v58, 0.0  ;;  %v10565_v9 = vadd.f32 %v10564_v4, %v10563_v18  ;;  %v10566_v50 = vpop.f32.mrb[238].mxu0  ;;  %v10629_v48 = vadd.f32 %v10628_v60, %v10627_v37  ;;  %v10630_v35 = vpop.f32.mrb[238].mxu1 }
 0x37e   :  { %v10567_v56 = vpop.f32.mrb[239].mxu0  ;;  %v10631_v3 = vpop.f32.mrb[239].mxu1 }
 0x37f   :  { %v4232_v62 = vpack.c.bf16 %v4219_v28, %v4218_v49  ;;  %v4079_v55 = vadd.f32 %v10565_v9, %v13562_v6  ;;  %v10568_v16 = vadd.f32 %v10567_v56, %v10566_v50  ;;  %v10632_v23 = vadd.f32 %v10631_v3, %v10630_v35 }
 0x381   :  { %v4176_v34 = vadd.f32 %v10629_v48, %v4079_v55  ;;  %v4082_v30 = vadd.f32 %v10568_v16, %v13565_v57  ;;  %4777 = vmatmul.mubr.bf16.gmra.mrb[8].mxu0 %v4232_v62  ;;  %4890 = vmatmul.mubr.bf16.gmra.mrb[8].mxu1 %v4232_v62  ;;  %v11938_v57 = vld [vmem:[%s15253_s1 + $0x20] sm:$0xff]  }
 0x382   :  { %4786 = vmatprep.mubr.bf16.mxu0 %v11937_v21  ;;  %4899 = vmatprep.mubr.bf16.mxu1 %v11937_v21 }
 0x383   :  { %v4179_v20 = vadd.f32 %v10632_v23, %v4082_v30  ;;  %v10569_v12 = vpop.f32.mrb[240].mxu0  ;;  %v10633_v11 = vpop.f32.mrb[240].mxu1  ;;  %v4220_v5 = vmax.f32 %v4176_v34, 0.0 }
 0x384   :  { %v10570_v53 = vpop.f32.mrb[241].mxu0  ;;  %v10634_v1 = vpop.f32.mrb[241].mxu1 }
 0x385   :  { %v4221_v36 = vmax.f32 %v4179_v20, 0.0  ;;  %v10571_v13 = vadd.f32 %v10570_v53, %v10569_v12  ;;  %v10572_v29 = vpop.f32.mrb[242].mxu0  ;;  %v10635_v6 = vadd.f32 %v10634_v1, %v10633_v11  ;;  %v10636_v22 = vpop.f32.mrb[242].mxu1 }
 0x386   :  { %v10573_v0 = vpop.f32.mrb[243].mxu0  ;;  %v10637_v32 = vpop.f32.mrb[243].mxu1 }
 0x387   :  { %v4233_v15 = vpack.c.bf16 %v4221_v36, %v4220_v5  ;;  %v4087_v27 = vadd.f32 %v10571_v13, %v13568_v63  ;;  %v10574_v25 = vadd.f32 %v10573_v0, %v10572_v29  ;;  %v10638_v61 = vadd.f32 %v10637_v32, %v10636_v22 }
 0x389   :  { %v4184_v8 = vadd.f32 %v10635_v6, %v4087_v27  ;;  %v4090_v2 = vadd.f32 %v10574_v25, %v13571_v44  ;;  %4787 = vmatmul.mubr.bf16.gmra.mrb[12].mxu0 %v4233_v15  ;;  %4900 = vmatmul.mubr.bf16.gmra.mrb[12].mxu1 %v4233_v15  ;;  %v11939_v44 = vld [vmem:[%s15253_s1 + $0x28] sm:$0xff]  }
 0x38a   :  { %4796 = vmatprep.mubr.bf16.mxu0 %v11938_v57  ;;  %4909 = vmatprep.mubr.bf16.mxu1 %v11938_v57 }
 0x38b   :  { %v4187_v17 = vadd.f32 %v10638_v61, %v4090_v2  ;;  %v10575_v10 = vpop.f32.mrb[244].mxu0  ;;  %v10639_v31 = vpop.f32.mrb[244].mxu1  ;;  %v4222_v40 = vmax.f32 %v4184_v8, 0.0 }
 0x38c   :  { %v10576_v24 = vpop.f32.mrb[245].mxu0  ;;  %v10640_v59 = vpop.f32.mrb[245].mxu1 }
 0x38d   :  { %v4223_v51 = vmax.f32 %v4187_v17, 0.0  ;;  %v10577_v43 = vadd.f32 %v10576_v24, %v10575_v10  ;;  %v10578_v58 = vpop.f32.mrb[246].mxu0  ;;  %v10641_v63 = vadd.f32 %v10640_v59, %v10639_v31  ;;  %v10642_v18 = vpop.f32.mrb[246].mxu1 }
 0x38e   :  { %v10579_v37 = vpop.f32.mrb[247].mxu0  ;;  %v10643_v9 = vpop.f32.mrb[247].mxu1 }
 0x38f   :  { %v4234_v4 = vpack.c.bf16 %v4223_v51, %v4222_v40  ;;  %v4095_v49 = vadd.f32 %v10577_v43, %v13574_v19  ;;  %v10580_v28 = vadd.f32 %v10579_v37, %v10578_v58  ;;  %v10644_v60 = vadd.f32 %v10643_v9, %v10642_v18  ;;  %v4382_v18 = vld [vmem:[#allocation13] sm:$0xf] }
 0x390   :  { %v13629_v37 = vrot.slane %v4382_v18, %v12687_v42 }
 0x391   :  { %v4192_v50 = vadd.f32 %v10641_v63, %v4095_v49  ;;  %v4098_v48 = vadd.f32 %v10580_v28, %v13577_v26  ;;  %4797 = vmatmul.mubr.bf16.gmra.mrb[16].mxu0 %v4234_v4  ;;  %4910 = vmatmul.mubr.bf16.gmra.mrb[16].mxu1 %v4234_v4  ;;  %v11940_v26 = vld [vmem:[%s15253_s1 + $0x30] sm:$0xff]  }
 0x392   :  { %4806 = vmatprep.mubr.bf16.mxu0 %v11939_v44  ;;  %4919 = vmatprep.mubr.bf16.mxu1 %v11939_v44  ;;  %v13635_v44 = vrot.slane %v4382_v18, %v12695_v46 }
 0x393   :  { %v4195_v35 = vadd.f32 %v10644_v60, %v4098_v48  ;;  %v10581_v56 = vpop.f32.mrb[248].mxu0  ;;  %v10645_v21 = vpop.f32.mrb[248].mxu1  ;;  %v4224_v55 = vmax.f32 %v4192_v50, 0.0 }
 0x394   :  { %v10582_v62 = vpop.f32.mrb[249].mxu0  ;;  %v10646_v23 = vpop.f32.mrb[249].mxu1 }
 0x395   :  { %v4225_v16 = vmax.f32 %v4195_v35, 0.0  ;;  %v10583_v3 = vadd.f32 %v10582_v62, %v10581_v56  ;;  %v10584_v34 = vpop.f32.mrb[250].mxu0  ;;  %v10647_v19 = vadd.f32 %v10646_v23, %v10645_v21  ;;  %v10648_v30 = vpop.f32.mrb[250].mxu1 }
 0x396   :  { %v10585_v20 = vpop.f32.mrb[251].mxu0  ;;  %v10649_v5 = vpop.f32.mrb[251].mxu1 }
 0x397   :  { %v4235_v12 = vpack.c.bf16 %v4225_v16, %v4224_v55  ;;  %v4103_v11 = vadd.f32 %v10583_v3, %v13580_v38  ;;  %v10586_v53 = vadd.f32 %v10585_v20, %v10584_v34  ;;  %v10650_v36 = vadd.f32 %v10649_v5, %v10648_v30 }
 0x399   :  { %v4200_v13 = vadd.f32 %v10647_v19, %v4103_v11  ;;  %v4106_v1 = vadd.f32 %v10586_v53, %v13583_v54  ;;  %4807 = vmatmul.mubr.bf16.gmra.mrb[20].mxu0 %v4235_v12  ;;  %4920 = vmatmul.mubr.bf16.gmra.mrb[20].mxu1 %v4235_v12  ;;  %v11941_v54 = vld [vmem:[%s15253_s1 + $0x38] sm:$0xff]  }
 0x39a   :  { %4816 = vmatprep.mubr.bf16.mxu0 %v11940_v26  ;;  %4929 = vmatprep.mubr.bf16.mxu1 %v11940_v26 }
 0x39b   :  { %v4203_v29 = vadd.f32 %v10650_v36, %v4106_v1  ;;  %v10587_v6 = vpop.f32.mrb[252].mxu0  ;;  %v10651_v22 = vpop.f32.mrb[252].mxu1  ;;  %v4226_v57 = vmax.f32 %v4200_v13, 0.0 }
 0x39c   :  { %v10588_v0 = vpop.f32.mrb[253].mxu0  ;;  %v10652_v25 = vpop.f32.mrb[253].mxu1 }
 0x39d   :  { %v4227_v15 = vmax.f32 %v4203_v29, 0.0  ;;  %v10589_v27 = vadd.f32 %v10588_v0, %v10587_v6  ;;  %v10590_v32 = vpop.f32.mrb[254].mxu0  ;;  %v10653_v38 = vadd.f32 %v10652_v25, %v10651_v22  ;;  %v10654_v61 = vpop.f32.mrb[254].mxu1 }
 0x39e   :  { %v10591_v8 = vpop.f32.mrb[255].mxu0  ;;  %v10655_v31 = vpop.f32.mrb[255].mxu1 }
 0x39f   :  { %v4236_v2 = vpack.c.bf16 %v4227_v15, %v4226_v57  ;;  %v4111_v17 = vadd.f32 %v10589_v27, %v13586_v33  ;;  %v10592_v10 = vadd.f32 %v10591_v8, %v10590_v32  ;;  %v10656_v24 = vadd.f32 %v10655_v31, %v10654_v61 }
 0x3a0   :  { %v13632_v33 = vrot.slane %v4382_v18, %v12692_v45 }
 0x3a1   :  { %v4208_v40 = vadd.f32 %v10653_v38, %v4111_v17  ;;  %v4114_v51 = vadd.f32 %v10592_v10, %v13589_v14  ;;  %4817 = vmatmul.mubr.bf16.gmra.mrb[24].mxu0 %v4236_v2  ;;  %4930 = vmatmul.mubr.bf16.gmra.mrb[24].mxu1 %v4236_v2  ;;  %v13638_v14 = vrot.slane %v4382_v18, %v12698_v47 }
 0x3a2   :  { %4826 = vmatprep.mubr.bf16.mxu0 %v11941_v54  ;;  %4939 = vmatprep.mubr.bf16.mxu1 %v11941_v54 }
 0x3a3   :  { %v4211_v43 = vadd.f32 %v10656_v24, %v4114_v51  ;;  %v4228_v59 = vmax.f32 %v4208_v40, 0.0 }
 0x3a5   :  { %v4229_v58 = vmax.f32 %v4211_v43, 0.0 }
 0x3a7   :  { %v4237_v63 = vpack.c.bf16 %v4229_v58, %v4228_v59 }
 0x3a9   :  { %4827 = vmatmul.mubr.bf16.gmra.mrb[28].mxu0 %v4237_v63  ;;  %4940 = vmatmul.mubr.bf16.gmra.mrb[28].mxu1 %v4237_v63 }
 0x444   :  { %v4758_v4 = vpop.f32.mrb[0].mxu0  ;;  %v4871_v49 = vpop.f32.mrb[0].mxu1 }
 0x445   :  { %v13641_v28 = vadd.f32 %v4758_v4, %v13629_v37  ;;  %v13644_v9 = vadd.f32 %v4871_v49, %v13632_v33  ;;  %v4760_v60 = vpop.f32.mrb[1].mxu0  ;;  %v4873_v50 = vpop.f32.mrb[1].mxu1 }
 0x446   :  { %v13647_v48 = vadd.f32 %v4760_v60, %v13635_v44  ;;  %v13650_v35 = vadd.f32 %v4873_v50, %v13638_v14  ;;  %v4762_v56 = vpop.f32.mrb[2].mxu0  ;;  %v4875_v21 = vpop.f32.mrb[2].mxu1 }
 0x447   :  { %v13655_v16 = vadd.f32 %v4762_v56, %v13629_v37  ;;  %v13658_v3 = vadd.f32 %v4875_v21, %v13632_v33  ;;  %v4764_v23 = vpop.f32.mrb[3].mxu0  ;;  %v4877_v34 = vpop.f32.mrb[3].mxu1 }
 0x448   :  { %v13663_v20 = vadd.f32 %v4764_v23, %v13635_v44  ;;  %v13666_v26 = vadd.f32 %v4877_v34, %v13638_v14 }
 0x44c   :  { %v4768_v36 = vpop.f32.mrb[4].mxu0  ;;  %v4881_v13 = vpop.f32.mrb[4].mxu1 }
 0x44d   :  { %v13673_v1 = vadd.f32 %v4768_v36, %v13629_v37  ;;  %v13676_v29 = vadd.f32 %v4881_v13, %v13632_v33  ;;  %v4770_v6 = vpop.f32.mrb[5].mxu0  ;;  %v4883_v22 = vpop.f32.mrb[5].mxu1 }
 0x44e   :  { %v13679_v0 = vadd.f32 %v4770_v6, %v13635_v44  ;;  %v13682_v57 = vadd.f32 %v4883_v22, %v13638_v14  ;;  %v4772_v15 = vpop.f32.mrb[6].mxu0  ;;  %v4885_v27 = vpop.f32.mrb[6].mxu1 }
 0x44f   :  { %v13687_v38 = vadd.f32 %v4772_v15, %v13629_v37  ;;  %v13690_v61 = vadd.f32 %v4885_v27, %v13632_v33  ;;  %v4774_v8 = vpop.f32.mrb[7].mxu0  ;;  %v4887_v54 = vpop.f32.mrb[7].mxu1 }
 0x450   :  { %v13695_v10 = vadd.f32 %v4774_v8, %v13635_v44  ;;  %v13698_v31 = vadd.f32 %v4887_v54, %v13638_v14 }
 0x454   :  { %v4778_v59 = vpop.f32.mrb[8].mxu0  ;;  %v4891_v58 = vpop.f32.mrb[8].mxu1 }
 0x455   :  { %v13705_v63 = vadd.f32 %v4778_v59, %v13629_v37  ;;  %v13708_v18 = vadd.f32 %v4891_v58, %v13632_v33  ;;  %v4780_v4 = vpop.f32.mrb[9].mxu0  ;;  %v4893_v49 = vpop.f32.mrb[9].mxu1 }
 0x456   :  { %v13711_v60 = vadd.f32 %v4780_v4, %v13635_v44  ;;  %v13714_v50 = vadd.f32 %v4893_v49, %v13638_v14  ;;  %v4782_v56 = vpop.f32.mrb[10].mxu0  ;;  %v4895_v21 = vpop.f32.mrb[10].mxu1 }
 0x457   :  { %v13719_v36 = vadd.f32 %v4782_v56, %v13629_v37  ;;  %v13722_v13 = vadd.f32 %v4895_v21, %v13632_v33  ;;  %v4784_v6 = vpop.f32.mrb[11].mxu0  ;;  %v4897_v22 = vpop.f32.mrb[11].mxu1 }
 0x458   :  { %v13727_v8 = vadd.f32 %v4784_v6, %v13635_v44  ;;  %v13730_v54 = vadd.f32 %v4897_v22, %v13638_v14 }
 0x45c   :  { %v4788_v56 = vpop.f32.mrb[12].mxu0  ;;  %v4901_v21 = vpop.f32.mrb[12].mxu1 }
 0x45d   :  { %v13737_v34 = vadd.f32 %v4788_v56, %v13629_v37  ;;  %v13740_v27 = vadd.f32 %v4901_v21, %v13632_v33  ;;  %v4790_v6 = vpop.f32.mrb[13].mxu0  ;;  %v4903_v40 = vpop.f32.mrb[13].mxu1 }
 0x45e   :  { %v13743_v22 = vadd.f32 %v4790_v6, %v13635_v44  ;;  %v13746_v32 = vadd.f32 %v4903_v40, %v13638_v14  ;;  %v4792_v58 = vpop.f32.mrb[14].mxu0  ;;  %v4905_v43 = vpop.f32.mrb[14].mxu1 }
 0x45f   :  { %v13751_v56 = vadd.f32 %v4792_v58, %v13629_v37  ;;  %v13754_v21 = vadd.f32 %v4905_v43, %v13632_v33  ;;  %v4794_v11 = vpop.f32.mrb[15].mxu0  ;;  %v4907_v55 = vpop.f32.mrb[15].mxu1 }
 0x460   :  { %v13759_v40 = vadd.f32 %v4794_v11, %v13635_v44  ;;  %v13762_v30 = vadd.f32 %v4907_v55, %v13638_v14 }
 0x464   :  { %v4798_v59 = vpop.f32.mrb[16].mxu0  ;;  %v4911_v23 = vpop.f32.mrb[16].mxu1 }
 0x465   :  { %v13769_v6 = vadd.f32 %v4798_v59, %v13629_v37  ;;  %v13772_v5 = vadd.f32 %v4911_v23, %v13632_v33  ;;  %v4800_v11 = vpop.f32.mrb[17].mxu0  ;;  %v4913_v4 = vpop.f32.mrb[17].mxu1 }
 0x466   :  { %v13775_v55 = vadd.f32 %v4800_v11, %v13635_v44  ;;  %v13778_v17 = vadd.f32 %v4913_v4, %v13638_v14  ;;  %v4802_v58 = vpop.f32.mrb[18].mxu0  ;;  %v4915_v49 = vpop.f32.mrb[18].mxu1 }
 0x467   :  { %15303 = vst [vmem:[#allocation35_spill] sm:$0xff] %v13772_v5  ;;  %v13783_v59 = vadd.f32 %v4802_v58, %v13629_v37  ;;  %v13786_v23 = vadd.f32 %v4915_v49, %v13632_v33  ;;  %v4804_v24 = vpop.f32.mrb[19].mxu0  ;;  %v4917_v25 = vpop.f32.mrb[19].mxu1 }
 0x468   :  { %15304 = vst [vmem:[#allocation36_spill] sm:$0xff] %v13778_v17  ;;  %v13791_v4 = vadd.f32 %v4804_v24, %v13635_v44  ;;  %v13794_v2 = vadd.f32 %v4917_v25, %v13638_v14 }
 0x469   :  { %15305 = vst [vmem:[#allocation37_spill] sm:$0xff] %v13786_v23 }
 0x46a   :  { %15306 = vst [vmem:[#allocation38_spill] sm:$0xff] %v13794_v2 }
 0x46c   :  { %v4808_v12 = vpop.f32.mrb[20].mxu0  ;;  %v4921_v62 = vpop.f32.mrb[20].mxu1 }
 0x46d   :  { %v13801_v11 = vadd.f32 %v4808_v12, %v13629_v37  ;;  %v13804_v51 = vadd.f32 %v4921_v62, %v13632_v33  ;;  %v4810_v24 = vpop.f32.mrb[21].mxu0  ;;  %v4923_v53 = vpop.f32.mrb[21].mxu1 }
 0x46e   :  { %v13807_v25 = vadd.f32 %v4810_v24, %v13635_v44  ;;  %v13810_v15 = vadd.f32 %v4923_v53, %v13638_v14  ;;  %v4812_v58 = vpop.f32.mrb[22].mxu0  ;;  %v4925_v43 = vpop.f32.mrb[22].mxu1 }
 0x46f   :  { %15307 = vst [vmem:[#allocation39_spill] sm:$0xff] %v13804_v51  ;;  %v13815_v12 = vadd.f32 %v4812_v58, %v13629_v37  ;;  %v13818_v62 = vadd.f32 %v4925_v43, %v13632_v33  ;;  %v4814_v39 = vpop.f32.mrb[23].mxu0  ;;  %v4927_v52 = vpop.f32.mrb[23].mxu1 }
 0x470   :  { %15308 = vst [vmem:[#allocation40_spill] sm:$0xff] %v13810_v15  ;;  %v13823_v53 = vadd.f32 %v4814_v39, %v13635_v44  ;;  %v13826_v41 = vadd.f32 %v4927_v52, %v13638_v14 }
 0x471   :  { %15309 = vst [vmem:[#allocation41_spill] sm:$0xff] %v13818_v62 }
 0x472   :  { %15310 = vst [vmem:[#allocation42_spill] sm:$0xff] %v13826_v41 }
 0x474   :  { %v4818_v47 = vpop.f32.mrb[24].mxu0  ;;  %v4931_v46 = vpop.f32.mrb[24].mxu1 }
 0x475   :  { %v13833_v24 = vadd.f32 %v4818_v47, %v13629_v37  ;;  %v13836_v7 = vadd.f32 %v4931_v46, %v13632_v33  ;;  %v4820_v39 = vpop.f32.mrb[25].mxu0  ;;  %v4933_v45 = vpop.f32.mrb[25].mxu1 }
 0x476   :  { %v13839_v52 = vadd.f32 %v4820_v39, %v13635_v44  ;;  %v13842_v19 = vadd.f32 %v4933_v45, %v13638_v14  ;;  %v4822_v58 = vpop.f32.mrb[26].mxu0  ;;  %v4935_v49 = vpop.f32.mrb[26].mxu1 }
 0x477   :  { %15311 = vst [vmem:[#allocation43_spill] sm:$0xff] %v13836_v7  ;;  %v13847_v47 = vadd.f32 %v4822_v58, %v13629_v37  ;;  %v13850_v46 = vadd.f32 %v4935_v49, %v13632_v33  ;;  %v4824_v62 = vpop.f32.mrb[27].mxu0  ;;  %v4937_v51 = vpop.f32.mrb[27].mxu1 }
 0x478   :  { %15312 = vst [vmem:[#allocation44_spill] sm:$0xff] %v13842_v19  ;;  %v13855_v45 = vadd.f32 %v4824_v62, %v13635_v44  ;;  %v13858_v15 = vadd.f32 %v4937_v51, %v13638_v14 }
 0x479   :  { %15313 = vst [vmem:[#allocation45_spill] sm:$0xff] %v13850_v46 }
 0x47a   :  { %15314 = vst [vmem:[#allocation46_spill] sm:$0xff] %v13858_v15 }
 0x47c   :  { %v4828_v7 = vpop.f32.mrb[28].mxu0  ;;  %v4941_v23 = vpop.f32.mrb[28].mxu1 }
 0x47d   :  { %v13865_v39 = vadd.f32 %v4828_v7, %v13629_v37  ;;  %v13868_v41 = vadd.f32 %v4941_v23, %v13632_v33  ;;  %v4830_v62 = vpop.f32.mrb[29].mxu0  ;;  %v4943_v19 = vpop.f32.mrb[29].mxu1 }
 0x47e   :  { %v13871_v51 = vadd.f32 %v4830_v62, %v13635_v44  ;;  %v13874_v42 = vadd.f32 %v4943_v19, %v13638_v14  ;;  %v4832_v58 = vpop.f32.mrb[30].mxu0  ;;  %v4945_v43 = vpop.f32.mrb[30].mxu1 }
 0x47f   :  { %v13879_v7 = vadd.f32 %v4832_v58, %v13629_v37  ;;  %v13882_v23 = vadd.f32 %v4945_v43, %v13632_v33  ;;  %v4834_v15 = vpop.f32.mrb[31].mxu0  ;;  %v4947_v5 = vpop.f32.mrb[31].mxu1 }
 0x480   :  { %v13887_v19 = vadd.f32 %v4834_v15, %v13635_v44  ;;  %v13890_v17 = vadd.f32 %v4947_v5, %v13638_v14 }
 0x481   :  { %12287 = dma.done.wait [#allocation4], 65536 }
 0x482   :  { %12288 = vsyncadd [#allocation4], 4294901760  ;;  %v15315_v43 = vmax.f32 %v13647_v48, 0.0  ;;  %v15316_v2 = vmax.f32 %v13663_v20, 0.0  ;;  %v5019_v44 = vld [vmem:[#allocation3 + $0x8] sm:$0xff]  ;;  %v5021_v14 = vld [vmem:[#allocation3 + $0x18] sm:$0xff] }
 0x483   :  { %v5018_v5 = vld [vmem:[#allocation3] sm:$0xff]  ;;  %5646 = vmatprep.subr.bf16.mxu0 %v5019_v44  ;;  %5872 = vmatprep.subr.bf16.mxu1 %v5021_v14  ;;  %v5020_v15 = vld [vmem:[#allocation3 + $0x10] sm:$0xff]  ;;  %v5035_v37 = vld [vmem:[#allocation3 + $0x88] sm:$0xff] }
 0x484   :  { %v13900_v49 = vpack.c.bf16 %v15316_v2, %v15315_v43  ;;  %v5037_v33 = vld [vmem:[#allocation3 + $0x98] sm:$0xff]  ;;  %5647 = vmatpush1.bf16.msra.mxu0 %v5018_v5  ;;  %5873 = vmatpush1.bf16.msra.mxu1 %v5020_v15  ;;  %v5034_v48 = vld [vmem:[#allocation3 + $0x80] sm:$0xff]  ;;  %v5036_v20 = vld [vmem:[#allocation3 + $0x90] sm:$0xff] }
 0x485   :  { %5648 = vmatprep.subr.bf16.mxu0 %v5035_v37  ;;  %5874 = vmatprep.subr.bf16.mxu1 %v5037_v33  ;;  %v5051_v2 = vld [vmem:[#allocation3 + $0x108] sm:$0xff]  ;;  %v5053_v43 = vld [vmem:[#allocation3 + $0x118] sm:$0xff]  ;;  %v5050_v46 = vld [vmem:[#allocation3 + $0x100] sm:$0xff] }
 0x486   :  { %15317 = vst [vmem:[#allocation47_spill] sm:$0xff] %v13900_v49  ;;  %5678 = vmatprep.mubr.bf16.mxu0 %v13900_v49  ;;  %5904 = vmatprep.mubr.bf16.mxu1 %v13900_v49  ;;  %v5052_v58 = vld [vmem:[#allocation3 + $0x110] sm:$0xff]  ;;  %v5067_v62 = vld [vmem:[#allocation3 + $0x188] sm:$0xff]  ;;  %v5069_v44 = vld [vmem:[#allocation3 + $0x198] sm:$0xff]  ;;  %v15319_v49 = vmax.f32 %v13655_v16, 0.0 }
 0x487   :  { %v5066_v14 = vld [vmem:[#allocation3 + $0x180] sm:$0xff]  ;;  %v5068_v5 = vld [vmem:[#allocation3 + $0x190] sm:$0xff]  ;;  %v5083_v37 = vld [vmem:[#allocation3 + $0x208] sm:$0xff] }
 0x488   :  { %5649 = vmatpush1.bf16.msra.mxu0 %v5034_v48  ;;  %5875 = vmatpush1.bf16.msra.mxu1 %v5036_v20  ;;  %v5085_v33 = vld [vmem:[#allocation3 + $0x218] sm:$0xff]  ;;  %v5082_v15 = vld [vmem:[#allocation3 + $0x200] sm:$0xff]  ;;  %v5084_v48 = vld [vmem:[#allocation3 + $0x210] sm:$0xff] }
 0x489   :  { %5650 = vmatprep.subr.bf16.mxu0 %v5051_v2  ;;  %5876 = vmatprep.subr.bf16.mxu1 %v5053_v43  ;;  %v5099_v20 = vld [vmem:[#allocation3 + $0x288] sm:$0xff]  ;;  %v5101_v2 = vld [vmem:[#allocation3 + $0x298] sm:$0xff]  ;;  %v5292_v16 = vld [vmem:[#allocation3 + $0x890] sm:$0xff] }
 0x48a   :  { %v5117_v43 = vld [vmem:[#allocation3 + $0x318] sm:$0xff] }
 0x48c   :  { %5651 = vmatpush1.bf16.msra.mxu0 %v5050_v46  ;;  %5877 = vmatpush1.bf16.msra.mxu1 %v5052_v58  ;;  %v5098_v46 = vld [vmem:[#allocation3 + $0x280] sm:$0xff]  ;;  %v5100_v58 = vld [vmem:[#allocation3 + $0x290] sm:$0xff] }
 0x48d   :  { %5652 = vmatprep.subr.bf16.mxu0 %v5067_v62  ;;  %5878 = vmatprep.subr.bf16.mxu1 %v5069_v44  ;;  %v5115_v62 = vld [vmem:[#allocation3 + $0x308] sm:$0xff]  ;;  %v5114_v44 = vld [vmem:[#allocation3 + $0x300] sm:$0xff] }
 0x490   :  { %5653 = vmatpush1.bf16.msra.mxu0 %v5066_v14  ;;  %5879 = vmatpush1.bf16.msra.mxu1 %v5068_v5  ;;  %v5116_v14 = vld [vmem:[#allocation3 + $0x310] sm:$0xff]  ;;  %v5131_v5 = vld [vmem:[#allocation3 + $0x388] sm:$0xff] }
 0x491   :  { %5654 = vmatprep.subr.bf16.mxu0 %v5083_v37  ;;  %5880 = vmatprep.subr.bf16.mxu1 %v5085_v33  ;;  %v5133_v37 = vld [vmem:[#allocation3 + $0x398] sm:$0xff]  ;;  %v5130_v33 = vld [vmem:[#allocation3 + $0x380] sm:$0xff] }
 0x494   :  { %5655 = vmatpush1.bf16.msra.mxu0 %v5082_v15  ;;  %5881 = vmatpush1.bf16.msra.mxu1 %v5084_v48  ;;  %v5132_v15 = vld [vmem:[#allocation3 + $0x390] sm:$0xff]  ;;  %v5147_v48 = vld [vmem:[#allocation3 + $0x408] sm:$0xff] }
 0x495   :  { %5656 = vmatprep.subr.bf16.mxu0 %v5099_v20  ;;  %5882 = vmatprep.subr.bf16.mxu1 %v5101_v2  ;;  %v5149_v20 = vld [vmem:[#allocation3 + $0x418] sm:$0xff]  ;;  %v5146_v2 = vld [vmem:[#allocation3 + $0x400] sm:$0xff] }
 0x498   :  { %5657 = vmatpush1.bf16.msra.mxu0 %v5098_v46  ;;  %5883 = vmatpush1.bf16.msra.mxu1 %v5100_v58  ;;  %v5148_v46 = vld [vmem:[#allocation3 + $0x410] sm:$0xff]  ;;  %v5163_v58 = vld [vmem:[#allocation3 + $0x488] sm:$0xff] }
 0x499   :  { %5658 = vmatprep.subr.bf16.mxu0 %v5115_v62  ;;  %5884 = vmatprep.subr.bf16.mxu1 %v5117_v43  ;;  %v5165_v62 = vld [vmem:[#allocation3 + $0x498] sm:$0xff]  ;;  %v5162_v43 = vld [vmem:[#allocation3 + $0x480] sm:$0xff] }
 0x49c   :  { %5659 = vmatpush1.bf16.msra.mxu0 %v5114_v44  ;;  %5885 = vmatpush1.bf16.msra.mxu1 %v5116_v14  ;;  %v5164_v44 = vld [vmem:[#allocation3 + $0x490] sm:$0xff]  ;;  %v5179_v14 = vld [vmem:[#allocation3 + $0x508] sm:$0xff] }
 0x49d   :  { %5660 = vmatprep.subr.bf16.mxu0 %v5131_v5  ;;  %5886 = vmatprep.subr.bf16.mxu1 %v5133_v37  ;;  %v5181_v5 = vld [vmem:[#allocation3 + $0x518] sm:$0xff]  ;;  %v5178_v37 = vld [vmem:[#allocation3 + $0x500] sm:$0xff] }
 0x4a0   :  { %5661 = vmatpush1.bf16.msra.mxu0 %v5130_v33  ;;  %5887 = vmatpush1.bf16.msra.mxu1 %v5132_v15  ;;  %v5180_v33 = vld [vmem:[#allocation3 + $0x510] sm:$0xff]  ;;  %v5195_v15 = vld [vmem:[#allocation3 + $0x588] sm:$0xff] }
 0x4a1   :  { %5662 = vmatprep.subr.bf16.mxu0 %v5147_v48  ;;  %5888 = vmatprep.subr.bf16.mxu1 %v5149_v20  ;;  %v5197_v48 = vld [vmem:[#allocation3 + $0x598] sm:$0xff]  ;;  %v5194_v20 = vld [vmem:[#allocation3 + $0x580] sm:$0xff] }
 0x4a4   :  { %5663 = vmatpush1.bf16.msra.mxu0 %v5146_v2  ;;  %5889 = vmatpush1.bf16.msra.mxu1 %v5148_v46  ;;  %v5196_v2 = vld [vmem:[#allocation3 + $0x590] sm:$0xff]  ;;  %v5211_v46 = vld [vmem:[#allocation3 + $0x608] sm:$0xff] }
 0x4a5   :  { %5664 = vmatprep.subr.bf16.mxu0 %v5163_v58  ;;  %5890 = vmatprep.subr.bf16.mxu1 %v5165_v62  ;;  %v5213_v58 = vld [vmem:[#allocation3 + $0x618] sm:$0xff]  ;;  %v5210_v62 = vld [vmem:[#allocation3 + $0x600] sm:$0xff] }
 0x4a8   :  { %5665 = vmatpush1.bf16.msra.mxu0 %v5162_v43  ;;  %5891 = vmatpush1.bf16.msra.mxu1 %v5164_v44  ;;  %v5212_v43 = vld [vmem:[#allocation3 + $0x610] sm:$0xff]  ;;  %v5227_v44 = vld [vmem:[#allocation3 + $0x688] sm:$0xff] }
 0x4a9   :  { %5666 = vmatprep.subr.bf16.mxu0 %v5179_v14  ;;  %5892 = vmatprep.subr.bf16.mxu1 %v5181_v5  ;;  %v5229_v14 = vld [vmem:[#allocation3 + $0x698] sm:$0xff]  ;;  %v5226_v5 = vld [vmem:[#allocation3 + $0x680] sm:$0xff] }
 0x4ac   :  { %5667 = vmatpush1.bf16.msra.mxu0 %v5178_v37  ;;  %5893 = vmatpush1.bf16.msra.mxu1 %v5180_v33  ;;  %v5228_v37 = vld [vmem:[#allocation3 + $0x690] sm:$0xff]  ;;  %v5243_v33 = vld [vmem:[#allocation3 + $0x708] sm:$0xff] }
 0x4ad   :  { %5668 = vmatprep.subr.bf16.mxu0 %v5195_v15  ;;  %5894 = vmatprep.subr.bf16.mxu1 %v5197_v48  ;;  %v5245_v15 = vld [vmem:[#allocation3 + $0x718] sm:$0xff]  ;;  %v5242_v48 = vld [vmem:[#allocation3 + $0x700] sm:$0xff] }
 0x4b0   :  { %5669 = vmatpush1.bf16.msra.mxu0 %v5194_v20  ;;  %5895 = vmatpush1.bf16.msra.mxu1 %v5196_v2  ;;  %v5244_v20 = vld [vmem:[#allocation3 + $0x710] sm:$0xff]  ;;  %v5259_v2 = vld [vmem:[#allocation3 + $0x788] sm:$0xff] }
 0x4b1   :  { %5670 = vmatprep.subr.bf16.mxu0 %v5211_v46  ;;  %5896 = vmatprep.subr.bf16.mxu1 %v5213_v58  ;;  %v5261_v46 = vld [vmem:[#allocation3 + $0x798] sm:$0xff]  ;;  %v5258_v58 = vld [vmem:[#allocation3 + $0x780] sm:$0xff] }
 0x4b4   :  { %5671 = vmatpush1.bf16.msra.mxu0 %v5210_v62  ;;  %5897 = vmatpush1.bf16.msra.mxu1 %v5212_v43  ;;  %v5260_v62 = vld [vmem:[#allocation3 + $0x790] sm:$0xff]  ;;  %v5275_v43 = vld [vmem:[#allocation3 + $0x808] sm:$0xff] }
 0x4b5   :  { %5672 = vmatprep.subr.bf16.mxu0 %v5227_v44  ;;  %5898 = vmatprep.subr.bf16.mxu1 %v5229_v14  ;;  %v5277_v44 = vld [vmem:[#allocation3 + $0x818] sm:$0xff]  ;;  %v15318_v14 = vmax.f32 %v13641_v28, 0.0  ;;  %v5290_v28 = vld [vmem:[#allocation3 + $0x880] sm:$0xff] }
 0x4b8   :  { %5673 = vmatpush1.bf16.msra.mxu0 %v5226_v5  ;;  %5899 = vmatpush1.bf16.msra.mxu1 %v5228_v37  ;;  %v13908_v5 = vpack.c.bf16 %v15319_v49, %v15318_v14  ;;  %v5274_v37 = vld [vmem:[#allocation3 + $0x800] sm:$0xff]  ;;  %v5307_v49 = vld [vmem:[#allocation3 + $0x908] sm:$0xff] }
 0x4b9   :  { %5674 = vmatprep.subr.bf16.mxu0 %v5243_v33  ;;  %5900 = vmatprep.subr.bf16.mxu1 %v5245_v15  ;;  %v5276_v33 = vld [vmem:[#allocation3 + $0x810] sm:$0xff]  ;;  %v5291_v15 = vld [vmem:[#allocation3 + $0x888] sm:$0xff] }
 0x4ba   :  { %v5323_v14 = vld [vmem:[#allocation3 + $0x988] sm:$0xff] }
 0x4bc   :  { %5675 = vmatpush1.bf16.msra.mxu0 %v5242_v48  ;;  %5901 = vmatpush1.bf16.msra.mxu1 %v5244_v20  ;;  %v5293_v48 = vld [vmem:[#allocation3 + $0x898] sm:$0xff]  ;;  %v15320_v20 = vmax.f32 %v13679_v0, 0.0  ;;  %v15322_v0 = vmax.f32 %v13673_v1, 0.0  ;;  %v5322_v1 = vld [vmem:[#allocation3 + $0x980] sm:$0xff] }
 0x4bd   :  { %5676 = vmatprep.subr.bf16.mxu0 %v5259_v2  ;;  %5902 = vmatprep.subr.bf16.mxu1 %v5261_v46  ;;  %v15321_v2 = vmax.f32 %v13695_v10, 0.0  ;;  %v15323_v10 = vmax.f32 %v13687_v38, 0.0  ;;  %v5324_v38 = vld [vmem:[#allocation3 + $0x990] sm:$0xff] }
 0x4bf   :  { %v13914_v46 = vpack.c.bf16 %v15321_v2, %v15320_v20  ;;  %v5339_v20 = vld [vmem:[#allocation3 + $0xa08] sm:$0xff]  ;;  %v5341_v2 = vld [vmem:[#allocation3 + $0xa18] sm:$0xff] }
 0x4c0   :  { %5677 = vmatpush1.bf16.msra.mxu0 %v5258_v58  ;;  %5903 = vmatpush1.bf16.msra.mxu1 %v5260_v62  ;;  %v5309_v58 = vld [vmem:[#allocation3 + $0x918] sm:$0xff]  ;;  %v13924_v62 = vpack.c.bf16 %v15323_v10, %v15322_v0  ;;  %v15328_v10 = vmax.f32 %v13743_v22, 0.0  ;;  %v15330_v22 = vmax.f32 %v13737_v34, 0.0  ;;  %v5386_v34 = vld [vmem:[#allocation3 + $0xb80] sm:$0xff] }
 0x4c1   :  { %5759 = vmatprep.subr.bf16.mxu0 %v5275_v43  ;;  %5985 = vmatprep.subr.bf16.mxu1 %v5277_v44  ;;  %v5306_v43 = vld [vmem:[#allocation3 + $0x900] sm:$0xff]  ;;  %v5308_v44 = vld [vmem:[#allocation3 + $0x910] sm:$0xff]  ;;  %v5357_v0 = vld [vmem:[#allocation3 + $0xa98] sm:$0xff] }
 0x4c3   :  { %5679 = vmatmul.mubr.bf16.vlgmr.msra.gmra.mrb[32].mxu0 %v13908_v5  ;;  %5905 = vmatmul.mubr.bf16.vlgmr.msra.gmra.mrb[32].mxu1 %v13908_v5 }
 0x4c4   :  { %5760 = vmatpush1.bf16.msra.mxu0 %v5274_v37  ;;  %5986 = vmatpush1.bf16.msra.mxu1 %v5276_v33  ;;  %v5325_v37 = vld [vmem:[#allocation3 + $0x998] sm:$0xff]  ;;  %v15324_v33 = vmax.f32 %v13711_v60, 0.0  ;;  %v15326_v60 = vmax.f32 %v13705_v63, 0.0  ;;  %v5354_v63 = vld [vmem:[#allocation3 + $0xa80] sm:$0xff] }
 0x4c5   :  { %5761 = vmatprep.subr.bf16.mxu0 %v5291_v15  ;;  %5987 = vmatprep.subr.bf16.mxu1 %v5293_v48  ;;  %v15325_v15 = vmax.f32 %v13727_v8, 0.0  ;;  %v15327_v8 = vmax.f32 %v13719_v36, 0.0  ;;  %v5356_v36 = vld [vmem:[#allocation3 + $0xa90] sm:$0xff] }
 0x4c6   :  { %5688 = vmatprep.mubr.bf16.mxu0 %v13914_v46  ;;  %5914 = vmatprep.mubr.bf16.mxu1 %v13914_v46 }
 0x4c7   :  { %v13930_v48 = vpack.c.bf16 %v15325_v15, %v15324_v33  ;;  %v5370_v15 = vld [vmem:[#allocation3 + $0xb00] sm:$0xff] }
 0x4c8   :  { %5762 = vmatpush1.bf16.msra.mxu0 %v5290_v28  ;;  %5988 = vmatpush1.bf16.msra.mxu1 %v5292_v16  ;;  %v13940_v28 = vpack.c.bf16 %v15327_v8, %v15326_v60  ;;  %v5338_v16 = vld [vmem:[#allocation3 + $0xa00] sm:$0xff]  ;;  %v15333_v60 = vmax.f32 %v13791_v4, 0.0  ;;  %v15335_v4 = vmax.f32 %v13783_v59, 0.0  ;;  %v5420_v59 = vld [vmem:[#allocation3 + $0xc90] sm:$0xff] }
 0x4c9   :  { %5763 = vmatprep.subr.bf16.mxu0 %v5307_v49  ;;  %5989 = vmatprep.subr.bf16.mxu1 %v5309_v58  ;;  %v5340_v49 = vld [vmem:[#allocation3 + $0xa10] sm:$0xff]  ;;  %v5355_v58 = vld [vmem:[#allocation3 + $0xa88] sm:$0xff] }
 0x4cb   :  { %5689 = vmatmul.mubr.bf16.gmra.mrb[36].mxu0 %v13924_v62  ;;  %5915 = vmatmul.mubr.bf16.gmra.mrb[36].mxu1 %v13924_v62 }
 0x4cc   :  { %5764 = vmatpush1.bf16.msra.mxu0 %v5306_v43  ;;  %5990 = vmatpush1.bf16.msra.mxu1 %v5308_v44  ;;  %v15329_v43 = vmax.f32 %v13759_v40, 0.0  ;;  %v15331_v40 = vmax.f32 %v13751_v56, 0.0  ;;  %v5388_v56 = vld [vmem:[#allocation3 + $0xb90] sm:$0xff] }
 0x4cd   :  { %5765 = vmatprep.subr.bf16.mxu0 %v5323_v14  ;;  %5991 = vmatprep.subr.bf16.mxu1 %v5325_v37  ;;  %v5371_v14 = vld [vmem:[#allocation3 + $0xb08] sm:$0xff]  ;;  %v5373_v37 = vld [vmem:[#allocation3 + $0xb18] sm:$0xff] }
 0x4ce   :  { %5698 = vmatprep.mubr.bf16.mxu0 %v13930_v48  ;;  %5924 = vmatprep.mubr.bf16.mxu1 %v13930_v48  ;;  %v13946_v44 = vpack.c.bf16 %v15329_v43, %v15328_v10  ;;  %v13956_v33 = vpack.c.bf16 %v15331_v40, %v15330_v22  ;;  %v5404_v10 = vld [vmem:[#allocation3 + $0xc10] sm:$0xff]  ;;  %v5419_v43 = vld [vmem:[#allocation3 + $0xc88] sm:$0xff]  ;;  %v5437_v40 = vld [vmem:[#allocation3 + $0xd18] sm:$0xff] }
 0x4cf   :  { %v5435_v22 = vld [vmem:[#allocation3 + $0xd08] sm:$0xff] }
 0x4d0   :  { %5766 = vmatpush1.bf16.msra.mxu0 %v5322_v1  ;;  %5992 = vmatpush1.bf16.msra.mxu1 %v5324_v38  ;;  %v5372_v1 = vld [vmem:[#allocation3 + $0xb10] sm:$0xff]  ;;  %v5387_v38 = vld [vmem:[#allocation3 + $0xb88] sm:$0xff] }
 0x4d1   :  { %5767 = vmatprep.subr.bf16.mxu0 %v5339_v20  ;;  %5993 = vmatprep.subr.bf16.mxu1 %v5341_v2  ;;  %v5389_v20 = vld [vmem:[#allocation3 + $0xb98] sm:$0xff]  ;;  %v15332_v2 = vmax.f32 %v13775_v55, 0.0  ;;  %v15334_v55 = vmax.f32 %v13769_v6, 0.0  ;;  %v5418_v6 = vld [vmem:[#allocation3 + $0xc80] sm:$0xff] }
 0x4d3   :  { %5699 = vmatmul.mubr.bf16.gmra.mrb[40].mxu0 %v13940_v28  ;;  %5925 = vmatmul.mubr.bf16.gmra.mrb[40].mxu1 %v13940_v28  ;;  %v13962_v8 = vpack.c.bf16 %v15333_v60, %v15332_v2  ;;  %v5453_v2 = vld [vmem:[#allocation3 + $0xd98] sm:$0xff]  ;;  %v15340_v60 = vmax.f32 %v13839_v52, 0.0  ;;  %v15342_v52 = vmax.f32 %v13833_v24, 0.0  ;;  %v5482_v24 = vld [vmem:[#allocation3 + $0xe80] sm:$0xff] }
 0x4d4   :  { %5768 = vmatpush1.bf16.msra.mxu0 %v5338_v16  ;;  %5994 = vmatpush1.bf16.msra.mxu1 %v5340_v49  ;;  %v5403_v16 = vld [vmem:[#allocation3 + $0xc08] sm:$0xff]  ;;  %v5405_v49 = vld [vmem:[#allocation3 + $0xc18] sm:$0xff] }
 0x4d5   :  { %5769 = vmatprep.subr.bf16.mxu0 %v5355_v58  ;;  %5995 = vmatprep.subr.bf16.mxu1 %v5357_v0  ;;  %v13972_v58 = vpack.c.bf16 %v15335_v4, %v15334_v55  ;;  %v5402_v0 = vld [vmem:[#allocation3 + $0xc00] sm:$0xff] }
 0x4d6   :  { %5708 = vmatprep.mubr.bf16.mxu0 %v13946_v44  ;;  %5934 = vmatprep.mubr.bf16.mxu1 %v13946_v44  ;;  %v5466_v4 = vld [vmem:[#allocation3 + $0xe00] sm:$0xff] }
 0x4d8   :  { %5770 = vmatpush1.bf16.msra.mxu0 %v5354_v63  ;;  %5996 = vmatpush1.bf16.msra.mxu1 %v5356_v36  ;;  %v5421_v63 = vld [vmem:[#allocation3 + $0xc98] sm:$0xff]  ;;  %v15336_v36 = vmax.f32 %v13807_v25, 0.0  ;;  %v15338_v25 = vmax.f32 %v13801_v11, 0.0  ;;  %v5450_v11 = vld [vmem:[#allocation3 + $0xd80] sm:$0xff] }
 0x4d9   :  { %5771 = vmatprep.subr.bf16.mxu0 %v5371_v14  ;;  %5997 = vmatprep.subr.bf16.mxu1 %v5373_v37  ;;  %v15337_v14 = vmax.f32 %v13823_v53, 0.0  ;;  %v15339_v53 = vmax.f32 %v13815_v12, 0.0  ;;  %v5452_v12 = vld [vmem:[#allocation3 + $0xd90] sm:$0xff] }
 0x4db   :  { %5709 = vmatmul.mubr.bf16.gmra.mrb[44].mxu0 %v13956_v33  ;;  %5935 = vmatmul.mubr.bf16.gmra.mrb[44].mxu1 %v13956_v33  ;;  %v13978_v37 = vpack.c.bf16 %v15337_v14, %v15336_v36  ;;  %v15345_v36 = vmax.f32 %v13887_v19, 0.0  ;;  %v15347_v19 = vmax.f32 %v13879_v7, 0.0  ;;  %v5516_v7 = vld [vmem:[#allocation3 + $0xf90] sm:$0xff] }
 0x4dc   :  { %5772 = vmatpush1.bf16.msra.mxu0 %v5370_v15  ;;  %5998 = vmatpush1.bf16.msra.mxu1 %v5372_v1  ;;  %v13988_v15 = vpack.c.bf16 %v15339_v53, %v15338_v25  ;;  %v5434_v1 = vld [vmem:[#allocation3 + $0xd00] sm:$0xff]  ;;  %v5500_v25 = vld [vmem:[#allocation3 + $0xf10] sm:$0xff]  ;;  %v5515_v53 = vld [vmem:[#allocation3 + $0xf88] sm:$0xff] }
 0x4dd   :  { %5773 = vmatprep.subr.bf16.mxu0 %v5387_v38  ;;  %5999 = vmatprep.subr.bf16.mxu1 %v5389_v20  ;;  %v5436_v38 = vld [vmem:[#allocation3 + $0xd10] sm:$0xff]  ;;  %v5451_v20 = vld [vmem:[#allocation3 + $0xd88] sm:$0xff] }
 0x4de   :  { %5718 = vmatprep.mubr.bf16.mxu0 %v13962_v8  ;;  %5944 = vmatprep.mubr.bf16.mxu1 %v13962_v8 }
 0x4e0   :  { %5774 = vmatpush1.bf16.msra.mxu0 %v5386_v34  ;;  %6000 = vmatpush1.bf16.msra.mxu1 %v5388_v56  ;;  %v15341_v34 = vmax.f32 %v13855_v45, 0.0  ;;  %v15343_v45 = vmax.f32 %v13847_v47, 0.0  ;;  %v5484_v47 = vld [vmem:[#allocation3 + $0xe90] sm:$0xff] }
 0x4e1   :  { %5775 = vmatprep.subr.bf16.mxu0 %v5403_v16  ;;  %6001 = vmatprep.subr.bf16.mxu1 %v5405_v49  ;;  %v5467_v16 = vld [vmem:[#allocation3 + $0xe08] sm:$0xff]  ;;  %v5469_v49 = vld [vmem:[#allocation3 + $0xe18] sm:$0xff] }
 0x4e2   :  { %v13994_v56 = vpack.c.bf16 %v15341_v34, %v15340_v60  ;;  %v14004_v55 = vpack.c.bf16 %v15343_v45, %v15342_v52  ;;  %v5023_v60 = vld [vmem:[#allocation3 + $0x28] sm:$0xff]  ;;  %v5025_v34 = vld [vmem:[#allocation3 + $0x38] sm:$0xff]  ;;  %v15352_v45 = vmax.f32 %v13682_v57, 0.0  ;;  %v15354_v57 = vmax.f32 %v13676_v29, 0.0  ;;  %v5070_v29 = vld [vmem:[#allocation3 + $0x1a0] sm:$0xff] }
 0x4e3   :  { %5719 = vmatmul.mubr.bf16.gmra.mrb[48].mxu0 %v13972_v58  ;;  %5945 = vmatmul.mubr.bf16.gmra.mrb[48].mxu1 %v13972_v58  ;;  %v5041_v52 = vld [vmem:[#allocation3 + $0xb8] sm:$0xff] }
 0x4e4   :  { %5776 = vmatpush1.bf16.msra.mxu0 %v5402_v0  ;;  %6002 = vmatpush1.bf16.msra.mxu1 %v5404_v10  ;;  %v5468_v0 = vld [vmem:[#allocation3 + $0xe10] sm:$0xff]  ;;  %v5483_v10 = vld [vmem:[#allocation3 + $0xe88] sm:$0xff] }
 0x4e5   :  { %5777 = vmatprep.subr.bf16.mxu0 %v5419_v43  ;;  %6003 = vmatprep.subr.bf16.mxu1 %v5421_v63  ;;  %v5485_v43 = vld [vmem:[#allocation3 + $0xe98] sm:$0xff]  ;;  %v15344_v63 = vmax.f32 %v13871_v51, 0.0  ;;  %v15346_v51 = vmax.f32 %v13865_v39, 0.0  ;;  %v5514_v39 = vld [vmem:[#allocation3 + $0xf80] sm:$0xff] }
 0x4e6   :  { %5728 = vmatprep.mubr.bf16.mxu0 %v13978_v37  ;;  %5954 = vmatprep.mubr.bf16.mxu1 %v13978_v37 }
 0x4e7   :  { %v14010_v14 = vpack.c.bf16 %v15345_v36, %v15344_v63  ;;  %v5054_v36 = vld [vmem:[#allocation3 + $0x120] sm:$0xff] }
 0x4e8   :  { %5778 = vmatpush1.bf16.msra.mxu0 %v5418_v6  ;;  %6004 = vmatpush1.bf16.msra.mxu1 %v5420_v59  ;;  %v5499_v6 = vld [vmem:[#allocation3 + $0xf08] sm:$0xff]  ;;  %v5501_v59 = vld [vmem:[#allocation3 + $0xf18] sm:$0xff] }
 0x4e9   :  { %5779 = vmatprep.subr.bf16.mxu0 %v5435_v22  ;;  %6005 = vmatprep.subr.bf16.mxu1 %v5437_v40  ;;  %v14020_v22 = vpack.c.bf16 %v15347_v19, %v15346_v51  ;;  %v5498_v40 = vld [vmem:[#allocation3 + $0xf00] sm:$0xff]  ;;  %v15357_v51 = vmax.f32 %v13730_v54, 0.0  ;;  %v15359_v54 = vmax.f32 %v13722_v13, 0.0  ;;  %v5104_v13 = vld [vmem:[#allocation3 + $0x2b0] sm:$0xff] }
 0x4eb   :  { %5729 = vmatmul.mubr.bf16.gmra.mrb[52].mxu0 %v13988_v15  ;;  %5955 = vmatmul.mubr.bf16.gmra.mrb[52].mxu1 %v13988_v15 }
 0x4ec   :  { %5780 = vmatpush1.bf16.msra.mxu0 %v5434_v1  ;;  %6006 = vmatpush1.bf16.msra.mxu1 %v5436_v38  ;;  %v5517_v1 = vld [vmem:[#allocation3 + $0xf98] sm:$0xff]  ;;  %v15348_v38 = vmax.f32 %v13650_v35, 0.0  ;;  %v15350_v35 = vmax.f32 %v13644_v9, 0.0  ;;  %v5038_v9 = vld [vmem:[#allocation3 + $0xa0] sm:$0xff] }
 0x4ed   :  { %5781 = vmatprep.subr.bf16.mxu0 %v5451_v20  ;;  %6007 = vmatprep.subr.bf16.mxu1 %v5453_v2  ;;  %v15349_v20 = vmax.f32 %v13666_v26, 0.0  ;;  %v15351_v26 = vmax.f32 %v13658_v3, 0.0  ;;  %v5040_v3 = vld [vmem:[#allocation3 + $0xb0] sm:$0xff] }
 0x4ee   :  { %5738 = vmatprep.mubr.bf16.mxu0 %v13994_v56  ;;  %5964 = vmatprep.mubr.bf16.mxu1 %v13994_v56 }
 0x4ef   :  { %v14026_v2 = vpack.c.bf16 %v15349_v20, %v15348_v38  ;;  %v5088_v38 = vld [vmem:[#allocation3 + $0x230] sm:$0xff]  ;;  %v5103_v20 = vld [vmem:[#allocation3 + $0x2a8] sm:$0xff] }
 0x4f0   :  { %5782 = vmatpush1.bf16.msra.mxu0 %v5450_v11  ;;  %6008 = vmatpush1.bf16.msra.mxu1 %v5452_v12  ;;  %v14036_v11 = vpack.c.bf16 %v15351_v26, %v15350_v35  ;;  %v5022_v12 = vld [vmem:[#allocation3 + $0x20] sm:$0xff]  ;;  %v5119_v35 = vld [vmem:[#allocation3 + $0x328] sm:$0xff]  ;;  %v5121_v26 = vld [vmem:[#allocation3 + $0x338] sm:$0xff] }
 0x4f1   :  { %5783 = vmatprep.subr.bf16.mxu0 %v5467_v16  ;;  %6009 = vmatprep.subr.bf16.mxu1 %v5469_v49  ;;  %v5024_v16 = vld [vmem:[#allocation3 + $0x30] sm:$0xff]  ;;  %v5039_v49 = vld [vmem:[#allocation3 + $0xa8] sm:$0xff] }
 0x4f3   :  { %5739 = vmatmul.mubr.bf16.gmra.mrb[56].mxu0 %v14004_v55  ;;  %5965 = vmatmul.mubr.bf16.gmra.mrb[56].mxu1 %v14004_v55 }
 0x4f4   :  { %5784 = vmatpush1.bf16.msra.mxu0 %v5466_v4  ;;  %6010 = vmatpush1.bf16.msra.mxu1 %v5468_v0  ;;  %v15353_v4 = vmax.f32 %v13698_v31, 0.0  ;;  %v15355_v31 = vmax.f32 %v13690_v61, 0.0  ;;  %v5072_v61 = vld [vmem:[#allocation3 + $0x1b0] sm:$0xff] }
 0x4f5   :  { %5785 = vmatprep.subr.bf16.mxu0 %v5483_v10  ;;  %6011 = vmatprep.subr.bf16.mxu1 %v5485_v43  ;;  %v5055_v10 = vld [vmem:[#allocation3 + $0x128] sm:$0xff]  ;;  %v5057_v43 = vld [vmem:[#allocation3 + $0x138] sm:$0xff] }
 0x4f6   :  { %5748 = vmatprep.mubr.bf16.mxu0 %v14010_v14  ;;  %5974 = vmatprep.mubr.bf16.mxu1 %v14010_v14  ;;  %v14042_v0 = vpack.c.bf16 %v15353_v4, %v15352_v45  ;;  %v14052_v63 = vpack.c.bf16 %v15355_v31, %v15354_v57  ;;  %v5137_v45 = vld [vmem:[#allocation3 + $0x3b8] sm:$0xff]  ;;  %v15364_v4 = vld [vmem:[#allocation36_spill] sm:$0xff]  ;;  %v5151_v57 = vld [vmem:[#allocation3 + $0x428] sm:$0xff] }
 0x4f7   :  { %v5153_v31 = vld [vmem:[#allocation3 + $0x438] sm:$0xff] }
 0x4f8   :  { %5786 = vmatpush1.bf16.msra.mxu0 %v5482_v24  ;;  %6012 = vmatpush1.bf16.msra.mxu1 %v5484_v47  ;;  %v5056_v24 = vld [vmem:[#allocation3 + $0x130] sm:$0xff]  ;;  %v5071_v47 = vld [vmem:[#allocation3 + $0x1a8] sm:$0xff] }
 0x4f9   :  { %5787 = vmatprep.subr.bf16.mxu0 %v5499_v6  ;;  %6013 = vmatprep.subr.bf16.mxu1 %v5501_v59  ;;  %v5073_v6 = vld [vmem:[#allocation3 + $0x1b8] sm:$0xff]  ;;  %v15356_v59 = vmax.f32 %v13714_v50, 0.0  ;;  %v15358_v50 = vmax.f32 %v13708_v18, 0.0  ;;  %v5102_v18 = vld [vmem:[#allocation3 + $0x2a0] sm:$0xff] }
 0x4fb   :  { %5749 = vmatmul.mubr.bf16.gmra.mrb[60].mxu0 %v14020_v22  ;;  %5975 = vmatmul.mubr.bf16.gmra.mrb[60].mxu1 %v14020_v22  ;;  %v14058_v19 = vpack.c.bf16 %v15357_v51, %v15356_v59  ;;  %v5150_v51 = vld [vmem:[#allocation3 + $0x420] sm:$0xff] }
 0x4fc   :  { %5788 = vmatpush1.bf16.msra.mxu0 %v5498_v40  ;;  %6014 = vmatpush1.bf16.msra.mxu1 %v5500_v25  ;;  %v5087_v40 = vld [vmem:[#allocation3 + $0x228] sm:$0xff]  ;;  %v5089_v25 = vld [vmem:[#allocation3 + $0x238] sm:$0xff] }
 0x4fd   :  { %5789 = vmatprep.subr.bf16.mxu0 %v5515_v53  ;;  %6015 = vmatprep.subr.bf16.mxu1 %v5517_v1  ;;  %v14068_v53 = vpack.c.bf16 %v15359_v54, %v15358_v50  ;;  %v5086_v1 = vld [vmem:[#allocation3 + $0x220] sm:$0xff] }
 0x4fe   :  { %5791 = vmatprep.mubr.bf16.mxu0 %v14026_v2  ;;  %6017 = vmatprep.mubr.bf16.mxu1 %v14026_v2  ;;  %v15374_v54 = vld [vmem:[#allocation42_spill] sm:$0xff] }
 0x500   :  { %5790 = vmatpush1.bf16.msra.mxu0 %v5514_v39  ;;  %6016 = vmatpush1.bf16.msra.mxu1 %v5516_v7  ;;  %v5105_v39 = vld [vmem:[#allocation3 + $0x2b8] sm:$0xff]  ;;  %v15360_v7 = vmax.f32 %v13746_v32, 0.0  ;;  %v15363_v32 = vmax.f32 %v13754_v21, 0.0  ;;  %v5136_v21 = vld [vmem:[#allocation3 + $0x3b0] sm:$0xff] }
 0x501   :  { %6098 = vmatprep.subr.bf16.mxu0 %v5023_v60  ;;  %6324 = vmatprep.subr.bf16.mxu1 %v5025_v34  ;;  %v15361_v60 = vmax.f32 %v13762_v30, 0.0  ;;  %v15362_v30 = vmax.f32 %v13740_v27, 0.0  ;;  %v5134_v27 = vld [vmem:[#allocation3 + $0x3a0] sm:$0xff] }
 0x503   :  { %5792 = vmatmul.mubr.bf16.vlgmr.msra.gmra.mrb[32].mxu0 %v14036_v11  ;;  %6018 = vmatmul.mubr.bf16.vlgmr.msra.gmra.mrb[32].mxu1 %v14036_v11  ;;  %v14074_v34 = vpack.c.bf16 %v15361_v60, %v15360_v7  ;;  %v5183_v7 = vld [vmem:[#allocation3 + $0x528] sm:$0xff]  ;;  %v5185_v60 = vld [vmem:[#allocation3 + $0x538] sm:$0xff] }
 0x504   :  { %6099 = vmatpush1.bf16.msra.mxu0 %v5022_v12  ;;  %6325 = vmatpush1.bf16.msra.mxu1 %v5024_v16  ;;  %v14084_v12 = vpack.c.bf16 %v15363_v32, %v15362_v30  ;;  %v5118_v16 = vld [vmem:[#allocation3 + $0x320] sm:$0xff] }
 0x505   :  { %6100 = vmatprep.subr.bf16.mxu0 %v5039_v49  ;;  %6326 = vmatprep.subr.bf16.mxu1 %v5041_v52  ;;  %v5120_v49 = vld [vmem:[#allocation3 + $0x330] sm:$0xff]  ;;  %v5135_v52 = vld [vmem:[#allocation3 + $0x3a8] sm:$0xff]  ;;  %v5182_v32 = vld [vmem:[#allocation3 + $0x520] sm:$0xff] }
 0x506   :  { %5801 = vmatprep.mubr.bf16.mxu0 %v14042_v0  ;;  %6027 = vmatprep.mubr.bf16.mxu1 %v14042_v0 }
 0x508   :  { %6101 = vmatpush1.bf16.msra.mxu0 %v5038_v9  ;;  %6327 = vmatpush1.bf16.msra.mxu1 %v5040_v3  ;;  %v15365_v9 = vmax.f32 %v15364_v4, 0.0  ;;  %v15366_v3 = vld [vmem:[#allocation38_spill] sm:$0xff] }
 0x509   :  { %6102 = vmatprep.subr.bf16.mxu0 %v5055_v10  ;;  %6328 = vmatprep.subr.bf16.mxu1 %v5057_v43  ;;  %v15367_v10 = vmax.f32 %v15366_v3, 0.0 }
 0x50b   :  { %5802 = vmatmul.mubr.bf16.gmra.mrb[36].mxu0 %v14052_v63  ;;  %6028 = vmatmul.mubr.bf16.gmra.mrb[36].mxu1 %v14052_v63  ;;  %v14090_v43 = vpack.c.bf16 %v15367_v10, %v15365_v9  ;;  %v15382_v9 = vld [vmem:[#allocation46_spill] sm:$0xff] }
 0x50c   :  { %6103 = vmatpush1.bf16.msra.mxu0 %v5054_v36  ;;  %6329 = vmatpush1.bf16.msra.mxu1 %v5056_v24  ;;  %v15368_v36 = vld [vmem:[#allocation35_spill] sm:$0xff]  ;;  %v15383_v3 = vmax.f32 %v15382_v9, 0.0 }
 0x50d   :  { %6104 = vmatprep.subr.bf16.mxu0 %v5071_v47  ;;  %6330 = vmatprep.subr.bf16.mxu1 %v5073_v6  ;;  %v15369_v24 = vmax.f32 %v15368_v36, 0.0  ;;  %v15370_v47 = vld [vmem:[#allocation37_spill] sm:$0xff]  ;;  %v15384_v36 = vld [vmem:[#allocation43_spill] sm:$0xff] }
 0x50e   :  { %5811 = vmatprep.mubr.bf16.mxu0 %v14058_v19  ;;  %6037 = vmatprep.mubr.bf16.mxu1 %v14058_v19  ;;  %v15371_v6 = vmax.f32 %v15370_v47, 0.0  ;;  %v15386_v47 = vld [vmem:[#allocation45_spill] sm:$0xff]  ;;  %v5295_v9 = vld [vmem:[#allocation3 + $0x8a8] sm:$0xff] }
 0x510   :  { %6105 = vmatpush1.bf16.msra.mxu0 %v5070_v29  ;;  %6331 = vmatpush1.bf16.msra.mxu1 %v5072_v61  ;;  %v14100_v59 = vpack.c.bf16 %v15371_v6, %v15369_v24  ;;  %v5152_v29 = vld [vmem:[#allocation3 + $0x430] sm:$0xff]  ;;  %v5167_v61 = vld [vmem:[#allocation3 + $0x4a8] sm:$0xff]  ;;  %v15385_v24 = vmax.f32 %v15384_v36, 0.0  ;;  %v15387_v6 = vmax.f32 %v15386_v47, 0.0  ;;  %v5310_v36 = vld [vmem:[#allocation3 + $0x920] sm:$0xff] }
 0x511   :  { %6106 = vmatprep.subr.bf16.mxu0 %v5087_v40  ;;  %6332 = vmatprep.subr.bf16.mxu1 %v5089_v25  ;;  %v5169_v40 = vld [vmem:[#allocation3 + $0x4b8] sm:$0xff]  ;;  %v15372_v25 = vld [vmem:[#allocation40_spill] sm:$0xff]  ;;  %v5327_v47 = vld [vmem:[#allocation3 + $0x9a8] sm:$0xff] }
 0x512   :  { %v15373_v50 = vmax.f32 %v15372_v25, 0.0  ;;  %v5233_v25 = vld [vmem:[#allocation3 + $0x6b8] sm:$0xff] }
 0x513   :  { %5812 = vmatmul.mubr.bf16.gmra.mrb[40].mxu0 %v14068_v53  ;;  %6038 = vmatmul.mubr.bf16.gmra.mrb[40].mxu1 %v14068_v53 }
 0x514   :  { %6107 = vmatpush1.bf16.msra.mxu0 %v5086_v1  ;;  %6333 = vmatpush1.bf16.msra.mxu1 %v5088_v38  ;;  %v15375_v1 = vmax.f32 %v15374_v54, 0.0  ;;  %v15389_v54 = vmax.f32 %v13890_v17, 0.0  ;;  %v15391_v17 = vmax.f32 %v13882_v23, 0.0  ;;  %v5279_v23 = vld [vmem:[#allocation3 + $0x828] sm:$0xff] }
 0x515   :  { %6108 = vmatprep.subr.bf16.mxu0 %v5103_v20  ;;  %6334 = vmatprep.subr.bf16.mxu1 %v5105_v39  ;;  %v5166_v20 = vld [vmem:[#allocation3 + $0x4a0] sm:$0xff]  ;;  %v5168_v39 = vld [vmem:[#allocation3 + $0x4b0] sm:$0xff] }
 0x516   :  { %5821 = vmatprep.mubr.bf16.mxu0 %v14074_v34  ;;  %6047 = vmatprep.mubr.bf16.mxu1 %v14074_v34  ;;  %v14106_v38 = vpack.c.bf16 %v15375_v1, %v15373_v50  ;;  %v15388_v50 = vmax.f32 %v13874_v42, 0.0  ;;  %v15390_v42 = vmax.f32 %v13868_v41, 0.0  ;;  %v5264_v41 = vld [vmem:[#allocation3 + $0x7b0] sm:$0xff] }
 0x518   :  { %6109 = vmatpush1.bf16.msra.mxu0 %v5102_v18  ;;  %6335 = vmatpush1.bf16.msra.mxu1 %v5104_v13  ;;  %v15376_v18 = vld [vmem:[#allocation39_spill] sm:$0xff]  ;;  %v14138_v1 = vpack.c.bf16 %v15389_v54, %v15388_v50  ;;  %v5342_v50 = vld [vmem:[#allocation3 + $0xa20] sm:$0xff]  ;;  %v5344_v54 = vld [vmem:[#allocation3 + $0xa30] sm:$0xff] }
 0x519   :  { %6110 = vmatprep.subr.bf16.mxu0 %v5119_v35  ;;  %6336 = vmatprep.subr.bf16.mxu1 %v5121_v26  ;;  %v15377_v13 = vmax.f32 %v15376_v18, 0.0  ;;  %v15378_v35 = vld [vmem:[#allocation41_spill] sm:$0xff]  ;;  %v14148_v18 = vpack.c.bf16 %v15391_v17, %v15390_v42  ;;  %v5375_v42 = vld [vmem:[#allocation3 + $0xb28] sm:$0xff] }
 0x51a   :  { %v15379_v26 = vmax.f32 %v15378_v35, 0.0  ;;  %v5248_v35 = vld [vmem:[#allocation3 + $0x730] sm:$0xff]  ;;  %v5377_v17 = vld [vmem:[#allocation3 + $0xb38] sm:$0xff] }
 0x51b   :  { %5822 = vmatmul.mubr.bf16.gmra.mrb[44].mxu0 %v14084_v12  ;;  %6048 = vmatmul.mubr.bf16.gmra.mrb[44].mxu1 %v14084_v12 }
 0x51c   :  { %6111 = vmatpush1.bf16.msra.mxu0 %v5118_v16  ;;  %6337 = vmatpush1.bf16.msra.mxu1 %v5120_v49  ;;  %v14116_v30 = vpack.c.bf16 %v15379_v26, %v15377_v13  ;;  %v5184_v16 = vld [vmem:[#allocation3 + $0x530] sm:$0xff]  ;;  %v5199_v49 = vld [vmem:[#allocation3 + $0x5a8] sm:$0xff]  ;;  %v5246_v13 = vld [vmem:[#allocation3 + $0x720] sm:$0xff] }
 0x51d   :  { %6112 = vmatprep.subr.bf16.mxu0 %v5135_v52  ;;  %6338 = vmatprep.subr.bf16.mxu1 %v5137_v45  ;;  %v5201_v52 = vld [vmem:[#allocation3 + $0x5b8] sm:$0xff]  ;;  %v15380_v45 = vld [vmem:[#allocation44_spill] sm:$0xff]  ;;  %v5263_v26 = vld [vmem:[#allocation3 + $0x7a8] sm:$0xff] }
 0x51e   :  { %5831 = vmatprep.mubr.bf16.mxu0 %v14090_v43  ;;  %6057 = vmatprep.mubr.bf16.mxu1 %v14090_v43  ;;  %v15381_v4 = vmax.f32 %v15380_v45, 0.0  ;;  %v5278_v45 = vld [vmem:[#allocation3 + $0x820] sm:$0xff] }
 0x520   :  { %6113 = vmatpush1.bf16.msra.mxu0 %v5134_v27  ;;  %6339 = vmatpush1.bf16.msra.mxu1 %v5136_v21  ;;  %v14122_v10 = vpack.c.bf16 %v15383_v3, %v15381_v4  ;;  %v5198_v27 = vld [vmem:[#allocation3 + $0x5a0] sm:$0xff]  ;;  %v5200_v21 = vld [vmem:[#allocation3 + $0x5b0] sm:$0xff]  ;;  %v5297_v3 = vld [vmem:[#allocation3 + $0x8b8] sm:$0xff] }
 0x521   :  { %6114 = vmatprep.subr.bf16.mxu0 %v5151_v57  ;;  %6340 = vmatprep.subr.bf16.mxu1 %v5153_v31  ;;  %v5215_v57 = vld [vmem:[#allocation3 + $0x628] sm:$0xff]  ;;  %v5217_v31 = vld [vmem:[#allocation3 + $0x638] sm:$0xff]  ;;  %v5280_v4 = vld [vmem:[#allocation3 + $0x830] sm:$0xff] }
 0x523   :  { %5832 = vmatmul.mubr.bf16.gmra.mrb[48].mxu0 %v14100_v59  ;;  %6058 = vmatmul.mubr.bf16.gmra.mrb[48].mxu1 %v14100_v59 }
 0x524   :  { %6115 = vmatpush1.bf16.msra.mxu0 %v5150_v51  ;;  %6341 = vmatpush1.bf16.msra.mxu1 %v5152_v29  ;;  %v14132_v51 = vpack.c.bf16 %v15387_v6, %v15385_v24  ;;  %v5214_v29 = vld [vmem:[#allocation3 + $0x620] sm:$0xff]  ;;  %v5312_v24 = vld [vmem:[#allocation3 + $0x930] sm:$0xff]  ;;  %v5329_v6 = vld [vmem:[#allocation3 + $0x9b8] sm:$0xff] }
 0x525   :  { %6116 = vmatprep.subr.bf16.mxu0 %v5167_v61  ;;  %6342 = vmatprep.subr.bf16.mxu1 %v5169_v40  ;;  %v5216_v61 = vld [vmem:[#allocation3 + $0x630] sm:$0xff]  ;;  %v5231_v40 = vld [vmem:[#allocation3 + $0x6a8] sm:$0xff] }
 0x526   :  { %5841 = vmatprep.mubr.bf16.mxu0 %v14106_v38  ;;  %6067 = vmatprep.mubr.bf16.mxu1 %v14106_v38 }
 0x528   :  { %6117 = vmatpush1.bf16.msra.mxu0 %v5166_v20  ;;  %6343 = vmatpush1.bf16.msra.mxu1 %v5168_v39  ;;  %v5230_v20 = vld [vmem:[#allocation3 + $0x6a0] sm:$0xff]  ;;  %v5232_v39 = vld [vmem:[#allocation3 + $0x6b0] sm:$0xff] }
 0x529   :  { %6118 = vmatprep.subr.bf16.mxu0 %v5183_v7  ;;  %6344 = vmatprep.subr.bf16.mxu1 %v5185_v60  ;;  %v5247_v7 = vld [vmem:[#allocation3 + $0x728] sm:$0xff]  ;;  %v5249_v60 = vld [vmem:[#allocation3 + $0x738] sm:$0xff] }
 0x52b   :  { %5842 = vmatmul.mubr.bf16.gmra.mrb[52].mxu0 %v14116_v30  ;;  %6068 = vmatmul.mubr.bf16.gmra.mrb[52].mxu1 %v14116_v30 }
 0x52c   :  { %6119 = vmatpush1.bf16.msra.mxu0 %v5182_v32  ;;  %6345 = vmatpush1.bf16.msra.mxu1 %v5184_v16  ;;  %v5265_v32 = vld [vmem:[#allocation3 + $0x7b8] sm:$0xff]  ;;  %v5262_v16 = vld [vmem:[#allocation3 + $0x7a0] sm:$0xff] }
 0x52d   :  { %6120 = vmatprep.subr.bf16.mxu0 %v5199_v49  ;;  %6346 = vmatprep.subr.bf16.mxu1 %v5201_v52  ;;  %v5281_v49 = vld [vmem:[#allocation3 + $0x838] sm:$0xff]  ;;  %v15392_v52 = vld [vmem:[#allocation47_spill] sm:$0xff] }
 0x52e   :  { %5851 = vmatprep.mubr.bf16.mxu0 %v14122_v10  ;;  %6077 = vmatprep.mubr.bf16.mxu1 %v14122_v10 }
 0x530   :  { %6121 = vmatpush1.bf16.msra.mxu0 %v5198_v27  ;;  %6347 = vmatpush1.bf16.msra.mxu1 %v5200_v21  ;;  %v5294_v27 = vld [vmem:[#allocation3 + $0x8a0] sm:$0xff]  ;;  %v5296_v21 = vld [vmem:[#allocation3 + $0x8b0] sm:$0xff] }
 0x531   :  { %6122 = vmatprep.subr.bf16.mxu0 %v5215_v57  ;;  %6348 = vmatprep.subr.bf16.mxu1 %v5217_v31  ;;  %v5311_v57 = vld [vmem:[#allocation3 + $0x928] sm:$0xff]  ;;  %v5313_v31 = vld [vmem:[#allocation3 + $0x938] sm:$0xff] }
 0x533   :  { %5852 = vmatmul.mubr.bf16.gmra.mrb[56].mxu0 %v14132_v51  ;;  %6078 = vmatmul.mubr.bf16.gmra.mrb[56].mxu1 %v14132_v51 }
 0x534   :  { %6123 = vmatpush1.bf16.msra.mxu0 %v5214_v29  ;;  %6349 = vmatpush1.bf16.msra.mxu1 %v5216_v61  ;;  %v5326_v29 = vld [vmem:[#allocation3 + $0x9a0] sm:$0xff]  ;;  %v5328_v61 = vld [vmem:[#allocation3 + $0x9b0] sm:$0xff] }
 0x535   :  { %6124 = vmatprep.subr.bf16.mxu0 %v5231_v40  ;;  %6350 = vmatprep.subr.bf16.mxu1 %v5233_v25  ;;  %v5343_v40 = vld [vmem:[#allocation3 + $0xa28] sm:$0xff]  ;;  %v5345_v25 = vld [vmem:[#allocation3 + $0xa38] sm:$0xff] }
 0x536   :  { %5861 = vmatprep.mubr.bf16.mxu0 %v14138_v1  ;;  %6087 = vmatprep.mubr.bf16.mxu1 %v14138_v1 }
 0x538   :  { %6125 = vmatpush1.bf16.msra.mxu0 %v5230_v20  ;;  %6351 = vmatpush1.bf16.msra.mxu1 %v5232_v39  ;;  %v5359_v20 = vld [vmem:[#allocation3 + $0xaa8] sm:$0xff]  ;;  %v5361_v39 = vld [vmem:[#allocation3 + $0xab8] sm:$0xff] }
 0x539   :  { %6126 = vmatprep.subr.bf16.mxu0 %v5247_v7  ;;  %6352 = vmatprep.subr.bf16.mxu1 %v5249_v60  ;;  %v5358_v7 = vld [vmem:[#allocation3 + $0xaa0] sm:$0xff]  ;;  %v5360_v60 = vld [vmem:[#allocation3 + $0xab0] sm:$0xff] }
 0x53b   :  { %5862 = vmatmul.mubr.bf16.gmra.mrb[60].mxu0 %v14148_v18  ;;  %6088 = vmatmul.mubr.bf16.gmra.mrb[60].mxu1 %v14148_v18 }
 0x53c   :  { %6127 = vmatpush1.bf16.msra.mxu0 %v5246_v13  ;;  %6353 = vmatpush1.bf16.msra.mxu1 %v5248_v35  ;;  %v5374_v13 = vld [vmem:[#allocation3 + $0xb20] sm:$0xff]  ;;  %v5376_v35 = vld [vmem:[#allocation3 + $0xb30] sm:$0xff] }
 0x53d   :  { %6128 = vmatprep.subr.bf16.mxu0 %v5263_v26  ;;  %6354 = vmatprep.subr.bf16.mxu1 %v5265_v32  ;;  %v5391_v26 = vld [vmem:[#allocation3 + $0xba8] sm:$0xff]  ;;  %v5393_v32 = vld [vmem:[#allocation3 + $0xbb8] sm:$0xff] }
 0x53e   :  { %6130 = vmatprep.mubr.bf16.mxu0 %v15392_v52  ;;  %6356 = vmatprep.mubr.bf16.mxu1 %v15392_v52 }
 0x540   :  { %6129 = vmatpush1.bf16.msra.mxu0 %v5262_v16  ;;  %6355 = vmatpush1.bf16.msra.mxu1 %v5264_v41  ;;  %v5390_v16 = vld [vmem:[#allocation3 + $0xba0] sm:$0xff]  ;;  %v5392_v41 = vld [vmem:[#allocation3 + $0xbb0] sm:$0xff] }
 0x541   :  { %6211 = vmatprep.subr.bf16.mxu0 %v5279_v23  ;;  %6437 = vmatprep.subr.bf16.mxu1 %v5281_v49  ;;  %v5407_v23 = vld [vmem:[#allocation3 + $0xc28] sm:$0xff]  ;;  %v5409_v49 = vld [vmem:[#allocation3 + $0xc38] sm:$0xff] }
 0x543   :  { %6131 = vmatmul.mubr.bf16.vlgmr.msra.gmra.mrb[64].mxu0 %v13908_v5  ;;  %6357 = vmatmul.mubr.bf16.vlgmr.msra.gmra.mrb[64].mxu1 %v13908_v5 }
 0x544   :  { %6212 = vmatpush1.bf16.msra.mxu0 %v5278_v45  ;;  %6438 = vmatpush1.bf16.msra.mxu1 %v5280_v4  ;;  %v5406_v45 = vld [vmem:[#allocation3 + $0xc20] sm:$0xff]  ;;  %v5408_v4 = vld [vmem:[#allocation3 + $0xc30] sm:$0xff] }
 0x545   :  { %6213 = vmatprep.subr.bf16.mxu0 %v5295_v9  ;;  %6439 = vmatprep.subr.bf16.mxu1 %v5297_v3  ;;  %v5423_v9 = vld [vmem:[#allocation3 + $0xca8] sm:$0xff]  ;;  %v5425_v3 = vld [vmem:[#allocation3 + $0xcb8] sm:$0xff] }
 0x546   :  { %6140 = vmatprep.mubr.bf16.mxu0 %v13914_v46  ;;  %6366 = vmatprep.mubr.bf16.mxu1 %v13914_v46 }
 0x548   :  { %6214 = vmatpush1.bf16.msra.mxu0 %v5294_v27  ;;  %6440 = vmatpush1.bf16.msra.mxu1 %v5296_v21  ;;  %v5422_v27 = vld [vmem:[#allocation3 + $0xca0] sm:$0xff]  ;;  %v5424_v21 = vld [vmem:[#allocation3 + $0xcb0] sm:$0xff] }
 0x549   :  { %6215 = vmatprep.subr.bf16.mxu0 %v5311_v57  ;;  %6441 = vmatprep.subr.bf16.mxu1 %v5313_v31  ;;  %v5439_v57 = vld [vmem:[#allocation3 + $0xd28] sm:$0xff]  ;;  %v5441_v31 = vld [vmem:[#allocation3 + $0xd38] sm:$0xff] }
 0x54b   :  { %6141 = vmatmul.mubr.bf16.gmra.mrb[68].mxu0 %v13924_v62  ;;  %6367 = vmatmul.mubr.bf16.gmra.mrb[68].mxu1 %v13924_v62 }
 0x54c   :  { %6216 = vmatpush1.bf16.msra.mxu0 %v5310_v36  ;;  %6442 = vmatpush1.bf16.msra.mxu1 %v5312_v24  ;;  %v5438_v36 = vld [vmem:[#allocation3 + $0xd20] sm:$0xff]  ;;  %v5440_v24 = vld [vmem:[#allocation3 + $0xd30] sm:$0xff] }
 0x54d   :  { %6217 = vmatprep.subr.bf16.mxu0 %v5327_v47  ;;  %6443 = vmatprep.subr.bf16.mxu1 %v5329_v6  ;;  %v5455_v47 = vld [vmem:[#allocation3 + $0xda8] sm:$0xff]  ;;  %v5457_v6 = vld [vmem:[#allocation3 + $0xdb8] sm:$0xff] }
 0x54e   :  { %6150 = vmatprep.mubr.bf16.mxu0 %v13930_v48  ;;  %6376 = vmatprep.mubr.bf16.mxu1 %v13930_v48 }
 0x550   :  { %6218 = vmatpush1.bf16.msra.mxu0 %v5326_v29  ;;  %6444 = vmatpush1.bf16.msra.mxu1 %v5328_v61  ;;  %v5454_v29 = vld [vmem:[#allocation3 + $0xda0] sm:$0xff]  ;;  %v5456_v61 = vld [vmem:[#allocation3 + $0xdb0] sm:$0xff] }
 0x551   :  { %6219 = vmatprep.subr.bf16.mxu0 %v5343_v40  ;;  %6445 = vmatprep.subr.bf16.mxu1 %v5345_v25  ;;  %v5471_v40 = vld [vmem:[#allocation3 + $0xe28] sm:$0xff]  ;;  %v5473_v25 = vld [vmem:[#allocation3 + $0xe38] sm:$0xff] }
 0x553   :  { %6151 = vmatmul.mubr.bf16.gmra.mrb[72].mxu0 %v13940_v28  ;;  %6377 = vmatmul.mubr.bf16.gmra.mrb[72].mxu1 %v13940_v28 }
 0x554   :  { %6220 = vmatpush1.bf16.msra.mxu0 %v5342_v50  ;;  %6446 = vmatpush1.bf16.msra.mxu1 %v5344_v54  ;;  %v5470_v50 = vld [vmem:[#allocation3 + $0xe20] sm:$0xff]  ;;  %v5472_v54 = vld [vmem:[#allocation3 + $0xe30] sm:$0xff] }
 0x555   :  { %6221 = vmatprep.subr.bf16.mxu0 %v5359_v20  ;;  %6447 = vmatprep.subr.bf16.mxu1 %v5361_v39  ;;  %v5487_v20 = vld [vmem:[#allocation3 + $0xea8] sm:$0xff]  ;;  %v5489_v39 = vld [vmem:[#allocation3 + $0xeb8] sm:$0xff] }
 0x556   :  { %6160 = vmatprep.mubr.bf16.mxu0 %v13946_v44  ;;  %6386 = vmatprep.mubr.bf16.mxu1 %v13946_v44 }
 0x558   :  { %6222 = vmatpush1.bf16.msra.mxu0 %v5358_v7  ;;  %6448 = vmatpush1.bf16.msra.mxu1 %v5360_v60  ;;  %v5486_v7 = vld [vmem:[#allocation3 + $0xea0] sm:$0xff]  ;;  %v5488_v60 = vld [vmem:[#allocation3 + $0xeb0] sm:$0xff] }
 0x559   :  { %6223 = vmatprep.subr.bf16.mxu0 %v5375_v42  ;;  %6449 = vmatprep.subr.bf16.mxu1 %v5377_v17  ;;  %v5503_v42 = vld [vmem:[#allocation3 + $0xf28] sm:$0xff]  ;;  %v5505_v17 = vld [vmem:[#allocation3 + $0xf38] sm:$0xff] }
 0x55b   :  { %6161 = vmatmul.mubr.bf16.gmra.mrb[76].mxu0 %v13956_v33  ;;  %6387 = vmatmul.mubr.bf16.gmra.mrb[76].mxu1 %v13956_v33 }
 0x55c   :  { %6224 = vmatpush1.bf16.msra.mxu0 %v5374_v13  ;;  %6450 = vmatpush1.bf16.msra.mxu1 %v5376_v35  ;;  %v5502_v13 = vld [vmem:[#allocation3 + $0xf20] sm:$0xff]  ;;  %v5504_v35 = vld [vmem:[#allocation3 + $0xf30] sm:$0xff] }
 0x55d   :  { %6225 = vmatprep.subr.bf16.mxu0 %v5391_v26  ;;  %6451 = vmatprep.subr.bf16.mxu1 %v5393_v32  ;;  %v5519_v26 = vld [vmem:[#allocation3 + $0xfa8] sm:$0xff]  ;;  %v5521_v32 = vld [vmem:[#allocation3 + $0xfb8] sm:$0xff] }
 0x55e   :  { %6170 = vmatprep.mubr.bf16.mxu0 %v13962_v8  ;;  %6396 = vmatprep.mubr.bf16.mxu1 %v13962_v8 }
 0x560   :  { %6226 = vmatpush1.bf16.msra.mxu0 %v5390_v16  ;;  %6452 = vmatpush1.bf16.msra.mxu1 %v5392_v41  ;;  %v5518_v16 = vld [vmem:[#allocation3 + $0xfa0] sm:$0xff]  ;;  %v5520_v41 = vld [vmem:[#allocation3 + $0xfb0] sm:$0xff] }
 0x561   :  { %6227 = vmatprep.subr.bf16.mxu0 %v5407_v23  ;;  %6453 = vmatprep.subr.bf16.mxu1 %v5409_v49  ;;  %v5027_v23 = vld [vmem:[#allocation3 + $0x48] sm:$0xff]  ;;  %v5029_v49 = vld [vmem:[#allocation3 + $0x58] sm:$0xff] }
 0x563   :  { %6171 = vmatmul.mubr.bf16.gmra.mrb[80].mxu0 %v13972_v58  ;;  %6397 = vmatmul.mubr.bf16.gmra.mrb[80].mxu1 %v13972_v58 }
 0x564   :  { %6228 = vmatpush1.bf16.msra.mxu0 %v5406_v45  ;;  %6454 = vmatpush1.bf16.msra.mxu1 %v5408_v4  ;;  %v5026_v45 = vld [vmem:[#allocation3 + $0x40] sm:$0xff]  ;;  %v5028_v4 = vld [vmem:[#allocation3 + $0x50] sm:$0xff] }
 0x565   :  { %6229 = vmatprep.subr.bf16.mxu0 %v5423_v9  ;;  %6455 = vmatprep.subr.bf16.mxu1 %v5425_v3  ;;  %v5043_v9 = vld [vmem:[#allocation3 + $0xc8] sm:$0xff]  ;;  %v5045_v3 = vld [vmem:[#allocation3 + $0xd8] sm:$0xff] }
 0x566   :  { %6180 = vmatprep.mubr.bf16.mxu0 %v13978_v37  ;;  %6406 = vmatprep.mubr.bf16.mxu1 %v13978_v37 }
 0x568   :  { %6230 = vmatpush1.bf16.msra.mxu0 %v5422_v27  ;;  %6456 = vmatpush1.bf16.msra.mxu1 %v5424_v21  ;;  %v5042_v27 = vld [vmem:[#allocation3 + $0xc0] sm:$0xff]  ;;  %v5044_v21 = vld [vmem:[#allocation3 + $0xd0] sm:$0xff] }
 0x569   :  { %6231 = vmatprep.subr.bf16.mxu0 %v5439_v57  ;;  %6457 = vmatprep.subr.bf16.mxu1 %v5441_v31  ;;  %v5059_v57 = vld [vmem:[#allocation3 + $0x148] sm:$0xff]  ;;  %v5061_v31 = vld [vmem:[#allocation3 + $0x158] sm:$0xff] }
 0x56b   :  { %6181 = vmatmul.mubr.bf16.gmra.mrb[84].mxu0 %v13988_v15  ;;  %6407 = vmatmul.mubr.bf16.gmra.mrb[84].mxu1 %v13988_v15 }
 0x56c   :  { %6232 = vmatpush1.bf16.msra.mxu0 %v5438_v36  ;;  %6458 = vmatpush1.bf16.msra.mxu1 %v5440_v24  ;;  %v5058_v36 = vld [vmem:[#allocation3 + $0x140] sm:$0xff]  ;;  %v5060_v24 = vld [vmem:[#allocation3 + $0x150] sm:$0xff] }
 0x56d   :  { %6233 = vmatprep.subr.bf16.mxu0 %v5455_v47  ;;  %6459 = vmatprep.subr.bf16.mxu1 %v5457_v6  ;;  %v5075_v47 = vld [vmem:[#allocation3 + $0x1c8] sm:$0xff]  ;;  %v5077_v6 = vld [vmem:[#allocation3 + $0x1d8] sm:$0xff] }
 0x56e   :  { %6190 = vmatprep.mubr.bf16.mxu0 %v13994_v56  ;;  %6416 = vmatprep.mubr.bf16.mxu1 %v13994_v56 }
 0x570   :  { %6234 = vmatpush1.bf16.msra.mxu0 %v5454_v29  ;;  %6460 = vmatpush1.bf16.msra.mxu1 %v5456_v61  ;;  %v5074_v29 = vld [vmem:[#allocation3 + $0x1c0] sm:$0xff]  ;;  %v5076_v61 = vld [vmem:[#allocation3 + $0x1d0] sm:$0xff] }
 0x571   :  { %6235 = vmatprep.subr.bf16.mxu0 %v5471_v40  ;;  %6461 = vmatprep.subr.bf16.mxu1 %v5473_v25  ;;  %v5091_v40 = vld [vmem:[#allocation3 + $0x248] sm:$0xff]  ;;  %v5093_v25 = vld [vmem:[#allocation3 + $0x258] sm:$0xff] }
 0x573   :  { %6191 = vmatmul.mubr.bf16.gmra.mrb[88].mxu0 %v14004_v55  ;;  %6417 = vmatmul.mubr.bf16.gmra.mrb[88].mxu1 %v14004_v55 }
 0x574   :  { %6236 = vmatpush1.bf16.msra.mxu0 %v5470_v50  ;;  %6462 = vmatpush1.bf16.msra.mxu1 %v5472_v54  ;;  %v5090_v50 = vld [vmem:[#allocation3 + $0x240] sm:$0xff]  ;;  %v5092_v54 = vld [vmem:[#allocation3 + $0x250] sm:$0xff] }
 0x575   :  { %6237 = vmatprep.subr.bf16.mxu0 %v5487_v20  ;;  %6463 = vmatprep.subr.bf16.mxu1 %v5489_v39  ;;  %v5107_v20 = vld [vmem:[#allocation3 + $0x2c8] sm:$0xff]  ;;  %v5109_v39 = vld [vmem:[#allocation3 + $0x2d8] sm:$0xff] }
 0x576   :  { %6200 = vmatprep.mubr.bf16.mxu0 %v14010_v14  ;;  %6426 = vmatprep.mubr.bf16.mxu1 %v14010_v14 }
 0x578   :  { %6238 = vmatpush1.bf16.msra.mxu0 %v5486_v7  ;;  %6464 = vmatpush1.bf16.msra.mxu1 %v5488_v60  ;;  %v5106_v7 = vld [vmem:[#allocation3 + $0x2c0] sm:$0xff]  ;;  %v5108_v60 = vld [vmem:[#allocation3 + $0x2d0] sm:$0xff] }
 0x579   :  { %6239 = vmatprep.subr.bf16.mxu0 %v5503_v42  ;;  %6465 = vmatprep.subr.bf16.mxu1 %v5505_v17  ;;  %v5123_v42 = vld [vmem:[#allocation3 + $0x348] sm:$0xff]  ;;  %v5125_v17 = vld [vmem:[#allocation3 + $0x358] sm:$0xff] }
 0x57b   :  { %6201 = vmatmul.mubr.bf16.gmra.mrb[92].mxu0 %v14020_v22  ;;  %6427 = vmatmul.mubr.bf16.gmra.mrb[92].mxu1 %v14020_v22 }
 0x57c   :  { %6240 = vmatpush1.bf16.msra.mxu0 %v5502_v13  ;;  %6466 = vmatpush1.bf16.msra.mxu1 %v5504_v35  ;;  %v5122_v13 = vld [vmem:[#allocation3 + $0x340] sm:$0xff]  ;;  %v5124_v35 = vld [vmem:[#allocation3 + $0x350] sm:$0xff] }
 0x57d   :  { %6241 = vmatprep.subr.bf16.mxu0 %v5519_v26  ;;  %6467 = vmatprep.subr.bf16.mxu1 %v5521_v32  ;;  %v5139_v26 = vld [vmem:[#allocation3 + $0x3c8] sm:$0xff]  ;;  %v5141_v32 = vld [vmem:[#allocation3 + $0x3d8] sm:$0xff] }
 0x57e   :  { %6243 = vmatprep.mubr.bf16.mxu0 %v14026_v2  ;;  %6469 = vmatprep.mubr.bf16.mxu1 %v14026_v2 }
 0x580   :  { %6242 = vmatpush1.bf16.msra.mxu0 %v5518_v16  ;;  %6468 = vmatpush1.bf16.msra.mxu1 %v5520_v41  ;;  %v5138_v16 = vld [vmem:[#allocation3 + $0x3c0] sm:$0xff]  ;;  %v5140_v41 = vld [vmem:[#allocation3 + $0x3d0] sm:$0xff] }
 0x581   :  { %6550 = vmatprep.subr.bf16.mxu0 %v5027_v23  ;;  %6776 = vmatprep.subr.bf16.mxu1 %v5029_v49  ;;  %v5155_v23 = vld [vmem:[#allocation3 + $0x448] sm:$0xff]  ;;  %v5157_v49 = vld [vmem:[#allocation3 + $0x458] sm:$0xff] }
 0x583   :  { %6244 = vmatmul.mubr.bf16.vlgmr.msra.gmra.mrb[64].mxu0 %v14036_v11  ;;  %6470 = vmatmul.mubr.bf16.vlgmr.msra.gmra.mrb[64].mxu1 %v14036_v11 }
 0x584   :  { %6551 = vmatpush1.bf16.msra.mxu0 %v5026_v45  ;;  %6777 = vmatpush1.bf16.msra.mxu1 %v5028_v4  ;;  %v5154_v45 = vld [vmem:[#allocation3 + $0x440] sm:$0xff]  ;;  %v5156_v4 = vld [vmem:[#allocation3 + $0x450] sm:$0xff] }
 0x585   :  { %6552 = vmatprep.subr.bf16.mxu0 %v5043_v9  ;;  %6778 = vmatprep.subr.bf16.mxu1 %v5045_v3  ;;  %v5171_v9 = vld [vmem:[#allocation3 + $0x4c8] sm:$0xff]  ;;  %v5173_v3 = vld [vmem:[#allocation3 + $0x4d8] sm:$0xff] }
 0x586   :  { %6253 = vmatprep.mubr.bf16.mxu0 %v14042_v0  ;;  %6479 = vmatprep.mubr.bf16.mxu1 %v14042_v0 }
 0x588   :  { %6553 = vmatpush1.bf16.msra.mxu0 %v5042_v27  ;;  %6779 = vmatpush1.bf16.msra.mxu1 %v5044_v21  ;;  %v5170_v27 = vld [vmem:[#allocation3 + $0x4c0] sm:$0xff]  ;;  %v5172_v21 = vld [vmem:[#allocation3 + $0x4d0] sm:$0xff] }
 0x589   :  { %6554 = vmatprep.subr.bf16.mxu0 %v5059_v57  ;;  %6780 = vmatprep.subr.bf16.mxu1 %v5061_v31  ;;  %v5187_v57 = vld [vmem:[#allocation3 + $0x548] sm:$0xff]  ;;  %v5189_v31 = vld [vmem:[#allocation3 + $0x558] sm:$0xff] }
 0x58b   :  { %6254 = vmatmul.mubr.bf16.gmra.mrb[68].mxu0 %v14052_v63  ;;  %6480 = vmatmul.mubr.bf16.gmra.mrb[68].mxu1 %v14052_v63 }
 0x58c   :  { %6555 = vmatpush1.bf16.msra.mxu0 %v5058_v36  ;;  %6781 = vmatpush1.bf16.msra.mxu1 %v5060_v24  ;;  %v5186_v36 = vld [vmem:[#allocation3 + $0x540] sm:$0xff]  ;;  %v5188_v24 = vld [vmem:[#allocation3 + $0x550] sm:$0xff] }
 0x58d   :  { %6556 = vmatprep.subr.bf16.mxu0 %v5075_v47  ;;  %6782 = vmatprep.subr.bf16.mxu1 %v5077_v6  ;;  %v5203_v47 = vld [vmem:[#allocation3 + $0x5c8] sm:$0xff]  ;;  %v5205_v6 = vld [vmem:[#allocation3 + $0x5d8] sm:$0xff] }
 0x58e   :  { %6263 = vmatprep.mubr.bf16.mxu0 %v14058_v19  ;;  %6489 = vmatprep.mubr.bf16.mxu1 %v14058_v19 }
 0x590   :  { %6557 = vmatpush1.bf16.msra.mxu0 %v5074_v29  ;;  %6783 = vmatpush1.bf16.msra.mxu1 %v5076_v61  ;;  %v5202_v29 = vld [vmem:[#allocation3 + $0x5c0] sm:$0xff]  ;;  %v5204_v61 = vld [vmem:[#allocation3 + $0x5d0] sm:$0xff] }
 0x591   :  { %6558 = vmatprep.subr.bf16.mxu0 %v5091_v40  ;;  %6784 = vmatprep.subr.bf16.mxu1 %v5093_v25  ;;  %v5219_v40 = vld [vmem:[#allocation3 + $0x648] sm:$0xff]  ;;  %v5221_v25 = vld [vmem:[#allocation3 + $0x658] sm:$0xff] }
 0x593   :  { %6264 = vmatmul.mubr.bf16.gmra.mrb[72].mxu0 %v14068_v53  ;;  %6490 = vmatmul.mubr.bf16.gmra.mrb[72].mxu1 %v14068_v53 }
 0x594   :  { %6559 = vmatpush1.bf16.msra.mxu0 %v5090_v50  ;;  %6785 = vmatpush1.bf16.msra.mxu1 %v5092_v54  ;;  %v5218_v50 = vld [vmem:[#allocation3 + $0x640] sm:$0xff]  ;;  %v5220_v54 = vld [vmem:[#allocation3 + $0x650] sm:$0xff] }
 0x595   :  { %6560 = vmatprep.subr.bf16.mxu0 %v5107_v20  ;;  %6786 = vmatprep.subr.bf16.mxu1 %v5109_v39  ;;  %v5235_v20 = vld [vmem:[#allocation3 + $0x6c8] sm:$0xff]  ;;  %v5237_v39 = vld [vmem:[#allocation3 + $0x6d8] sm:$0xff] }
 0x596   :  { %6273 = vmatprep.mubr.bf16.mxu0 %v14074_v34  ;;  %6499 = vmatprep.mubr.bf16.mxu1 %v14074_v34 }
 0x598   :  { %6561 = vmatpush1.bf16.msra.mxu0 %v5106_v7  ;;  %6787 = vmatpush1.bf16.msra.mxu1 %v5108_v60  ;;  %v5234_v7 = vld [vmem:[#allocation3 + $0x6c0] sm:$0xff]  ;;  %v5236_v60 = vld [vmem:[#allocation3 + $0x6d0] sm:$0xff] }
 0x599   :  { %6562 = vmatprep.subr.bf16.mxu0 %v5123_v42  ;;  %6788 = vmatprep.subr.bf16.mxu1 %v5125_v17  ;;  %v5251_v42 = vld [vmem:[#allocation3 + $0x748] sm:$0xff]  ;;  %v5253_v17 = vld [vmem:[#allocation3 + $0x758] sm:$0xff] }
 0x59b   :  { %6274 = vmatmul.mubr.bf16.gmra.mrb[76].mxu0 %v14084_v12  ;;  %6500 = vmatmul.mubr.bf16.gmra.mrb[76].mxu1 %v14084_v12 }
 0x59c   :  { %6563 = vmatpush1.bf16.msra.mxu0 %v5122_v13  ;;  %6789 = vmatpush1.bf16.msra.mxu1 %v5124_v35  ;;  %v5250_v13 = vld [vmem:[#allocation3 + $0x740] sm:$0xff]  ;;  %v5252_v35 = vld [vmem:[#allocation3 + $0x750] sm:$0xff] }
 0x59d   :  { %6564 = vmatprep.subr.bf16.mxu0 %v5139_v26  ;;  %6790 = vmatprep.subr.bf16.mxu1 %v5141_v32  ;;  %v5267_v26 = vld [vmem:[#allocation3 + $0x7c8] sm:$0xff]  ;;  %v5269_v32 = vld [vmem:[#allocation3 + $0x7d8] sm:$0xff] }
 0x59e   :  { %6283 = vmatprep.mubr.bf16.mxu0 %v14090_v43  ;;  %6509 = vmatprep.mubr.bf16.mxu1 %v14090_v43 }
 0x5a0   :  { %6565 = vmatpush1.bf16.msra.mxu0 %v5138_v16  ;;  %6791 = vmatpush1.bf16.msra.mxu1 %v5140_v41  ;;  %v5266_v16 = vld [vmem:[#allocation3 + $0x7c0] sm:$0xff]  ;;  %v5268_v41 = vld [vmem:[#allocation3 + $0x7d0] sm:$0xff] }
 0x5a1   :  { %6566 = vmatprep.subr.bf16.mxu0 %v5155_v23  ;;  %6792 = vmatprep.subr.bf16.mxu1 %v5157_v49  ;;  %v5283_v23 = vld [vmem:[#allocation3 + $0x848] sm:$0xff]  ;;  %v5285_v49 = vld [vmem:[#allocation3 + $0x858] sm:$0xff] }
 0x5a3   :  { %6284 = vmatmul.mubr.bf16.gmra.mrb[80].mxu0 %v14100_v59  ;;  %6510 = vmatmul.mubr.bf16.gmra.mrb[80].mxu1 %v14100_v59 }
 0x5a4   :  { %6567 = vmatpush1.bf16.msra.mxu0 %v5154_v45  ;;  %6793 = vmatpush1.bf16.msra.mxu1 %v5156_v4  ;;  %v5282_v45 = vld [vmem:[#allocation3 + $0x840] sm:$0xff]  ;;  %v5284_v4 = vld [vmem:[#allocation3 + $0x850] sm:$0xff] }
 0x5a5   :  { %6568 = vmatprep.subr.bf16.mxu0 %v5171_v9  ;;  %6794 = vmatprep.subr.bf16.mxu1 %v5173_v3  ;;  %v5299_v9 = vld [vmem:[#allocation3 + $0x8c8] sm:$0xff]  ;;  %v5301_v3 = vld [vmem:[#allocation3 + $0x8d8] sm:$0xff] }
 0x5a6   :  { %6293 = vmatprep.mubr.bf16.mxu0 %v14106_v38  ;;  %6519 = vmatprep.mubr.bf16.mxu1 %v14106_v38 }
 0x5a8   :  { %6569 = vmatpush1.bf16.msra.mxu0 %v5170_v27  ;;  %6795 = vmatpush1.bf16.msra.mxu1 %v5172_v21  ;;  %v5298_v27 = vld [vmem:[#allocation3 + $0x8c0] sm:$0xff]  ;;  %v5300_v21 = vld [vmem:[#allocation3 + $0x8d0] sm:$0xff] }
 0x5a9   :  { %6570 = vmatprep.subr.bf16.mxu0 %v5187_v57  ;;  %6796 = vmatprep.subr.bf16.mxu1 %v5189_v31  ;;  %v5315_v57 = vld [vmem:[#allocation3 + $0x948] sm:$0xff]  ;;  %v5317_v31 = vld [vmem:[#allocation3 + $0x958] sm:$0xff] }
 0x5ab   :  { %6294 = vmatmul.mubr.bf16.gmra.mrb[84].mxu0 %v14116_v30  ;;  %6520 = vmatmul.mubr.bf16.gmra.mrb[84].mxu1 %v14116_v30 }
 0x5ac   :  { %6571 = vmatpush1.bf16.msra.mxu0 %v5186_v36  ;;  %6797 = vmatpush1.bf16.msra.mxu1 %v5188_v24  ;;  %v5314_v36 = vld [vmem:[#allocation3 + $0x940] sm:$0xff]  ;;  %v5316_v24 = vld [vmem:[#allocation3 + $0x950] sm:$0xff] }
 0x5ad   :  { %6572 = vmatprep.subr.bf16.mxu0 %v5203_v47  ;;  %6798 = vmatprep.subr.bf16.mxu1 %v5205_v6  ;;  %v5331_v47 = vld [vmem:[#allocation3 + $0x9c8] sm:$0xff]  ;;  %v5333_v6 = vld [vmem:[#allocation3 + $0x9d8] sm:$0xff] }
 0x5ae   :  { %6303 = vmatprep.mubr.bf16.mxu0 %v14122_v10  ;;  %6529 = vmatprep.mubr.bf16.mxu1 %v14122_v10 }
 0x5b0   :  { %6573 = vmatpush1.bf16.msra.mxu0 %v5202_v29  ;;  %6799 = vmatpush1.bf16.msra.mxu1 %v5204_v61  ;;  %v5330_v29 = vld [vmem:[#allocation3 + $0x9c0] sm:$0xff]  ;;  %v5332_v61 = vld [vmem:[#allocation3 + $0x9d0] sm:$0xff] }
 0x5b1   :  { %6574 = vmatprep.subr.bf16.mxu0 %v5219_v40  ;;  %6800 = vmatprep.subr.bf16.mxu1 %v5221_v25  ;;  %v5347_v40 = vld [vmem:[#allocation3 + $0xa48] sm:$0xff]  ;;  %v5349_v25 = vld [vmem:[#allocation3 + $0xa58] sm:$0xff] }
 0x5b3   :  { %6304 = vmatmul.mubr.bf16.gmra.mrb[88].mxu0 %v14132_v51  ;;  %6530 = vmatmul.mubr.bf16.gmra.mrb[88].mxu1 %v14132_v51 }
 0x5b4   :  { %6575 = vmatpush1.bf16.msra.mxu0 %v5218_v50  ;;  %6801 = vmatpush1.bf16.msra.mxu1 %v5220_v54  ;;  %v5562_v50 = vld [vmem:[#allocation15] sm:$0xff]  ;;  %v5346_v54 = vld [vmem:[#allocation3 + $0xa40] sm:$0xff] }
 0x5b5   :  { %6576 = vmatprep.subr.bf16.mxu0 %v5235_v20  ;;  %6802 = vmatprep.subr.bf16.mxu1 %v5237_v39  ;;  %v5348_v20 = vld [vmem:[#allocation3 + $0xa50] sm:$0xff]  ;;  %v5363_v39 = vld [vmem:[#allocation3 + $0xac8] sm:$0xff] }
 0x5b6   :  { %6313 = vmatprep.mubr.bf16.mxu0 %v14138_v1  ;;  %6539 = vmatprep.mubr.bf16.mxu1 %v14138_v1 }
 0x5b8   :  { %6577 = vmatpush1.bf16.msra.mxu0 %v5234_v7  ;;  %6803 = vmatpush1.bf16.msra.mxu1 %v5236_v60  ;;  %v5365_v7 = vld [vmem:[#allocation3 + $0xad8] sm:$0xff]  ;;  %v15393_v60 = vld [vmem:[#allocation27_spill] sm:$0xff] }
 0x5b9   :  { %6578 = vmatprep.subr.bf16.mxu0 %v5251_v42  ;;  %6804 = vmatprep.subr.bf16.mxu1 %v5253_v17  ;;  %v14229_v42 = vrot.slane %v5562_v50, %v15393_v60  ;;  %v15394_v17 = vld [vmem:[#allocation28_spill] sm:$0xff] }
 0x5bb   :  { %6314 = vmatmul.mubr.bf16.gmra.mrb[92].mxu0 %v14148_v18  ;;  %6540 = vmatmul.mubr.bf16.gmra.mrb[92].mxu1 %v14148_v18 }
 0x5bc   :  { %6579 = vmatpush1.bf16.msra.mxu0 %v5250_v13  ;;  %6805 = vmatpush1.bf16.msra.mxu1 %v5252_v35  ;;  %v14232_v13 = vrot.slane %v5562_v50, %v15394_v17  ;;  %v15395_v35 = vld [vmem:[#allocation29_spill] sm:$0xff] }
 0x5bd   :  { %6580 = vmatprep.subr.bf16.mxu0 %v5267_v26  ;;  %6806 = vmatprep.subr.bf16.mxu1 %v5269_v32  ;;  %v14235_v26 = vrot.slane %v5562_v50, %v15395_v35  ;;  %v15396_v32 = vld [vmem:[#allocation30_spill] sm:$0xff] }
 0x5be   :  { %6582 = vmatprep.mubr.bf16.mxu0 %v15392_v52  ;;  %6808 = vmatprep.mubr.bf16.mxu1 %v15392_v52 }
 0x5c0   :  { %6581 = vmatpush1.bf16.msra.mxu0 %v5266_v16  ;;  %6807 = vmatpush1.bf16.msra.mxu1 %v5268_v41  ;;  %v14238_v16 = vrot.slane %v5562_v50, %v15396_v32  ;;  %v5362_v41 = vld [vmem:[#allocation3 + $0xac0] sm:$0xff]  ;;  %v5380_v50 = vld [vmem:[#allocation3 + $0xb50] sm:$0xff] }
 0x5c1   :  { %6663 = vmatprep.subr.bf16.mxu0 %v5283_v23  ;;  %6889 = vmatprep.subr.bf16.mxu1 %v5285_v49  ;;  %v5364_v23 = vld [vmem:[#allocation3 + $0xad0] sm:$0xff] }
 0x5c3   :  { %6583 = vmatmul.mubr.bf16.vlgmr.msra.gmra.mrb[96].mxu0 %v13908_v5  ;;  %6809 = vmatmul.mubr.bf16.vlgmr.msra.gmra.mrb[96].mxu1 %v13908_v5 }
 0x5c4   :  { %6664 = vmatpush1.bf16.msra.mxu0 %v5282_v45  ;;  %6890 = vmatpush1.bf16.msra.mxu1 %v5284_v4  ;;  %v5379_v4 = vld [vmem:[#allocation3 + $0xb48] sm:$0xff] }
 0x5c5   :  { %6665 = vmatprep.subr.bf16.mxu0 %v5299_v9  ;;  %6891 = vmatprep.subr.bf16.mxu1 %v5301_v3  ;;  %v5381_v9 = vld [vmem:[#allocation3 + $0xb58] sm:$0xff] }
 0x5c6   :  { %6592 = vmatprep.mubr.bf16.mxu0 %v13914_v46  ;;  %6818 = vmatprep.mubr.bf16.mxu1 %v13914_v46 }
 0x5c8   :  { %6666 = vmatpush1.bf16.msra.mxu0 %v5298_v27  ;;  %6892 = vmatpush1.bf16.msra.mxu1 %v5300_v21 }
 0x5c9   :  { %6667 = vmatprep.subr.bf16.mxu0 %v5315_v57  ;;  %6893 = vmatprep.subr.bf16.mxu1 %v5317_v31 }
 0x5cb   :  { %6593 = vmatmul.mubr.bf16.gmra.mrb[100].mxu0 %v13924_v62  ;;  %6819 = vmatmul.mubr.bf16.gmra.mrb[100].mxu1 %v13924_v62 }
 0x5cc   :  { %6668 = vmatpush1.bf16.msra.mxu0 %v5314_v36  ;;  %6894 = vmatpush1.bf16.msra.mxu1 %v5316_v24 }
 0x5cd   :  { %6669 = vmatprep.subr.bf16.mxu0 %v5331_v47  ;;  %6895 = vmatprep.subr.bf16.mxu1 %v5333_v6 }
 0x5ce   :  { %6602 = vmatprep.mubr.bf16.mxu0 %v13930_v48  ;;  %6828 = vmatprep.mubr.bf16.mxu1 %v13930_v48 }
 0x5d0   :  { %6670 = vmatpush1.bf16.msra.mxu0 %v5330_v29  ;;  %6896 = vmatpush1.bf16.msra.mxu1 %v5332_v61 }
 0x5d1   :  { %6671 = vmatprep.subr.bf16.mxu0 %v5347_v40  ;;  %6897 = vmatprep.subr.bf16.mxu1 %v5349_v25  ;;  %v5378_v25 = vld [vmem:[#allocation3 + $0xb40] sm:$0xff] }
 0x5d3   :  { %6603 = vmatmul.mubr.bf16.gmra.mrb[104].mxu0 %v13940_v28  ;;  %6829 = vmatmul.mubr.bf16.gmra.mrb[104].mxu1 %v13940_v28 }
 0x5d4   :  { %6672 = vmatpush1.bf16.msra.mxu0 %v5346_v54  ;;  %6898 = vmatpush1.bf16.msra.mxu1 %v5348_v20 }
 0x5d5   :  { %6673 = vmatprep.subr.bf16.mxu0 %v5363_v39  ;;  %6899 = vmatprep.subr.bf16.mxu1 %v5365_v7  ;;  %v5395_v39 = vld [vmem:[#allocation3 + $0xbc8] sm:$0xff]  ;;  %v5397_v7 = vld [vmem:[#allocation3 + $0xbd8] sm:$0xff] }
 0x5d6   :  { %v5793_v49 = vpop.f32.mrb[32].mxu0  ;;  %v6019_v45 = vpop.f32.mrb[32].mxu1  ;;  %6612 = vmatprep.mubr.bf16.mxu0 %v13946_v44  ;;  %6838 = vmatprep.mubr.bf16.mxu1 %v13946_v44 }
 0x5d7   :  { %v11169_v3 = vadd.f32 %v5793_v49, %v14229_v42  ;;  %v11201_v27 = vadd.f32 %v6019_v45, %v14232_v13  ;;  %v5795_v21 = vpop.f32.mrb[33].mxu0  ;;  %v6021_v57 = vpop.f32.mrb[33].mxu1 }
 0x5d8   :  { %v11170_v31 = vadd.f32 %v5795_v21, %v14235_v26  ;;  %v11202_v36 = vadd.f32 %v6021_v57, %v14238_v16  ;;  %v5797_v24 = vpop.f32.mrb[34].mxu0  ;;  %v6023_v47 = vpop.f32.mrb[34].mxu1  ;;  %6674 = vmatpush1.bf16.msra.mxu0 %v5362_v41  ;;  %6900 = vmatpush1.bf16.msra.mxu1 %v5364_v23 }
 0x5d9   :  { %v11171_v6 = vadd.f32 %v5797_v24, %v14229_v42  ;;  %v11203_v29 = vadd.f32 %v6023_v47, %v14232_v13  ;;  %v5799_v61 = vpop.f32.mrb[35].mxu0  ;;  %v6025_v40 = vpop.f32.mrb[35].mxu1  ;;  %6675 = vmatprep.subr.bf16.mxu0 %v5379_v4  ;;  %6901 = vmatprep.subr.bf16.mxu1 %v5381_v9  ;;  %v7454_v49 = vmax.f32 %v11169_v3, 0.0  ;;  %v7456_v45 = vmax.f32 %v11201_v27, 0.0  ;;  %v5394_v3 = vld [vmem:[#allocation3 + $0xbc0] sm:$0xff]  ;;  %v5396_v27 = vld [vmem:[#allocation3 + $0xbd0] sm:$0xff] }
 0x5da   :  { %v11172_v54 = vadd.f32 %v5799_v61, %v14235_v26  ;;  %v11204_v20 = vadd.f32 %v6025_v40, %v14238_v16  ;;  %v7455_v21 = vmax.f32 %v11170_v31, 0.0  ;;  %v7457_v57 = vmax.f32 %v11202_v36, 0.0  ;;  %v5411_v31 = vld [vmem:[#allocation3 + $0xc48] sm:$0xff]  ;;  %v5413_v36 = vld [vmem:[#allocation3 + $0xc58] sm:$0xff] }
 0x5db   :  { %v7470_v41 = vmax.f32 %v11171_v6, 0.0  ;;  %v7472_v23 = vmax.f32 %v11203_v29, 0.0  ;;  %6613 = vmatmul.mubr.bf16.gmra.mrb[108].mxu0 %v13956_v33  ;;  %6839 = vmatmul.mubr.bf16.gmra.mrb[108].mxu1 %v13956_v33 }
 0x5dc   :  { %v7471_v4 = vmax.f32 %v11172_v54, 0.0  ;;  %v7473_v9 = vmax.f32 %v11204_v20, 0.0  ;;  %6676 = vmatpush1.bf16.msra.mxu0 %v5378_v25  ;;  %6902 = vmatpush1.bf16.msra.mxu1 %v5380_v50 }
 0x5dd   :  { %v14252_v24 = vpack.c.bf16 %v7470_v41, %v7454_v49  ;;  %v14254_v47 = vpack.c.bf16 %v7472_v23, %v7456_v45  ;;  %6677 = vmatprep.subr.bf16.mxu0 %v5395_v39  ;;  %6903 = vmatprep.subr.bf16.mxu1 %v5397_v7 }
 0x5de   :  { %v14256_v6 = vpack.c.bf16 %v7471_v4, %v7455_v21  ;;  %v14258_v29 = vpack.c.bf16 %v7473_v9, %v7457_v57  ;;  %v5803_v61 = vpop.f32.mrb[36].mxu0  ;;  %v6029_v40 = vpop.f32.mrb[36].mxu1  ;;  %6622 = vmatprep.mubr.bf16.mxu0 %v13962_v8  ;;  %6848 = vmatprep.mubr.bf16.mxu1 %v13962_v8  ;;  %v5410_v4 = vld [vmem:[#allocation3 + $0xc40] sm:$0xff]  ;;  %v5412_v9 = vld [vmem:[#allocation3 + $0xc50] sm:$0xff] }
 0x5df   :  { %v11173_v25 = vadd.f32 %v5803_v61, %v14229_v42  ;;  %v11205_v50 = vadd.f32 %v6029_v40, %v14232_v13  ;;  %v5805_v54 = vpop.f32.mrb[37].mxu0  ;;  %v6031_v20 = vpop.f32.mrb[37].mxu1 }
 0x5e0   :  { %v11174_v39 = vadd.f32 %v5805_v54, %v14235_v26  ;;  %v11206_v7 = vadd.f32 %v6031_v20, %v14238_v16  ;;  %v5807_v49 = vpop.f32.mrb[38].mxu0  ;;  %v6033_v45 = vpop.f32.mrb[38].mxu1  ;;  %6678 = vmatpush1.bf16.msra.mxu0 %v5394_v3  ;;  %6904 = vmatpush1.bf16.msra.mxu1 %v5396_v27  ;;  %v5427_v54 = vld [vmem:[#allocation3 + $0xcc8] sm:$0xff]  ;;  %v5429_v20 = vld [vmem:[#allocation3 + $0xcd8] sm:$0xff] }
 0x5e1   :  { %v11175_v41 = vadd.f32 %v5807_v49, %v14229_v42  ;;  %v11207_v23 = vadd.f32 %v6033_v45, %v14232_v13  ;;  %v5809_v21 = vpop.f32.mrb[39].mxu0  ;;  %v6035_v57 = vpop.f32.mrb[39].mxu1  ;;  %6679 = vmatprep.subr.bf16.mxu0 %v5411_v31  ;;  %6905 = vmatprep.subr.bf16.mxu1 %v5413_v36  ;;  %v7486_v32 = vmax.f32 %v11173_v25, 0.0  ;;  %v7488_v35 = vmax.f32 %v11205_v50, 0.0  ;;  %v5426_v25 = vld [vmem:[#allocation3 + $0xcc0] sm:$0xff]  ;;  %v5428_v50 = vld [vmem:[#allocation3 + $0xcd0] sm:$0xff] }
 0x5e2   :  { %v11176_v61 = vadd.f32 %v5809_v21, %v14235_v26  ;;  %v11208_v40 = vadd.f32 %v6035_v57, %v14238_v16  ;;  %v7487_v49 = vmax.f32 %v11174_v39, 0.0  ;;  %v7489_v45 = vmax.f32 %v11206_v7, 0.0  ;;  %v5443_v39 = vld [vmem:[#allocation3 + $0xd48] sm:$0xff]  ;;  %v5445_v7 = vld [vmem:[#allocation3 + $0xd58] sm:$0xff] }
 0x5e3   :  { %v7502_v3 = vmax.f32 %v11175_v41, 0.0  ;;  %v7504_v27 = vmax.f32 %v11207_v23, 0.0  ;;  %6623 = vmatmul.mubr.bf16.gmra.mrb[112].mxu0 %v13972_v58  ;;  %6849 = vmatmul.mubr.bf16.gmra.mrb[112].mxu1 %v13972_v58 }
 0x5e4   :  { %v7503_v31 = vmax.f32 %v11176_v61, 0.0  ;;  %v7505_v36 = vmax.f32 %v11208_v40, 0.0  ;;  %6680 = vmatpush1.bf16.msra.mxu0 %v5410_v4  ;;  %6906 = vmatpush1.bf16.msra.mxu1 %v5412_v9 }
 0x5e5   :  { %v14272_v17 = vpack.c.bf16 %v7502_v3, %v7486_v32  ;;  %v14274_v21 = vpack.c.bf16 %v7504_v27, %v7488_v35  ;;  %6681 = vmatprep.subr.bf16.mxu0 %v5427_v54  ;;  %6907 = vmatprep.subr.bf16.mxu1 %v5429_v20 }
 0x5e6   :  { %v14276_v41 = vpack.c.bf16 %v7503_v31, %v7487_v49  ;;  %v14278_v23 = vpack.c.bf16 %v7505_v36, %v7489_v45  ;;  %v5813_v57 = vpop.f32.mrb[40].mxu0  ;;  %v6039_v60 = vpop.f32.mrb[40].mxu1  ;;  %6632 = vmatprep.mubr.bf16.mxu0 %v13978_v37  ;;  %6858 = vmatprep.mubr.bf16.mxu1 %v13978_v37  ;;  %v5442_v31 = vld [vmem:[#allocation3 + $0xd40] sm:$0xff] }
 0x5e7   :  { %15397 = vst [vmem:[#allocation36_spill] sm:$0xff] %v14272_v17  ;;  %15398 = vst [vmem:[#allocation38_spill] sm:$0xff] %v14274_v21  ;;  %v11177_v32 = vadd.f32 %v5813_v57, %v14229_v42  ;;  %v11209_v35 = vadd.f32 %v6039_v60, %v14232_v13  ;;  %v5815_v4 = vpop.f32.mrb[41].mxu0  ;;  %v6041_v9 = vpop.f32.mrb[41].mxu1  ;;  %v5444_v60 = vld [vmem:[#allocation3 + $0xd50] sm:$0xff] }
 0x5e8   :  { %15399 = vst [vmem:[#allocation35_spill] sm:$0xff] %v14276_v41  ;;  %15400 = vst [vmem:[#allocation37_spill] sm:$0xff] %v14278_v23  ;;  %v11178_v61 = vadd.f32 %v5815_v4, %v14235_v26  ;;  %v11210_v40 = vadd.f32 %v6041_v9, %v14238_v16  ;;  %v5817_v54 = vpop.f32.mrb[42].mxu0  ;;  %v6043_v20 = vpop.f32.mrb[42].mxu1  ;;  %6682 = vmatpush1.bf16.msra.mxu0 %v5426_v25  ;;  %6908 = vmatpush1.bf16.msra.mxu1 %v5428_v50  ;;  %v5459_v4 = vld [vmem:[#allocation3 + $0xdc8] sm:$0xff]  ;;  %v5461_v9 = vld [vmem:[#allocation3 + $0xdd8] sm:$0xff] }
 0x5e9   :  { %v11179_v3 = vadd.f32 %v5817_v54, %v14229_v42  ;;  %v11211_v27 = vadd.f32 %v6043_v20, %v14232_v13  ;;  %v5819_v49 = vpop.f32.mrb[43].mxu0  ;;  %v6045_v45 = vpop.f32.mrb[43].mxu1  ;;  %6683 = vmatprep.subr.bf16.mxu0 %v5443_v39  ;;  %6909 = vmatprep.subr.bf16.mxu1 %v5445_v7  ;;  %v7518_v21 = vmax.f32 %v11177_v32, 0.0  ;;  %v7520_v17 = vmax.f32 %v11209_v35, 0.0  ;;  %v5458_v32 = vld [vmem:[#allocation3 + $0xdc0] sm:$0xff]  ;;  %v5460_v35 = vld [vmem:[#allocation3 + $0xdd0] sm:$0xff] }
 0x5ea   :  { %v11180_v36 = vadd.f32 %v5819_v49, %v14235_v26  ;;  %v11212_v57 = vadd.f32 %v6045_v45, %v14238_v16  ;;  %v7519_v54 = vmax.f32 %v11178_v61, 0.0  ;;  %v7521_v20 = vmax.f32 %v11210_v40, 0.0  ;;  %v5475_v61 = vld [vmem:[#allocation3 + $0xe48] sm:$0xff]  ;;  %v5477_v40 = vld [vmem:[#allocation3 + $0xe58] sm:$0xff] }
 0x5eb   :  { %v7534_v25 = vmax.f32 %v11179_v3, 0.0  ;;  %v7536_v50 = vmax.f32 %v11211_v27, 0.0  ;;  %6633 = vmatmul.mubr.bf16.gmra.mrb[116].mxu0 %v13988_v15  ;;  %6859 = vmatmul.mubr.bf16.gmra.mrb[116].mxu1 %v13988_v15 }
 0x5ec   :  { %v7535_v39 = vmax.f32 %v11180_v36, 0.0  ;;  %v7537_v7 = vmax.f32 %v11212_v57, 0.0  ;;  %6684 = vmatpush1.bf16.msra.mxu0 %v5442_v31  ;;  %6910 = vmatpush1.bf16.msra.mxu1 %v5444_v60 }
 0x5ed   :  { %v14292_v23 = vpack.c.bf16 %v7534_v25, %v7518_v21  ;;  %v14294_v49 = vpack.c.bf16 %v7536_v50, %v7520_v17  ;;  %6685 = vmatprep.subr.bf16.mxu0 %v5459_v4  ;;  %6911 = vmatprep.subr.bf16.mxu1 %v5461_v9 }
 0x5ee   :  { %v14296_v3 = vpack.c.bf16 %v7535_v39, %v7519_v54  ;;  %v14298_v27 = vpack.c.bf16 %v7537_v7, %v7521_v20  ;;  %v5823_v45 = vpop.f32.mrb[44].mxu0  ;;  %v6049_v41 = vpop.f32.mrb[44].mxu1  ;;  %6642 = vmatprep.mubr.bf16.mxu0 %v13994_v56  ;;  %6868 = vmatprep.mubr.bf16.mxu1 %v13994_v56  ;;  %v5474_v39 = vld [vmem:[#allocation3 + $0xe40] sm:$0xff] }
 0x5ef   :  { %15401 = vst [vmem:[#allocation40_spill] sm:$0xff] %v14292_v23  ;;  %15402 = vst [vmem:[#allocation42_spill] sm:$0xff] %v14294_v49  ;;  %v11181_v21 = vadd.f32 %v5823_v45, %v14229_v42  ;;  %v11213_v17 = vadd.f32 %v6049_v41, %v14232_v13  ;;  %v5825_v31 = vpop.f32.mrb[45].mxu0  ;;  %v6051_v60 = vpop.f32.mrb[45].mxu1  ;;  %v5476_v41 = vld [vmem:[#allocation3 + $0xe50] sm:$0xff] }
 0x5f0   :  { %15403 = vst [vmem:[#allocation39_spill] sm:$0xff] %v14296_v3  ;;  %15404 = vst [vmem:[#allocation41_spill] sm:$0xff] %v14298_v27  ;;  %v11182_v36 = vadd.f32 %v5825_v31, %v14235_v26  ;;  %v11214_v57 = vadd.f32 %v6051_v60, %v14238_v16  ;;  %v5827_v4 = vpop.f32.mrb[46].mxu0  ;;  %v6053_v9 = vpop.f32.mrb[46].mxu1  ;;  %6686 = vmatpush1.bf16.msra.mxu0 %v5458_v32  ;;  %6912 = vmatpush1.bf16.msra.mxu1 %v5460_v35  ;;  %v5491_v31 = vld [vmem:[#allocation3 + $0xec8] sm:$0xff]  ;;  %v5493_v60 = vld [vmem:[#allocation3 + $0xed8] sm:$0xff] }
 0x5f1   :  { %v11183_v25 = vadd.f32 %v5827_v4, %v14229_v42  ;;  %v11215_v50 = vadd.f32 %v6053_v9, %v14232_v13  ;;  %v5829_v54 = vpop.f32.mrb[47].mxu0  ;;  %v6055_v20 = vpop.f32.mrb[47].mxu1  ;;  %6687 = vmatprep.subr.bf16.mxu0 %v5475_v61  ;;  %6913 = vmatprep.subr.bf16.mxu1 %v5477_v40  ;;  %v7550_v49 = vmax.f32 %v11181_v21, 0.0  ;;  %v7552_v23 = vmax.f32 %v11213_v17, 0.0  ;;  %v5490_v21 = vld [vmem:[#allocation3 + $0xec0] sm:$0xff]  ;;  %v5492_v17 = vld [vmem:[#allocation3 + $0xed0] sm:$0xff] }
 0x5f2   :  { %v11184_v7 = vadd.f32 %v5829_v54, %v14235_v26  ;;  %v11216_v45 = vadd.f32 %v6055_v20, %v14238_v16  ;;  %v7551_v4 = vmax.f32 %v11182_v36, 0.0  ;;  %v7553_v9 = vmax.f32 %v11214_v57, 0.0  ;;  %v5507_v36 = vld [vmem:[#allocation3 + $0xf48] sm:$0xff]  ;;  %v5509_v57 = vld [vmem:[#allocation3 + $0xf58] sm:$0xff] }
 0x5f3   :  { %v7566_v32 = vmax.f32 %v11183_v25, 0.0  ;;  %v7568_v35 = vmax.f32 %v11215_v50, 0.0  ;;  %6643 = vmatmul.mubr.bf16.gmra.mrb[120].mxu0 %v14004_v55  ;;  %6869 = vmatmul.mubr.bf16.gmra.mrb[120].mxu1 %v14004_v55 }
 0x5f4   :  { %v7567_v61 = vmax.f32 %v11184_v7, 0.0  ;;  %v7569_v40 = vmax.f32 %v11216_v45, 0.0  ;;  %6688 = vmatpush1.bf16.msra.mxu0 %v5474_v39  ;;  %6914 = vmatpush1.bf16.msra.mxu1 %v5476_v41 }
 0x5f5   :  { %v14312_v27 = vpack.c.bf16 %v7566_v32, %v7550_v49  ;;  %v14314_v54 = vpack.c.bf16 %v7568_v35, %v7552_v23  ;;  %6689 = vmatprep.subr.bf16.mxu0 %v5491_v31  ;;  %6915 = vmatprep.subr.bf16.mxu1 %v5493_v60 }
 0x5f6   :  { %v14316_v25 = vpack.c.bf16 %v7567_v61, %v7551_v4  ;;  %v14318_v50 = vpack.c.bf16 %v7569_v40, %v7553_v9  ;;  %v5833_v20 = vpop.f32.mrb[48].mxu0  ;;  %v6059_v3 = vpop.f32.mrb[48].mxu1  ;;  %6652 = vmatprep.mubr.bf16.mxu0 %v14010_v14  ;;  %6878 = vmatprep.mubr.bf16.mxu1 %v14010_v14  ;;  %v5506_v61 = vld [vmem:[#allocation3 + $0xf40] sm:$0xff] }
 0x5f7   :  { %15405 = vst [vmem:[#allocation44_spill] sm:$0xff] %v14312_v27  ;;  %15406 = vst [vmem:[#allocation46_spill] sm:$0xff] %v14314_v54  ;;  %v11185_v49 = vadd.f32 %v5833_v20, %v14229_v42  ;;  %v11217_v23 = vadd.f32 %v6059_v3, %v14232_v13  ;;  %v5835_v39 = vpop.f32.mrb[49].mxu0  ;;  %v6061_v41 = vpop.f32.mrb[49].mxu1  ;;  %v5508_v3 = vld [vmem:[#allocation3 + $0xf50] sm:$0xff] }
 0x5f8   :  { %15407 = vst [vmem:[#allocation43_spill] sm:$0xff] %v14316_v25  ;;  %15408 = vst [vmem:[#allocation45_spill] sm:$0xff] %v14318_v50  ;;  %v11186_v7 = vadd.f32 %v5835_v39, %v14235_v26  ;;  %v11218_v45 = vadd.f32 %v6061_v41, %v14238_v16  ;;  %v5837_v31 = vpop.f32.mrb[50].mxu0  ;;  %v6063_v60 = vpop.f32.mrb[50].mxu1  ;;  %6690 = vmatpush1.bf16.msra.mxu0 %v5490_v21  ;;  %6916 = vmatpush1.bf16.msra.mxu1 %v5492_v17  ;;  %v5523_v39 = vld [vmem:[#allocation3 + $0xfc8] sm:$0xff]  ;;  %v5525_v41 = vld [vmem:[#allocation3 + $0xfd8] sm:$0xff] }
 0x5f9   :  { %v11187_v32 = vadd.f32 %v5837_v31, %v14229_v42  ;;  %v11219_v35 = vadd.f32 %v6063_v60, %v14232_v13  ;;  %v5839_v4 = vpop.f32.mrb[51].mxu0  ;;  %v6065_v9 = vpop.f32.mrb[51].mxu1  ;;  %6691 = vmatprep.subr.bf16.mxu0 %v5507_v36  ;;  %6917 = vmatprep.subr.bf16.mxu1 %v5509_v57  ;;  %v7582_v54 = vmax.f32 %v11185_v49, 0.0  ;;  %v7584_v27 = vmax.f32 %v11217_v23, 0.0  ;;  %v5522_v49 = vld [vmem:[#allocation3 + $0xfc0] sm:$0xff]  ;;  %v5524_v23 = vld [vmem:[#allocation3 + $0xfd0] sm:$0xff] }
 0x5fa   :  { %v11188_v40 = vadd.f32 %v5839_v4, %v14235_v26  ;;  %v11220_v20 = vadd.f32 %v6065_v9, %v14238_v16  ;;  %v7583_v31 = vmax.f32 %v11186_v7, 0.0  ;;  %v7585_v60 = vmax.f32 %v11218_v45, 0.0  ;;  %v5031_v7 = vld [vmem:[#allocation3 + $0x68] sm:$0xff]  ;;  %v5033_v45 = vld [vmem:[#allocation3 + $0x78] sm:$0xff] }
 0x5fb   :  { %v7598_v21 = vmax.f32 %v11187_v32, 0.0  ;;  %v7600_v17 = vmax.f32 %v11219_v35, 0.0  ;;  %6653 = vmatmul.mubr.bf16.gmra.mrb[124].mxu0 %v14020_v22  ;;  %6879 = vmatmul.mubr.bf16.gmra.mrb[124].mxu1 %v14020_v22 }
 0x5fc   :  { %v7599_v36 = vmax.f32 %v11188_v40, 0.0  ;;  %v7601_v57 = vmax.f32 %v11220_v20, 0.0  ;;  %6692 = vmatpush1.bf16.msra.mxu0 %v5506_v61  ;;  %6918 = vmatpush1.bf16.msra.mxu1 %v5508_v3 }
 0x5fd   :  { %v14332_v50 = vpack.c.bf16 %v7598_v21, %v7582_v54  ;;  %v14334_v4 = vpack.c.bf16 %v7600_v17, %v7584_v27  ;;  %6693 = vmatprep.subr.bf16.mxu0 %v5523_v39  ;;  %6919 = vmatprep.subr.bf16.mxu1 %v5525_v41 }
 0x5fe   :  { %v14336_v32 = vpack.c.bf16 %v7599_v36, %v7583_v31  ;;  %v14338_v35 = vpack.c.bf16 %v7601_v57, %v7585_v60  ;;  %v5843_v9 = vpop.f32.mrb[52].mxu0  ;;  %v6069_v25 = vpop.f32.mrb[52].mxu1  ;;  %6695 = vmatprep.mubr.bf16.mxu0 %v14026_v2  ;;  %6921 = vmatprep.mubr.bf16.mxu1 %v14026_v2  ;;  %v5030_v36 = vld [vmem:[#allocation3 + $0x60] sm:$0xff] }
 0x5ff   :  { %15409 = vst [vmem:[#allocation47_spill] sm:$0xff] %v14332_v50  ;;  %15410 = vst [vmem:[#allocation48_spill] sm:$0xff] %v14334_v4  ;;  %v11189_v54 = vadd.f32 %v5843_v9, %v14229_v42  ;;  %v11221_v27 = vadd.f32 %v6069_v25, %v14232_v13  ;;  %v5845_v61 = vpop.f32.mrb[53].mxu0  ;;  %v6071_v3 = vpop.f32.mrb[53].mxu1  ;;  %v5032_v25 = vld [vmem:[#allocation3 + $0x70] sm:$0xff] }
 0x600   :  { %15411 = vst [vmem:[#allocation49_spill] sm:$0xff] %v14336_v32  ;;  %15412 = vst [vmem:[#allocation50_spill] sm:$0xff] %v14338_v35  ;;  %v11190_v40 = vadd.f32 %v5845_v61, %v14235_v26  ;;  %v11222_v20 = vadd.f32 %v6071_v3, %v14238_v16  ;;  %v5847_v39 = vpop.f32.mrb[54].mxu0  ;;  %v6073_v41 = vpop.f32.mrb[54].mxu1  ;;  %6694 = vmatpush1.bf16.msra.mxu0 %v5522_v49  ;;  %6920 = vmatpush1.bf16.msra.mxu1 %v5524_v23  ;;  %v5047_v61 = vld [vmem:[#allocation3 + $0xe8] sm:$0xff]  ;;  %v5049_v3 = vld [vmem:[#allocation3 + $0xf8] sm:$0xff] }
 0x601   :  { %v11191_v21 = vadd.f32 %v5847_v39, %v14229_v42  ;;  %v11223_v17 = vadd.f32 %v6073_v41, %v14232_v13  ;;  %v5849_v31 = vpop.f32.mrb[55].mxu0  ;;  %v6075_v60 = vpop.f32.mrb[55].mxu1  ;;  %7002 = vmatprep.subr.bf16.mxu0 %v5031_v7  ;;  %7228 = vmatprep.subr.bf16.mxu1 %v5033_v45  ;;  %v7614_v4 = vmax.f32 %v11189_v54, 0.0  ;;  %v7616_v50 = vmax.f32 %v11221_v27, 0.0  ;;  %v5046_v54 = vld [vmem:[#allocation3 + $0xe0] sm:$0xff]  ;;  %v5048_v27 = vld [vmem:[#allocation3 + $0xf0] sm:$0xff] }
 0x602   :  { %v11192_v57 = vadd.f32 %v5849_v31, %v14235_v26  ;;  %v11224_v9 = vadd.f32 %v6075_v60, %v14238_v16  ;;  %v7615_v39 = vmax.f32 %v11190_v40, 0.0  ;;  %v7617_v41 = vmax.f32 %v11222_v20, 0.0  ;;  %v5063_v40 = vld [vmem:[#allocation3 + $0x168] sm:$0xff]  ;;  %v5065_v20 = vld [vmem:[#allocation3 + $0x178] sm:$0xff] }
 0x603   :  { %v7630_v49 = vmax.f32 %v11191_v21, 0.0  ;;  %v7632_v23 = vmax.f32 %v11223_v17, 0.0  ;;  %6696 = vmatmul.mubr.bf16.vlgmr.msra.gmra.mrb[96].mxu0 %v14036_v11  ;;  %6922 = vmatmul.mubr.bf16.vlgmr.msra.gmra.mrb[96].mxu1 %v14036_v11 }
 0x604   :  { %v7631_v7 = vmax.f32 %v11192_v57, 0.0  ;;  %v7633_v45 = vmax.f32 %v11224_v9, 0.0  ;;  %7003 = vmatpush1.bf16.msra.mxu0 %v5030_v36  ;;  %7229 = vmatpush1.bf16.msra.mxu1 %v5032_v25 }
 0x605   :  { %v14352_v35 = vpack.c.bf16 %v7630_v49, %v7614_v4  ;;  %v14354_v31 = vpack.c.bf16 %v7632_v23, %v7616_v50  ;;  %7004 = vmatprep.subr.bf16.mxu0 %v5047_v61  ;;  %7230 = vmatprep.subr.bf16.mxu1 %v5049_v3 }
 0x606   :  { %v14356_v21 = vpack.c.bf16 %v7631_v7, %v7615_v39  ;;  %v14358_v17 = vpack.c.bf16 %v7633_v45, %v7617_v41  ;;  %v5853_v60 = vpop.f32.mrb[56].mxu0  ;;  %v6079_v32 = vpop.f32.mrb[56].mxu1  ;;  %6705 = vmatprep.mubr.bf16.mxu0 %v14042_v0  ;;  %6931 = vmatprep.mubr.bf16.mxu1 %v14042_v0  ;;  %v5062_v7 = vld [vmem:[#allocation3 + $0x160] sm:$0xff] }
 0x607   :  { %15413 = vst [vmem:[#allocation51_spill] sm:$0xff] %v14352_v35  ;;  %15414 = vst [vmem:[#allocation52_spill] sm:$0xff] %v14354_v31  ;;  %v11193_v4 = vadd.f32 %v5853_v60, %v14229_v42  ;;  %v11225_v50 = vadd.f32 %v6079_v32, %v14232_v13  ;;  %v5855_v36 = vpop.f32.mrb[57].mxu0  ;;  %v6081_v25 = vpop.f32.mrb[57].mxu1  ;;  %v5064_v32 = vld [vmem:[#allocation3 + $0x170] sm:$0xff] }
 0x608   :  { %15415 = vst [vmem:[#allocation53_spill] sm:$0xff] %v14356_v21  ;;  %15416 = vst [vmem:[#allocation54_spill] sm:$0xff] %v14358_v17  ;;  %v11194_v57 = vadd.f32 %v5855_v36, %v14235_v26  ;;  %v11226_v9 = vadd.f32 %v6081_v25, %v14238_v16  ;;  %v5857_v61 = vpop.f32.mrb[58].mxu0  ;;  %v6083_v3 = vpop.f32.mrb[58].mxu1  ;;  %7005 = vmatpush1.bf16.msra.mxu0 %v5046_v54  ;;  %7231 = vmatpush1.bf16.msra.mxu1 %v5048_v27  ;;  %v5079_v36 = vld [vmem:[#allocation3 + $0x1e8] sm:$0xff]  ;;  %v5081_v25 = vld [vmem:[#allocation3 + $0x1f8] sm:$0xff] }
 0x609   :  { %v11195_v49 = vadd.f32 %v5857_v61, %v14229_v42  ;;  %v11227_v23 = vadd.f32 %v6083_v3, %v14232_v13  ;;  %v5859_v39 = vpop.f32.mrb[59].mxu0  ;;  %v6085_v41 = vpop.f32.mrb[59].mxu1  ;;  %7006 = vmatprep.subr.bf16.mxu0 %v5063_v40  ;;  %7232 = vmatprep.subr.bf16.mxu1 %v5065_v20  ;;  %v7646_v31 = vmax.f32 %v11193_v4, 0.0  ;;  %v7648_v35 = vmax.f32 %v11225_v50, 0.0  ;;  %v5078_v4 = vld [vmem:[#allocation3 + $0x1e0] sm:$0xff]  ;;  %v5080_v50 = vld [vmem:[#allocation3 + $0x1f0] sm:$0xff] }
 0x60a   :  { %v11196_v45 = vadd.f32 %v5859_v39, %v14235_v26  ;;  %v11228_v60 = vadd.f32 %v6085_v41, %v14238_v16  ;;  %v7647_v61 = vmax.f32 %v11194_v57, 0.0  ;;  %v7649_v3 = vmax.f32 %v11226_v9, 0.0  ;;  %v5095_v57 = vld [vmem:[#allocation3 + $0x268] sm:$0xff]  ;;  %v5097_v9 = vld [vmem:[#allocation3 + $0x278] sm:$0xff] }
 0x60b   :  { %v7662_v54 = vmax.f32 %v11195_v49, 0.0  ;;  %v7664_v27 = vmax.f32 %v11227_v23, 0.0  ;;  %6706 = vmatmul.mubr.bf16.gmra.mrb[100].mxu0 %v14052_v63  ;;  %6932 = vmatmul.mubr.bf16.gmra.mrb[100].mxu1 %v14052_v63 }
 0x60c   :  { %v7663_v40 = vmax.f32 %v11196_v45, 0.0  ;;  %v7665_v20 = vmax.f32 %v11228_v60, 0.0  ;;  %7007 = vmatpush1.bf16.msra.mxu0 %v5062_v7  ;;  %7233 = vmatpush1.bf16.msra.mxu1 %v5064_v32 }
 0x60d   :  { %v14372_v17 = vpack.c.bf16 %v7662_v54, %v7646_v31  ;;  %v14374_v39 = vpack.c.bf16 %v7664_v27, %v7648_v35  ;;  %7008 = vmatprep.subr.bf16.mxu0 %v5079_v36  ;;  %7234 = vmatprep.subr.bf16.mxu1 %v5081_v25 }
 0x60e   :  { %v14376_v49 = vpack.c.bf16 %v7663_v40, %v7647_v61  ;;  %v14378_v23 = vpack.c.bf16 %v7665_v20, %v7649_v3  ;;  %v5863_v41 = vpop.f32.mrb[60].mxu0  ;;  %v6089_v21 = vpop.f32.mrb[60].mxu1  ;;  %6715 = vmatprep.mubr.bf16.mxu0 %v14058_v19  ;;  %6941 = vmatprep.mubr.bf16.mxu1 %v14058_v19  ;;  %v5094_v40 = vld [vmem:[#allocation3 + $0x260] sm:$0xff] }
 0x60f   :  { %15417 = vst [vmem:[#allocation55_spill] sm:$0xff] %v14372_v17  ;;  %15418 = vst [vmem:[#allocation56_spill] sm:$0xff] %v14374_v39  ;;  %v11197_v31 = vadd.f32 %v5863_v41, %v14229_v42  ;;  %v11229_v35 = vadd.f32 %v6089_v21, %v14232_v13  ;;  %v5865_v7 = vpop.f32.mrb[61].mxu0  ;;  %v6091_v32 = vpop.f32.mrb[61].mxu1  ;;  %v5096_v21 = vld [vmem:[#allocation3 + $0x270] sm:$0xff] }
 0x610   :  { %v11198_v45 = vadd.f32 %v5865_v7, %v14235_v26  ;;  %v11230_v60 = vadd.f32 %v6091_v32, %v14238_v16  ;;  %v5867_v36 = vpop.f32.mrb[62].mxu0  ;;  %v6093_v25 = vpop.f32.mrb[62].mxu1  ;;  %7009 = vmatpush1.bf16.msra.mxu0 %v5078_v4  ;;  %7235 = vmatpush1.bf16.msra.mxu1 %v5080_v50  ;;  %v5111_v7 = vld [vmem:[#allocation3 + $0x2e8] sm:$0xff]  ;;  %v5113_v32 = vld [vmem:[#allocation3 + $0x2f8] sm:$0xff] }
 0x611   :  { %v11199_v54 = vadd.f32 %v5867_v36, %v14229_v42  ;;  %v11231_v27 = vadd.f32 %v6093_v25, %v14232_v13  ;;  %v5869_v61 = vpop.f32.mrb[63].mxu0  ;;  %v6095_v3 = vpop.f32.mrb[63].mxu1  ;;  %7010 = vmatprep.subr.bf16.mxu0 %v5095_v57  ;;  %7236 = vmatprep.subr.bf16.mxu1 %v5097_v9  ;;  %v7678_v39 = vmax.f32 %v11197_v31, 0.0  ;;  %v7680_v17 = vmax.f32 %v11229_v35, 0.0  ;;  %v5112_v31 = vld [vmem:[#allocation3 + $0x2f0] sm:$0xff] }
 0x612   :  { %v11200_v20 = vadd.f32 %v5869_v61, %v14235_v26  ;;  %v11232_v41 = vadd.f32 %v6095_v3, %v14238_v16  ;;  %v7679_v42 = vmax.f32 %v11198_v45, 0.0  ;;  %v7681_v13 = vmax.f32 %v11230_v60, 0.0  ;;  %v5110_v16 = vld [vmem:[#allocation3 + $0x2e0] sm:$0xff]  ;;  %v5127_v45 = vld [vmem:[#allocation3 + $0x368] sm:$0xff]  ;;  %v5129_v60 = vld [vmem:[#allocation3 + $0x378] sm:$0xff] }
 0x613   :  { %v7694_v4 = vmax.f32 %v11199_v54, 0.0  ;;  %v7696_v50 = vmax.f32 %v11231_v27, 0.0  ;;  %6716 = vmatmul.mubr.bf16.gmra.mrb[104].mxu0 %v14068_v53  ;;  %6942 = vmatmul.mubr.bf16.gmra.mrb[104].mxu1 %v14068_v53  ;;  %v5143_v54 = vld [vmem:[#allocation3 + $0x3e8] sm:$0xff]  ;;  %v5145_v27 = vld [vmem:[#allocation3 + $0x3f8] sm:$0xff]  ;;  %v5142_v61 = vld [vmem:[#allocation3 + $0x3e0] sm:$0xff] }
 0x614   :  { %v7695_v57 = vmax.f32 %v11200_v20, 0.0  ;;  %v7697_v9 = vmax.f32 %v11232_v41, 0.0  ;;  %7011 = vmatpush1.bf16.msra.mxu0 %v5094_v40  ;;  %7237 = vmatpush1.bf16.msra.mxu1 %v5096_v21  ;;  %v5144_v3 = vld [vmem:[#allocation3 + $0x3f0] sm:$0xff]  ;;  %v5159_v40 = vld [vmem:[#allocation3 + $0x468] sm:$0xff]  ;;  %v5161_v21 = vld [vmem:[#allocation3 + $0x478] sm:$0xff] }
 0x615   :  { %v14392_v36 = vpack.c.bf16 %v7694_v4, %v7678_v39  ;;  %v14394_v26 = vpack.c.bf16 %v7696_v50, %v7680_v17  ;;  %7012 = vmatprep.subr.bf16.mxu0 %v5111_v7  ;;  %7238 = vmatprep.subr.bf16.mxu1 %v5113_v32  ;;  %v5126_v17 = vld [vmem:[#allocation3 + $0x360] sm:$0xff]  ;;  %v5128_v39 = vld [vmem:[#allocation3 + $0x370] sm:$0xff]  ;;  %v5175_v7 = vld [vmem:[#allocation3 + $0x4e8] sm:$0xff] }
 0x616   :  { %v14396_v35 = vpack.c.bf16 %v7695_v57, %v7679_v42  ;;  %v14398_v25 = vpack.c.bf16 %v7697_v9, %v7681_v13  ;;  %6725 = vmatprep.mubr.bf16.mxu0 %v14074_v34  ;;  %6951 = vmatprep.mubr.bf16.mxu1 %v14074_v34  ;;  %v5158_v20 = vld [vmem:[#allocation3 + $0x460] sm:$0xff]  ;;  %v5160_v41 = vld [vmem:[#allocation3 + $0x470] sm:$0xff]  ;;  %v5177_v32 = vld [vmem:[#allocation3 + $0x4f8] sm:$0xff] }
 0x617   :  { %v5174_v4 = vld [vmem:[#allocation3 + $0x4e0] sm:$0xff]  ;;  %v5176_v50 = vld [vmem:[#allocation3 + $0x4f0] sm:$0xff]  ;;  %v5191_v42 = vld [vmem:[#allocation3 + $0x568] sm:$0xff] }
 0x618   :  { %7013 = vmatpush1.bf16.msra.mxu0 %v5110_v16  ;;  %7239 = vmatpush1.bf16.msra.mxu1 %v5112_v31  ;;  %v5193_v13 = vld [vmem:[#allocation3 + $0x578] sm:$0xff]  ;;  %v5190_v57 = vld [vmem:[#allocation3 + $0x560] sm:$0xff]  ;;  %v5192_v9 = vld [vmem:[#allocation3 + $0x570] sm:$0xff] }
 0x619   :  { %7014 = vmatprep.subr.bf16.mxu0 %v5127_v45  ;;  %7240 = vmatprep.subr.bf16.mxu1 %v5129_v60  ;;  %v5207_v16 = vld [vmem:[#allocation3 + $0x5e8] sm:$0xff]  ;;  %v5209_v31 = vld [vmem:[#allocation3 + $0x5f8] sm:$0xff]  ;;  %v5206_v45 = vld [vmem:[#allocation3 + $0x5e0] sm:$0xff] }
 0x61a   :  { %v5208_v60 = vld [vmem:[#allocation3 + $0x5f0] sm:$0xff] }
 0x61b   :  { %6726 = vmatmul.mubr.bf16.gmra.mrb[108].mxu0 %v14084_v12  ;;  %6952 = vmatmul.mubr.bf16.gmra.mrb[108].mxu1 %v14084_v12 }
 0x61c   :  { %7015 = vmatpush1.bf16.msra.mxu0 %v5126_v17  ;;  %7241 = vmatpush1.bf16.msra.mxu1 %v5128_v39  ;;  %v5223_v17 = vld [vmem:[#allocation3 + $0x668] sm:$0xff]  ;;  %v5225_v39 = vld [vmem:[#allocation3 + $0x678] sm:$0xff] }
 0x61d   :  { %7016 = vmatprep.subr.bf16.mxu0 %v5143_v54  ;;  %7242 = vmatprep.subr.bf16.mxu1 %v5145_v27  ;;  %v5222_v54 = vld [vmem:[#allocation3 + $0x660] sm:$0xff]  ;;  %v5224_v27 = vld [vmem:[#allocation3 + $0x670] sm:$0xff] }
 0x61e   :  { %6735 = vmatprep.mubr.bf16.mxu0 %v14090_v43  ;;  %6961 = vmatprep.mubr.bf16.mxu1 %v14090_v43 }
 0x620   :  { %7017 = vmatpush1.bf16.msra.mxu0 %v5142_v61  ;;  %7243 = vmatpush1.bf16.msra.mxu1 %v5144_v3  ;;  %v5239_v61 = vld [vmem:[#allocation3 + $0x6e8] sm:$0xff]  ;;  %v5241_v3 = vld [vmem:[#allocation3 + $0x6f8] sm:$0xff] }
 0x621   :  { %7018 = vmatprep.subr.bf16.mxu0 %v5159_v40  ;;  %7244 = vmatprep.subr.bf16.mxu1 %v5161_v21  ;;  %v5238_v40 = vld [vmem:[#allocation3 + $0x6e0] sm:$0xff]  ;;  %v5240_v21 = vld [vmem:[#allocation3 + $0x6f0] sm:$0xff] }
 0x623   :  { %6736 = vmatmul.mubr.bf16.gmra.mrb[112].mxu0 %v14100_v59  ;;  %6962 = vmatmul.mubr.bf16.gmra.mrb[112].mxu1 %v14100_v59 }
 0x624   :  { %7019 = vmatpush1.bf16.msra.mxu0 %v5158_v20  ;;  %7245 = vmatpush1.bf16.msra.mxu1 %v5160_v41  ;;  %v5255_v20 = vld [vmem:[#allocation3 + $0x768] sm:$0xff]  ;;  %v5257_v41 = vld [vmem:[#allocation3 + $0x778] sm:$0xff] }
 0x625   :  { %7020 = vmatprep.subr.bf16.mxu0 %v5175_v7  ;;  %7246 = vmatprep.subr.bf16.mxu1 %v5177_v32  ;;  %v5254_v7 = vld [vmem:[#allocation3 + $0x760] sm:$0xff]  ;;  %v5256_v32 = vld [vmem:[#allocation3 + $0x770] sm:$0xff] }
 0x626   :  { %6745 = vmatprep.mubr.bf16.mxu0 %v14106_v38  ;;  %6971 = vmatprep.mubr.bf16.mxu1 %v14106_v38 }
 0x628   :  { %7021 = vmatpush1.bf16.msra.mxu0 %v5174_v4  ;;  %7247 = vmatpush1.bf16.msra.mxu1 %v5176_v50  ;;  %v5271_v4 = vld [vmem:[#allocation3 + $0x7e8] sm:$0xff]  ;;  %v5273_v50 = vld [vmem:[#allocation3 + $0x7f8] sm:$0xff] }
 0x629   :  { %7022 = vmatprep.subr.bf16.mxu0 %v5191_v42  ;;  %7248 = vmatprep.subr.bf16.mxu1 %v5193_v13  ;;  %v5270_v42 = vld [vmem:[#allocation3 + $0x7e0] sm:$0xff]  ;;  %v5272_v13 = vld [vmem:[#allocation3 + $0x7f0] sm:$0xff] }
 0x62b   :  { %6746 = vmatmul.mubr.bf16.gmra.mrb[116].mxu0 %v14116_v30  ;;  %6972 = vmatmul.mubr.bf16.gmra.mrb[116].mxu1 %v14116_v30 }
 0x62c   :  { %7023 = vmatpush1.bf16.msra.mxu0 %v5190_v57  ;;  %7249 = vmatpush1.bf16.msra.mxu1 %v5192_v9  ;;  %v5287_v57 = vld [vmem:[#allocation3 + $0x868] sm:$0xff]  ;;  %v5289_v9 = vld [vmem:[#allocation3 + $0x878] sm:$0xff] }
 0x62d   :  { %7024 = vmatprep.subr.bf16.mxu0 %v5207_v16  ;;  %7250 = vmatprep.subr.bf16.mxu1 %v5209_v31  ;;  %v5286_v16 = vld [vmem:[#allocation3 + $0x860] sm:$0xff]  ;;  %v5288_v31 = vld [vmem:[#allocation3 + $0x870] sm:$0xff] }
 0x62e   :  { %6755 = vmatprep.mubr.bf16.mxu0 %v14122_v10  ;;  %6981 = vmatprep.mubr.bf16.mxu1 %v14122_v10 }
 0x630   :  { %7025 = vmatpush1.bf16.msra.mxu0 %v5206_v45  ;;  %7251 = vmatpush1.bf16.msra.mxu1 %v5208_v60  ;;  %v5303_v45 = vld [vmem:[#allocation3 + $0x8e8] sm:$0xff]  ;;  %v5305_v60 = vld [vmem:[#allocation3 + $0x8f8] sm:$0xff] }
 0x631   :  { %7026 = vmatprep.subr.bf16.mxu0 %v5223_v17  ;;  %7252 = vmatprep.subr.bf16.mxu1 %v5225_v39  ;;  %v5302_v17 = vld [vmem:[#allocation3 + $0x8e0] sm:$0xff]  ;;  %v5319_v39 = vld [vmem:[#allocation3 + $0x968] sm:$0xff] }
 0x633   :  { %6756 = vmatmul.mubr.bf16.gmra.mrb[120].mxu0 %v14132_v51  ;;  %6982 = vmatmul.mubr.bf16.gmra.mrb[120].mxu1 %v14132_v51 }
 0x634   :  { %7027 = vmatpush1.bf16.msra.mxu0 %v5222_v54  ;;  %7253 = vmatpush1.bf16.msra.mxu1 %v5224_v27  ;;  %v5321_v54 = vld [vmem:[#allocation3 + $0x978] sm:$0xff]  ;;  %v5318_v27 = vld [vmem:[#allocation3 + $0x960] sm:$0xff] }
 0x635   :  { %7028 = vmatprep.subr.bf16.mxu0 %v5239_v61  ;;  %7254 = vmatprep.subr.bf16.mxu1 %v5241_v3  ;;  %v5320_v61 = vld [vmem:[#allocation3 + $0x970] sm:$0xff]  ;;  %v5335_v3 = vld [vmem:[#allocation3 + $0x9e8] sm:$0xff] }
 0x636   :  { %6765 = vmatprep.mubr.bf16.mxu0 %v14138_v1  ;;  %6991 = vmatprep.mubr.bf16.mxu1 %v14138_v1 }
 0x638   :  { %7029 = vmatpush1.bf16.msra.mxu0 %v5238_v40  ;;  %7255 = vmatpush1.bf16.msra.mxu1 %v5240_v21  ;;  %v5334_v40 = vld [vmem:[#allocation3 + $0x9e0] sm:$0xff]  ;;  %v5351_v21 = vld [vmem:[#allocation3 + $0xa68] sm:$0xff] }
 0x639   :  { %7030 = vmatprep.subr.bf16.mxu0 %v5255_v20  ;;  %7256 = vmatprep.subr.bf16.mxu1 %v5257_v41  ;;  %v5353_v20 = vld [vmem:[#allocation3 + $0xa78] sm:$0xff]  ;;  %v5350_v41 = vld [vmem:[#allocation3 + $0xa60] sm:$0xff] }
 0x63b   :  { %6766 = vmatmul.mubr.bf16.gmra.mrb[124].mxu0 %v14148_v18  ;;  %6992 = vmatmul.mubr.bf16.gmra.mrb[124].mxu1 %v14148_v18 }
 0x63c   :  { %7031 = vmatpush1.bf16.msra.mxu0 %v5254_v7  ;;  %7257 = vmatpush1.bf16.msra.mxu1 %v5256_v32  ;;  %v5352_v7 = vld [vmem:[#allocation3 + $0xa70] sm:$0xff]  ;;  %v5367_v32 = vld [vmem:[#allocation3 + $0xae8] sm:$0xff] }
 0x63d   :  { %7032 = vmatprep.subr.bf16.mxu0 %v5271_v4  ;;  %7258 = vmatprep.subr.bf16.mxu1 %v5273_v50  ;;  %v12078_v4 = vld [vmem:[#allocation15] sm:$0xff]  ;;  %v15419_v50 = vld [vmem:[#allocation31_spill] sm:$0xff] }
 0x63e   :  { %7034 = vmatprep.mubr.bf16.mxu0 %v15392_v52  ;;  %7260 = vmatprep.mubr.bf16.mxu1 %v15392_v52  ;;  %v5304_v52 = vld [vmem:[#allocation3 + $0x8f0] sm:$0xff] }
 0x640   :  { %7033 = vmatpush1.bf16.msra.mxu0 %v5270_v42  ;;  %7259 = vmatpush1.bf16.msra.mxu1 %v5272_v13  ;;  %v14433_v42 = vrot.slane %v12078_v4, %v15419_v50  ;;  %v15420_v13 = vld [vmem:[#allocation33_spill] sm:$0xff] }
 0x641   :  { %7115 = vmatprep.subr.bf16.mxu0 %v5287_v57  ;;  %7341 = vmatprep.subr.bf16.mxu1 %v5289_v9  ;;  %v15421_v57 = vld [vmem:[#allocation32_spill] sm:$0xff] }
 0x642   :  { %v14439_v9 = vrot.slane %v12078_v4, %v15421_v57 }
 0x643   :  { %7035 = vmatmul.mubr.bf16.vlgmr.msra.gmra.mrb[128].mxu0 %v13908_v5  ;;  %7261 = vmatmul.mubr.bf16.vlgmr.msra.gmra.mrb[128].mxu1 %v13908_v5  ;;  %v5337_v5 = vld [vmem:[#allocation3 + $0x9f8] sm:$0xff] }
 0x644   :  { %7116 = vmatpush1.bf16.msra.mxu0 %v5286_v16  ;;  %7342 = vmatpush1.bf16.msra.mxu1 %v5288_v31  ;;  %v15422_v16 = vld [vmem:[#allocation34_spill] sm:$0xff] }
 0x645   :  { %7117 = vmatprep.subr.bf16.mxu0 %v5303_v45  ;;  %7343 = vmatprep.subr.bf16.mxu1 %v5305_v60  ;;  %v14442_v31 = vrot.slane %v12078_v4, %v15422_v16  ;;  %v5366_v45 = vld [vmem:[#allocation3 + $0xae0] sm:$0xff]  ;;  %v5368_v60 = vld [vmem:[#allocation3 + $0xaf0] sm:$0xff] }
 0x646   :  { %7044 = vmatprep.mubr.bf16.mxu0 %v13914_v46  ;;  %7270 = vmatprep.mubr.bf16.mxu1 %v13914_v46  ;;  %v5336_v46 = vld [vmem:[#allocation3 + $0x9f0] sm:$0xff] }
 0x648   :  { %7118 = vmatpush1.bf16.msra.mxu0 %v5302_v17  ;;  %7344 = vmatpush1.bf16.msra.mxu1 %v5304_v52  ;;  %v5383_v52 = vld [vmem:[#allocation3 + $0xb68] sm:$0xff] }
 0x649   :  { %7119 = vmatprep.subr.bf16.mxu0 %v5319_v39  ;;  %7345 = vmatprep.subr.bf16.mxu1 %v5321_v54  ;;  %v5385_v39 = vld [vmem:[#allocation3 + $0xb78] sm:$0xff] }
 0x64b   :  { %7045 = vmatmul.mubr.bf16.gmra.mrb[132].mxu0 %v13924_v62  ;;  %7271 = vmatmul.mubr.bf16.gmra.mrb[132].mxu1 %v13924_v62  ;;  %v5369_v62 = vld [vmem:[#allocation3 + $0xaf8] sm:$0xff] }
 0x64c   :  { %7120 = vmatpush1.bf16.msra.mxu0 %v5318_v27  ;;  %7346 = vmatpush1.bf16.msra.mxu1 %v5320_v61 }
 0x64d   :  { %7121 = vmatprep.subr.bf16.mxu0 %v5335_v3  ;;  %7347 = vmatprep.subr.bf16.mxu1 %v5337_v5 }
 0x64e   :  { %7054 = vmatprep.mubr.bf16.mxu0 %v13930_v48  ;;  %7280 = vmatprep.mubr.bf16.mxu1 %v13930_v48  ;;  %v14436_v48 = vrot.slane %v12078_v4, %v15420_v13 }
 0x650   :  { %7122 = vmatpush1.bf16.msra.mxu0 %v5334_v40  ;;  %7348 = vmatpush1.bf16.msra.mxu1 %v5336_v46 }
 0x651   :  { %7123 = vmatprep.subr.bf16.mxu0 %v5351_v21  ;;  %7349 = vmatprep.subr.bf16.mxu1 %v5353_v20 }
 0x653   :  { %7055 = vmatmul.mubr.bf16.gmra.mrb[136].mxu0 %v13940_v28  ;;  %7281 = vmatmul.mubr.bf16.gmra.mrb[136].mxu1 %v13940_v28 }
 0x654   :  { %7124 = vmatpush1.bf16.msra.mxu0 %v5350_v41  ;;  %7350 = vmatpush1.bf16.msra.mxu1 %v5352_v7 }
 0x655   :  { %7125 = vmatprep.subr.bf16.mxu0 %v5367_v32  ;;  %7351 = vmatprep.subr.bf16.mxu1 %v5369_v62  ;;  %v5382_v32 = vld [vmem:[#allocation3 + $0xb60] sm:$0xff]  ;;  %v5384_v62 = vld [vmem:[#allocation3 + $0xb70] sm:$0xff] }
 0x656   :  { %v6245_v28 = vpop.f32.mrb[64].mxu0  ;;  %v6471_v17 = vpop.f32.mrb[64].mxu1  ;;  %7064 = vmatprep.mubr.bf16.mxu0 %v13946_v44  ;;  %7290 = vmatprep.mubr.bf16.mxu1 %v13946_v44 }
 0x657   :  { %v11233_v54 = vadd.f32 %v6245_v28, %v14433_v42  ;;  %v11265_v27 = vadd.f32 %v6471_v17, %v14436_v48  ;;  %v6247_v61 = vpop.f32.mrb[65].mxu0  ;;  %v6473_v3 = vpop.f32.mrb[65].mxu1  ;;  %v5399_v17 = vld [vmem:[#allocation3 + $0xbe8] sm:$0xff] }
 0x658   :  { %v11234_v5 = vadd.f32 %v6247_v61, %v14439_v9  ;;  %v11266_v40 = vadd.f32 %v6473_v3, %v14442_v31  ;;  %v6249_v46 = vpop.f32.mrb[66].mxu0  ;;  %v6475_v21 = vpop.f32.mrb[66].mxu1  ;;  %7126 = vmatpush1.bf16.msra.mxu0 %v5366_v45  ;;  %7352 = vmatpush1.bf16.msra.mxu1 %v5368_v60  ;;  %v5401_v61 = vld [vmem:[#allocation3 + $0xbf8] sm:$0xff] }
 0x659   :  { %v11235_v20 = vadd.f32 %v6249_v46, %v14433_v42  ;;  %v11267_v44 = vadd.f32 %v6475_v21, %v14436_v48  ;;  %v6251_v41 = vpop.f32.mrb[67].mxu0  ;;  %v6477_v7 = vpop.f32.mrb[67].mxu1  ;;  %7127 = vmatprep.subr.bf16.mxu0 %v5383_v52  ;;  %7353 = vmatprep.subr.bf16.mxu1 %v5385_v39  ;;  %v7458_v3 = vmax.f32 %v11233_v54, 0.0  ;;  %v7460_v16 = vmax.f32 %v11265_v27, 0.0  ;;  %v5398_v54 = vld [vmem:[#allocation3 + $0xbe0] sm:$0xff]  ;;  %v5400_v27 = vld [vmem:[#allocation3 + $0xbf0] sm:$0xff] }
 0x65a   :  { %v11236_v4 = vadd.f32 %v6251_v41, %v14439_v9  ;;  %v11268_v28 = vadd.f32 %v6477_v7, %v14442_v31  ;;  %v7459_v46 = vmax.f32 %v11234_v5, 0.0  ;;  %v7461_v21 = vmax.f32 %v11266_v40, 0.0  ;;  %v5415_v5 = vld [vmem:[#allocation3 + $0xc68] sm:$0xff]  ;;  %v5417_v40 = vld [vmem:[#allocation3 + $0xc78] sm:$0xff] }
 0x65b   :  { %v7474_v45 = vmax.f32 %v11235_v20, 0.0  ;;  %v7476_v60 = vmax.f32 %v11267_v44, 0.0  ;;  %7065 = vmatmul.mubr.bf16.gmra.mrb[140].mxu0 %v13956_v33  ;;  %7291 = vmatmul.mubr.bf16.gmra.mrb[140].mxu1 %v13956_v33 }
 0x65c   :  { %v7475_v52 = vmax.f32 %v11236_v4, 0.0  ;;  %v7477_v39 = vmax.f32 %v11268_v28, 0.0  ;;  %7128 = vmatpush1.bf16.msra.mxu0 %v5382_v32  ;;  %7354 = vmatpush1.bf16.msra.mxu1 %v5384_v62 }
 0x65d   :  { %v14456_v57 = vpack.c.bf16 %v7474_v45, %v7458_v3  ;;  %v14458_v41 = vpack.c.bf16 %v7476_v60, %v7460_v16  ;;  %7129 = vmatprep.subr.bf16.mxu0 %v5399_v17  ;;  %7355 = vmatprep.subr.bf16.mxu1 %v5401_v61 }
 0x65e   :  { %v14460_v20 = vpack.c.bf16 %v7475_v52, %v7459_v46  ;;  %v14462_v44 = vpack.c.bf16 %v7477_v39, %v7461_v21  ;;  %v6255_v7 = vpop.f32.mrb[68].mxu0  ;;  %v6481_v33 = vpop.f32.mrb[68].mxu1  ;;  %7074 = vmatprep.mubr.bf16.mxu0 %v13962_v8  ;;  %7300 = vmatprep.mubr.bf16.mxu1 %v13962_v8  ;;  %v5414_v21 = vld [vmem:[#allocation3 + $0xc60] sm:$0xff]  ;;  %v5416_v52 = vld [vmem:[#allocation3 + $0xc70] sm:$0xff] }
 0x65f   :  { %v11237_v32 = vadd.f32 %v6255_v7, %v14433_v42  ;;  %v11269_v16 = vadd.f32 %v6481_v33, %v14436_v48  ;;  %v6257_v62 = vpop.f32.mrb[69].mxu0  ;;  %v6483_v4 = vpop.f32.mrb[69].mxu1  ;;  %v5431_v33 = vld [vmem:[#allocation3 + $0xce8] sm:$0xff] }
 0x660   :  { %v11238_v28 = vadd.f32 %v6257_v62, %v14439_v9  ;;  %v11270_v17 = vadd.f32 %v6483_v4, %v14442_v31  ;;  %v6259_v61 = vpop.f32.mrb[70].mxu0  ;;  %v6485_v3 = vpop.f32.mrb[70].mxu1  ;;  %7130 = vmatpush1.bf16.msra.mxu0 %v5398_v54  ;;  %7356 = vmatpush1.bf16.msra.mxu1 %v5400_v27  ;;  %v5433_v62 = vld [vmem:[#allocation3 + $0xcf8] sm:$0xff] }
 0x661   :  { %v11239_v45 = vadd.f32 %v6259_v61, %v14433_v42  ;;  %v11271_v8 = vadd.f32 %v6485_v3, %v14436_v48  ;;  %v6261_v60 = vpop.f32.mrb[71].mxu0  ;;  %v6487_v46 = vpop.f32.mrb[71].mxu1  ;;  %7131 = vmatprep.subr.bf16.mxu0 %v5415_v5  ;;  %7357 = vmatprep.subr.bf16.mxu1 %v5417_v40  ;;  %v7490_v4 = vmax.f32 %v11237_v32, 0.0  ;;  %v7492_v13 = vmax.f32 %v11269_v16, 0.0  ;;  %v5430_v32 = vld [vmem:[#allocation3 + $0xce0] sm:$0xff]  ;;  %v5432_v16 = vld [vmem:[#allocation3 + $0xcf0] sm:$0xff] }
 0x662   :  { %v11240_v39 = vadd.f32 %v6261_v60, %v14439_v9  ;;  %v11272_v7 = vadd.f32 %v6487_v46, %v14442_v31  ;;  %v7491_v61 = vmax.f32 %v11238_v28, 0.0  ;;  %v7493_v3 = vmax.f32 %v11270_v17, 0.0  ;;  %v5447_v28 = vld [vmem:[#allocation3 + $0xd68] sm:$0xff]  ;;  %v5449_v17 = vld [vmem:[#allocation3 + $0xd78] sm:$0xff] }
 0x663   :  { %v7506_v54 = vmax.f32 %v11239_v45, 0.0  ;;  %v7508_v27 = vmax.f32 %v11271_v8, 0.0  ;;  %7075 = vmatmul.mubr.bf16.gmra.mrb[144].mxu0 %v13972_v58  ;;  %7301 = vmatmul.mubr.bf16.gmra.mrb[144].mxu1 %v13972_v58 }
 0x664   :  { %v7507_v5 = vmax.f32 %v11240_v39, 0.0  ;;  %v7509_v40 = vmax.f32 %v11272_v7, 0.0  ;;  %7132 = vmatpush1.bf16.msra.mxu0 %v5414_v21  ;;  %7358 = vmatpush1.bf16.msra.mxu1 %v5416_v52 }
 0x665   :  { %v14476_v50 = vpack.c.bf16 %v7506_v54, %v7490_v4  ;;  %v14478_v60 = vpack.c.bf16 %v7508_v27, %v7492_v13  ;;  %7133 = vmatprep.subr.bf16.mxu0 %v5431_v33  ;;  %7359 = vmatprep.subr.bf16.mxu1 %v5433_v62 }
 0x666   :  { %v14480_v45 = vpack.c.bf16 %v7507_v5, %v7491_v61  ;;  %v14482_v8 = vpack.c.bf16 %v7509_v40, %v7493_v3  ;;  %v6265_v46 = vpop.f32.mrb[72].mxu0  ;;  %v6491_v58 = vpop.f32.mrb[72].mxu1  ;;  %7084 = vmatprep.mubr.bf16.mxu0 %v13978_v37  ;;  %7310 = vmatprep.mubr.bf16.mxu1 %v13978_v37  ;;  %v5446_v3 = vld [vmem:[#allocation3 + $0xd60] sm:$0xff]  ;;  %v5448_v5 = vld [vmem:[#allocation3 + $0xd70] sm:$0xff] }
 0x667   :  { %15423 = vst [vmem:[#allocation57_spill] sm:$0xff] %v14476_v50  ;;  %15424 = vst [vmem:[#allocation58_spill] sm:$0xff] %v14478_v60  ;;  %v11241_v21 = vadd.f32 %v6265_v46, %v14433_v42  ;;  %v11273_v13 = vadd.f32 %v6491_v58, %v14436_v48  ;;  %v6267_v52 = vpop.f32.mrb[73].mxu0  ;;  %v6493_v39 = vpop.f32.mrb[73].mxu1  ;;  %v5463_v58 = vld [vmem:[#allocation3 + $0xde8] sm:$0xff] }
 0x668   :  { %v11242_v7 = vadd.f32 %v6267_v52, %v14439_v9  ;;  %v11274_v33 = vadd.f32 %v6493_v39, %v14442_v31  ;;  %v6269_v62 = vpop.f32.mrb[74].mxu0  ;;  %v6495_v4 = vpop.f32.mrb[74].mxu1  ;;  %7134 = vmatpush1.bf16.msra.mxu0 %v5430_v32  ;;  %7360 = vmatpush1.bf16.msra.mxu1 %v5432_v16  ;;  %v5465_v52 = vld [vmem:[#allocation3 + $0xdf8] sm:$0xff] }
 0x669   :  { %v11243_v54 = vadd.f32 %v6269_v62, %v14433_v42  ;;  %v11275_v37 = vadd.f32 %v6495_v4, %v14436_v48  ;;  %v6271_v27 = vpop.f32.mrb[75].mxu0  ;;  %v6497_v61 = vpop.f32.mrb[75].mxu1  ;;  %7135 = vmatprep.subr.bf16.mxu0 %v5447_v28  ;;  %7361 = vmatprep.subr.bf16.mxu1 %v5449_v17  ;;  %v7522_v39 = vmax.f32 %v11241_v21, 0.0  ;;  %v7524_v60 = vmax.f32 %v11273_v13, 0.0  ;;  %v5462_v21 = vld [vmem:[#allocation3 + $0xde0] sm:$0xff]  ;;  %v5464_v13 = vld [vmem:[#allocation3 + $0xdf0] sm:$0xff] }
 0x66a   :  { %v11244_v40 = vadd.f32 %v6271_v27, %v14439_v9  ;;  %v11276_v46 = vadd.f32 %v6497_v61, %v14442_v31  ;;  %v7523_v62 = vmax.f32 %v11242_v7, 0.0  ;;  %v7525_v4 = vmax.f32 %v11274_v33, 0.0  ;;  %v5479_v7 = vld [vmem:[#allocation3 + $0xe68] sm:$0xff]  ;;  %v5481_v33 = vld [vmem:[#allocation3 + $0xe78] sm:$0xff] }
 0x66b   :  { %v7538_v32 = vmax.f32 %v11243_v54, 0.0  ;;  %v7540_v16 = vmax.f32 %v11275_v37, 0.0  ;;  %7085 = vmatmul.mubr.bf16.gmra.mrb[148].mxu0 %v13988_v15  ;;  %7311 = vmatmul.mubr.bf16.gmra.mrb[148].mxu1 %v13988_v15 }
 0x66c   :  { %v7539_v28 = vmax.f32 %v11244_v40, 0.0  ;;  %v7541_v17 = vmax.f32 %v11276_v46, 0.0  ;;  %7136 = vmatpush1.bf16.msra.mxu0 %v5446_v3  ;;  %7362 = vmatpush1.bf16.msra.mxu1 %v5448_v5 }
 0x66d   :  { %v14496_v50 = vpack.c.bf16 %v7538_v32, %v7522_v39  ;;  %v14498_v27 = vpack.c.bf16 %v7540_v16, %v7524_v60  ;;  %7137 = vmatprep.subr.bf16.mxu0 %v5463_v58  ;;  %7363 = vmatprep.subr.bf16.mxu1 %v5465_v52 }
 0x66e   :  { %v14500_v54 = vpack.c.bf16 %v7539_v28, %v7523_v62  ;;  %v14502_v37 = vpack.c.bf16 %v7541_v17, %v7525_v4  ;;  %v6275_v61 = vpop.f32.mrb[76].mxu0  ;;  %v6501_v15 = vpop.f32.mrb[76].mxu1  ;;  %7094 = vmatprep.mubr.bf16.mxu0 %v13994_v56  ;;  %7320 = vmatprep.mubr.bf16.mxu1 %v13994_v56  ;;  %v5478_v4 = vld [vmem:[#allocation3 + $0xe60] sm:$0xff]  ;;  %v5480_v28 = vld [vmem:[#allocation3 + $0xe70] sm:$0xff] }
 0x66f   :  { %15425 = vst [vmem:[#allocation59_spill] sm:$0xff] %v14496_v50  ;;  %15426 = vst [vmem:[#allocation60_spill] sm:$0xff] %v14498_v27  ;;  %v11245_v3 = vadd.f32 %v6275_v61, %v14433_v42  ;;  %v11277_v60 = vadd.f32 %v6501_v15, %v14436_v48  ;;  %v6277_v5 = vpop.f32.mrb[77].mxu0  ;;  %v6503_v40 = vpop.f32.mrb[77].mxu1  ;;  %v5495_v15 = vld [vmem:[#allocation3 + $0xee8] sm:$0xff] }
 0x670   :  { %v11246_v46 = vadd.f32 %v6277_v5, %v14439_v9  ;;  %v11278_v58 = vadd.f32 %v6503_v40, %v14442_v31  ;;  %v6279_v52 = vpop.f32.mrb[78].mxu0  ;;  %v6505_v39 = vpop.f32.mrb[78].mxu1  ;;  %7138 = vmatpush1.bf16.msra.mxu0 %v5462_v21  ;;  %7364 = vmatpush1.bf16.msra.mxu1 %v5464_v13  ;;  %v5497_v5 = vld [vmem:[#allocation3 + $0xef8] sm:$0xff] }
 0x671   :  { %v11247_v32 = vadd.f32 %v6279_v52, %v14433_v42  ;;  %v11279_v56 = vadd.f32 %v6505_v39, %v14436_v48  ;;  %v6281_v16 = vpop.f32.mrb[79].mxu0  ;;  %v6507_v62 = vpop.f32.mrb[79].mxu1  ;;  %7139 = vmatprep.subr.bf16.mxu0 %v5479_v7  ;;  %7365 = vmatprep.subr.bf16.mxu1 %v5481_v33  ;;  %v7554_v40 = vmax.f32 %v11245_v3, 0.0  ;;  %v7556_v27 = vmax.f32 %v11277_v60, 0.0  ;;  %v5494_v3 = vld [vmem:[#allocation3 + $0xee0] sm:$0xff]  ;;  %v5496_v60 = vld [vmem:[#allocation3 + $0xef0] sm:$0xff] }
 0x672   :  { %v11248_v17 = vadd.f32 %v6281_v16, %v14439_v9  ;;  %v11280_v61 = vadd.f32 %v6507_v62, %v14442_v31  ;;  %v7555_v52 = vmax.f32 %v11246_v46, 0.0  ;;  %v7557_v39 = vmax.f32 %v11278_v58, 0.0  ;;  %v5511_v46 = vld [vmem:[#allocation3 + $0xf68] sm:$0xff]  ;;  %v5513_v58 = vld [vmem:[#allocation3 + $0xf78] sm:$0xff] }
 0x673   :  { %v7570_v21 = vmax.f32 %v11247_v32, 0.0  ;;  %v7572_v13 = vmax.f32 %v11279_v56, 0.0  ;;  %7095 = vmatmul.mubr.bf16.gmra.mrb[152].mxu0 %v14004_v55  ;;  %7321 = vmatmul.mubr.bf16.gmra.mrb[152].mxu1 %v14004_v55 }
 0x674   :  { %v7571_v7 = vmax.f32 %v11248_v17, 0.0  ;;  %v7573_v33 = vmax.f32 %v11280_v61, 0.0  ;;  %7140 = vmatpush1.bf16.msra.mxu0 %v5478_v4  ;;  %7366 = vmatpush1.bf16.msra.mxu1 %v5480_v28 }
 0x675   :  { %v14516_v50 = vpack.c.bf16 %v7570_v21, %v7554_v40  ;;  %v14518_v16 = vpack.c.bf16 %v7572_v13, %v7556_v27  ;;  %7141 = vmatprep.subr.bf16.mxu0 %v5495_v15  ;;  %7367 = vmatprep.subr.bf16.mxu1 %v5497_v5 }
 0x676   :  { %v14520_v32 = vpack.c.bf16 %v7571_v7, %v7555_v52  ;;  %v14522_v56 = vpack.c.bf16 %v7573_v33, %v7557_v39  ;;  %v6285_v62 = vpop.f32.mrb[80].mxu0  ;;  %v6511_v55 = vpop.f32.mrb[80].mxu1  ;;  %7104 = vmatprep.mubr.bf16.mxu0 %v14010_v14  ;;  %7330 = vmatprep.mubr.bf16.mxu1 %v14010_v14  ;;  %v5510_v39 = vld [vmem:[#allocation3 + $0xf60] sm:$0xff]  ;;  %v5512_v7 = vld [vmem:[#allocation3 + $0xf70] sm:$0xff] }
 0x677   :  { %15427 = vst [vmem:[#allocation61_spill] sm:$0xff] %v14516_v50  ;;  %15428 = vst [vmem:[#allocation62_spill] sm:$0xff] %v14518_v16  ;;  %v11249_v4 = vadd.f32 %v6285_v62, %v14433_v42  ;;  %v11281_v27 = vadd.f32 %v6511_v55, %v14436_v48  ;;  %v6287_v28 = vpop.f32.mrb[81].mxu0  ;;  %v6513_v17 = vpop.f32.mrb[81].mxu1  ;;  %v5527_v55 = vld [vmem:[#allocation3 + $0xfe8] sm:$0xff]  ;;  %v5526_v50 = vld [vmem:[#allocation3 + $0xfe0] sm:$0xff] }
 0x678   :  { %15429 = vst [vmem:[#allocation63_spill] sm:$0xff] %v14522_v56  ;;  %v11250_v61 = vadd.f32 %v6287_v28, %v14439_v9  ;;  %v11282_v15 = vadd.f32 %v6513_v17, %v14442_v31  ;;  %v6289_v5 = vpop.f32.mrb[82].mxu0  ;;  %v6515_v40 = vpop.f32.mrb[82].mxu1  ;;  %7142 = vmatpush1.bf16.msra.mxu0 %v5494_v3  ;;  %7368 = vmatpush1.bf16.msra.mxu1 %v5496_v60  ;;  %v5529_v28 = vld [vmem:[#allocation3 + $0xff8] sm:$0xff] }
 0x679   :  { %v11251_v21 = vadd.f32 %v6289_v5, %v14433_v42  ;;  %v11283_v14 = vadd.f32 %v6515_v40, %v14436_v48  ;;  %v6291_v13 = vpop.f32.mrb[83].mxu0  ;;  %v6517_v52 = vpop.f32.mrb[83].mxu1  ;;  %7143 = vmatprep.subr.bf16.mxu0 %v5511_v46  ;;  %7369 = vmatprep.subr.bf16.mxu1 %v5513_v58  ;;  %v7586_v17 = vmax.f32 %v11249_v4, 0.0  ;;  %v7588_v16 = vmax.f32 %v11281_v27, 0.0  ;;  %v5528_v4 = vld [vmem:[#allocation3 + $0xff0] sm:$0xff]  ;;  %v11950_v27 = vld [vmem:[#allocation16 + $0x40] sm:$0xff]  }
 0x67a   :  { %v11252_v33 = vadd.f32 %v6291_v13, %v14439_v9  ;;  %v11284_v62 = vadd.f32 %v6517_v52, %v14442_v31  ;;  %v7587_v5 = vmax.f32 %v11250_v61, 0.0  ;;  %v7589_v40 = vmax.f32 %v11282_v15, 0.0 }
 0x67b   :  { %v7602_v3 = vmax.f32 %v11251_v21, 0.0  ;;  %v7604_v60 = vmax.f32 %v11283_v14, 0.0  ;;  %7105 = vmatmul.mubr.bf16.gmra.mrb[156].mxu0 %v14020_v22  ;;  %7331 = vmatmul.mubr.bf16.gmra.mrb[156].mxu1 %v14020_v22  ;;  %v11952_v21 = vld [vmem:[#allocation16 + $0xc0] sm:$0xff]  }
 0x67c   :  { %v7603_v46 = vmax.f32 %v11252_v33, 0.0  ;;  %v7605_v58 = vmax.f32 %v11284_v62, 0.0  ;;  %7144 = vmatpush1.bf16.msra.mxu0 %v5510_v39  ;;  %7370 = vmatpush1.bf16.msra.mxu1 %v5512_v7 }
 0x67d   :  { %v14536_v13 = vpack.c.bf16 %v7602_v3, %v7586_v17  ;;  %v14538_v52 = vpack.c.bf16 %v7604_v60, %v7588_v16  ;;  %7145 = vmatprep.subr.bf16.mxu0 %v5527_v55  ;;  %7371 = vmatprep.subr.bf16.mxu1 %v5529_v28  ;;  %v11951_v17 = vld [vmem:[#allocation16] sm:$0xff]  }
 0x67e   :  { %v14540_v14 = vpack.c.bf16 %v7603_v46, %v7587_v5  ;;  %v14542_v56 = vpack.c.bf16 %v7605_v58, %v7589_v40  ;;  %v6295_v22 = vpop.f32.mrb[84].mxu0  ;;  %v6521_v61 = vpop.f32.mrb[84].mxu1  ;;  %7147 = vmatprep.mubr.bf16.mxu0 %v14026_v2  ;;  %7373 = vmatprep.mubr.bf16.mxu1 %v14026_v2  ;;  %v11953_v3 = vld [vmem:[#allocation16 + $0x80] sm:$0xff]  }
 0x67f   :  { %15430 = vst [vmem:[#allocation64_spill] sm:$0xff] %v14536_v13  ;;  %15431 = vst [vmem:[#allocation65_spill] sm:$0xff] %v14538_v52  ;;  %v11253_v15 = vadd.f32 %v6295_v22, %v14433_v42  ;;  %v11285_v16 = vadd.f32 %v6521_v61, %v14436_v48  ;;  %v6297_v39 = vpop.f32.mrb[85].mxu0  ;;  %v6523_v7 = vpop.f32.mrb[85].mxu1  ;;  %v11954_v22 = vld [vmem:[#allocation16 + $0x48] sm:$0xff]  }
 0x680   :  { %v11254_v33 = vadd.f32 %v6297_v39, %v14439_v9  ;;  %v11286_v62 = vadd.f32 %v6523_v7, %v14442_v31  ;;  %v6299_v55 = vpop.f32.mrb[86].mxu0  ;;  %v6525_v28 = vpop.f32.mrb[86].mxu1  ;;  %7146 = vmatpush1.bf16.msra.mxu0 %v5526_v50  ;;  %7372 = vmatpush1.bf16.msra.mxu1 %v5528_v4  ;;  %v11956_v61 = vld [vmem:[#allocation16 + $0xc8] sm:$0xff]  }
 0x681   :  { %v11255_v60 = vadd.f32 %v6299_v55, %v14433_v42  ;;  %v11287_v2 = vadd.f32 %v6525_v28, %v14436_v48  ;;  %v6301_v5 = vpop.f32.mrb[87].mxu0  ;;  %v6527_v40 = vpop.f32.mrb[87].mxu1  ;;  %10657 = vmatprep.subr.bf16.mxu0 %v11950_v27  ;;  %10721 = vmatprep.subr.bf16.mxu1 %v11952_v21  ;;  %v7618_v39 = vmax.f32 %v11253_v15, 0.0  ;;  %v7620_v7 = vmax.f32 %v11285_v16, 0.0  ;;  %v11955_v27 = vld [vmem:[#allocation16 + $0x8] sm:$0xff]   ;;  %v11958_v15 = vld [vmem:[#allocation16 + $0x50] sm:$0xff]  }
 0x682   :  { %v11256_v46 = vadd.f32 %v6301_v5, %v14439_v9  ;;  %v11288_v58 = vadd.f32 %v6527_v40, %v14442_v31  ;;  %v7619_v55 = vmax.f32 %v11254_v33, 0.0  ;;  %v7621_v28 = vmax.f32 %v11286_v62, 0.0  ;;  %v11957_v21 = vld [vmem:[#allocation16 + $0x88] sm:$0xff]   ;;  %v11960_v16 = vld [vmem:[#allocation16 + $0xd0] sm:$0xff]  }
 0x683   :  { %v7634_v50 = vmax.f32 %v11255_v60, 0.0  ;;  %v7636_v4 = vmax.f32 %v11287_v2, 0.0  ;;  %7148 = vmatmul.mubr.bf16.vlgmr.msra.gmra.mrb[128].mxu0 %v14036_v11  ;;  %7374 = vmatmul.mubr.bf16.vlgmr.msra.gmra.mrb[128].mxu1 %v14036_v11 }
 0x684   :  { %v7635_v52 = vmax.f32 %v11256_v46, 0.0  ;;  %v7637_v13 = vmax.f32 %v11288_v58, 0.0  ;;  %10658 = vmatpush3.bf16.msra.mxu0 %v11951_v17  ;;  %10722 = vmatpush3.bf16.msra.mxu1 %v11953_v3 }
 0x685   :  { %v14556_v5 = vpack.c.bf16 %v7634_v50, %v7618_v39  ;;  %v14558_v40 = vpack.c.bf16 %v7636_v4, %v7620_v7  ;;  %7157 = vmatprep.mubr.bf16.mxu0 %v14042_v0  ;;  %7383 = vmatprep.mubr.bf16.mxu1 %v14042_v0  ;;  %v11959_v50 = vld [vmem:[#allocation16 + $0x10] sm:$0xff]  }
 0x686   :  { %v14562_v60 = vpack.c.bf16 %v7635_v52, %v7619_v55  ;;  %v14564_v11 = vpack.c.bf16 %v7637_v13, %v7621_v28  ;;  %v6305_v33 = vpop.f32.mrb[88].mxu0  ;;  %v6531_v62 = vpop.f32.mrb[88].mxu1  ;;  %10659 = vmatprep.subr.bf16.mxu0 %v11954_v22  ;;  %10723 = vmatprep.subr.bf16.mxu1 %v11956_v61  ;;  %v11961_v4 = vld [vmem:[#allocation16 + $0x90] sm:$0xff]  }
 0x687   :  { %15432 = vst [vmem:[#allocation66_spill] sm:$0xff] %v14558_v40  ;;  %v11257_v17 = vadd.f32 %v6305_v33, %v14433_v42  ;;  %v11289_v3 = vadd.f32 %v6531_v62, %v14436_v48  ;;  %v6307_v2 = vpop.f32.mrb[89].mxu0  ;;  %v6533_v46 = vpop.f32.mrb[89].mxu1  ;;  %v11962_v33 = vld [vmem:[#allocation16 + $0x58] sm:$0xff]  }
 0x688   :  { %v11258_v58 = vadd.f32 %v6307_v2, %v14439_v9  ;;  %v11290_v0 = vadd.f32 %v6533_v46, %v14442_v31  ;;  %v6309_v39 = vpop.f32.mrb[90].mxu0  ;;  %v6535_v7 = vpop.f32.mrb[90].mxu1  ;;  %10660 = vmatpush3.bf16.msra.mxu0 %v11955_v27  ;;  %10724 = vmatpush3.bf16.msra.mxu1 %v11957_v21  ;;  %v11964_v62 = vld [vmem:[#allocation16 + $0xd8] sm:$0xff]  }
 0x689   :  { %v11259_v13 = vadd.f32 %v6309_v39, %v14433_v42  ;;  %v11291_v52 = vadd.f32 %v6535_v7, %v14436_v48  ;;  %v6311_v22 = vpop.f32.mrb[91].mxu0  ;;  %v6537_v61 = vpop.f32.mrb[91].mxu1  ;;  %10661 = vmatprep.subr.bf16.mxu0 %v11958_v15  ;;  %10725 = vmatprep.subr.bf16.mxu1 %v11960_v16  ;;  %v7650_v2 = vmax.f32 %v11257_v17, 0.0  ;;  %v7652_v46 = vmax.f32 %v11289_v3, 0.0  ;;  %v11963_v17 = vld [vmem:[#allocation16 + $0x18] sm:$0xff]  }
 0x68a   :  { %v11260_v55 = vadd.f32 %v6311_v22, %v14439_v9  ;;  %v11292_v28 = vadd.f32 %v6537_v61, %v14442_v31  ;;  %v7651_v39 = vmax.f32 %v11258_v58, 0.0  ;;  %v7653_v7 = vmax.f32 %v11290_v0, 0.0  ;;  %v11965_v3 = vld [vmem:[#allocation16 + $0x98] sm:$0xff]   ;;  %v11966_v0 = vld [vmem:[#allocation16 + $0x60] sm:$0xff]  }
 0x68b   :  { %v7666_v27 = vmax.f32 %v11259_v13, 0.0  ;;  %v7668_v21 = vmax.f32 %v11291_v52, 0.0  ;;  %7158 = vmatmul.mubr.bf16.gmra.mrb[132].mxu0 %v14052_v63  ;;  %7384 = vmatmul.mubr.bf16.gmra.mrb[132].mxu1 %v14052_v63  ;;  %v11968_v61 = vld [vmem:[#allocation16 + $0xe0] sm:$0xff]  }
 0x68c   :  { %v7667_v15 = vmax.f32 %v11260_v55, 0.0  ;;  %v7669_v40 = vmax.f32 %v11292_v28, 0.0  ;;  %7167 = vmatprep.mubr.bf16.mxu0 %v14058_v19  ;;  %7393 = vmatprep.mubr.bf16.mxu1 %v14058_v19 }
 0x68d   :  { %v14578_v16 = vpack.c.bf16 %v7666_v27, %v7650_v2  ;;  %v14580_v22 = vpack.c.bf16 %v7668_v21, %v7652_v46  ;;  %10662 = vmatpush3.bf16.msra.mxu0 %v11959_v50  ;;  %10726 = vmatpush3.bf16.msra.mxu1 %v11961_v4 }
 0x68e   :  { %v14582_v13 = vpack.c.bf16 %v7667_v15, %v7651_v39  ;;  %v14584_v52 = vpack.c.bf16 %v7669_v40, %v7653_v7  ;;  %v6315_v63 = vpop.f32.mrb[92].mxu0  ;;  %v6541_v58 = vpop.f32.mrb[92].mxu1  ;;  %10663 = vmatprep.subr.bf16.mxu0 %v11962_v33  ;;  %10727 = vmatprep.subr.bf16.mxu1 %v11964_v62  ;;  %v11967_v39 = vld [vmem:[#allocation16 + $0x20] sm:$0xff]  }
 0x68f   :  { %15433 = vst [vmem:[#allocation67_spill] sm:$0xff] %v14578_v16  ;;  %15434 = vst [vmem:[#allocation68_spill] sm:$0xff] %v14580_v22  ;;  %v11261_v19 = vadd.f32 %v6315_v63, %v14433_v42  ;;  %v11293_v55 = vadd.f32 %v6541_v58, %v14436_v48  ;;  %v6317_v28 = vpop.f32.mrb[93].mxu0  ;;  %v6543_v2 = vpop.f32.mrb[93].mxu1  ;;  %v11969_v7 = vld [vmem:[#allocation16 + $0xa0] sm:$0xff]   ;;  %v11970_v58 = vld [vmem:[#allocation16 + $0x68] sm:$0xff]  }
 0x690   :  { %v11262_v50 = vadd.f32 %v6317_v28, %v14439_v9  ;;  %v11294_v4 = vadd.f32 %v6543_v2, %v14442_v31  ;;  %v6319_v46 = vpop.f32.mrb[94].mxu0  ;;  %v6545_v27 = vpop.f32.mrb[94].mxu1  ;;  %v11972_v28 = vld [vmem:[#allocation16 + $0xe8] sm:$0xff]  }
 0x691   :  { %v11263_v40 = vadd.f32 %v6319_v46, %v14433_v42  ;;  %v11295_v21 = vadd.f32 %v6545_v27, %v14436_v48  ;;  %v6321_v33 = vpop.f32.mrb[95].mxu0  ;;  %v6547_v62 = vpop.f32.mrb[95].mxu1  ;;  %10664 = vmatpush3.bf16.msra.mxu0 %v11963_v17  ;;  %10728 = vmatpush3.bf16.msra.mxu1 %v11965_v3  ;;  %v7682_v2 = vmax.f32 %v11261_v19, 0.0  ;;  %v7684_v22 = vmax.f32 %v11293_v55, 0.0  ;;  %v11979_v27 = vld [vmem:[#allocation16 + $0x38] sm:$0xff]  }
 0x692   :  { %v11264_v15 = vadd.f32 %v6321_v33, %v14439_v9  ;;  %v11296_v63 = vadd.f32 %v6547_v62, %v14442_v31  ;;  %10665 = vmatprep.subr.bf16.mxu0 %v11966_v0  ;;  %10729 = vmatprep.subr.bf16.mxu1 %v11968_v61  ;;  %v7683_v48 = vmax.f32 %v11262_v50, 0.0  ;;  %v7685_v17 = vmax.f32 %v11294_v4, 0.0  ;;  %v11971_v0 = vld [vmem:[#allocation16 + $0x28] sm:$0xff]   ;;  %v11976_v50 = vld [vmem:[#allocation16 + $0xf0] sm:$0xff]   ;;  %v11984_v33 = vld [vmem:[#allocation16 + $0x1c0] sm:$0xff]  }
 0x693   :  { %v7698_v16 = vmax.f32 %v11263_v40, 0.0  ;;  %v7700_v42 = vmax.f32 %v11295_v21, 0.0  ;;  %7168 = vmatmul.mubr.bf16.gmra.mrb[136].mxu0 %v14068_v53  ;;  %7394 = vmatmul.mubr.bf16.gmra.mrb[136].mxu1 %v14068_v53  ;;  %v11973_v61 = vld [vmem:[#allocation16 + $0xa8] sm:$0xff]   ;;  %v11974_v53 = vld [vmem:[#allocation16 + $0x70] sm:$0xff]   ;;  %v11981_v40 = vld [vmem:[#allocation16 + $0xb8] sm:$0xff]  }
 0x694   :  { %v7699_v3 = vmax.f32 %v11264_v15, 0.0  ;;  %v7701_v46 = vmax.f32 %v11296_v63, 0.0  ;;  %7177 = vmatprep.mubr.bf16.mxu0 %v14074_v34  ;;  %7403 = vmatprep.mubr.bf16.mxu1 %v14074_v34  ;;  %v11975_v4 = vld [vmem:[#allocation16 + $0x30] sm:$0xff]   ;;  %v11982_v21 = vld [vmem:[#allocation16 + $0x140] sm:$0xff]  }
 0x695   :  { %v14598_v9 = vpack.c.bf16 %v7698_v16, %v7682_v2  ;;  %v14600_v31 = vpack.c.bf16 %v7700_v42, %v7684_v22  ;;  %10666 = vmatpush3.bf16.msra.mxu0 %v11967_v39  ;;  %10730 = vmatpush3.bf16.msra.mxu1 %v11969_v7  ;;  %v11977_v34 = vld [vmem:[#allocation16 + $0xb0] sm:$0xff]   ;;  %v11978_v16 = vld [vmem:[#allocation16 + $0x78] sm:$0xff]   ;;  %v15439_v15 = vld [vmem:[#allocation39_spill] sm:$0xff] }
 0x696   :  { %v14602_v19 = vpack.c.bf16 %v7699_v3, %v7683_v48  ;;  %v14604_v55 = vpack.c.bf16 %v7701_v46, %v7685_v17  ;;  %10667 = vmatprep.subr.bf16.mxu0 %v11970_v58  ;;  %10731 = vmatprep.subr.bf16.mxu1 %v11972_v28  ;;  %v11980_v22 = vld [vmem:[#allocation16 + $0xf8] sm:$0xff]   ;;  %v11993_v62 = vld [vmem:[#allocation16 + $0x190] sm:$0xff]   ;;  %v11998_v2 = vld [vmem:[#allocation16 + $0x160] sm:$0xff]  }
 0x697   :  { %v15437_v39 = vld [vmem:[#allocation36_spill] sm:$0xff]  ;;  %v15438_v7 = vld [vmem:[#allocation38_spill] sm:$0xff]  ;;  %v15440_v63 = vld [vmem:[#allocation41_spill] sm:$0xff] }
 0x698   :  { %v11995_v58 = vld [vmem:[#allocation16 + $0x118] sm:$0xff]   ;;  %v12000_v42 = vld [vmem:[#allocation16 + $0x1e0] sm:$0xff]   ;;  %v12002_v46 = vld [vmem:[#allocation16 + $0x168] sm:$0xff]  }
 0x699   :  { %10668 = vmatpush3.bf16.msra.mxu0 %v11971_v0  ;;  %10732 = vmatpush3.bf16.msra.mxu1 %v11973_v61  ;;  %v11997_v28 = vld [vmem:[#allocation16 + $0x198] sm:$0xff]   ;;  %v11999_v17 = vld [vmem:[#allocation16 + $0x120] sm:$0xff]   ;;  %v12004_v0 = vld [vmem:[#allocation16 + $0x1e8] sm:$0xff]  }
 0x69a   :  { %10669 = vmatprep.subr.bf16.mxu0 %v11974_v53  ;;  %10733 = vmatprep.subr.bf16.mxu1 %v11976_v50  ;;  %v14634_v48 = vld [vmem:[#allocation15 + $0x8] sm:$0xff]  ;;  %v12001_v3 = vld [vmem:[#allocation16 + $0x1a0] sm:$0xff]   ;;  %v15441_v61 = vld [vmem:[#allocation40_spill] sm:$0xff] }
 0x69b   :  { %7178 = vmatmul.mubr.bf16.gmra.mrb[140].mxu0 %v14084_v12  ;;  %7404 = vmatmul.mubr.bf16.gmra.mrb[140].mxu1 %v14084_v12  ;;  %v11983_v12 = vld [vmem:[#allocation16 + $0x100] sm:$0xff]  }
 0x69c   :  { %7187 = vmatprep.mubr.bf16.mxu0 %v14090_v43  ;;  %7413 = vmatprep.mubr.bf16.mxu1 %v14090_v43  ;;  %v11985_v43 = vld [vmem:[#allocation16 + $0x180] sm:$0xff]  }
 0x69d   :  { %10670 = vmatpush3.bf16.msra.mxu0 %v11975_v4  ;;  %10734 = vmatpush3.bf16.msra.mxu1 %v11977_v34  ;;  %v15442_v53 = vld [vmem:[#allocation42_spill] sm:$0xff]  ;;  %v15443_v50 = vld [vmem:[#allocation27_spill] sm:$0xff]  ;;  %v15444_v34 = vld [vmem:[#allocation28_spill] sm:$0xff] }
 0x69e   :  { %10671 = vmatprep.subr.bf16.mxu0 %v11978_v16  ;;  %10735 = vmatprep.subr.bf16.mxu1 %v11980_v22  ;;  %v14640_v4 = vrot.slane %v14634_v48, %v15443_v50  ;;  %v14644_v16 = vrot.slane %v14634_v48, %v15444_v34  ;;  %v15445_v22 = vld [vmem:[#allocation43_spill] sm:$0xff]  ;;  %v15449_v34 = vld [vmem:[#allocation44_spill] sm:$0xff] }
 0x6a1   :  { %10672 = vmatpush3.bf16.msra.mxu0 %v11979_v27  ;;  %10736 = vmatpush3.bf16.msra.mxu1 %v11981_v40  ;;  %v15446_v27 = vld [vmem:[#allocation45_spill] sm:$0xff] }
 0x6a2   :  { %10785 = vmatprep.subr.bf16.mxu0 %v11982_v21  ;;  %10849 = vmatprep.subr.bf16.mxu1 %v11984_v33  ;;  %v15447_v40 = vld [vmem:[#allocation29_spill] sm:$0xff]  ;;  %v15448_v33 = vld [vmem:[#allocation30_spill] sm:$0xff] }
 0x6a3   :  { %7188 = vmatmul.mubr.bf16.gmra.mrb[144].mxu0 %v14100_v59  ;;  %7414 = vmatmul.mubr.bf16.gmra.mrb[144].mxu1 %v14100_v59  ;;  %v11986_v59 = vld [vmem:[#allocation16 + $0x148] sm:$0xff]   ;;  %v14650_v21 = vrot.slane %v14634_v48, %v15447_v40 }
 0x6a4   :  { %7197 = vmatprep.mubr.bf16.mxu0 %v14106_v38  ;;  %7423 = vmatprep.mubr.bf16.mxu1 %v14106_v38  ;;  %v11988_v38 = vld [vmem:[#allocation16 + $0x1c8] sm:$0xff]  }
 0x6ab   :  { %7198 = vmatmul.mubr.bf16.gmra.mrb[148].mxu0 %v14116_v30  ;;  %7424 = vmatmul.mubr.bf16.gmra.mrb[148].mxu1 %v14116_v30  ;;  %v15435_v30 = vld [vmem:[#allocation35_spill] sm:$0xff] }
 0x6ac   :  { %7207 = vmatprep.mubr.bf16.mxu0 %v14122_v10  ;;  %7433 = vmatprep.mubr.bf16.mxu1 %v14122_v10  ;;  %v15436_v10 = vld [vmem:[#allocation37_spill] sm:$0xff] }
 0x6b3   :  { %7208 = vmatmul.mubr.bf16.gmra.mrb[152].mxu0 %v14132_v51  ;;  %7434 = vmatmul.mubr.bf16.gmra.mrb[152].mxu1 %v14132_v51  ;;  %v11987_v51 = vld [vmem:[#allocation16 + $0x108] sm:$0xff]  }
 0x6b4   :  { %7217 = vmatprep.mubr.bf16.mxu0 %v14138_v1  ;;  %7443 = vmatprep.mubr.bf16.mxu1 %v14138_v1  ;;  %v11989_v1 = vld [vmem:[#allocation16 + $0x188] sm:$0xff]  }
 0x6bb   :  { %7218 = vmatmul.mubr.bf16.gmra.mrb[156].mxu0 %v14148_v18  ;;  %7444 = vmatmul.mubr.bf16.gmra.mrb[156].mxu1 %v14148_v18  ;;  %v11990_v18 = vld [vmem:[#allocation16 + $0x150] sm:$0xff]  }
 0x6bc   :  { %8901 = vmatprep.mubr.bf16.mxu0 %v14256_v6  ;;  %8998 = vmatprep.mubr.bf16.mxu1 %v14258_v29  ;;  %v11992_v6 = vld [vmem:[#allocation16 + $0x1d0] sm:$0xff]  }
 0x6bd   :  { %v11991_v29 = vld [vmem:[#allocation16 + $0x110] sm:$0xff]  }
 0x6c3   :  { %8902 = vmatmul.mubr.bf16.vlgmr.msra.gmra.mrb[160].mxu0 %v14252_v24  ;;  %8999 = vmatmul.mubr.bf16.vlgmr.msra.gmra.mrb[160].mxu1 %v14254_v47  ;;  %v11994_v24 = vld [vmem:[#allocation16 + $0x158] sm:$0xff]  }
 0x6c4   :  { %8909 = vmatprep.mubr.bf16.mxu0 %v15435_v30  ;;  %9006 = vmatprep.mubr.bf16.mxu1 %v15436_v10  ;;  %v11996_v47 = vld [vmem:[#allocation16 + $0x1d8] sm:$0xff]   ;;  %v12006_v10 = vld [vmem:[#allocation16 + $0x170] sm:$0xff]  }
 0x6c5   :  { %10786 = vmatpush3.bf16.msra.mxu0 %v11983_v12  ;;  %10850 = vmatpush3.bf16.msra.mxu1 %v11985_v43  ;;  %v14654_v12 = vrot.slane %v14634_v48, %v15448_v33  ;;  %v12003_v43 = vld [vmem:[#allocation16 + $0x128] sm:$0xff]  }
 0x6c6   :  { %10787 = vmatprep.subr.bf16.mxu0 %v11986_v59  ;;  %10851 = vmatprep.subr.bf16.mxu1 %v11988_v38  ;;  %v12005_v59 = vld [vmem:[#allocation16 + $0x1a8] sm:$0xff]  }
 0x6c9   :  { %10788 = vmatpush3.bf16.msra.mxu0 %v11987_v51  ;;  %10852 = vmatpush3.bf16.msra.mxu1 %v11989_v1  ;;  %v12008_v51 = vld [vmem:[#allocation16 + $0x1f0] sm:$0xff]  }
 0x6ca   :  { %10789 = vmatprep.subr.bf16.mxu0 %v11990_v18  ;;  %10853 = vmatprep.subr.bf16.mxu1 %v11992_v6 }
 0x6cb   :  { %8910 = vmatmul.mubr.bf16.gmra.mrb[164].mxu0 %v15437_v39  ;;  %9007 = vmatmul.mubr.bf16.gmra.mrb[164].mxu1 %v15438_v7 }
 0x6cc   :  { %8917 = vmatprep.mubr.bf16.mxu0 %v15439_v15  ;;  %9014 = vmatprep.mubr.bf16.mxu1 %v15440_v63 }
 0x6cd   :  { %10790 = vmatpush3.bf16.msra.mxu0 %v11991_v29  ;;  %10854 = vmatpush3.bf16.msra.mxu1 %v11993_v62 }
 0x6ce   :  { %10791 = vmatprep.subr.bf16.mxu0 %v11994_v24  ;;  %10855 = vmatprep.subr.bf16.mxu1 %v11996_v47 }
 0x6d1   :  { %10792 = vmatpush3.bf16.msra.mxu0 %v11995_v58  ;;  %10856 = vmatpush3.bf16.msra.mxu1 %v11997_v28  ;;  %v12007_v28 = vld [vmem:[#allocation16 + $0x130] sm:$0xff]  }
 0x6d2   :  { %10793 = vmatprep.subr.bf16.mxu0 %v11998_v2  ;;  %10857 = vmatprep.subr.bf16.mxu1 %v12000_v42  ;;  %v12009_v2 = vld [vmem:[#allocation16 + $0x1b0] sm:$0xff]  }
 0x6d3   :  { %8918 = vmatmul.mubr.bf16.gmra.mrb[168].mxu0 %v15441_v61  ;;  %9015 = vmatmul.mubr.bf16.gmra.mrb[168].mxu1 %v15442_v53 }
 0x6d4   :  { %8925 = vmatprep.mubr.bf16.mxu0 %v15445_v22  ;;  %9022 = vmatprep.mubr.bf16.mxu1 %v15446_v27  ;;  %v15450_v22 = vld [vmem:[#allocation46_spill] sm:$0xff] }
 0x6d5   :  { %10794 = vmatpush3.bf16.msra.mxu0 %v11999_v17  ;;  %10858 = vmatpush3.bf16.msra.mxu1 %v12001_v3  ;;  %v12010_v3 = vld [vmem:[#allocation16 + $0x178] sm:$0xff]  }
 0x6d6   :  { %v6697_v38 = vpop.f32.mrb[96].mxu0  ;;  %v6923_v30 = vpop.f32.mrb[96].mxu1  ;;  %10795 = vmatprep.subr.bf16.mxu0 %v12002_v46  ;;  %10859 = vmatprep.subr.bf16.mxu1 %v12004_v0  ;;  %v12012_v46 = vld [vmem:[#allocation16 + $0x1f8] sm:$0xff]  }
 0x6d7   :  { %v11297_v1 = vadd.f32 %v6697_v38, %v14640_v4  ;;  %v11329_v18 = vadd.f32 %v6923_v30, %v14644_v16  ;;  %v6699_v6 = vpop.f32.mrb[97].mxu0  ;;  %v6925_v29 = vpop.f32.mrb[97].mxu1  ;;  %v15452_v38 = vld [vmem:[#allocation50_spill] sm:$0xff] }
 0x6d8   :  { %v11298_v62 = vadd.f32 %v6699_v6, %v14650_v21  ;;  %v11330_v24 = vadd.f32 %v6925_v29, %v14654_v12  ;;  %v6701_v47 = vpop.f32.mrb[98].mxu0  ;;  %v6927_v39 = vpop.f32.mrb[98].mxu1 }
 0x6d9   :  { %v11299_v7 = vadd.f32 %v6701_v47, %v14640_v4  ;;  %v11331_v15 = vadd.f32 %v6927_v39, %v14644_v16  ;;  %v6703_v63 = vpop.f32.mrb[99].mxu0  ;;  %v6929_v58 = vpop.f32.mrb[99].mxu1  ;;  %10796 = vmatpush3.bf16.msra.mxu0 %v12003_v43  ;;  %10860 = vmatpush3.bf16.msra.mxu1 %v12005_v59  ;;  %v7462_v0 = vmax.f32 %v11297_v1, 0.0  ;;  %v7464_v61 = vmax.f32 %v11329_v18, 0.0  ;;  %v15451_v59 = vld [vmem:[#allocation49_spill] sm:$0xff]  ;;  %v12016_v47 = vld [vmem:[#allocation16 + $0x2c0] sm:$0xff]  }
 0x6da   :  { %v11300_v42 = vadd.f32 %v6703_v63, %v14650_v21  ;;  %v11332_v17 = vadd.f32 %v6929_v58, %v14654_v12  ;;  %10797 = vmatprep.subr.bf16.mxu0 %v12006_v10  ;;  %10861 = vmatprep.subr.bf16.mxu1 %v12008_v51  ;;  %v7463_v27 = vmax.f32 %v11298_v62, 0.0  ;;  %v7465_v40 = vmax.f32 %v11330_v24, 0.0  ;;  %v12011_v51 = vld [vmem:[#allocation16 + $0x138] sm:$0xff]   ;;  %v12014_v24 = vld [vmem:[#allocation16 + $0x240] sm:$0xff]  }
 0x6db   :  { %v7478_v53 = vmax.f32 %v11299_v7, 0.0  ;;  %v7480_v50 = vmax.f32 %v11331_v15, 0.0  ;;  %8926 = vmatmul.mubr.bf16.gmra.mrb[172].mxu0 %v15449_v34  ;;  %9023 = vmatmul.mubr.bf16.gmra.mrb[172].mxu1 %v15450_v22  ;;  %v12013_v1 = vld [vmem:[#allocation16 + $0x1b8] sm:$0xff]  }
 0x6dc   :  { %v7479_v33 = vmax.f32 %v11300_v42, 0.0  ;;  %v7481_v43 = vmax.f32 %v11332_v17, 0.0  ;;  %8933 = vmatprep.mubr.bf16.mxu0 %v15451_v59  ;;  %9030 = vmatprep.mubr.bf16.mxu1 %v15452_v38 }
 0x6dd   :  { %v14668_v30 = vpack.c.bf16 %v7478_v53, %v7462_v0  ;;  %v14670_v10 = vpack.c.bf16 %v7480_v50, %v7464_v61  ;;  %10798 = vmatpush3.bf16.msra.mxu0 %v12007_v28  ;;  %10862 = vmatpush3.bf16.msra.mxu1 %v12009_v2 }
 0x6de   :  { %v14672_v18 = vpack.c.bf16 %v7479_v33, %v7463_v27  ;;  %v14674_v6 = vpack.c.bf16 %v7481_v43, %v7465_v40  ;;  %v6707_v29 = vpop.f32.mrb[100].mxu0  ;;  %v6933_v62 = vpop.f32.mrb[100].mxu1  ;;  %10799 = vmatprep.subr.bf16.mxu0 %v12010_v3  ;;  %10863 = vmatprep.subr.bf16.mxu1 %v12012_v46  ;;  %v15453_v40 = vld [vmem:[#allocation47_spill] sm:$0xff]  ;;  %v15454_v33 = vld [vmem:[#allocation48_spill] sm:$0xff] }
 0x6df   :  { %v11301_v39 = vadd.f32 %v6707_v29, %v14640_v4  ;;  %v11333_v7 = vadd.f32 %v6933_v62, %v14644_v16  ;;  %v6709_v15 = vpop.f32.mrb[101].mxu0  ;;  %v6935_v63 = vpop.f32.mrb[101].mxu1 }
 0x6e0   :  { %v11302_v58 = vadd.f32 %v6709_v15, %v14650_v21  ;;  %v11334_v28 = vadd.f32 %v6935_v63, %v14654_v12  ;;  %v6711_v2 = vpop.f32.mrb[102].mxu0  ;;  %v6937_v42 = vpop.f32.mrb[102].mxu1 }
 0x6e1   :  { %v11303_v17 = vadd.f32 %v6711_v2, %v14640_v4  ;;  %v11335_v0 = vadd.f32 %v6937_v42, %v14644_v16  ;;  %v6713_v3 = vpop.f32.mrb[103].mxu0  ;;  %v6939_v46 = vpop.f32.mrb[103].mxu1  ;;  %10800 = vmatpush3.bf16.msra.mxu0 %v12011_v51  ;;  %10864 = vmatpush3.bf16.msra.mxu1 %v12013_v1  ;;  %v7494_v50 = vmax.f32 %v11301_v39, 0.0  ;;  %v7496_v34 = vmax.f32 %v11333_v7, 0.0  ;;  %v15455_v51 = vld [vmem:[#allocation53_spill] sm:$0xff]  ;;  %v15456_v1 = vld [vmem:[#allocation54_spill] sm:$0xff] }
 0x6e2   :  { %v11304_v61 = vadd.f32 %v6713_v3, %v14650_v21  ;;  %v11336_v53 = vadd.f32 %v6939_v46, %v14654_v12  ;;  %10913 = vmatprep.subr.bf16.mxu0 %v12014_v24  ;;  %10977 = vmatprep.subr.bf16.mxu1 %v12016_v47  ;;  %v7495_v43 = vmax.f32 %v11302_v58, 0.0  ;;  %v7497_v59 = vmax.f32 %v11334_v28, 0.0 }
 0x6e3   :  { %v7510_v22 = vmax.f32 %v11303_v17, 0.0  ;;  %v7512_v27 = vmax.f32 %v11335_v0, 0.0  ;;  %8934 = vmatmul.mubr.bf16.gmra.mrb[176].mxu0 %v15453_v40  ;;  %9031 = vmatmul.mubr.bf16.gmra.mrb[176].mxu1 %v15454_v33 }
 0x6e4   :  { %v7511_v38 = vmax.f32 %v11304_v61, 0.0  ;;  %v7513_v29 = vmax.f32 %v11336_v53, 0.0  ;;  %8941 = vmatprep.mubr.bf16.mxu0 %v15455_v51  ;;  %9038 = vmatprep.mubr.bf16.mxu1 %v15456_v1 }
 0x6e5   :  { %v14688_v62 = vpack.c.bf16 %v7510_v22, %v7494_v50  ;;  %v14690_v24 = vpack.c.bf16 %v7512_v27, %v7496_v34 }
 0x6e6   :  { %v14692_v47 = vpack.c.bf16 %v7511_v38, %v7495_v43  ;;  %v14694_v39 = vpack.c.bf16 %v7513_v29, %v7497_v59  ;;  %v6717_v7 = vpop.f32.mrb[104].mxu0  ;;  %v6943_v15 = vpop.f32.mrb[104].mxu1  ;;  %v15457_v59 = vld [vmem:[#allocation51_spill] sm:$0xff]  ;;  %v15458_v38 = vld [vmem:[#allocation52_spill] sm:$0xff] }
 0x6e7   :  { %v11305_v63 = vadd.f32 %v6717_v7, %v14640_v4  ;;  %v11337_v58 = vadd.f32 %v6943_v15, %v14644_v16  ;;  %v6719_v28 = vpop.f32.mrb[105].mxu0  ;;  %v6945_v2 = vpop.f32.mrb[105].mxu1 }
 0x6e8   :  { %v11306_v42 = vadd.f32 %v6719_v28, %v14650_v21  ;;  %v11338_v17 = vadd.f32 %v6945_v2, %v14654_v12  ;;  %v6721_v0 = vpop.f32.mrb[106].mxu0  ;;  %v6947_v3 = vpop.f32.mrb[106].mxu1 }
 0x6e9   :  { %v11307_v46 = vadd.f32 %v6721_v0, %v14640_v4  ;;  %v11339_v61 = vadd.f32 %v6947_v3, %v14644_v16  ;;  %v6723_v53 = vpop.f32.mrb[107].mxu0  ;;  %v6949_v50 = vpop.f32.mrb[107].mxu1  ;;  %v7526_v27 = vmax.f32 %v11305_v63, 0.0  ;;  %v7528_v40 = vmax.f32 %v11337_v58, 0.0 }
 0x6ea   :  { %v11308_v34 = vadd.f32 %v6723_v53, %v14650_v21  ;;  %v11340_v22 = vadd.f32 %v6949_v50, %v14654_v12  ;;  %v7527_v29 = vmax.f32 %v11306_v42, 0.0  ;;  %v7529_v51 = vmax.f32 %v11338_v17, 0.0 }
 0x6eb   :  { %v7542_v33 = vmax.f32 %v11307_v46, 0.0  ;;  %v7544_v43 = vmax.f32 %v11339_v61, 0.0  ;;  %8942 = vmatmul.mubr.bf16.gmra.mrb[180].mxu0 %v15457_v59  ;;  %9039 = vmatmul.mubr.bf16.gmra.mrb[180].mxu1 %v15458_v38 }
 0x6ec   :  { %v7543_v1 = vmax.f32 %v11308_v34, 0.0  ;;  %v7545_v7 = vmax.f32 %v11340_v22, 0.0  ;;  %8949 = vmatprep.mubr.bf16.mxu0 %v14376_v49  ;;  %9046 = vmatprep.mubr.bf16.mxu1 %v14378_v23 }
 0x6ed   :  { %v14708_v15 = vpack.c.bf16 %v7542_v33, %v7526_v27  ;;  %v14710_v28 = vpack.c.bf16 %v7544_v43, %v7528_v40 }
 0x6ee   :  { %v14712_v63 = vpack.c.bf16 %v7543_v1, %v7527_v29  ;;  %v14714_v58 = vpack.c.bf16 %v7545_v7, %v7529_v51  ;;  %v6727_v2 = vpop.f32.mrb[108].mxu0  ;;  %v6953_v0 = vpop.f32.mrb[108].mxu1  ;;  %v15459_v51 = vld [vmem:[#allocation55_spill] sm:$0xff]  ;;  %v15460_v1 = vld [vmem:[#allocation56_spill] sm:$0xff] }
 0x6ef   :  { %v11309_v3 = vadd.f32 %v6727_v2, %v14640_v4  ;;  %v11341_v42 = vadd.f32 %v6953_v0, %v14644_v16  ;;  %v6729_v17 = vpop.f32.mrb[109].mxu0  ;;  %v6955_v46 = vpop.f32.mrb[109].mxu1 }
 0x6f0   :  { %v11310_v49 = vadd.f32 %v6729_v17, %v14650_v21  ;;  %v11342_v23 = vadd.f32 %v6955_v46, %v14654_v12  ;;  %v6731_v61 = vpop.f32.mrb[110].mxu0  ;;  %v6957_v53 = vpop.f32.mrb[110].mxu1 }
 0x6f1   :  { %v11311_v50 = vadd.f32 %v6731_v61, %v14640_v4  ;;  %v11343_v34 = vadd.f32 %v6957_v53, %v14644_v16  ;;  %v6733_v22 = vpop.f32.mrb[111].mxu0  ;;  %v6959_v27 = vpop.f32.mrb[111].mxu1  ;;  %v7558_v43 = vmax.f32 %v11309_v3, 0.0  ;;  %v7560_v59 = vmax.f32 %v11341_v42, 0.0 }
 0x6f2   :  { %v11312_v40 = vadd.f32 %v6733_v22, %v14650_v21  ;;  %v11344_v33 = vadd.f32 %v6959_v27, %v14654_v12  ;;  %v7559_v7 = vmax.f32 %v11310_v49, 0.0  ;;  %v7561_v2 = vmax.f32 %v11342_v23, 0.0 }
 0x6f3   :  { %v7574_v38 = vmax.f32 %v11311_v50, 0.0  ;;  %v7576_v29 = vmax.f32 %v11343_v34, 0.0  ;;  %8950 = vmatmul.mubr.bf16.gmra.mrb[184].mxu0 %v15459_v51  ;;  %9047 = vmatmul.mubr.bf16.gmra.mrb[184].mxu1 %v15460_v1 }
 0x6f4   :  { %v7575_v0 = vmax.f32 %v11312_v40, 0.0  ;;  %v7577_v17 = vmax.f32 %v11344_v33, 0.0  ;;  %8957 = vmatprep.mubr.bf16.mxu0 %v14396_v35  ;;  %9054 = vmatprep.mubr.bf16.mxu1 %v14398_v25 }
 0x6f5   :  { %v14728_v46 = vpack.c.bf16 %v7574_v38, %v7558_v43  ;;  %v14730_v61 = vpack.c.bf16 %v7576_v29, %v7560_v59 }
 0x6f6   :  { %v14732_v3 = vpack.c.bf16 %v7575_v0, %v7559_v7  ;;  %v14734_v42 = vpack.c.bf16 %v7577_v17, %v7561_v2  ;;  %v6737_v53 = vpop.f32.mrb[112].mxu0  ;;  %v6963_v50 = vpop.f32.mrb[112].mxu1 }
 0x6f7   :  { %v11313_v34 = vadd.f32 %v6737_v53, %v14640_v4  ;;  %v11345_v49 = vadd.f32 %v6963_v50, %v14644_v16  ;;  %v6739_v23 = vpop.f32.mrb[113].mxu0  ;;  %v6965_v22 = vpop.f32.mrb[113].mxu1 }
 0x6f8   :  { %v11314_v35 = vadd.f32 %v6739_v23, %v14650_v21  ;;  %v11346_v25 = vadd.f32 %v6965_v22, %v14654_v12  ;;  %v6741_v27 = vpop.f32.mrb[114].mxu0  ;;  %v6967_v40 = vpop.f32.mrb[114].mxu1 }
 0x6f9   :  { %v11315_v33 = vadd.f32 %v6741_v27, %v14640_v4  ;;  %v11347_v43 = vadd.f32 %v6967_v40, %v14644_v16  ;;  %v6743_v59 = vpop.f32.mrb[115].mxu0  ;;  %v6969_v38 = vpop.f32.mrb[115].mxu1  ;;  %v7590_v1 = vmax.f32 %v11313_v34, 0.0  ;;  %v7592_v7 = vmax.f32 %v11345_v49, 0.0 }
 0x6fa   :  { %v11316_v29 = vadd.f32 %v6743_v59, %v14650_v21  ;;  %v11348_v51 = vadd.f32 %v6969_v38, %v14654_v12  ;;  %v7591_v17 = vmax.f32 %v11314_v35, 0.0  ;;  %v7593_v53 = vmax.f32 %v11346_v25, 0.0 }
 0x6fb   :  { %v7606_v2 = vmax.f32 %v11315_v33, 0.0  ;;  %v7608_v0 = vmax.f32 %v11347_v43, 0.0  ;;  %8958 = vmatmul.mubr.bf16.gmra.mrb[188].mxu0 %v14392_v36  ;;  %9055 = vmatmul.mubr.bf16.gmra.mrb[188].mxu1 %v14394_v26 }
 0x6fc   :  { %v7607_v50 = vmax.f32 %v11316_v29, 0.0  ;;  %v7609_v23 = vmax.f32 %v11348_v51, 0.0  ;;  %9095 = vmatprep.mubr.bf16.mxu0 %v14460_v20  ;;  %9192 = vmatprep.mubr.bf16.mxu1 %v14462_v44 }
 0x6fd   :  { %v14748_v22 = vpack.c.bf16 %v7606_v2, %v7590_v1  ;;  %v14750_v27 = vpack.c.bf16 %v7608_v0, %v7592_v7  ;;  %v12015_v7 = vld [vmem:[#allocation16 + $0x200] sm:$0xff]  }
 0x6fe   :  { %v14752_v34 = vpack.c.bf16 %v7607_v50, %v7591_v17  ;;  %v14754_v49 = vpack.c.bf16 %v7609_v23, %v7593_v53  ;;  %v6747_v40 = vpop.f32.mrb[116].mxu0  ;;  %v6973_v36 = vpop.f32.mrb[116].mxu1  ;;  %v12017_v2 = vld [vmem:[#allocation16 + $0x280] sm:$0xff]   ;;  %v12018_v53 = vld [vmem:[#allocation16 + $0x248] sm:$0xff]  }
 0x6ff   :  { %15461 = vst [vmem:[#allocation35_spill] sm:$0xff] %v14750_v27  ;;  %v11317_v26 = vadd.f32 %v6747_v40, %v14640_v4  ;;  %v11349_v35 = vadd.f32 %v6973_v36, %v14644_v16  ;;  %v6749_v25 = vpop.f32.mrb[117].mxu0  ;;  %v6975_v33 = vpop.f32.mrb[117].mxu1  ;;  %v12020_v50 = vld [vmem:[#allocation16 + $0x2c8] sm:$0xff]  }
 0x700   :  { %v11318_v20 = vadd.f32 %v6749_v25, %v14650_v21  ;;  %v11350_v44 = vadd.f32 %v6975_v33, %v14654_v12  ;;  %v6751_v43 = vpop.f32.mrb[118].mxu0  ;;  %v6977_v59 = vpop.f32.mrb[118].mxu1 }
 0x701   :  { %v11319_v38 = vadd.f32 %v6751_v43, %v14640_v4  ;;  %v11351_v29 = vadd.f32 %v6977_v59, %v14644_v16  ;;  %v6753_v51 = vpop.f32.mrb[119].mxu0  ;;  %v6979_v1 = vpop.f32.mrb[119].mxu1  ;;  %v7622_v23 = vmax.f32 %v11317_v26, 0.0  ;;  %v7624_v40 = vmax.f32 %v11349_v35, 0.0  ;;  %v12019_v26 = vld [vmem:[#allocation16 + $0x208] sm:$0xff]  }
 0x702   :  { %v11320_v0 = vadd.f32 %v6753_v51, %v14650_v21  ;;  %v11352_v17 = vadd.f32 %v6979_v1, %v14654_v12  ;;  %v7623_v33 = vmax.f32 %v11318_v20, 0.0  ;;  %v7625_v43 = vmax.f32 %v11350_v44, 0.0  ;;  %v12021_v35 = vld [vmem:[#allocation16 + $0x288] sm:$0xff]   ;;  %v12022_v44 = vld [vmem:[#allocation16 + $0x250] sm:$0xff]  }
 0x703   :  { %v7638_v36 = vmax.f32 %v11319_v38, 0.0  ;;  %v7640_v25 = vmax.f32 %v11351_v29, 0.0  ;;  %9096 = vmatmul.mubr.bf16.vlgmr.msra.gmra.mrb[192].mxu0 %v14456_v57  ;;  %9193 = vmatmul.mubr.bf16.vlgmr.msra.gmra.mrb[192].mxu1 %v14458_v41 }
 0x704   :  { %v7639_v59 = vmax.f32 %v11320_v0, 0.0  ;;  %v7641_v27 = vmax.f32 %v11352_v17, 0.0  ;;  %9103 = vmatprep.mubr.bf16.mxu0 %v14480_v45  ;;  %9200 = vmatprep.mubr.bf16.mxu1 %v14482_v8  ;;  %v12024_v45 = vld [vmem:[#allocation16 + $0x2d0] sm:$0xff]  }
 0x705   :  { %v14768_v51 = vpack.c.bf16 %v7638_v36, %v7622_v23  ;;  %v14770_v1 = vpack.c.bf16 %v7640_v25, %v7624_v40  ;;  %10914 = vmatpush3.bf16.msra.mxu0 %v12015_v7  ;;  %10978 = vmatpush3.bf16.msra.mxu1 %v12017_v2  ;;  %v12023_v25 = vld [vmem:[#allocation16 + $0x210] sm:$0xff]  }
 0x706   :  { %v14772_v38 = vpack.c.bf16 %v7639_v59, %v7623_v33  ;;  %v14774_v57 = vpack.c.bf16 %v7641_v27, %v7625_v43  ;;  %v6757_v41 = vpop.f32.mrb[120].mxu0  ;;  %v6983_v20 = vpop.f32.mrb[120].mxu1  ;;  %10915 = vmatprep.subr.bf16.mxu0 %v12018_v53  ;;  %10979 = vmatprep.subr.bf16.mxu1 %v12020_v50  ;;  %v12025_v33 = vld [vmem:[#allocation16 + $0x290] sm:$0xff]  }
 0x707   :  { %15462 = vst [vmem:[#allocation37_spill] sm:$0xff] %v14768_v51  ;;  %15463 = vst [vmem:[#allocation36_spill] sm:$0xff] %v14770_v1  ;;  %v11321_v8 = vadd.f32 %v6757_v41, %v14640_v4  ;;  %v11353_v29 = vadd.f32 %v6983_v20, %v14644_v16  ;;  %v6759_v0 = vpop.f32.mrb[121].mxu0  ;;  %v6985_v17 = vpop.f32.mrb[121].mxu1  ;;  %v12026_v41 = vld [vmem:[#allocation16 + $0x258] sm:$0xff]  }
 0x708   :  { %15464 = vst [vmem:[#allocation38_spill] sm:$0xff] %v14772_v38  ;;  %15465 = vst [vmem:[#allocation39_spill] sm:$0xff] %v14774_v57  ;;  %v11322_v7 = vadd.f32 %v6759_v0, %v14650_v21  ;;  %v11354_v2 = vadd.f32 %v6985_v17, %v14654_v12  ;;  %v6761_v23 = vpop.f32.mrb[122].mxu0  ;;  %v6987_v40 = vpop.f32.mrb[122].mxu1  ;;  %v12028_v20 = vld [vmem:[#allocation16 + $0x2d8] sm:$0xff]  }
 0x709   :  { %v11323_v27 = vadd.f32 %v6761_v23, %v14640_v4  ;;  %v11355_v36 = vadd.f32 %v6987_v40, %v14644_v16  ;;  %v6763_v53 = vpop.f32.mrb[123].mxu0  ;;  %v6989_v50 = vpop.f32.mrb[123].mxu1  ;;  %10916 = vmatpush3.bf16.msra.mxu0 %v12019_v26  ;;  %10980 = vmatpush3.bf16.msra.mxu1 %v12021_v35  ;;  %v7654_v0 = vmax.f32 %v11321_v8, 0.0  ;;  %v7656_v17 = vmax.f32 %v11353_v29, 0.0  ;;  %v15466_v51 = vld [vmem:[#allocation57_spill] sm:$0xff]  ;;  %v15467_v40 = vld [vmem:[#allocation58_spill] sm:$0xff] }
 0x70a   :  { %v11324_v43 = vadd.f32 %v6763_v53, %v14650_v21  ;;  %v11356_v59 = vadd.f32 %v6989_v50, %v14654_v12  ;;  %10917 = vmatprep.subr.bf16.mxu0 %v12022_v44  ;;  %10981 = vmatprep.subr.bf16.mxu1 %v12024_v45  ;;  %v7655_v26 = vmax.f32 %v11322_v7, 0.0  ;;  %v7657_v35 = vmax.f32 %v11354_v2, 0.0  ;;  %v12027_v8 = vld [vmem:[#allocation16 + $0x218] sm:$0xff]  }
 0x70b   :  { %v7670_v1 = vmax.f32 %v11323_v27, 0.0  ;;  %v7672_v23 = vmax.f32 %v11355_v36, 0.0  ;;  %9104 = vmatmul.mubr.bf16.gmra.mrb[196].mxu0 %v15466_v51  ;;  %9201 = vmatmul.mubr.bf16.gmra.mrb[196].mxu1 %v15467_v40  ;;  %v12029_v29 = vld [vmem:[#allocation16 + $0x298] sm:$0xff]   ;;  %v12030_v36 = vld [vmem:[#allocation16 + $0x260] sm:$0xff]  }
 0x70c   :  { %v7671_v57 = vmax.f32 %v11324_v43, 0.0  ;;  %v7673_v38 = vmax.f32 %v11356_v59, 0.0  ;;  %9111 = vmatprep.mubr.bf16.mxu0 %v14500_v54  ;;  %9208 = vmatprep.mubr.bf16.mxu1 %v14502_v37  ;;  %v12032_v54 = vld [vmem:[#allocation16 + $0x2e0] sm:$0xff]  }
 0x70d   :  { %v14788_v44 = vpack.c.bf16 %v7670_v1, %v7654_v0  ;;  %v14790_v45 = vpack.c.bf16 %v7672_v23, %v7656_v17  ;;  %10918 = vmatpush3.bf16.msra.mxu0 %v12023_v25  ;;  %10982 = vmatpush3.bf16.msra.mxu1 %v12025_v33  ;;  %v12031_v0 = vld [vmem:[#allocation16 + $0x220] sm:$0xff]  }
 0x70e   :  { %v14792_v27 = vpack.c.bf16 %v7671_v57, %v7655_v26  ;;  %v14794_v51 = vpack.c.bf16 %v7673_v38, %v7657_v35  ;;  %v6767_v7 = vpop.f32.mrb[124].mxu0  ;;  %v6993_v2 = vpop.f32.mrb[124].mxu1  ;;  %10919 = vmatprep.subr.bf16.mxu0 %v12026_v41  ;;  %10983 = vmatprep.subr.bf16.mxu1 %v12028_v20  ;;  %v12033_v17 = vld [vmem:[#allocation16 + $0x2a0] sm:$0xff]   ;;  %v12034_v26 = vld [vmem:[#allocation16 + $0x268] sm:$0xff]  }
 0x70f   :  { %v11325_v37 = vadd.f32 %v6767_v7, %v14640_v4  ;;  %v11357_v1 = vadd.f32 %v6993_v2, %v14644_v16  ;;  %v6769_v53 = vpop.f32.mrb[125].mxu0  ;;  %v6995_v50 = vpop.f32.mrb[125].mxu1  ;;  %v12036_v35 = vld [vmem:[#allocation16 + $0x2e8] sm:$0xff]  }
 0x710   :  { %v11326_v25 = vadd.f32 %v6769_v53, %v14650_v21  ;;  %v11358_v33 = vadd.f32 %v6995_v50, %v14654_v12  ;;  %v6771_v57 = vpop.f32.mrb[126].mxu0  ;;  %v6997_v43 = vpop.f32.mrb[126].mxu1  ;;  %v15468_v50 = vld [vmem:[#allocation59_spill] sm:$0xff] }
 0x711   :  { %v11327_v38 = vadd.f32 %v6771_v57, %v14640_v4  ;;  %v11359_v59 = vadd.f32 %v6997_v43, %v14644_v16  ;;  %v6773_v41 = vpop.f32.mrb[127].mxu0  ;;  %v6999_v20 = vpop.f32.mrb[127].mxu1  ;;  %10920 = vmatpush3.bf16.msra.mxu0 %v12027_v8  ;;  %10984 = vmatpush3.bf16.msra.mxu1 %v12029_v29  ;;  %v7686_v7 = vmax.f32 %v11325_v37, 0.0  ;;  %v7688_v2 = vmax.f32 %v11357_v1, 0.0  ;;  %v15469_v16 = vld [vmem:[#allocation60_spill] sm:$0xff] }
 0x712   :  { %v11328_v23 = vadd.f32 %v6773_v41, %v14650_v21  ;;  %v11360_v40 = vadd.f32 %v6999_v20, %v14654_v12  ;;  %10921 = vmatprep.subr.bf16.mxu0 %v12030_v36  ;;  %10985 = vmatprep.subr.bf16.mxu1 %v12032_v54  ;;  %v7687_v8 = vmax.f32 %v11326_v25, 0.0  ;;  %v7689_v29 = vmax.f32 %v11358_v33, 0.0  ;;  %v15470_v21 = vld [vmem:[#allocation63_spill] sm:$0xff]  ;;  %v12038_v25 = vld [vmem:[#allocation16 + $0x270] sm:$0xff]   ;;  %v12042_v41 = vld [vmem:[#allocation16 + $0x278] sm:$0xff]  }
 0x713   :  { %v7702_v53 = vmax.f32 %v11327_v38, 0.0  ;;  %v7704_v4 = vmax.f32 %v11359_v59, 0.0  ;;  %9112 = vmatmul.mubr.bf16.gmra.mrb[200].mxu0 %v15468_v50  ;;  %9209 = vmatmul.mubr.bf16.gmra.mrb[200].mxu1 %v15469_v16  ;;  %v12035_v54 = vld [vmem:[#allocation16 + $0x228] sm:$0xff]   ;;  %v12040_v33 = vld [vmem:[#allocation16 + $0x2f0] sm:$0xff]   ;;  %v12044_v20 = vld [vmem:[#allocation16 + $0x2f8] sm:$0xff]  }
 0x714   :  { %v7703_v57 = vmax.f32 %v11328_v23, 0.0  ;;  %v7705_v43 = vmax.f32 %v11360_v40, 0.0  ;;  %9119 = vmatprep.mubr.bf16.mxu0 %v14520_v32  ;;  %9216 = vmatprep.mubr.bf16.mxu1 %v15470_v21  ;;  %v12037_v37 = vld [vmem:[#allocation16 + $0x2a8] sm:$0xff]   ;;  %v12039_v32 = vld [vmem:[#allocation16 + $0x230] sm:$0xff]   ;;  %v12043_v23 = vld [vmem:[#allocation16 + $0x238] sm:$0xff]  }
 0x715   :  { %v14808_v12 = vpack.c.bf16 %v7702_v53, %v7686_v7  ;;  %v14810_v36 = vpack.c.bf16 %v7704_v4, %v7688_v2  ;;  %10922 = vmatpush3.bf16.msra.mxu0 %v12031_v0  ;;  %10986 = vmatpush3.bf16.msra.mxu1 %v12033_v17  ;;  %v12041_v59 = vld [vmem:[#allocation16 + $0x2b0] sm:$0xff]   ;;  %v15472_v17 = vld [vmem:[#allocation62_spill] sm:$0xff] }
 0x716   :  { %v14812_v1 = vpack.c.bf16 %v7703_v57, %v7687_v8  ;;  %v14814_v38 = vpack.c.bf16 %v7705_v43, %v7689_v29  ;;  %10923 = vmatprep.subr.bf16.mxu0 %v12034_v26  ;;  %10987 = vmatprep.subr.bf16.mxu1 %v12036_v35  ;;  %v15471_v0 = vld [vmem:[#allocation61_spill] sm:$0xff]  ;;  %v12046_v26 = vld [vmem:[#allocation16 + $0x340] sm:$0xff]   ;;  %v15473_v7 = vld [vmem:[#allocation64_spill] sm:$0xff] }
 0x717   :  { %v12045_v40 = vld [vmem:[#allocation16 + $0x2b8] sm:$0xff]   ;;  %v12048_v35 = vld [vmem:[#allocation16 + $0x3c0] sm:$0xff]   ;;  %v15477_v53 = vld [vmem:[#allocation68_spill] sm:$0xff] }
 0x718   :  { %v15474_v2 = vld [vmem:[#allocation65_spill] sm:$0xff]  ;;  %v12064_v4 = vld [vmem:[#allocation16 + $0x3e0] sm:$0xff]   ;;  %v15480_v57 = vld [vmem:[#allocation32_spill] sm:$0xff] }
 0x719   :  { %10924 = vmatpush3.bf16.msra.mxu0 %v12035_v54  ;;  %10988 = vmatpush3.bf16.msra.mxu1 %v12037_v37  ;;  %v12063_v50 = vld [vmem:[#allocation16 + $0x320] sm:$0xff]   ;;  %v15479_v8 = vld [vmem:[#allocation33_spill] sm:$0xff]  ;;  %v14858_v43 = vrot.slane %v14634_v48, %v15480_v57  ;;  %v12069_v54 = vld [vmem:[#allocation16 + $0x3a8] sm:$0xff]  }
 0x71a   :  { %10925 = vmatprep.subr.bf16.mxu0 %v12038_v25  ;;  %10989 = vmatprep.subr.bf16.mxu1 %v12040_v33  ;;  %v12065_v16 = vld [vmem:[#allocation16 + $0x3a0] sm:$0xff]   ;;  %v14852_v29 = vrot.slane %v14634_v48, %v15479_v8  ;;  %v12070_v33 = vld [vmem:[#allocation16 + $0x370] sm:$0xff]  }
 0x71b   :  { %9120 = vmatmul.mubr.bf16.gmra.mrb[204].mxu0 %v15471_v0  ;;  %9217 = vmatmul.mubr.bf16.gmra.mrb[204].mxu1 %v15472_v17  ;;  %v15481_v21 = vld [vmem:[#allocation34_spill] sm:$0xff] }
 0x71c   :  { %9127 = vmatprep.mubr.bf16.mxu0 %v14540_v14  ;;  %9224 = vmatprep.mubr.bf16.mxu1 %v14542_v56  ;;  %v15475_v56 = vld [vmem:[#allocation66_spill] sm:$0xff]  ;;  %v15476_v14 = vld [vmem:[#allocation67_spill] sm:$0xff] }
 0x71d   :  { %10926 = vmatpush3.bf16.msra.mxu0 %v12039_v32  ;;  %10990 = vmatpush3.bf16.msra.mxu1 %v12041_v59 }
 0x71e   :  { %10927 = vmatprep.subr.bf16.mxu0 %v12042_v41  ;;  %10991 = vmatprep.subr.bf16.mxu1 %v12044_v20 }
 0x721   :  { %10928 = vmatpush3.bf16.msra.mxu0 %v12043_v23  ;;  %10992 = vmatpush3.bf16.msra.mxu1 %v12045_v40 }
 0x722   :  { %11041 = vmatprep.subr.bf16.mxu0 %v12046_v26  ;;  %11105 = vmatprep.subr.bf16.mxu1 %v12048_v35 }
 0x723   :  { %9128 = vmatmul.mubr.bf16.gmra.mrb[208].mxu0 %v15473_v7  ;;  %9225 = vmatmul.mubr.bf16.gmra.mrb[208].mxu1 %v15474_v2  ;;  %v12071_v7 = vld [vmem:[#allocation16 + $0x330] sm:$0xff]  }
 0x724   :  { %9135 = vmatprep.mubr.bf16.mxu0 %v14562_v60  ;;  %9232 = vmatprep.mubr.bf16.mxu1 %v14564_v11  ;;  %v12049_v60 = vld [vmem:[#allocation16 + $0x380] sm:$0xff]   ;;  %v12050_v11 = vld [vmem:[#allocation16 + $0x348] sm:$0xff]   ;;  %v12073_v2 = vld [vmem:[#allocation16 + $0x3b0] sm:$0xff]  }
 0x72b   :  { %9136 = vmatmul.mubr.bf16.gmra.mrb[212].mxu0 %v14556_v5  ;;  %9233 = vmatmul.mubr.bf16.gmra.mrb[212].mxu1 %v15475_v56  ;;  %v12047_v5 = vld [vmem:[#allocation16 + $0x300] sm:$0xff]  }
 0x72c   :  { %9143 = vmatprep.mubr.bf16.mxu0 %v14582_v13  ;;  %9240 = vmatprep.mubr.bf16.mxu1 %v14584_v52  ;;  %v12052_v13 = vld [vmem:[#allocation16 + $0x3c8] sm:$0xff]  }
 0x72d   :  { %v12051_v52 = vld [vmem:[#allocation16 + $0x308] sm:$0xff]  }
 0x733   :  { %9144 = vmatmul.mubr.bf16.gmra.mrb[216].mxu0 %v15476_v14  ;;  %9241 = vmatmul.mubr.bf16.gmra.mrb[216].mxu1 %v15477_v53  ;;  %v12074_v53 = vld [vmem:[#allocation16 + $0x378] sm:$0xff]  }
 0x734   :  { %9151 = vmatprep.mubr.bf16.mxu0 %v14602_v19  ;;  %9248 = vmatprep.mubr.bf16.mxu1 %v14604_v55  ;;  %v12056_v19 = vld [vmem:[#allocation16 + $0x3d0] sm:$0xff]  }
 0x735   :  { %v12055_v55 = vld [vmem:[#allocation16 + $0x310] sm:$0xff]  }
 0x73b   :  { %9152 = vmatmul.mubr.bf16.gmra.mrb[220].mxu0 %v14598_v9  ;;  %9249 = vmatmul.mubr.bf16.gmra.mrb[220].mxu1 %v14600_v31  ;;  %v12053_v9 = vld [vmem:[#allocation16 + $0x388] sm:$0xff]   ;;  %v12054_v31 = vld [vmem:[#allocation16 + $0x350] sm:$0xff]  }
 0x73c   :  { %9289 = vmatprep.mubr.bf16.mxu0 %v14672_v18  ;;  %9386 = vmatprep.mubr.bf16.mxu1 %v14674_v6  ;;  %v12057_v18 = vld [vmem:[#allocation16 + $0x390] sm:$0xff]   ;;  %v12059_v6 = vld [vmem:[#allocation16 + $0x318] sm:$0xff]  }
 0x743   :  { %9290 = vmatmul.mubr.bf16.vlgmr.msra.gmra.mrb[224].mxu0 %v14668_v30  ;;  %9387 = vmatmul.mubr.bf16.vlgmr.msra.gmra.mrb[224].mxu1 %v14670_v10  ;;  %v12058_v30 = vld [vmem:[#allocation16 + $0x358] sm:$0xff]  }
 0x744   :  { %9297 = vmatprep.mubr.bf16.mxu0 %v14692_v47  ;;  %9394 = vmatprep.mubr.bf16.mxu1 %v14694_v39  ;;  %v12060_v10 = vld [vmem:[#allocation16 + $0x3d8] sm:$0xff]   ;;  %v12062_v39 = vld [vmem:[#allocation16 + $0x360] sm:$0xff]  }
 0x745   :  { %11042 = vmatpush3.bf16.msra.mxu0 %v12047_v5  ;;  %11106 = vmatpush3.bf16.msra.mxu1 %v12049_v60  ;;  %v12061_v47 = vld [vmem:[#allocation16 + $0x398] sm:$0xff]  }
 0x746   :  { %11043 = vmatprep.subr.bf16.mxu0 %v12050_v11  ;;  %11107 = vmatprep.subr.bf16.mxu1 %v12052_v13  ;;  %v12076_v5 = vld [vmem:[#allocation16 + $0x3f8] sm:$0xff]  }
 0x749   :  { %11044 = vmatpush3.bf16.msra.mxu0 %v12051_v52  ;;  %11108 = vmatpush3.bf16.msra.mxu1 %v12053_v9 }
 0x74a   :  { %11045 = vmatprep.subr.bf16.mxu0 %v12054_v31  ;;  %11109 = vmatprep.subr.bf16.mxu1 %v12056_v19 }
 0x74b   :  { %9298 = vmatmul.mubr.bf16.gmra.mrb[228].mxu0 %v14688_v62  ;;  %9395 = vmatmul.mubr.bf16.gmra.mrb[228].mxu1 %v14690_v24  ;;  %v12066_v62 = vld [vmem:[#allocation16 + $0x368] sm:$0xff]  }
 0x74c   :  { %9305 = vmatprep.mubr.bf16.mxu0 %v14712_v63  ;;  %9402 = vmatprep.mubr.bf16.mxu1 %v14714_v58  ;;  %v12068_v24 = vld [vmem:[#allocation16 + $0x3e8] sm:$0xff]  }
 0x74d   :  { %11046 = vmatpush3.bf16.msra.mxu0 %v12055_v55  ;;  %11110 = vmatpush3.bf16.msra.mxu1 %v12057_v18  ;;  %v15478_v63 = vld [vmem:[#allocation31_spill] sm:$0xff] }
 0x74e   :  { %11047 = vmatprep.subr.bf16.mxu0 %v12058_v30  ;;  %11111 = vmatprep.subr.bf16.mxu1 %v12060_v10  ;;  %v14848_v58 = vrot.slane %v14634_v48, %v15478_v63  ;;  %v12075_v10 = vld [vmem:[#allocation16 + $0x338] sm:$0xff]  }
 0x751   :  { %11048 = vmatpush3.bf16.msra.mxu0 %v12059_v6  ;;  %11112 = vmatpush3.bf16.msra.mxu1 %v12061_v47  ;;  %v12077_v6 = vld [vmem:[#allocation16 + $0x3b8] sm:$0xff]  }
 0x752   :  { %11049 = vmatprep.subr.bf16.mxu0 %v12062_v39  ;;  %11113 = vmatprep.subr.bf16.mxu1 %v12064_v4 }
 0x753   :  { %9306 = vmatmul.mubr.bf16.gmra.mrb[232].mxu0 %v14708_v15  ;;  %9403 = vmatmul.mubr.bf16.gmra.mrb[232].mxu1 %v14710_v28  ;;  %v14862_v15 = vrot.slane %v14634_v48, %v15481_v21  ;;  %v12067_v28 = vld [vmem:[#allocation16 + $0x328] sm:$0xff]  }
 0x754   :  { %9313 = vmatprep.mubr.bf16.mxu0 %v14732_v3  ;;  %9410 = vmatprep.mubr.bf16.mxu1 %v14734_v42  ;;  %v12072_v3 = vld [vmem:[#allocation16 + $0x3f0] sm:$0xff]  }
 0x755   :  { %11050 = vmatpush3.bf16.msra.mxu0 %v12063_v50  ;;  %11114 = vmatpush3.bf16.msra.mxu1 %v12065_v16 }
 0x756   :  { %v7149_v37 = vpop.f32.mrb[128].mxu0  ;;  %v7375_v25 = vpop.f32.mrb[128].mxu1  ;;  %11051 = vmatprep.subr.bf16.mxu0 %v12066_v62  ;;  %11115 = vmatprep.subr.bf16.mxu1 %v12068_v24 }
 0x757   :  { %v11361_v42 = vadd.f32 %v7149_v37, %v14848_v58  ;;  %v11393_v32 = vadd.f32 %v7375_v25, %v14852_v29  ;;  %v7151_v59 = vpop.f32.mrb[129].mxu0  ;;  %v7377_v41 = vpop.f32.mrb[129].mxu1 }
 0x758   :  { %v11362_v20 = vadd.f32 %v7151_v59, %v14858_v43  ;;  %v11394_v48 = vadd.f32 %v7377_v41, %v14862_v15  ;;  %v7153_v0 = vpop.f32.mrb[130].mxu0  ;;  %v7379_v17 = vpop.f32.mrb[130].mxu1 }
 0x759   :  { %v11363_v23 = vadd.f32 %v7153_v0, %v14848_v58  ;;  %v11395_v40 = vadd.f32 %v7379_v17, %v14852_v29  ;;  %v7155_v26 = vpop.f32.mrb[131].mxu0  ;;  %v7381_v35 = vpop.f32.mrb[131].mxu1  ;;  %11052 = vmatpush3.bf16.msra.mxu0 %v12067_v28  ;;  %11116 = vmatpush3.bf16.msra.mxu1 %v12069_v54  ;;  %v7466_v60 = vmax.f32 %v11361_v42, 0.0  ;;  %v7468_v11 = vmax.f32 %v11393_v32, 0.0  ;;  %v15482_v32 = vld [vmem:[#allocation35_spill] sm:$0xff]  ;;  %v15483_v0 = vld [vmem:[#allocation38_spill] sm:$0xff] }
 0x75a   :  { %v11364_v56 = vadd.f32 %v7155_v26, %v14858_v43  ;;  %v11396_v14 = vadd.f32 %v7381_v35, %v14862_v15  ;;  %11053 = vmatprep.subr.bf16.mxu0 %v12070_v33  ;;  %11117 = vmatprep.subr.bf16.mxu1 %v12072_v3  ;;  %v7467_v9 = vmax.f32 %v11362_v20, 0.0  ;;  %v7469_v31 = vmax.f32 %v11394_v48, 0.0  ;;  %v15484_v17 = vld [vmem:[#allocation39_spill] sm:$0xff] }
 0x75b   :  { %v7482_v13 = vmax.f32 %v11363_v23, 0.0  ;;  %v7484_v52 = vmax.f32 %v11395_v40, 0.0  ;;  %9314 = vmatmul.mubr.bf16.gmra.mrb[236].mxu0 %v14728_v46  ;;  %9411 = vmatmul.mubr.bf16.gmra.mrb[236].mxu1 %v14730_v61 }
 0x75c   :  { %v7483_v19 = vmax.f32 %v11364_v56, 0.0  ;;  %v7485_v55 = vmax.f32 %v11396_v14, 0.0  ;;  %9321 = vmatprep.mubr.bf16.mxu0 %v14752_v34  ;;  %9418 = vmatprep.mubr.bf16.mxu1 %v14754_v49 }
 0x75d   :  { %v14876_v18 = vpack.c.bf16 %v7482_v13, %v7466_v60  ;;  %v14878_v30 = vpack.c.bf16 %v7484_v52, %v7468_v11  ;;  %11054 = vmatpush3.bf16.msra.mxu0 %v12071_v7  ;;  %11118 = vmatpush3.bf16.msra.mxu1 %v12073_v2 }
 0x75e   :  { %v14880_v47 = vpack.c.bf16 %v7483_v19, %v7467_v9  ;;  %v14882_v46 = vpack.c.bf16 %v7485_v55, %v7469_v31  ;;  %v7159_v61 = vpop.f32.mrb[132].mxu0  ;;  %v7385_v39 = vpop.f32.mrb[132].mxu1  ;;  %11055 = vmatprep.subr.bf16.mxu0 %v12074_v53  ;;  %11119 = vmatprep.subr.bf16.mxu1 %v12076_v5 }
 0x75f   :  { %v11365_v34 = vadd.f32 %v7159_v61, %v14848_v58  ;;  %v11397_v49 = vadd.f32 %v7385_v39, %v14852_v29  ;;  %v7161_v4 = vpop.f32.mrb[133].mxu0  ;;  %v7387_v50 = vpop.f32.mrb[133].mxu1 }
 0x760   :  { %v11366_v16 = vadd.f32 %v7161_v4, %v14858_v43  ;;  %v11398_v62 = vadd.f32 %v7387_v50, %v14862_v15  ;;  %v7163_v24 = vpop.f32.mrb[134].mxu0  ;;  %v7389_v63 = vpop.f32.mrb[134].mxu1  ;;  %v15486_v4 = vld [vmem:[#allocation36_spill] sm:$0xff] }
 0x761   :  { %v11367_v8 = vadd.f32 %v7163_v24, %v14848_v58  ;;  %v11399_v57 = vadd.f32 %v7389_v63, %v14852_v29  ;;  %v7165_v21 = vpop.f32.mrb[135].mxu0  ;;  %v7391_v28 = vpop.f32.mrb[135].mxu1  ;;  %11056 = vmatpush3.bf16.msra.mxu0 %v12075_v10  ;;  %11120 = vmatpush3.bf16.msra.mxu1 %v12077_v6  ;;  %v7498_v25 = vmax.f32 %v11365_v34, 0.0  ;;  %v7500_v33 = vmax.f32 %v11397_v49, 0.0  ;;  %v15485_v49 = vld [vmem:[#allocation37_spill] sm:$0xff] }
 0x762   :  { %v11368_v54 = vadd.f32 %v7165_v21, %v14858_v43  ;;  %v11400_v37 = vadd.f32 %v7391_v28, %v14862_v15  ;;  %v7499_v59 = vmax.f32 %v11366_v16, 0.0  ;;  %v7501_v41 = vmax.f32 %v11398_v62, 0.0 }
 0x763   :  { %v7514_v3 = vmax.f32 %v11367_v8, 0.0  ;;  %v7516_v42 = vmax.f32 %v11399_v57, 0.0  ;;  %9322 = vmatmul.mubr.bf16.gmra.mrb[240].mxu0 %v14748_v22  ;;  %9419 = vmatmul.mubr.bf16.gmra.mrb[240].mxu1 %v15482_v32 }
 0x764   :  { %v7515_v20 = vmax.f32 %v11368_v54, 0.0  ;;  %v7517_v48 = vmax.f32 %v11400_v37, 0.0  ;;  %9329 = vmatprep.mubr.bf16.mxu0 %v15483_v0  ;;  %9426 = vmatprep.mubr.bf16.mxu1 %v15484_v17 }
 0x765   :  { %v14896_v23 = vpack.c.bf16 %v7514_v3, %v7498_v25  ;;  %v14898_v40 = vpack.c.bf16 %v7516_v42, %v7500_v33 }
 0x766   :  { %v14900_v26 = vpack.c.bf16 %v7515_v20, %v7499_v59  ;;  %v14902_v35 = vpack.c.bf16 %v7517_v48, %v7501_v41  ;;  %v7169_v7 = vpop.f32.mrb[136].mxu0  ;;  %v7395_v22 = vpop.f32.mrb[136].mxu1 }
 0x767   :  { %v11369_v2 = vadd.f32 %v7169_v7, %v14848_v58  ;;  %v11401_v56 = vadd.f32 %v7395_v22, %v14852_v29  ;;  %v7171_v14 = vpop.f32.mrb[137].mxu0  ;;  %v7397_v53 = vpop.f32.mrb[137].mxu1 }
 0x768   :  { %v11370_v5 = vadd.f32 %v7171_v14, %v14858_v43  ;;  %v11402_v60 = vadd.f32 %v7397_v53, %v14862_v15  ;;  %v7173_v11 = vpop.f32.mrb[138].mxu0  ;;  %v7399_v13 = vpop.f32.mrb[138].mxu1 }
 0x769   :  { %v11371_v52 = vadd.f32 %v7173_v11, %v14848_v58  ;;  %v11403_v9 = vadd.f32 %v7399_v13, %v14852_v29  ;;  %v7175_v31 = vpop.f32.mrb[139].mxu0  ;;  %v7401_v19 = vpop.f32.mrb[139].mxu1  ;;  %v7530_v6 = vmax.f32 %v11369_v2, 0.0  ;;  %v7532_v61 = vmax.f32 %v11401_v56, 0.0 }
 0x76a   :  { %v11372_v55 = vadd.f32 %v7175_v31, %v14858_v43  ;;  %v11404_v10 = vadd.f32 %v7401_v19, %v14862_v15  ;;  %v7531_v50 = vmax.f32 %v11370_v5, 0.0  ;;  %v7533_v16 = vmax.f32 %v11402_v60, 0.0 }
 0x76b   :  { %v7546_v39 = vmax.f32 %v11371_v52, 0.0  ;;  %v7548_v34 = vmax.f32 %v11403_v9, 0.0  ;;  %9330 = vmatmul.mubr.bf16.gmra.mrb[244].mxu0 %v15485_v49  ;;  %9427 = vmatmul.mubr.bf16.gmra.mrb[244].mxu1 %v15486_v4 }
 0x76c   :  { %v7547_v62 = vmax.f32 %v11372_v55, 0.0  ;;  %v7549_v24 = vmax.f32 %v11404_v10, 0.0  ;;  %9337 = vmatprep.mubr.bf16.mxu0 %v14792_v27  ;;  %9434 = vmatprep.mubr.bf16.mxu1 %v14794_v51 }
 0x76d   :  { %v14916_v63 = vpack.c.bf16 %v7546_v39, %v7530_v6  ;;  %v14918_v8 = vpack.c.bf16 %v7548_v34, %v7532_v61 }
 0x76e   :  { %v14920_v57 = vpack.c.bf16 %v7547_v62, %v7531_v50  ;;  %v14922_v21 = vpack.c.bf16 %v7549_v24, %v7533_v16  ;;  %v7179_v28 = vpop.f32.mrb[140].mxu0  ;;  %v7405_v54 = vpop.f32.mrb[140].mxu1 }
 0x76f   :  { %v11373_v37 = vadd.f32 %v7179_v28, %v14848_v58  ;;  %v11405_v25 = vadd.f32 %v7405_v54, %v14852_v29  ;;  %v7181_v33 = vpop.f32.mrb[141].mxu0  ;;  %v7407_v3 = vpop.f32.mrb[141].mxu1 }
 0x770   :  { %v11374_v27 = vadd.f32 %v7181_v33, %v14858_v43  ;;  %v11406_v51 = vadd.f32 %v7407_v3, %v14862_v15  ;;  %v7183_v42 = vpop.f32.mrb[142].mxu0  ;;  %v7409_v32 = vpop.f32.mrb[142].mxu1 }
 0x771   :  { %v11375_v59 = vadd.f32 %v7183_v42, %v14848_v58  ;;  %v11407_v41 = vadd.f32 %v7409_v32, %v14852_v29  ;;  %v7185_v20 = vpop.f32.mrb[143].mxu0  ;;  %v7411_v48 = vpop.f32.mrb[143].mxu1  ;;  %v7562_v7 = vmax.f32 %v11373_v37, 0.0  ;;  %v7564_v22 = vmax.f32 %v11405_v25, 0.0 }
 0x772   :  { %v11376_v0 = vadd.f32 %v7185_v20, %v14858_v43  ;;  %v11408_v17 = vadd.f32 %v7411_v48, %v14862_v15  ;;  %v7563_v14 = vmax.f32 %v11374_v27, 0.0  ;;  %v7565_v53 = vmax.f32 %v11406_v51, 0.0 }
 0x773   :  { %v7578_v2 = vmax.f32 %v11375_v59, 0.0  ;;  %v7580_v56 = vmax.f32 %v11407_v41, 0.0  ;;  %9338 = vmatmul.mubr.bf16.gmra.mrb[248].mxu0 %v14788_v44  ;;  %9435 = vmatmul.mubr.bf16.gmra.mrb[248].mxu1 %v14790_v45 }
 0x774   :  { %v7579_v5 = vmax.f32 %v11376_v0, 0.0  ;;  %v7581_v60 = vmax.f32 %v11408_v17, 0.0  ;;  %9345 = vmatprep.mubr.bf16.mxu0 %v14812_v1  ;;  %9442 = vmatprep.mubr.bf16.mxu1 %v14814_v38 }
 0x775   :  { %v14936_v11 = vpack.c.bf16 %v7578_v2, %v7562_v7  ;;  %v14938_v13 = vpack.c.bf16 %v7580_v56, %v7564_v22 }
 0x776   :  { %v14940_v52 = vpack.c.bf16 %v7579_v5, %v7563_v14  ;;  %v14942_v9 = vpack.c.bf16 %v7581_v60, %v7565_v53  ;;  %v7189_v31 = vpop.f32.mrb[144].mxu0  ;;  %v7415_v44 = vpop.f32.mrb[144].mxu1 }
 0x777   :  { %v11377_v45 = vadd.f32 %v7189_v31, %v14848_v58  ;;  %v11409_v19 = vadd.f32 %v7415_v44, %v14852_v29  ;;  %v7191_v55 = vpop.f32.mrb[145].mxu0  ;;  %v7417_v10 = vpop.f32.mrb[145].mxu1 }
 0x778   :  { %v11378_v1 = vadd.f32 %v7191_v55, %v14858_v43  ;;  %v11410_v38 = vadd.f32 %v7417_v10, %v14862_v15  ;;  %v7193_v6 = vpop.f32.mrb[146].mxu0  ;;  %v7419_v61 = vpop.f32.mrb[146].mxu1 }
 0x779   :  { %v11379_v39 = vadd.f32 %v7193_v6, %v14848_v58  ;;  %v11411_v34 = vadd.f32 %v7419_v61, %v14852_v29  ;;  %v7195_v49 = vpop.f32.mrb[147].mxu0  ;;  %v7421_v4 = vpop.f32.mrb[147].mxu1  ;;  %v7594_v62 = vmax.f32 %v11377_v45, 0.0  ;;  %v7596_v24 = vmax.f32 %v11409_v19, 0.0 }
 0x77a   :  { %v11380_v50 = vadd.f32 %v7195_v49, %v14858_v43  ;;  %v11412_v16 = vadd.f32 %v7421_v4, %v14862_v15  ;;  %v7595_v37 = vmax.f32 %v11378_v1, 0.0  ;;  %v7597_v25 = vmax.f32 %v11410_v38, 0.0 }
 0x77b   :  { %v7610_v28 = vmax.f32 %v11379_v39, 0.0  ;;  %v7612_v54 = vmax.f32 %v11411_v34, 0.0  ;;  %9346 = vmatmul.mubr.bf16.gmra.mrb[252].mxu0 %v14808_v12  ;;  %9443 = vmatmul.mubr.bf16.gmra.mrb[252].mxu1 %v14810_v36 }
 0x77c   :  { %v7611_v33 = vmax.f32 %v11380_v50, 0.0  ;;  %v7613_v3 = vmax.f32 %v11412_v16, 0.0  ;;  %9483 = vmatprep.mubr.bf16.mxu0 %v14880_v47  ;;  %9580 = vmatprep.mubr.bf16.mxu1 %v14882_v46 }
 0x77d   :  { %v14956_v27 = vpack.c.bf16 %v7610_v28, %v7594_v62  ;;  %v14958_v51 = vpack.c.bf16 %v7612_v54, %v7596_v24 }
 0x77e   :  { %v14960_v42 = vpack.c.bf16 %v7611_v33, %v7595_v37  ;;  %v14962_v32 = vpack.c.bf16 %v7613_v3, %v7597_v25  ;;  %v7199_v59 = vpop.f32.mrb[148].mxu0  ;;  %v7425_v12 = vpop.f32.mrb[148].mxu1 }
 0x77f   :  { %v11381_v36 = vadd.f32 %v7199_v59, %v14848_v58  ;;  %v11413_v41 = vadd.f32 %v7425_v12, %v14852_v29  ;;  %v7201_v20 = vpop.f32.mrb[149].mxu0  ;;  %v7427_v48 = vpop.f32.mrb[149].mxu1 }
 0x780   :  { %v11382_v47 = vadd.f32 %v7201_v20, %v14858_v43  ;;  %v11414_v46 = vadd.f32 %v7427_v48, %v14862_v15  ;;  %v7203_v0 = vpop.f32.mrb[150].mxu0  ;;  %v7429_v17 = vpop.f32.mrb[150].mxu1 }
 0x781   :  { %v11383_v7 = vadd.f32 %v7203_v0, %v14848_v58  ;;  %v11415_v22 = vadd.f32 %v7429_v17, %v14852_v29  ;;  %v7205_v2 = vpop.f32.mrb[151].mxu0  ;;  %v7431_v56 = vpop.f32.mrb[151].mxu1  ;;  %v7626_v5 = vmax.f32 %v11381_v36, 0.0  ;;  %v7628_v60 = vmax.f32 %v11413_v41, 0.0 }
 0x782   :  { %v11384_v14 = vadd.f32 %v7205_v2, %v14858_v43  ;;  %v11416_v53 = vadd.f32 %v7431_v56, %v14862_v15  ;;  %v7627_v45 = vmax.f32 %v11382_v47, 0.0  ;;  %v7629_v19 = vmax.f32 %v11414_v46, 0.0 }
 0x783   :  { %v7642_v31 = vmax.f32 %v11383_v7, 0.0  ;;  %v7644_v44 = vmax.f32 %v11415_v22, 0.0  ;;  %9484 = vmatmul.mubr.bf16.vlgmr.msra.gmra.mrb[0].mxu0 %v14876_v18  ;;  %9581 = vmatmul.mubr.bf16.vlgmr.msra.gmra.mrb[0].mxu1 %v14878_v30 }
 0x784   :  { %v7643_v55 = vmax.f32 %v11384_v14, 0.0  ;;  %v7645_v10 = vmax.f32 %v11416_v53, 0.0  ;;  %9491 = vmatprep.mubr.bf16.mxu0 %v14900_v26  ;;  %9588 = vmatprep.mubr.bf16.mxu1 %v14902_v35 }
 0x785   :  { %v14976_v1 = vpack.c.bf16 %v7642_v31, %v7626_v5  ;;  %v14978_v38 = vpack.c.bf16 %v7644_v44, %v7628_v60 }
 0x786   :  { %v14980_v6 = vpack.c.bf16 %v7643_v55, %v7627_v45  ;;  %v14982_v61 = vpack.c.bf16 %v7645_v10, %v7629_v19  ;;  %v7209_v39 = vpop.f32.mrb[152].mxu0  ;;  %v7435_v18 = vpop.f32.mrb[152].mxu1 }
 0x787   :  { %v11385_v30 = vadd.f32 %v7209_v39, %v14848_v58  ;;  %v11417_v34 = vadd.f32 %v7435_v18, %v14852_v29  ;;  %v7211_v49 = vpop.f32.mrb[153].mxu0  ;;  %v7437_v4 = vpop.f32.mrb[153].mxu1 }
 0x788   :  { %v11386_v26 = vadd.f32 %v7211_v49, %v14858_v43  ;;  %v11418_v35 = vadd.f32 %v7437_v4, %v14862_v15  ;;  %v7213_v50 = vpop.f32.mrb[154].mxu0  ;;  %v7439_v16 = vpop.f32.mrb[154].mxu1 }
 0x789   :  { %v11387_v62 = vadd.f32 %v7213_v50, %v14848_v58  ;;  %v11419_v24 = vadd.f32 %v7439_v16, %v14852_v29  ;;  %v7215_v28 = vpop.f32.mrb[155].mxu0  ;;  %v7441_v54 = vpop.f32.mrb[155].mxu1  ;;  %v7658_v33 = vmax.f32 %v11385_v30, 0.0  ;;  %v7660_v3 = vmax.f32 %v11417_v34, 0.0 }
 0x78a   :  { %v11388_v37 = vadd.f32 %v7215_v28, %v14858_v43  ;;  %v11420_v25 = vadd.f32 %v7441_v54, %v14862_v15  ;;  %v7659_v36 = vmax.f32 %v11386_v26, 0.0  ;;  %v7661_v41 = vmax.f32 %v11418_v35, 0.0  ;;  %v15024_v35 = vld [vmem:[#allocation18] ss:$0 sm:$0xff] }
 0x78b   :  { %v7674_v59 = vmax.f32 %v11387_v62, 0.0  ;;  %v7676_v12 = vmax.f32 %v11419_v24, 0.0  ;;  %9492 = vmatmul.mubr.bf16.gmra.mrb[4].mxu0 %v14896_v23  ;;  %9589 = vmatmul.mubr.bf16.gmra.mrb[4].mxu1 %v14898_v40 }
 0x78c   :  { %v7675_v20 = vmax.f32 %v11388_v37, 0.0  ;;  %v7677_v48 = vmax.f32 %v11420_v25, 0.0  ;;  %9499 = vmatprep.mubr.bf16.mxu0 %v14920_v57  ;;  %9596 = vmatprep.mubr.bf16.mxu1 %v14922_v21 }
 0x78d   :  { %v14996_v47 = vpack.c.bf16 %v7674_v59, %v7658_v33  ;;  %v14998_v46 = vpack.c.bf16 %v7676_v12, %v7660_v3 }
 0x78e   :  { %v15000_v0 = vpack.c.bf16 %v7675_v20, %v7659_v36  ;;  %v15002_v17 = vpack.c.bf16 %v7677_v48, %v7661_v41  ;;  %v7219_v7 = vpop.f32.mrb[156].mxu0  ;;  %v7445_v23 = vpop.f32.mrb[156].mxu1 }
 0x78f   :  { %v11389_v40 = vadd.f32 %v7219_v7, %v14848_v58  ;;  %v11421_v22 = vadd.f32 %v7445_v23, %v14852_v29  ;;  %v7221_v2 = vpop.f32.mrb[157].mxu0  ;;  %v7447_v56 = vpop.f32.mrb[157].mxu1 }
 0x790   :  { %v11390_v57 = vadd.f32 %v7221_v2, %v14858_v43  ;;  %v11422_v21 = vadd.f32 %v7447_v56, %v14862_v15  ;;  %v7223_v14 = vpop.f32.mrb[158].mxu0  ;;  %v7449_v53 = vpop.f32.mrb[158].mxu1 }
 0x791   :  { %v11391_v5 = vadd.f32 %v7223_v14, %v14848_v58  ;;  %v11423_v60 = vadd.f32 %v7449_v53, %v14852_v29  ;;  %v7225_v31 = vpop.f32.mrb[159].mxu0  ;;  %v7451_v44 = vpop.f32.mrb[159].mxu1  ;;  %v7690_v55 = vmax.f32 %v11389_v40, 0.0  ;;  %v7692_v10 = vmax.f32 %v11421_v22, 0.0 }
 0x792   :  { %v11392_v45 = vadd.f32 %v7225_v31, %v14858_v43  ;;  %v11424_v19 = vadd.f32 %v7451_v44, %v14862_v15  ;;  %v7691_v30 = vmax.f32 %v11390_v57, 0.0  ;;  %v7693_v34 = vmax.f32 %v11422_v21, 0.0 }
 0x793   :  { %v7706_v39 = vmax.f32 %v11391_v5, 0.0  ;;  %v7708_v18 = vmax.f32 %v11423_v60, 0.0  ;;  %9500 = vmatmul.mubr.bf16.gmra.mrb[8].mxu0 %v14916_v63  ;;  %9597 = vmatmul.mubr.bf16.gmra.mrb[8].mxu1 %v14918_v8 }
 0x794   :  { %v7707_v49 = vmax.f32 %v11392_v45, 0.0  ;;  %v7709_v58 = vmax.f32 %v11424_v19, 0.0  ;;  %9507 = vmatprep.mubr.bf16.mxu0 %v14940_v52  ;;  %9604 = vmatprep.mubr.bf16.mxu1 %v14942_v9 }
 0x795   :  { %v15016_v29 = vpack.c.bf16 %v7706_v39, %v7690_v55  ;;  %v15018_v43 = vpack.c.bf16 %v7708_v18, %v7692_v10 }
 0x796   :  { %v15020_v15 = vpack.c.bf16 %v7707_v49, %v7691_v30  ;;  %v15022_v4 = vpack.c.bf16 %v7709_v58, %v7693_v34  ;;  %v10673_v26 = vpop.f32.mrb[160].mxu0  ;;  %v10737_v63 = vpop.f32.mrb[160].mxu1 }
 0x797   :  { %v10674_v8 = vpop.f32.mrb[161].mxu0  ;;  %v10738_v50 = vpop.f32.mrb[161].mxu1 }
 0x798   :  { %v10675_v16 = vadd.f32 %v10674_v8, %v10673_v26  ;;  %v10739_v62 = vadd.f32 %v10738_v50, %v10737_v63  ;;  %v10676_v24 = vpop.f32.mrb[162].mxu0  ;;  %v10740_v52 = vpop.f32.mrb[162].mxu1 }
 0x799   :  { %v10677_v28 = vpop.f32.mrb[163].mxu0  ;;  %v10741_v9 = vpop.f32.mrb[163].mxu1 }
 0x79a   :  { %v8904_v54 = vadd.f32 %v10675_v16, %v15024_v35  ;;  %v10678_v37 = vadd.f32 %v10677_v28, %v10676_v24  ;;  %v10742_v25 = vadd.f32 %v10741_v9, %v10740_v52 }
 0x79b   :  { %9508 = vmatmul.mubr.bf16.gmra.mrb[12].mxu0 %v14936_v11  ;;  %9605 = vmatmul.mubr.bf16.gmra.mrb[12].mxu1 %v14938_v13 }
 0x79c   :  { %v15029_v33 = vadd.f32 %v10739_v62, %v8904_v54  ;;  %v8907_v3 = vadd.f32 %v10678_v37, %v15024_v35  ;;  %9515 = vmatprep.mubr.bf16.mxu0 %v14960_v42  ;;  %9612 = vmatprep.mubr.bf16.mxu1 %v14962_v32 }
 0x79e   :  { %v15034_v59 = vadd.f32 %v10742_v25, %v8907_v3  ;;  %v10679_v12 = vpop.f32.mrb[164].mxu0  ;;  %v10743_v36 = vpop.f32.mrb[164].mxu1 }
 0x79f   :  { %v10680_v41 = vpop.f32.mrb[165].mxu0  ;;  %v10744_v20 = vpop.f32.mrb[165].mxu1 }
 0x7a0   :  { %v10681_v48 = vadd.f32 %v10680_v41, %v10679_v12  ;;  %v10745_v7 = vadd.f32 %v10744_v20, %v10743_v36  ;;  %v10682_v23 = vpop.f32.mrb[166].mxu0  ;;  %v10746_v11 = vpop.f32.mrb[166].mxu1 }
 0x7a1   :  { %v10683_v40 = vpop.f32.mrb[167].mxu0  ;;  %v10747_v13 = vpop.f32.mrb[167].mxu1 }
 0x7a2   :  { %v8912_v22 = vadd.f32 %v10681_v48, %v15024_v35  ;;  %v10684_v2 = vadd.f32 %v10683_v40, %v10682_v23  ;;  %v10748_v56 = vadd.f32 %v10747_v13, %v10746_v11 }
 0x7a3   :  { %9516 = vmatmul.mubr.bf16.gmra.mrb[16].mxu0 %v14956_v27  ;;  %9613 = vmatmul.mubr.bf16.gmra.mrb[16].mxu1 %v14958_v51 }
 0x7a4   :  { %v15039_v42 = vadd.f32 %v10745_v7, %v8912_v22  ;;  %v8915_v32 = vadd.f32 %v10684_v2, %v15024_v35  ;;  %9523 = vmatprep.mubr.bf16.mxu0 %v14980_v6  ;;  %9620 = vmatprep.mubr.bf16.mxu1 %v14982_v61 }
 0x7a6   :  { %v15044_v57 = vadd.f32 %v10748_v56, %v8915_v32  ;;  %v10685_v21 = vpop.f32.mrb[168].mxu0  ;;  %v10749_v14 = vpop.f32.mrb[168].mxu1 }
 0x7a7   :  { %v10686_v53 = vpop.f32.mrb[169].mxu0  ;;  %v10750_v5 = vpop.f32.mrb[169].mxu1 }
 0x7a8   :  { %v10687_v60 = vadd.f32 %v10686_v53, %v10685_v21  ;;  %v10751_v31 = vadd.f32 %v10750_v5, %v10749_v14  ;;  %v10688_v44 = vpop.f32.mrb[170].mxu0  ;;  %v10752_v27 = vpop.f32.mrb[170].mxu1 }
 0x7a9   :  { %v10689_v45 = vpop.f32.mrb[171].mxu0  ;;  %v10753_v51 = vpop.f32.mrb[171].mxu1 }
 0x7aa   :  { %v8920_v19 = vadd.f32 %v10687_v60, %v15024_v35  ;;  %v10690_v55 = vadd.f32 %v10689_v45, %v10688_v44  ;;  %v10754_v10 = vadd.f32 %v10753_v51, %v10752_v27 }
 0x7ab   :  { %9524 = vmatmul.mubr.bf16.gmra.mrb[20].mxu0 %v14976_v1  ;;  %9621 = vmatmul.mubr.bf16.gmra.mrb[20].mxu1 %v14978_v38 }
 0x7ac   :  { %v15049_v6 = vadd.f32 %v10751_v31, %v8920_v19  ;;  %v8923_v61 = vadd.f32 %v10690_v55, %v15024_v35  ;;  %9531 = vmatprep.mubr.bf16.mxu0 %v15000_v0  ;;  %9628 = vmatprep.mubr.bf16.mxu1 %v15002_v17 }
 0x7ae   :  { %v15054_v39 = vadd.f32 %v10754_v10, %v8923_v61  ;;  %v10691_v18 = vpop.f32.mrb[172].mxu0  ;;  %v10755_v30 = vpop.f32.mrb[172].mxu1 }
 0x7af   :  { %v10692_v34 = vpop.f32.mrb[173].mxu0  ;;  %v10756_v49 = vpop.f32.mrb[173].mxu1 }
 0x7b0   :  { %v10693_v58 = vadd.f32 %v10692_v34, %v10691_v18  ;;  %v10757_v26 = vadd.f32 %v10756_v49, %v10755_v30  ;;  %v10694_v63 = vpop.f32.mrb[174].mxu0  ;;  %v10758_v1 = vpop.f32.mrb[174].mxu1 }
 0x7b1   :  { %v10695_v8 = vpop.f32.mrb[175].mxu0  ;;  %v10759_v38 = vpop.f32.mrb[175].mxu1 }
 0x7b2   :  { %v8928_v50 = vadd.f32 %v10693_v58, %v15024_v35  ;;  %v10696_v16 = vadd.f32 %v10695_v8, %v10694_v63  ;;  %v10760_v62 = vadd.f32 %v10759_v38, %v10758_v1 }
 0x7b3   :  { %9532 = vmatmul.mubr.bf16.gmra.mrb[24].mxu0 %v14996_v47  ;;  %9629 = vmatmul.mubr.bf16.gmra.mrb[24].mxu1 %v14998_v46 }
 0x7b4   :  { %v15059_v0 = vadd.f32 %v10757_v26, %v8928_v50  ;;  %v8931_v17 = vadd.f32 %v10696_v16, %v15024_v35  ;;  %9539 = vmatprep.mubr.bf16.mxu0 %v15020_v15  ;;  %9636 = vmatprep.mubr.bf16.mxu1 %v15022_v4 }
 0x7b6   :  { %v15064_v24 = vadd.f32 %v10760_v62, %v8931_v17  ;;  %v10697_v52 = vpop.f32.mrb[176].mxu0  ;;  %v10761_v28 = vpop.f32.mrb[176].mxu1 }
 0x7b7   :  { %v10698_v9 = vpop.f32.mrb[177].mxu0  ;;  %v10762_v54 = vpop.f32.mrb[177].mxu1 }
 0x7b8   :  { %v10699_v37 = vadd.f32 %v10698_v9, %v10697_v52  ;;  %v10763_v25 = vadd.f32 %v10762_v54, %v10761_v28  ;;  %v10700_v3 = vpop.f32.mrb[178].mxu0  ;;  %v10764_v47 = vpop.f32.mrb[178].mxu1 }
 0x7b9   :  { %v10701_v12 = vpop.f32.mrb[179].mxu0  ;;  %v10765_v46 = vpop.f32.mrb[179].mxu1 }
 0x7ba   :  { %v8936_v36 = vadd.f32 %v10699_v37, %v15024_v35  ;;  %v10702_v41 = vadd.f32 %v10701_v12, %v10700_v3  ;;  %v10766_v20 = vadd.f32 %v10765_v46, %v10764_v47 }
 0x7bb   :  { %9540 = vmatmul.mubr.bf16.gmra.mrb[28].mxu0 %v15016_v29  ;;  %9637 = vmatmul.mubr.bf16.gmra.mrb[28].mxu1 %v15018_v43 }
 0x7bc   :  { %v15069_v15 = vadd.f32 %v10763_v25, %v8936_v36  ;;  %v8939_v4 = vadd.f32 %v10702_v41, %v15024_v35 }
 0x7be   :  { %v15072_v48 = vadd.f32 %v10766_v20, %v8939_v4  ;;  %v10703_v7 = vpop.f32.mrb[180].mxu0  ;;  %v10767_v23 = vpop.f32.mrb[180].mxu1 }
 0x7bf   :  { %v10704_v11 = vpop.f32.mrb[181].mxu0  ;;  %v10768_v40 = vpop.f32.mrb[181].mxu1 }
 0x7c0   :  { %v10705_v13 = vadd.f32 %v10704_v11, %v10703_v7  ;;  %v10769_v22 = vadd.f32 %v10768_v40, %v10767_v23  ;;  %v10706_v2 = vpop.f32.mrb[182].mxu0  ;;  %v10770_v56 = vpop.f32.mrb[182].mxu1 }
 0x7c1   :  { %v10707_v32 = vpop.f32.mrb[183].mxu0  ;;  %v10771_v21 = vpop.f32.mrb[183].mxu1 }
 0x7c2   :  { %v8944_v29 = vadd.f32 %v10705_v13, %v15024_v35  ;;  %v10708_v14 = vadd.f32 %v10707_v32, %v10706_v2  ;;  %v10772_v43 = vadd.f32 %v10771_v21, %v10770_v56 }
 0x7c4   :  { %v15075_v53 = vadd.f32 %v10769_v22, %v8944_v29  ;;  %v8947_v5 = vadd.f32 %v10708_v14, %v15024_v35 }
 0x7c6   :  { %v15078_v60 = vadd.f32 %v10772_v43, %v8947_v5  ;;  %v10709_v31 = vpop.f32.mrb[184].mxu0  ;;  %v10773_v44 = vpop.f32.mrb[184].mxu1 }
 0x7c7   :  { %v10710_v27 = vpop.f32.mrb[185].mxu0  ;;  %v10774_v45 = vpop.f32.mrb[185].mxu1 }
 0x7c8   :  { %v10711_v51 = vadd.f32 %v10710_v27, %v10709_v31  ;;  %v10775_v19 = vadd.f32 %v10774_v45, %v10773_v44  ;;  %v10712_v55 = vpop.f32.mrb[186].mxu0  ;;  %v10776_v10 = vpop.f32.mrb[186].mxu1 }
 0x7c9   :  { %v10713_v61 = vpop.f32.mrb[187].mxu0  ;;  %v10777_v18 = vpop.f32.mrb[187].mxu1 }
 0x7ca   :  { %v8952_v30 = vadd.f32 %v10711_v51, %v15024_v35  ;;  %v10714_v34 = vadd.f32 %v10713_v61, %v10712_v55  ;;  %v10778_v49 = vadd.f32 %v10777_v18, %v10776_v10 }
 0x7cc   :  { %v15081_v58 = vadd.f32 %v10775_v19, %v8952_v30  ;;  %v8955_v26 = vadd.f32 %v10714_v34, %v15024_v35 }
 0x7ce   :  { %v15084_v63 = vadd.f32 %v10778_v49, %v8955_v26  ;;  %v10715_v1 = vpop.f32.mrb[188].mxu0  ;;  %v10779_v8 = vpop.f32.mrb[188].mxu1 }
 0x7cf   :  { %v10716_v38 = vpop.f32.mrb[189].mxu0  ;;  %v10780_v50 = vpop.f32.mrb[189].mxu1 }
 0x7d0   :  { %v10717_v16 = vadd.f32 %v10716_v38, %v10715_v1  ;;  %v10781_v62 = vadd.f32 %v10780_v50, %v10779_v8  ;;  %v10718_v17 = vpop.f32.mrb[190].mxu0  ;;  %v10782_v52 = vpop.f32.mrb[190].mxu1 }
 0x7d1   :  { %v10719_v28 = vpop.f32.mrb[191].mxu0  ;;  %v10783_v9 = vpop.f32.mrb[191].mxu1 }
 0x7d2   :  { %v8960_v54 = vadd.f32 %v10717_v16, %v15024_v35  ;;  %v10720_v37 = vadd.f32 %v10719_v28, %v10718_v17  ;;  %v10784_v25 = vadd.f32 %v10783_v9, %v10782_v52 }
 0x7d4   :  { %v15087_v3 = vadd.f32 %v10781_v62, %v8960_v54  ;;  %v8963_v47 = vadd.f32 %v10720_v37, %v15024_v35 }
 0x7d6   :  { %v15090_v12 = vadd.f32 %v10784_v25, %v8963_v47  ;;  %v10801_v46 = vpop.f32.mrb[192].mxu0  ;;  %v10865_v36 = vpop.f32.mrb[192].mxu1 }
 0x7d7   :  { %v10802_v41 = vpop.f32.mrb[193].mxu0  ;;  %v10866_v20 = vpop.f32.mrb[193].mxu1 }
 0x7d8   :  { %v10803_v4 = vadd.f32 %v10802_v41, %v10801_v46  ;;  %v10867_v7 = vadd.f32 %v10866_v20, %v10865_v36  ;;  %v10804_v23 = vpop.f32.mrb[194].mxu0  ;;  %v10868_v11 = vpop.f32.mrb[194].mxu1 }
 0x7d9   :  { %v10805_v40 = vpop.f32.mrb[195].mxu0  ;;  %v10869_v13 = vpop.f32.mrb[195].mxu1 }
 0x7da   :  { %v9098_v22 = vadd.f32 %v10803_v4, %v15029_v33  ;;  %v10806_v2 = vadd.f32 %v10805_v40, %v10804_v23  ;;  %v10870_v56 = vadd.f32 %v10869_v13, %v10868_v11 }
 0x7dc   :  { %v15093_v32 = vadd.f32 %v10867_v7, %v9098_v22  ;;  %v9101_v35 = vadd.f32 %v10806_v2, %v15034_v59 }
 0x7de   :  { %v15096_v21 = vadd.f32 %v10870_v56, %v9101_v35  ;;  %v10807_v29 = vpop.f32.mrb[196].mxu0  ;;  %v10871_v14 = vpop.f32.mrb[196].mxu1 }
 0x7df   :  { %v10808_v43 = vpop.f32.mrb[197].mxu0  ;;  %v10872_v5 = vpop.f32.mrb[197].mxu1 }
 0x7e0   :  { %v10809_v31 = vadd.f32 %v10808_v43, %v10807_v29  ;;  %v10873_v44 = vadd.f32 %v10872_v5, %v10871_v14  ;;  %v10810_v27 = vpop.f32.mrb[198].mxu0  ;;  %v10874_v45 = vpop.f32.mrb[198].mxu1 }
 0x7e1   :  { %v10811_v51 = vpop.f32.mrb[199].mxu0  ;;  %v10875_v19 = vpop.f32.mrb[199].mxu1 }
 0x7e2   :  { %v9106_v33 = vadd.f32 %v10809_v31, %v15039_v42  ;;  %v10812_v55 = vadd.f32 %v10811_v51, %v10810_v27  ;;  %v10876_v10 = vadd.f32 %v10875_v19, %v10874_v45 }
 0x7e4   :  { %v15099_v61 = vadd.f32 %v10873_v44, %v9106_v33  ;;  %v9109_v59 = vadd.f32 %v10812_v55, %v15044_v57 }
 0x7e6   :  { %v15102_v18 = vadd.f32 %v10876_v10, %v9109_v59  ;;  %v10813_v30 = vpop.f32.mrb[200].mxu0  ;;  %v10877_v34 = vpop.f32.mrb[200].mxu1 }
 0x7e7   :  { %v10814_v49 = vpop.f32.mrb[201].mxu0  ;;  %v10878_v26 = vpop.f32.mrb[201].mxu1 }
 0x7e8   :  { %v10815_v1 = vadd.f32 %v10814_v49, %v10813_v30  ;;  %v10879_v8 = vadd.f32 %v10878_v26, %v10877_v34  ;;  %v10816_v38 = vpop.f32.mrb[202].mxu0  ;;  %v10880_v50 = vpop.f32.mrb[202].mxu1 }
 0x7e9   :  { %v10817_v16 = vpop.f32.mrb[203].mxu0  ;;  %v10881_v62 = vpop.f32.mrb[203].mxu1 }
 0x7ea   :  { %v9114_v42 = vadd.f32 %v10815_v1, %v15049_v6  ;;  %v10818_v17 = vadd.f32 %v10817_v16, %v10816_v38  ;;  %v10882_v52 = vadd.f32 %v10881_v62, %v10880_v50 }
 0x7ec   :  { %v15105_v28 = vadd.f32 %v10879_v8, %v9114_v42  ;;  %v9117_v57 = vadd.f32 %v10818_v17, %v15054_v39 }
 0x7ee   :  { %v15108_v9 = vadd.f32 %v10882_v52, %v9117_v57  ;;  %v10819_v54 = vpop.f32.mrb[204].mxu0  ;;  %v10883_v37 = vpop.f32.mrb[204].mxu1 }
 0x7ef   :  { %v10820_v25 = vpop.f32.mrb[205].mxu0  ;;  %v10884_v47 = vpop.f32.mrb[205].mxu1 }
 0x7f0   :  { %v10821_v46 = vadd.f32 %v10820_v25, %v10819_v54  ;;  %v10885_v36 = vadd.f32 %v10884_v47, %v10883_v37  ;;  %v10822_v41 = vpop.f32.mrb[206].mxu0  ;;  %v10886_v20 = vpop.f32.mrb[206].mxu1 }
 0x7f1   :  { %v10823_v4 = vpop.f32.mrb[207].mxu0  ;;  %v10887_v7 = vpop.f32.mrb[207].mxu1 }
 0x7f2   :  { %v9122_v6 = vadd.f32 %v10821_v46, %v15059_v0  ;;  %v10824_v23 = vadd.f32 %v10823_v4, %v10822_v41  ;;  %v10888_v11 = vadd.f32 %v10887_v7, %v10886_v20 }
 0x7f4   :  { %v15111_v40 = vadd.f32 %v10885_v36, %v9122_v6  ;;  %v9125_v39 = vadd.f32 %v10824_v23, %v15064_v24 }
 0x7f6   :  { %v15114_v13 = vadd.f32 %v10888_v11, %v9125_v39  ;;  %v10825_v22 = vpop.f32.mrb[208].mxu0  ;;  %v10889_v2 = vpop.f32.mrb[208].mxu1 }
 0x7f7   :  { %v10826_v56 = vpop.f32.mrb[209].mxu0  ;;  %v10890_v35 = vpop.f32.mrb[209].mxu1 }
 0x7f8   :  { %v10827_v29 = vadd.f32 %v10826_v56, %v10825_v22  ;;  %v10891_v14 = vadd.f32 %v10890_v35, %v10889_v2  ;;  %v10828_v43 = vpop.f32.mrb[210].mxu0  ;;  %v10892_v5 = vpop.f32.mrb[210].mxu1 }
 0x7f9   :  { %v10829_v31 = vpop.f32.mrb[211].mxu0  ;;  %v10893_v44 = vpop.f32.mrb[211].mxu1 }
 0x7fa   :  { %v9130_v0 = vadd.f32 %v10827_v29, %v15069_v15  ;;  %v10830_v27 = vadd.f32 %v10829_v31, %v10828_v43  ;;  %v10894_v45 = vadd.f32 %v10893_v44, %v10892_v5 }
 0x7fc   :  { %v15117_v51 = vadd.f32 %v10891_v14, %v9130_v0  ;;  %v9133_v24 = vadd.f32 %v10830_v27, %v15072_v48 }
 0x7fe   :  { %v15120_v19 = vadd.f32 %v10894_v45, %v9133_v24  ;;  %v10831_v33 = vpop.f32.mrb[212].mxu0  ;;  %v10895_v55 = vpop.f32.mrb[212].mxu1 }
 0x7ff   :  { %v10832_v10 = vpop.f32.mrb[213].mxu0  ;;  %v10896_v59 = vpop.f32.mrb[213].mxu1 }
 0x800   :  { %v10833_v30 = vadd.f32 %v10832_v10, %v10831_v33  ;;  %v10897_v34 = vadd.f32 %v10896_v59, %v10895_v55  ;;  %v10834_v49 = vpop.f32.mrb[214].mxu0  ;;  %v10898_v26 = vpop.f32.mrb[214].mxu1 }
 0x801   :  { %v10835_v1 = vpop.f32.mrb[215].mxu0  ;;  %v10899_v8 = vpop.f32.mrb[215].mxu1 }
 0x802   :  { %v9138_v15 = vadd.f32 %v10833_v30, %v15075_v53  ;;  %v10836_v38 = vadd.f32 %v10835_v1, %v10834_v49  ;;  %v10900_v50 = vadd.f32 %v10899_v8, %v10898_v26 }
 0x804   :  { %v15123_v16 = vadd.f32 %v10897_v34, %v9138_v15  ;;  %v9141_v48 = vadd.f32 %v10836_v38, %v15078_v60 }
 0x806   :  { %v15126_v62 = vadd.f32 %v10900_v50, %v9141_v48  ;;  %v10837_v42 = vpop.f32.mrb[216].mxu0  ;;  %v10901_v17 = vpop.f32.mrb[216].mxu1 }
 0x807   :  { %v10838_v52 = vpop.f32.mrb[217].mxu0  ;;  %v10902_v57 = vpop.f32.mrb[217].mxu1 }
 0x808   :  { %v10839_v54 = vadd.f32 %v10838_v52, %v10837_v42  ;;  %v10903_v37 = vadd.f32 %v10902_v57, %v10901_v17  ;;  %v10840_v25 = vpop.f32.mrb[218].mxu0  ;;  %v10904_v47 = vpop.f32.mrb[218].mxu1 }
 0x809   :  { %v10841_v46 = vpop.f32.mrb[219].mxu0  ;;  %v10905_v36 = vpop.f32.mrb[219].mxu1 }
 0x80a   :  { %v9146_v53 = vadd.f32 %v10839_v54, %v15081_v58  ;;  %v10842_v41 = vadd.f32 %v10841_v46, %v10840_v25  ;;  %v10906_v20 = vadd.f32 %v10905_v36, %v10904_v47 }
 0x80c   :  { %v15129_v4 = vadd.f32 %v10903_v37, %v9146_v53  ;;  %v9149_v60 = vadd.f32 %v10842_v41, %v15084_v63 }
 0x80e   :  { %v15132_v7 = vadd.f32 %v10906_v20, %v9149_v60  ;;  %v10843_v6 = vpop.f32.mrb[220].mxu0  ;;  %v10907_v23 = vpop.f32.mrb[220].mxu1 }
 0x80f   :  { %v10844_v11 = vpop.f32.mrb[221].mxu0  ;;  %v10908_v39 = vpop.f32.mrb[221].mxu1 }
 0x810   :  { %v10845_v22 = vadd.f32 %v10844_v11, %v10843_v6  ;;  %v10909_v2 = vadd.f32 %v10908_v39, %v10907_v23  ;;  %v10846_v56 = vpop.f32.mrb[222].mxu0  ;;  %v10910_v35 = vpop.f32.mrb[222].mxu1 }
 0x811   :  { %v10847_v29 = vpop.f32.mrb[223].mxu0  ;;  %v10911_v14 = vpop.f32.mrb[223].mxu1 }
 0x812   :  { %v9154_v58 = vadd.f32 %v10845_v22, %v15087_v3  ;;  %v10848_v43 = vadd.f32 %v10847_v29, %v10846_v56  ;;  %v10912_v5 = vadd.f32 %v10911_v14, %v10910_v35 }
 0x814   :  { %v15135_v31 = vadd.f32 %v10909_v2, %v9154_v58  ;;  %v9157_v63 = vadd.f32 %v10848_v43, %v15090_v12 }
 0x816   :  { %v15138_v44 = vadd.f32 %v10912_v5, %v9157_v63  ;;  %v10929_v0 = vpop.f32.mrb[224].mxu0  ;;  %v10993_v27 = vpop.f32.mrb[224].mxu1 }
 0x817   :  { %v10930_v45 = vpop.f32.mrb[225].mxu0  ;;  %v10994_v24 = vpop.f32.mrb[225].mxu1 }
 0x818   :  { %v10931_v33 = vadd.f32 %v10930_v45, %v10929_v0  ;;  %v10995_v55 = vadd.f32 %v10994_v24, %v10993_v27  ;;  %v10932_v10 = vpop.f32.mrb[226].mxu0  ;;  %v10996_v59 = vpop.f32.mrb[226].mxu1 }
 0x819   :  { %v10933_v30 = vpop.f32.mrb[227].mxu0  ;;  %v10997_v34 = vpop.f32.mrb[227].mxu1 }
 0x81a   :  { %v9292_v3 = vadd.f32 %v10931_v33, %v15093_v32  ;;  %v10934_v49 = vadd.f32 %v10933_v30, %v10932_v10  ;;  %v10998_v26 = vadd.f32 %v10997_v34, %v10996_v59 }
 0x81c   :  { %v15141_v1 = vadd.f32 %v10995_v55, %v9292_v3  ;;  %v9295_v12 = vadd.f32 %v10934_v49, %v15096_v21 }
 0x81e   :  { %v15144_v8 = vadd.f32 %v10998_v26, %v9295_v12  ;;  %v10935_v15 = vpop.f32.mrb[228].mxu0  ;;  %v10999_v38 = vpop.f32.mrb[228].mxu1 }
 0x81f   :  { %v10936_v50 = vpop.f32.mrb[229].mxu0  ;;  %v11000_v48 = vpop.f32.mrb[229].mxu1 }
 0x820   :  { %v10937_v42 = vadd.f32 %v10936_v50, %v10935_v15  ;;  %v11001_v17 = vadd.f32 %v11000_v48, %v10999_v38  ;;  %v10938_v52 = vpop.f32.mrb[230].mxu0  ;;  %v11002_v57 = vpop.f32.mrb[230].mxu1 }
 0x821   :  { %v10939_v54 = vpop.f32.mrb[231].mxu0  ;;  %v11003_v37 = vpop.f32.mrb[231].mxu1 }
 0x822   :  { %v9300_v32 = vadd.f32 %v10937_v42, %v15099_v61  ;;  %v10940_v25 = vadd.f32 %v10939_v54, %v10938_v52  ;;  %v11004_v47 = vadd.f32 %v11003_v37, %v11002_v57 }
 0x824   :  { %v15147_v46 = vadd.f32 %v11001_v17, %v9300_v32  ;;  %v9303_v21 = vadd.f32 %v10940_v25, %v15102_v18 }
 0x826   :  { %v15150_v36 = vadd.f32 %v11004_v47, %v9303_v21  ;;  %v10941_v53 = vpop.f32.mrb[232].mxu0  ;;  %v11005_v41 = vpop.f32.mrb[232].mxu1 }
 0x827   :  { %v10942_v20 = vpop.f32.mrb[233].mxu0  ;;  %v11006_v60 = vpop.f32.mrb[233].mxu1 }
 0x828   :  { %v10943_v6 = vadd.f32 %v10942_v20, %v10941_v53  ;;  %v11007_v23 = vadd.f32 %v11006_v60, %v11005_v41  ;;  %v10944_v11 = vpop.f32.mrb[234].mxu0  ;;  %v11008_v39 = vpop.f32.mrb[234].mxu1 }
 0x829   :  { %v10945_v22 = vpop.f32.mrb[235].mxu0  ;;  %v11009_v2 = vpop.f32.mrb[235].mxu1 }
 0x82a   :  { %v9308_v61 = vadd.f32 %v10943_v6, %v15105_v28  ;;  %v10946_v56 = vadd.f32 %v10945_v22, %v10944_v11  ;;  %v11010_v35 = vadd.f32 %v11009_v2, %v11008_v39 }
 0x82c   :  { %v15153_v29 = vadd.f32 %v11007_v23, %v9308_v61  ;;  %v9311_v18 = vadd.f32 %v10946_v56, %v15108_v9 }
 0x82e   :  { %v15156_v14 = vadd.f32 %v11010_v35, %v9311_v18  ;;  %v10947_v58 = vpop.f32.mrb[236].mxu0  ;;  %v11011_v43 = vpop.f32.mrb[236].mxu1 }
 0x82f   :  { %v10948_v5 = vpop.f32.mrb[237].mxu0  ;;  %v11012_v63 = vpop.f32.mrb[237].mxu1 }
 0x830   :  { %v10949_v0 = vadd.f32 %v10948_v5, %v10947_v58  ;;  %v11013_v27 = vadd.f32 %v11012_v63, %v11011_v43  ;;  %v10950_v45 = vpop.f32.mrb[238].mxu0  ;;  %v11014_v24 = vpop.f32.mrb[238].mxu1 }
 0x831   :  { %v10951_v33 = vpop.f32.mrb[239].mxu0  ;;  %v11015_v55 = vpop.f32.mrb[239].mxu1 }
 0x832   :  { %v9316_v28 = vadd.f32 %v10949_v0, %v15111_v40  ;;  %v10952_v10 = vadd.f32 %v10951_v33, %v10950_v45  ;;  %v11016_v59 = vadd.f32 %v11015_v55, %v11014_v24 }
 0x834   :  { %v15159_v30 = vadd.f32 %v11013_v27, %v9316_v28  ;;  %v9319_v9 = vadd.f32 %v10952_v10, %v15114_v13 }
 0x836   :  { %v15162_v34 = vadd.f32 %v11016_v59, %v9319_v9  ;;  %v10953_v3 = vpop.f32.mrb[240].mxu0  ;;  %v11017_v49 = vpop.f32.mrb[240].mxu1 }
 0x837   :  { %v10954_v26 = vpop.f32.mrb[241].mxu0  ;;  %v11018_v12 = vpop.f32.mrb[241].mxu1 }
 0x838   :  { %v10955_v15 = vadd.f32 %v10954_v26, %v10953_v3  ;;  %v11019_v38 = vadd.f32 %v11018_v12, %v11017_v49  ;;  %v10956_v50 = vpop.f32.mrb[242].mxu0  ;;  %v11020_v48 = vpop.f32.mrb[242].mxu1 }
 0x839   :  { %v10957_v42 = vpop.f32.mrb[243].mxu0  ;;  %v11021_v17 = vpop.f32.mrb[243].mxu1 }
 0x83a   :  { %v9324_v40 = vadd.f32 %v10955_v15, %v15117_v51  ;;  %v10958_v52 = vadd.f32 %v10957_v42, %v10956_v50  ;;  %v11022_v57 = vadd.f32 %v11021_v17, %v11020_v48 }
 0x83c   :  { %v15165_v54 = vadd.f32 %v11019_v38, %v9324_v40  ;;  %v9327_v13 = vadd.f32 %v10958_v52, %v15120_v19 }
 0x83e   :  { %v15168_v37 = vadd.f32 %v11022_v57, %v9327_v13  ;;  %v10959_v32 = vpop.f32.mrb[244].mxu0  ;;  %v11023_v25 = vpop.f32.mrb[244].mxu1 }
 0x83f   :  { %v10960_v47 = vpop.f32.mrb[245].mxu0  ;;  %v11024_v21 = vpop.f32.mrb[245].mxu1 }
 0x840   :  { %v10961_v53 = vadd.f32 %v10960_v47, %v10959_v32  ;;  %v11025_v41 = vadd.f32 %v11024_v21, %v11023_v25  ;;  %v10962_v20 = vpop.f32.mrb[246].mxu0  ;;  %v11026_v60 = vpop.f32.mrb[246].mxu1 }
 0x841   :  { %v10963_v6 = vpop.f32.mrb[247].mxu0  ;;  %v11027_v23 = vpop.f32.mrb[247].mxu1 }
 0x842   :  { %v9332_v51 = vadd.f32 %v10961_v53, %v15123_v16  ;;  %v10964_v11 = vadd.f32 %v10963_v6, %v10962_v20  ;;  %v11028_v39 = vadd.f32 %v11027_v23, %v11026_v60 }
 0x844   :  { %v15171_v22 = vadd.f32 %v11025_v41, %v9332_v51  ;;  %v9335_v19 = vadd.f32 %v10964_v11, %v15126_v62 }
 0x846   :  { %v15174_v2 = vadd.f32 %v11028_v39, %v9335_v19  ;;  %v10965_v61 = vpop.f32.mrb[248].mxu0  ;;  %v11029_v56 = vpop.f32.mrb[248].mxu1 }
 0x847   :  { %v10966_v35 = vpop.f32.mrb[249].mxu0  ;;  %v11030_v18 = vpop.f32.mrb[249].mxu1 }
 0x848   :  { %v10967_v58 = vadd.f32 %v10966_v35, %v10965_v61  ;;  %v11031_v43 = vadd.f32 %v11030_v18, %v11029_v56  ;;  %v10968_v5 = vpop.f32.mrb[250].mxu0  ;;  %v11032_v63 = vpop.f32.mrb[250].mxu1 }
 0x849   :  { %v10969_v0 = vpop.f32.mrb[251].mxu0  ;;  %v11033_v27 = vpop.f32.mrb[251].mxu1 }
 0x84a   :  { %v9340_v16 = vadd.f32 %v10967_v58, %v15129_v4  ;;  %v10970_v45 = vadd.f32 %v10969_v0, %v10968_v5  ;;  %v11034_v24 = vadd.f32 %v11033_v27, %v11032_v63 }
 0x84c   :  { %v15177_v33 = vadd.f32 %v11031_v43, %v9340_v16  ;;  %v9343_v62 = vadd.f32 %v10970_v45, %v15132_v7 }
 0x84e   :  { %v15180_v55 = vadd.f32 %v11034_v24, %v9343_v62  ;;  %v10971_v28 = vpop.f32.mrb[252].mxu0  ;;  %v11035_v10 = vpop.f32.mrb[252].mxu1 }
 0x84f   :  { %v10972_v59 = vpop.f32.mrb[253].mxu0  ;;  %v11036_v9 = vpop.f32.mrb[253].mxu1 }
 0x850   :  { %v10973_v3 = vadd.f32 %v10972_v59, %v10971_v28  ;;  %v11037_v49 = vadd.f32 %v11036_v9, %v11035_v10  ;;  %v10974_v26 = vpop.f32.mrb[254].mxu0  ;;  %v11038_v12 = vpop.f32.mrb[254].mxu1 }
 0x851   :  { %v10975_v15 = vpop.f32.mrb[255].mxu0  ;;  %v11039_v38 = vpop.f32.mrb[255].mxu1 }
 0x852   :  { %v9348_v4 = vadd.f32 %v10973_v3, %v15135_v31  ;;  %v10976_v50 = vadd.f32 %v10975_v15, %v10974_v26  ;;  %v11040_v48 = vadd.f32 %v11039_v38, %v11038_v12 }
 0x854   :  { %v15183_v42 = vadd.f32 %v11037_v49, %v9348_v4  ;;  %v9351_v7 = vadd.f32 %v10976_v50, %v15138_v44 }
 0x856   :  { %v15186_v17 = vadd.f32 %v11040_v48, %v9351_v7  ;;  %v11057_v40 = vpop.f32.mrb[0].mxu0  ;;  %v11121_v52 = vpop.f32.mrb[0].mxu1 }
 0x857   :  { %v11058_v57 = vpop.f32.mrb[1].mxu0  ;;  %v11122_v13 = vpop.f32.mrb[1].mxu1 }
 0x858   :  { %v11059_v32 = vadd.f32 %v11058_v57, %v11057_v40  ;;  %v11123_v25 = vadd.f32 %v11122_v13, %v11121_v52  ;;  %v11060_v47 = vpop.f32.mrb[2].mxu0  ;;  %v11124_v21 = vpop.f32.mrb[2].mxu1 }
 0x859   :  { %v11061_v53 = vpop.f32.mrb[3].mxu0  ;;  %v11125_v41 = vpop.f32.mrb[3].mxu1 }
 0x85a   :  { %v9486_v31 = vadd.f32 %v11059_v32, %v15141_v1  ;;  %v11062_v20 = vadd.f32 %v11061_v53, %v11060_v47  ;;  %v11126_v60 = vadd.f32 %v11125_v41, %v11124_v21 }
 0x85c   :  { %v9583_v6 = vadd.f32 %v11123_v25, %v9486_v31  ;;  %v9489_v23 = vadd.f32 %v11062_v20, %v15144_v8 }
 0x85e   :  { %9645 = vst [vmem:[%s15264_s12] sm:$0xff] %v9583_v6  ;;  %v9586_v44 = vadd.f32 %v11126_v60, %v9489_v23  ;;  %v11063_v51 = vpop.f32.mrb[4].mxu0  ;;  %v11127_v11 = vpop.f32.mrb[4].mxu1 }
 0x85f   :  { %v11064_v39 = vpop.f32.mrb[5].mxu0  ;;  %v11128_v19 = vpop.f32.mrb[5].mxu1 }
 0x860   :  { %9646 = vst [vmem:[%s15264_s12 + $0x8] sm:$0xff] %v9586_v44  ;;  %v11065_v61 = vadd.f32 %v11064_v39, %v11063_v51  ;;  %v11129_v1 = vadd.f32 %v11128_v19, %v11127_v11  ;;  %v11066_v56 = vpop.f32.mrb[6].mxu0  ;;  %v11130_v35 = vpop.f32.mrb[6].mxu1 }
 0x861   :  { %v11067_v18 = vpop.f32.mrb[7].mxu0  ;;  %v11131_v58 = vpop.f32.mrb[7].mxu1 }
 0x862   :  { %v9494_v8 = vadd.f32 %v11065_v61, %v15147_v46  ;;  %v11068_v43 = vadd.f32 %v11067_v18, %v11066_v56  ;;  %v11132_v5 = vadd.f32 %v11131_v58, %v11130_v35 }
 0x864   :  { %v9591_v63 = vadd.f32 %v11129_v1, %v9494_v8  ;;  %v9497_v0 = vadd.f32 %v11068_v43, %v15150_v36 }
 0x866   :  { %9647 = vst [vmem:[%s15264_s12 + $0x10] sm:$0xff] %v9591_v63  ;;  %v9594_v27 = vadd.f32 %v11132_v5, %v9497_v0  ;;  %v11069_v16 = vpop.f32.mrb[8].mxu0  ;;  %v11133_v45 = vpop.f32.mrb[8].mxu1 }
 0x867   :  { %v11070_v24 = vpop.f32.mrb[9].mxu0  ;;  %v11134_v62 = vpop.f32.mrb[9].mxu1 }
 0x868   :  { %9648 = vst [vmem:[%s15264_s12 + $0x18] sm:$0xff] %v9594_v27  ;;  %v11071_v28 = vadd.f32 %v11070_v24, %v11069_v16  ;;  %v11135_v46 = vadd.f32 %v11134_v62, %v11133_v45  ;;  %v11072_v10 = vpop.f32.mrb[10].mxu0  ;;  %v11136_v59 = vpop.f32.mrb[10].mxu1 }
 0x869   :  { %v11073_v9 = vpop.f32.mrb[11].mxu0  ;;  %v11137_v3 = vpop.f32.mrb[11].mxu1 }
 0x86a   :  { %v9502_v36 = vadd.f32 %v11071_v28, %v15153_v29  ;;  %v11074_v49 = vadd.f32 %v11073_v9, %v11072_v10  ;;  %v11138_v26 = vadd.f32 %v11137_v3, %v11136_v59 }
 0x86c   :  { %v9599_v12 = vadd.f32 %v11135_v46, %v9502_v36  ;;  %v9505_v15 = vadd.f32 %v11074_v49, %v15156_v14 }
 0x86e   :  { %9649 = vst [vmem:[%s15264_s12 + $0x20] sm:$0xff] %v9599_v12  ;;  %v9602_v38 = vadd.f32 %v11138_v26, %v9505_v15  ;;  %v11075_v4 = vpop.f32.mrb[12].mxu0  ;;  %v11139_v50 = vpop.f32.mrb[12].mxu1 }
 0x86f   :  { %v11076_v48 = vpop.f32.mrb[13].mxu0  ;;  %v11140_v7 = vpop.f32.mrb[13].mxu1 }
 0x870   :  { %9650 = vst [vmem:[%s15264_s12 + $0x28] sm:$0xff] %v9602_v38  ;;  %v11077_v40 = vadd.f32 %v11076_v48, %v11075_v4  ;;  %v11141_v29 = vadd.f32 %v11140_v7, %v11139_v50  ;;  %v11078_v52 = vpop.f32.mrb[14].mxu0  ;;  %v11142_v57 = vpop.f32.mrb[14].mxu1 }
 0x871   :  { %v11079_v13 = vpop.f32.mrb[15].mxu0  ;;  %v11143_v32 = vpop.f32.mrb[15].mxu1 }
 0x872   :  { %v9510_v14 = vadd.f32 %v11077_v40, %v15159_v30  ;;  %v11080_v25 = vadd.f32 %v11079_v13, %v11078_v52  ;;  %v11144_v47 = vadd.f32 %v11143_v32, %v11142_v57 }
 0x874   :  { %v9607_v21 = vadd.f32 %v11141_v29, %v9510_v14  ;;  %v9513_v53 = vadd.f32 %v11080_v25, %v15162_v34 }
 0x876   :  { %9651 = vst [vmem:[%s15264_s12 + $0x30] sm:$0xff] %v9607_v21  ;;  %v9610_v41 = vadd.f32 %v11144_v47, %v9513_v53  ;;  %v11081_v31 = vpop.f32.mrb[16].mxu0  ;;  %v11145_v20 = vpop.f32.mrb[16].mxu1 }
 0x877   :  { %v11082_v60 = vpop.f32.mrb[17].mxu0  ;;  %v11146_v6 = vpop.f32.mrb[17].mxu1 }
 0x878   :  { %9652 = vst [vmem:[%s15264_s12 + $0x38] sm:$0xff] %v9610_v41  ;;  %v11083_v23 = vadd.f32 %v11082_v60, %v11081_v31  ;;  %v11147_v30 = vadd.f32 %v11146_v6, %v11145_v20  ;;  %v11084_v44 = vpop.f32.mrb[18].mxu0  ;;  %v11148_v51 = vpop.f32.mrb[18].mxu1 }
 0x879   :  { %v11085_v11 = vpop.f32.mrb[19].mxu0  ;;  %v11149_v39 = vpop.f32.mrb[19].mxu1 }
 0x87a   :  { %v9518_v34 = vadd.f32 %v11083_v23, %v15165_v54  ;;  %v11086_v19 = vadd.f32 %v11085_v11, %v11084_v44  ;;  %v11150_v61 = vadd.f32 %v11149_v39, %v11148_v51 }
 0x87c   :  { %v9615_v1 = vadd.f32 %v11147_v30, %v9518_v34  ;;  %v9521_v56 = vadd.f32 %v11086_v19, %v15168_v37 }
 0x87e   :  { %9653 = vst [vmem:[%s15264_s12 + $0x40] sm:$0xff] %v9615_v1  ;;  %v9618_v35 = vadd.f32 %v11150_v61, %v9521_v56  ;;  %v11087_v18 = vpop.f32.mrb[20].mxu0  ;;  %v11151_v58 = vpop.f32.mrb[20].mxu1 }
 0x87f   :  { %v11088_v8 = vpop.f32.mrb[21].mxu0  ;;  %v11152_v43 = vpop.f32.mrb[21].mxu1 }
 0x880   :  { %9654 = vst [vmem:[%s15264_s12 + $0x48] sm:$0xff] %v9618_v35  ;;  %v11089_v5 = vadd.f32 %v11088_v8, %v11087_v18  ;;  %v11153_v54 = vadd.f32 %v11152_v43, %v11151_v58  ;;  %v11090_v63 = vpop.f32.mrb[22].mxu0  ;;  %v11154_v0 = vpop.f32.mrb[22].mxu1 }
 0x881   :  { %v11091_v27 = vpop.f32.mrb[23].mxu0  ;;  %v11155_v16 = vpop.f32.mrb[23].mxu1 }
 0x882   :  { %v9526_v37 = vadd.f32 %v11089_v5, %v15171_v22  ;;  %v11092_v45 = vadd.f32 %v11091_v27, %v11090_v63  ;;  %v11156_v24 = vadd.f32 %v11155_v16, %v11154_v0 }
 0x884   :  { %v9623_v62 = vadd.f32 %v11153_v54, %v9526_v37  ;;  %v9529_v28 = vadd.f32 %v11092_v45, %v15174_v2 }
 0x886   :  { %9655 = vst [vmem:[%s15264_s12 + $0x50] sm:$0xff] %v9623_v62  ;;  %v9626_v46 = vadd.f32 %v11156_v24, %v9529_v28  ;;  %v11093_v10 = vpop.f32.mrb[24].mxu0  ;;  %v11157_v59 = vpop.f32.mrb[24].mxu1 }
 0x887   :  { %v11094_v9 = vpop.f32.mrb[25].mxu0  ;;  %v11158_v3 = vpop.f32.mrb[25].mxu1 }
 0x888   :  { %9656 = vst [vmem:[%s15264_s12 + $0x58] sm:$0xff] %v9626_v46  ;;  %v11095_v36 = vadd.f32 %v11094_v9, %v11093_v10  ;;  %v11159_v22 = vadd.f32 %v11158_v3, %v11157_v59  ;;  %v11096_v49 = vpop.f32.mrb[26].mxu0  ;;  %v11160_v26 = vpop.f32.mrb[26].mxu1 }
 0x889   :  { %v11097_v12 = vpop.f32.mrb[27].mxu0  ;;  %v11161_v15 = vpop.f32.mrb[27].mxu1 }
 0x88a   :  { %v9534_v2 = vadd.f32 %v11095_v36, %v15177_v33  ;;  %v11098_v38 = vadd.f32 %v11097_v12, %v11096_v49  ;;  %v11162_v4 = vadd.f32 %v11161_v15, %v11160_v26 }
 0x88c   :  { %v9631_v50 = vadd.f32 %v11159_v22, %v9534_v2  ;;  %v9537_v48 = vadd.f32 %v11098_v38, %v15180_v55 }
 0x88e   :  { %9657 = vst [vmem:[%s15264_s12 + $0x60] sm:$0xff] %v9631_v50  ;;  %v9634_v7 = vadd.f32 %v11162_v4, %v9537_v48  ;;  %v11099_v40 = vpop.f32.mrb[28].mxu0  ;;  %v11163_v29 = vpop.f32.mrb[28].mxu1 }
 0x88f   :  { %v11100_v52 = vpop.f32.mrb[29].mxu0  ;;  %v11164_v57 = vpop.f32.mrb[29].mxu1 }
 0x890   :  { %9658 = vst [vmem:[%s15264_s12 + $0x68] sm:$0xff] %v9634_v7  ;;  %v11101_v13 = vadd.f32 %v11100_v52, %v11099_v40  ;;  %v11165_v33 = vadd.f32 %v11164_v57, %v11163_v29  ;;  %v11102_v32 = vpop.f32.mrb[30].mxu0  ;;  %v11166_v14 = vpop.f32.mrb[30].mxu1 }
 0x891   :  { %v11103_v25 = vpop.f32.mrb[31].mxu0  ;;  %v11167_v47 = vpop.f32.mrb[31].mxu1 }
 0x892   :  { %v9542_v55 = vadd.f32 %v11101_v13, %v15183_v42  ;;  %v11104_v21 = vadd.f32 %v11103_v25, %v11102_v32  ;;  %v11168_v53 = vadd.f32 %v11167_v47, %v11166_v14 }
 0x894   :  { %v9639_v41 = vadd.f32 %v11165_v33, %v9542_v55  ;;  %v9545_v31 = vadd.f32 %v11104_v21, %v15186_v17 }
 0x896   :  { %9659 = vst [vmem:[%s15264_s12 + $0x70] sm:$0xff] %v9639_v41  ;;  %v9642_v20 = vadd.f32 %v11168_v53, %v9545_v31 }
 0x898   :  { %9660 = vst [vmem:[%s15264_s12 + $0x78] sm:$0xff] %v9642_v20 }
 0x899   :  { %9665 = vsyncpa [#allocation6], 1 }
 0x89a   :  { %9666 = vsyncpa [#allocation8], 1 }
 0x89b   :  { %9667 = vsyncpa [#allocation11], 1 }
 0x89c   :  { %9668 = vsyncpa [#allocation14], 1 }
 0x89d   :  { %9669 = vsyncpa [#allocation17], 1 }
 0x89e   :  { %9670 = vsyncmov [#allocation4] }
 0x8a1   :  { %s9671_s25 = vpop.sfrf %9670 }
 0x8a2   :  { %p10144_p2 = scmp.ne.s32.totalorder %s9671_s25, 0 }
 0x8a4   :  { %9675 = shalt.err (%p10144_p2)  }

</bundles_post_ra>
